<compile_context>
chip_gen: v6e
topology: v6e:2x2x1
jax: 0.10.0
libtpu: 0.0.40
codegen_flags: <defaults>
</compile_context>

<pallas_src>
import functools

import jax
import jax.numpy as jnp
from jax.experimental import pallas as pl
from jax.experimental.pallas import tpu as pltpu


# ----------------------------------------------------------------------------
# Pallas kernel 1: fused (x @ w + b) -> activation, tiled over rows (M).
# ----------------------------------------------------------------------------
def _matmul_bias_act_kernel(x_ref, w_ref, b_ref, o_ref, *, act):
    acc = jnp.dot(x_ref[...], w_ref[...], preferred_element_type=jnp.float32)
    acc = acc + b_ref[...]                     # (tm, N) + (1, N) broadcast, f32
    if act == "relu":
        acc = jnp.maximum(acc, 0.0)
    elif act == "sigmoid":
        acc = jax.nn.sigmoid(acc)
    o_ref[...] = acc.astype(o_ref.dtype)


def matmul_bias_act(x, w, b, act="none", out_dtype=jnp.bfloat16, tm_max=1024):
    """x: (M, K) bf16, w: (K, N) bf16, b: (N,) f32 -> (M, N) out_dtype."""
    M, K = x.shape
    Kw, N = w.shape
    assert K == Kw
    tm = min(M, tm_max)                        # bounded tile; never tm = huge M
    grid_m = pl.cdiv(M, tm)
    return pl.pallas_call(
        functools.partial(_matmul_bias_act_kernel, act=act),
        out_shape=jax.ShapeDtypeStruct((M, N), out_dtype),
        grid_spec=pltpu.PrefetchScalarGridSpec(
            num_scalar_prefetch=0,
            grid=(grid_m,),
            in_specs=[
                pl.BlockSpec((tm, K), lambda i: (i, 0)),
                pl.BlockSpec((K, N), lambda i: (0, 0)),
                pl.BlockSpec((1, N), lambda i: (0, 0)),
            ],
            out_specs=pl.BlockSpec((tm, N), lambda i: (i, 0)),
        ),
        compiler_params=pltpu.CompilerParams(
            dimension_semantics=("parallel",),
            vmem_limit_bytes=32 * 1024 * 1024),
    )(x, w, b.reshape(1, N).astype(jnp.float32))


# ----------------------------------------------------------------------------
# Pallas kernel 2: fused FC bottleneck  lin_down -> mu -> (z=mu) -> fc_z -> lin_up
# ----------------------------------------------------------------------------
def _fc_stack_kernel(h_ref, wd_ref, bd_ref, wm_ref, bm_ref,
                     wz_ref, bz_ref, wu_ref, bu_ref, o_ref):
    f32 = jnp.float32
    h = h_ref[...]
    t = jnp.dot(h, wd_ref[...], preferred_element_type=f32) + bd_ref[...]
    t = jnp.maximum(t, 0.0).astype(jnp.bfloat16)
    mu = jnp.dot(t, wm_ref[...], preferred_element_type=f32) + bm_ref[...]
    # do_sampling=False eval semantics: z = mu (fc_logvar output is unused/dead).
    # TODO(synk): training-mode reparameterization (logvar + torch.randn_like)
    # is not implemented; only the eval path is exercised.
    z = mu.astype(jnp.bfloat16)
    d = jnp.dot(z, wz_ref[...], preferred_element_type=f32) + bz_ref[...]
    d = jnp.maximum(d, 0.0).astype(jnp.bfloat16)
    u = jnp.dot(d, wu_ref[...], preferred_element_type=f32) + bu_ref[...]
    u = jnp.maximum(u, 0.0)
    o_ref[...] = u.astype(o_ref.dtype)


def fc_stack(h, params):
    """h: (B, 64*nf) bf16  ->  (B, 64*nf) bf16, one pallas_call."""
    B, Din = h.shape
    wd, bd = params["lin_down_w"], params["lin_down_b"]
    wm, bm = params["mu_w"], params["mu_b"]
    wz, bz = params["z_w"], params["z_b"]
    wu, bu = params["lin_up_w"], params["lin_up_b"]
    Dmid, Dlat, Dout = wd.shape[1], wm.shape[1], wu.shape[1]

    def full(shape):
        return pl.BlockSpec(shape, lambda i: (0, 0))

    return pl.pallas_call(
        _fc_stack_kernel,
        out_shape=jax.ShapeDtypeStruct((B, Dout), jnp.bfloat16),
        grid_spec=pltpu.PrefetchScalarGridSpec(
            num_scalar_prefetch=0,
            grid=(1,),
            in_specs=[
                full((B, Din)),
                full((Din, Dmid)), full((1, Dmid)),
                full((Dmid, Dlat)), full((1, Dlat)),
                full((Dlat, Dmid)), full((1, Dmid)),
                full((Dmid, Dout)), full((1, Dout)),
            ],
            out_specs=full((B, Dout)),
        ),
        compiler_params=pltpu.CompilerParams(
            dimension_semantics=("arbitrary",),
            vmem_limit_bytes=32 * 1024 * 1024),
    )(h,
      wd, bd.reshape(1, Dmid).astype(jnp.float32),
      wm, bm.reshape(1, Dlat).astype(jnp.float32),
      wz, bz.reshape(1, Dmid).astype(jnp.float32),
      wu, bu.reshape(1, Dout).astype(jnp.float32))


# ----------------------------------------------------------------------------
# Conv / ConvTranspose wrappers (NHWC, indexing-only glue around one matmul).
# ----------------------------------------------------------------------------
def conv2d_s2(x_nhwc, w_mat, b, act, out_dtype=jnp.bfloat16, k=4, pad=1):
    """Conv2d(k=4, s=2, p=1).  x: (B,H,W,Cin) NHWC, w_mat: (k*k*Cin, Cout)."""
    B, H, W, C = x_nhwc.shape
    Ho = (H + 2 * pad - k) // 2 + 1
    Wo = (W + 2 * pad - k) // 2 + 1
    xp = jnp.pad(x_nhwc, ((0, 0), (pad, pad), (pad, pad), (0, 0)))
    taps = [xp[:, dh:dh + 2 * Ho:2, dw:dw + 2 * Wo:2, :]
            for dh in range(k) for dw in range(k)]
    patches = jnp.concatenate(taps, axis=-1)          # (B, Ho, Wo, k*k*C)
    patches = patches.reshape(B * Ho * Wo, k * k * C)
    out = matmul_bias_act(patches, w_mat, b, act=act, out_dtype=out_dtype)
    return out.reshape(B, Ho, Wo, -1)


def conv_transpose2d_s2(x_nhwc, wc_mat, b, act, out_dtype=jnp.bfloat16):
    """ConvTranspose2d(k=4, s=2, p=1) via sub-pixel conv + depth-to-space.

    x: (B,H,W,Cin) NHWC; wc_mat: (9*Cin, 4*Cout) combined phase weight;
    output: (B, 2H, 2W, Cout).  No zero-dilated intermediate is materialized.
    """
    B, H, W, C = x_nhwc.shape
    Cout = wc_mat.shape[1] // 4
    xp = jnp.pad(x_nhwc, ((0, 0), (1, 1), (1, 1), (0, 0)))
    taps = [xp[:, dh:dh + H, dw:dw + W, :] for dh in range(3) for dw in range(3)]
    patches = jnp.concatenate(taps, axis=-1).reshape(B * H * W, 9 * C)
    bc = jnp.tile(b, 4)                                # phase-major bias
    out = matmul_bias_act(patches, wc_mat, bc, act=act, out_dtype=out_dtype)
    out = out.reshape(B, H, W, 2, 2, Cout)             # (b, i, j, r, c, co)
    out = out.transpose(0, 1, 3, 2, 4, 5)              # (b, i, r, j, c, co)
    return out.reshape(B, 2 * H, 2 * W, Cout)


# ----------------------------------------------------------------------------
# Weight layout conversion (done once at init, outside the hot path).
# ----------------------------------------------------------------------------
# Per-output-parity taps of ConvTranspose2d(k=4, s=2, p=1):
#   output row 2i + r reads input rows {i + dh} with kernel index kh.
_PHASE_TAPS = {0: ((-1, 3), (0, 1)), 1: ((0, 2), (1, 0))}


def _convert_conv_weight(w_torch):
    """(Cout, Cin, 4, 4) PyTorch Conv2d -> (16*Cin, Cout) matmul weight."""
    cout, cin, kh, kw = w_torch.shape
    return w_torch.transpose(2, 3, 1, 0).reshape(kh * kw * cin, cout)


def _convert_conv_transpose_weight(w_t):
    """(Cin, Cout, 4, 4) PyTorch ConvTranspose2d -> (9*Cin, 4*Cout) phase weight."""
    cin, cout, _, _ = w_t.shape
    wc = jnp.zeros((9, cin, 4, cout), w_t.dtype)
    for r in (0, 1):
        for c in (0, 1):
            ph = r * 2 + c
            for dh, kh in _PHASE_TAPS[r]:
                for dw, kw in _PHASE_TAPS[c]:
                    tap = (dh + 1) * 3 + (dw + 1)
                    wc = wc.at[tap, :, ph, :].set(w_t[:, :, kh, kw])
    return wc.reshape(9 * cin, 4 * cout)


# ----------------------------------------------------------------------------
# Parameter construction (deterministic; matches module __init__ shapes).
# NOTE: FC weights are stored in the NHWC-flatten convention; a PyTorch
# checkpoint import would additionally permute the 64*nf axis of
# lin_down / lin_up (NCHW-flatten <-> NHWC-flatten).
# ----------------------------------------------------------------------------
def init_params(key, num_channels=3, latent_dims=128, num_filters=32):
    nf = num_filters
    keys = jax.random.split(key, 16)

    def winit(k, shape, fan_in):
        return (jax.random.normal(k, shape, jnp.float32)
                * (1.0 / jnp.sqrt(jnp.float32(fan_in))))

    def conv_w(k, cout, cin):
        w = winit(k, (cout, cin, 4, 4), cin * 16)
        return _convert_conv_weight(w).astype(jnp.bfloat16)

    def deconv_w(k, cin, cout):
        w = winit(k, (cin, cout, 4, 4), cin * 16)
        return _convert_conv_transpose_weight(w).astype(jnp.bfloat16)

    p = {}
    # encoder convs
    p["ec1_w"] = conv_w(keys[0], 8, num_channels)
    p["ec1_b"] = jnp.zeros((8,), jnp.float32)
    p["ec2_w"] = conv_w(keys[1], 16, 8)
    p["ec2_b"] = jnp.zeros((16,), jnp.float32)
    p["ec3_w"] = conv_w(keys[2], nf, 16)
    p["ec3_b"] = jnp.zeros((nf,), jnp.float32)
    # FC stack (stored (K, N) for x @ W)
    p["lin_down_w"] = winit(keys[3], (64 * nf, 8 * nf), 64 * nf).astype(jnp.bfloat16)
    p["lin_down_b"] = jnp.zeros((8 * nf,), jnp.float32)
    p["mu_w"] = winit(keys[4], (8 * nf, latent_dims), 8 * nf).astype(jnp.bfloat16)
    p["mu_b"] = jnp.zeros((latent_dims,), jnp.float32)
    # fc_logvar is dead in the do_sampling=False eval path and is omitted.
    p["z_w"] = winit(keys[5], (latent_dims, 8 * nf), latent_dims).astype(jnp.bfloat16)
    p["z_b"] = jnp.zeros((8 * nf,), jnp.float32)
    p["lin_up_w"] = winit(keys[6], (8 * nf, 64 * nf), 8 * nf).astype(jnp.bfloat16)
    p["lin_up_b"] = jnp.zeros((64 * nf,), jnp.float32)
    # decoder transposed convs
    p["dc1_w"] = deconv_w(keys[7], nf, 16)
    p["dc1_b"] = jnp.zeros((16,), jnp.float32)
    p["dc2_w"] = deconv_w(keys[8], 16, 8)
    p["dc2_b"] = jnp.zeros((8,), jnp.float32)
    p["dc3_w"] = deconv_w(keys[9], 8, num_channels)
    p["dc3_b"] = jnp.zeros((num_channels,), jnp.float32)
    return p


# ----------------------------------------------------------------------------
# Forward pass (do_sampling=False, eval semantics: z = mu).
# ----------------------------------------------------------------------------
def autoencoder_forward(params, x, num_filters=32):
    B = x.shape[0]
    # Single NCHW -> NHWC relayout at the boundary; everything stays NHWC after.
    h = x.astype(jnp.bfloat16).transpose(0, 2, 3, 1)

    # --- encode ---
    h = conv2d_s2(h, params["ec1_w"], params["ec1_b"], "relu")   # (B,32,32, 8)
    h = conv2d_s2(h, params["ec2_w"], params["ec2_b"], "relu")   # (B,16,16,16)
    h = conv2d_s2(h, params["ec3_w"], params["ec3_b"], "relu")   # (B, 8, 8,nf)
    h = h.reshape(B, -1)                                         # NHWC flatten

    # --- bottleneck (fused into one pallas_call; z = mu in eval) ---
    d = fc_stack(h, params)                                      # (B, 64*nf)

    # --- decode ---
    d = d.reshape(B, 8, 8, num_filters)
    d = conv_transpose2d_s2(d, params["dc1_w"], params["dc1_b"], "relu")
    d = conv_transpose2d_s2(d, params["dc2_w"], params["dc2_b"], "relu")
    d = conv_transpose2d_s2(d, params["dc3_w"], params["dc3_b"], "sigmoid",
                            out_dtype=jnp.float32)               # (B,64,64,C)
    x_hat = d.transpose(0, 3, 1, 2)                              # NHWC -> NCHW
    return x_hat, None, None


if __name__ == "__main__":
    key = jax.random.PRNGKey(0)
    k_param, k_x = jax.random.split(key)

    # The module's fc_lin_down / .view(-1, nf*8*8) imply 64x64 spatial input.
    B, C, H, W = 2, 3, 64, 64
    x = jax.random.uniform(k_x, (B, C, H, W), jnp.float32)

    params = init_params(k_param, num_channels=C, latent_dims=128,
                         num_filters=32)

    fwd = jax.jit(functools.partial(autoencoder_forward, num_filters=32))
    x_hat, mu_out, logvar_out = fwd(params, x)
    x_hat = jax.block_until_ready(x_hat)

    assert x_hat.shape == (B, C, H, W), x_hat.shape
    assert x_hat.dtype == jnp.float32
    assert mu_out is None and logvar_out is None
    assert bool(jnp.all(jnp.isfinite(x_hat)))
    assert bool(jnp.all((x_hat >= 0.0) & (x_hat <= 1.0)))   # sigmoid output

    print("KERNEL_OK")
</pallas_src>

<mosaic_0001>
module attributes {stable_mosaic.version = 11 : i64} {
  func.func @_matmul_bias_act_kernel(%arg0: i32, %arg1: memref<1024x48xbf16, #tpu.memory_space<vmem>>, %arg2: memref<48x8xbf16, #tpu.memory_space<vmem>>, %arg3: memref<1x8xf32, #tpu.memory_space<vmem>>, %arg4: memref<1024x8xbf16, #tpu.memory_space<vmem>>) attributes {dimension_semantics = [#tpu.dimension_semantics<parallel>], iteration_bounds = array<i64: 2>, scalar_prefetch = 0 : i64, scratch_operands = 0 : i64, tpu.core_type = #tpu.core_type<tc>, window_params = [{transform_indices = @transform_0, window_bounds = array<i64: 1024, 48>}, {pipeline_mode = #tpu.pipeline_mode<synchronous>, transform_indices = @transform_1, window_bounds = array<i64: 48, 8>}, {pipeline_mode = #tpu.pipeline_mode<synchronous>, transform_indices = @transform_2, window_bounds = array<i64: 1, 8>}, {transform_indices = @transform_3, window_bounds = array<i64: 1024, 8>}]} {
    %c0 = arith.constant 0 : index
    %c0_0 = arith.constant 0 : index
    %0 = vector.load %arg1[%c0, %c0_0] : memref<1024x48xbf16, #tpu.memory_space<vmem>>, vector<1024x48xbf16>
    %c0_1 = arith.constant 0 : index
    %c0_2 = arith.constant 0 : index
    %1 = vector.load %arg2[%c0_1, %c0_2] : memref<48x8xbf16, #tpu.memory_space<vmem>>, vector<48x8xbf16>
    %cst = arith.constant dense<0.000000e+00> : vector<1024x8xf32>
    %2 = tpu.matmul %0, %1, %cst {dimension_numbers = #tpu.dot_dimension_numbers<[1], [0], [0], [1], [0, 0, 1, 1], [], []>} : vector<1024x48xbf16>, vector<48x8xbf16>, vector<1024x8xf32> -> vector<1024x8xf32>
    %c0_3 = arith.constant 0 : index
    %c0_4 = arith.constant 0 : index
    %3 = vector.load %arg3[%c0_3, %c0_4] : memref<1x8xf32, #tpu.memory_space<vmem>>, vector<1x8xf32>
    %4 = vector.broadcast %3 : vector<1x8xf32> to vector<1024x8xf32>
    %5 = arith.addf %2, %4 : vector<1024x8xf32>
    %cst_5 = arith.constant 0.000000e+00 : f32
    %6 = vector.broadcast %cst_5 : f32 to vector<1024x8xf32>
    %7 = arith.maximumf %5, %6 : vector<1024x8xf32>
    %8 = arith.truncf %7 : vector<1024x8xf32> to vector<1024x8xbf16>
    %c0_6 = arith.constant 0 : index
    %c0_7 = arith.constant 0 : index
    %9 = vector.load %arg4[%c0_6, %c0_7] : memref<1024x8xbf16, #tpu.memory_space<vmem>>, vector<1024x8xbf16>
    tpu.vector_store %arg4[%c0_6, %c0_7], %8 {strides = array<i32>} : memref<1024x8xbf16, #tpu.memory_space<vmem>>, vector<1024x8xbf16>,
    return
  }
  func.func @transform_0(%arg0: i32) -> (i32, i32) {
    %c0_i32 = arith.constant 0 : i32
    %c0_i32_0 = arith.constant 0 : i32
    return %arg0, %c0_i32 : i32, i32
  }
  func.func @transform_1(%arg0: i32) -> (i32, i32) {
    %c0_i32 = arith.constant 0 : i32
    %c0_i32_0 = arith.constant 0 : i32
    %c0_i32_1 = arith.constant 0 : i32
    return %c0_i32, %c0_i32_0 : i32, i32
  }
  func.func @transform_2(%arg0: i32) -> (i32, i32) {
    %c0_i32 = arith.constant 0 : i32
    %c0_i32_0 = arith.constant 0 : i32
    %c0_i32_1 = arith.constant 0 : i32
    return %c0_i32, %c0_i32_0 : i32, i32
  }
  func.func @transform_3(%arg0: i32) -> (i32, i32) {
    %c0_i32 = arith.constant 0 : i32
    %c0_i32_0 = arith.constant 0 : i32
    return %arg0, %c0_i32 : i32, i32
  }
}

module attributes {stable_mosaic.version = 11 : i64} {
  func.func @_matmul_bias_act_kernel(%arg0: i32, %arg1: memref<512x128xbf16, #tpu.memory_space<vmem>>, %arg2: memref<128x16xbf16, #tpu.memory_space<vmem>>, %arg3: memref<1x16xf32, #tpu.memory_space<vmem>>, %arg4: memref<512x16xbf16, #tpu.memory_space<vmem>>) attributes {dimension_semantics = [#tpu.dimension_semantics<parallel>], iteration_bounds = array<i64: 1>, scalar_prefetch = 0 : i64, scratch_operands = 0 : i64, tpu.core_type = #tpu.core_type<tc>, window_params = [{transform_indices = @transform_0, window_bounds = array<i64: 512, 128>}, {pipeline_mode = #tpu.pipeline_mode<synchronous>, transform_indices = @transform_1, window_bounds = array<i64: 128, 16>}, {pipeline_mode = #tpu.pipeline_mode<synchronous>, transform_indices = @transform_2, window_bounds = array<i64: 1, 16>}, {transform_indices = @transform_3, window_bounds = array<i64: 512, 16>}]} {
    %c0 = arith.constant 0 : index
    %c0_0 = arith.constant 0 : index
    %0 = vector.load %arg1[%c0, %c0_0] : memref<512x128xbf16, #tpu.memory_space<vmem>>, vector<512x128xbf16>
    %c0_1 = arith.constant 0 : index
    %c0_2 = arith.constant 0 : index
    %1 = vector.load %arg2[%c0_1, %c0_2] : memref<128x16xbf16, #tpu.memory_space<vmem>>, vector<128x16xbf16>
    %cst = arith.constant dense<0.000000e+00> : vector<512x16xf32>
    %2 = tpu.matmul %0, %1, %cst {dimension_numbers = #tpu.dot_dimension_numbers<[1], [0], [0], [1], [0, 0, 1, 1], [], []>} : vector<512x128xbf16>, vector<128x16xbf16>, vector<512x16xf32> -> vector<512x16xf32>
    %c0_3 = arith.constant 0 : index
    %c0_4 = arith.constant 0 : index
    %3 = vector.load %arg3[%c0_3, %c0_4] : memref<1x16xf32, #tpu.memory_space<vmem>>, vector<1x16xf32>
    %4 = vector.broadcast %3 : vector<1x16xf32> to vector<512x16xf32>
    %5 = arith.addf %2, %4 : vector<512x16xf32>
    %cst_5 = arith.constant 0.000000e+00 : f32
    %6 = vector.broadcast %cst_5 : f32 to vector<512x16xf32>
    %7 = arith.maximumf %5, %6 : vector<512x16xf32>
    %8 = arith.truncf %7 : vector<512x16xf32> to vector<512x16xbf16>
    %c0_6 = arith.constant 0 : index
    %c0_7 = arith.constant 0 : index
    %9 = vector.load %arg4[%c0_6, %c0_7] : memref<512x16xbf16, #tpu.memory_space<vmem>>, vector<512x16xbf16>
    tpu.vector_store %arg4[%c0_6, %c0_7], %8 {strides = array<i32>} : memref<512x16xbf16, #tpu.memory_space<vmem>>, vector<512x16xbf16>,
    return
  }
  func.func @transform_0(%arg0: i32) -> (i32, i32) {
    %c0_i32 = arith.constant 0 : i32
    %c0_i32_0 = arith.constant 0 : i32
    return %arg0, %c0_i32 : i32, i32
  }
  func.func @transform_1(%arg0: i32) -> (i32, i32) {
    %c0_i32 = arith.constant 0 : i32
    %c0_i32_0 = arith.constant 0 : i32
    %c0_i32_1 = arith.constant 0 : i32
    return %c0_i32, %c0_i32_0 : i32, i32
  }
  func.func @transform_2(%arg0: i32) -> (i32, i32) {
    %c0_i32 = arith.constant 0 : i32
    %c0_i32_0 = arith.constant 0 : i32
    %c0_i32_1 = arith.constant 0 : i32
    return %c0_i32, %c0_i32_0 : i32, i32
  }
  func.func @transform_3(%arg0: i32) -> (i32, i32) {
    %c0_i32 = arith.constant 0 : i32
    %c0_i32_0 = arith.constant 0 : i32
    return %arg0, %c0_i32 : i32, i32
  }
}

module attributes {stable_mosaic.version = 11 : i64} {
  func.func @_matmul_bias_act_kernel(%arg0: i32, %arg1: memref<128x256xbf16, #tpu.memory_space<vmem>>, %arg2: memref<256x32xbf16, #tpu.memory_space<vmem>>, %arg3: memref<1x32xf32, #tpu.memory_space<vmem>>, %arg4: memref<128x32xbf16, #tpu.memory_space<vmem>>) attributes {dimension_semantics = [#tpu.dimension_semantics<parallel>], iteration_bounds = array<i64: 1>, scalar_prefetch = 0 : i64, scratch_operands = 0 : i64, tpu.core_type = #tpu.core_type<tc>, window_params = [{transform_indices = @transform_0, window_bounds = array<i64: 128, 256>}, {pipeline_mode = #tpu.pipeline_mode<synchronous>, transform_indices = @transform_1, window_bounds = array<i64: 256, 32>}, {pipeline_mode = #tpu.pipeline_mode<synchronous>, transform_indices = @transform_2, window_bounds = array<i64: 1, 32>}, {transform_indices = @transform_3, window_bounds = array<i64: 128, 32>}]} {
    %c0 = arith.constant 0 : index
    %c0_0 = arith.constant 0 : index
    %0 = vector.load %arg1[%c0, %c0_0] : memref<128x256xbf16, #tpu.memory_space<vmem>>, vector<128x256xbf16>
    %c0_1 = arith.constant 0 : index
    %c0_2 = arith.constant 0 : index
    %1 = vector.load %arg2[%c0_1, %c0_2] : memref<256x32xbf16, #tpu.memory_space<vmem>>, vector<256x32xbf16>
    %cst = arith.constant dense<0.000000e+00> : vector<128x32xf32>
    %2 = tpu.matmul %0, %1, %cst {dimension_numbers = #tpu.dot_dimension_numbers<[1], [0], [0], [1], [0, 0, 1, 1], [], []>} : vector<128x256xbf16>, vector<256x32xbf16>, vector<128x32xf32> -> vector<128x32xf32>
    %c0_3 = arith.constant 0 : index
    %c0_4 = arith.constant 0 : index
    %3 = vector.load %arg3[%c0_3, %c0_4] : memref<1x32xf32, #tpu.memory_space<vmem>>, vector<1x32xf32>
    %4 = vector.broadcast %3 : vector<1x32xf32> to vector<128x32xf32>
    %5 = arith.addf %2, %4 : vector<128x32xf32>
    %cst_5 = arith.constant 0.000000e+00 : f32
    %6 = vector.broadcast %cst_5 : f32 to vector<128x32xf32>
    %7 = arith.maximumf %5, %6 : vector<128x32xf32>
    %8 = arith.truncf %7 : vector<128x32xf32> to vector<128x32xbf16>
    %c0_6 = arith.constant 0 : index
    %c0_7 = arith.constant 0 : index
    %9 = vector.load %arg4[%c0_6, %c0_7] : memref<128x32xbf16, #tpu.memory_space<vmem>>, vector<128x32xbf16>
    tpu.vector_store %arg4[%c0_6, %c0_7], %8 {strides = array<i32>} : memref<128x32xbf16, #tpu.memory_space<vmem>>, vector<128x32xbf16>,
    return
  }
  func.func @transform_0(%arg0: i32) -> (i32, i32) {
    %c0_i32 = arith.constant 0 : i32
    %c0_i32_0 = arith.constant 0 : i32
    return %arg0, %c0_i32 : i32, i32
  }
  func.func @transform_1(%arg0: i32) -> (i32, i32) {
    %c0_i32 = arith.constant 0 : i32
    %c0_i32_0 = arith.constant 0 : i32
    %c0_i32_1 = arith.constant 0 : i32
    return %c0_i32, %c0_i32_0 : i32, i32
  }
  func.func @transform_2(%arg0: i32) -> (i32, i32) {
    %c0_i32 = arith.constant 0 : i32
    %c0_i32_0 = arith.constant 0 : i32
    %c0_i32_1 = arith.constant 0 : i32
    return %c0_i32, %c0_i32_0 : i32, i32
  }
  func.func @transform_3(%arg0: i32) -> (i32, i32) {
    %c0_i32 = arith.constant 0 : i32
    %c0_i32_0 = arith.constant 0 : i32
    return %arg0, %c0_i32 : i32, i32
  }
}

module attributes {stable_mosaic.version = 11 : i64} {
  func.func @_fc_stack_kernel(%arg0: i32, %arg1: memref<2x2048xbf16, #tpu.memory_space<vmem>>, %arg2: memref<2048x256xbf16, #tpu.memory_space<vmem>>, %arg3: memref<1x256xf32, #tpu.memory_space<vmem>>, %arg4: memref<256x128xbf16, #tpu.memory_space<vmem>>, %arg5: memref<1x128xf32, #tpu.memory_space<vmem>>, %arg6: memref<128x256xbf16, #tpu.memory_space<vmem>>, %arg7: memref<1x256xf32, #tpu.memory_space<vmem>>, %arg8: memref<256x2048xbf16, #tpu.memory_space<vmem>>, %arg9: memref<1x2048xf32, #tpu.memory_space<vmem>>, %arg10: memref<2x2048xbf16, #tpu.memory_space<vmem>>) attributes {dimension_semantics = [#tpu.dimension_semantics<arbitrary>], iteration_bounds = array<i64: 1>, scalar_prefetch = 0 : i64, scratch_operands = 0 : i64, tpu.core_type = #tpu.core_type<tc>, window_params = [{pipeline_mode = #tpu.pipeline_mode<synchronous>, transform_indices = @transform_0, window_bounds = array<i64: 2, 2048>}, {pipeline_mode = #tpu.pipeline_mode<synchronous>, transform_indices = @transform_1, window_bounds = array<i64: 2048, 256>}, {pipeline_mode = #tpu.pipeline_mode<synchronous>, transform_indices = @transform_2, window_bounds = array<i64: 1, 256>}, {pipeline_mode = #tpu.pipeline_mode<synchronous>, transform_indices = @transform_3, window_bounds = array<i64: 256, 128>}, {pipeline_mode = #tpu.pipeline_mode<synchronous>, transform_indices = @transform_4, window_bounds = array<i64: 1, 128>}, {pipeline_mode = #tpu.pipeline_mode<synchronous>, transform_indices = @transform_5, window_bounds = array<i64: 128, 256>}, {pipeline_mode = #tpu.pipeline_mode<synchronous>, transform_indices = @transform_6, window_bounds = array<i64: 1, 256>}, {pipeline_mode = #tpu.pipeline_mode<synchronous>, transform_indices = @transform_7, window_bounds = array<i64: 256, 2048>}, {pipeline_mode = #tpu.pipeline_mode<synchronous>, transform_indices = @transform_8, window_bounds = array<i64: 1, 2048>}, {pipeline_mode = #tpu.pipeline_mode<synchronous>, transform_indices = @transform_9, window_bounds = array<i64: 2, 2048>}]} {
    %c0 = arith.constant 0 : index
    %c0_0 = arith.constant 0 : index
    %0 = vector.load %arg1[%c0, %c0_0] : memref<2x2048xbf16, #tpu.memory_space<vmem>>, vector<2x2048xbf16>
    %c0_1 = arith.constant 0 : index
    %c0_2 = arith.constant 0 : index
    %1 = vector.load %arg2[%c0_1, %c0_2] : memref<2048x256xbf16, #tpu.memory_space<vmem>>, vector<2048x256xbf16>
    %cst = arith.constant dense<0.000000e+00> : vector<2x256xf32>
    %2 = tpu.matmul %0, %1, %cst {dimension_numbers = #tpu.dot_dimension_numbers<[1], [0], [0], [1], [0, 0, 1, 1], [], []>} : vector<2x2048xbf16>, vector<2048x256xbf16>, vector<2x256xf32> -> vector<2x256xf32>
    %c0_3 = arith.constant 0 : index
    %c0_4 = arith.constant 0 : index
    %3 = vector.load %arg3[%c0_3, %c0_4] : memref<1x256xf32, #tpu.memory_space<vmem>>, vector<1x256xf32>
    %4 = vector.broadcast %3 : vector<1x256xf32> to vector<2x256xf32>
    %5 = arith.addf %2, %4 : vector<2x256xf32>
    %cst_5 = arith.constant 0.000000e+00 : f32
    %6 = vector.broadcast %cst_5 : f32 to vector<2x256xf32>
    %7 = arith.maximumf %5, %6 : vector<2x256xf32>
    %8 = arith.truncf %7 : vector<2x256xf32> to vector<2x256xbf16>
    %c0_6 = arith.constant 0 : index
    %c0_7 = arith.constant 0 : index
    %9 = vector.load %arg4[%c0_6, %c0_7] : memref<256x128xbf16, #tpu.memory_space<vmem>>, vector<256x128xbf16>
    %cst_8 = arith.constant dense<0.000000e+00> : vector<2x128xf32>
    %10 = tpu.matmul %8, %9, %cst_8 {dimension_numbers = #tpu.dot_dimension_numbers<[1], [0], [0], [1], [0, 0, 1, 1], [], []>} : vector<2x256xbf16>, vector<256x128xbf16>, vector<2x128xf32> -> vector<2x128xf32>
    %c0_9 = arith.constant 0 : index
    %c0_10 = arith.constant 0 : index
    %11 = vector.load %arg5[%c0_9, %c0_10] : memref<1x128xf32, #tpu.memory_space<vmem>>, vector<1x128xf32>
    %12 = vector.broadcast %11 : vector<1x128xf32> to vector<2x128xf32>
    %13 = arith.addf %10, %12 : vector<2x128xf32>
    %14 = arith.truncf %13 : vector<2x128xf32> to vector<2x128xbf16>
    %c0_11 = arith.constant 0 : index
    %c0_12 = arith.constant 0 : index
    %15 = vector.load %arg6[%c0_11, %c0_12] : memref<128x256xbf16, #tpu.memory_space<vmem>>, vector<128x256xbf16>
    %cst_13 = arith.constant dense<0.000000e+00> : vector<2x256xf32>
    %16 = tpu.matmul %14, %15, %cst_13 {dimension_numbers = #tpu.dot_dimension_numbers<[1], [0], [0], [1], [0, 0, 1, 1], [], []>} : vector<2x128xbf16>, vector<128x256xbf16>, vector<2x256xf32> -> vector<2x256xf32>
    %c0_14 = arith.constant 0 : index
    %c0_15 = arith.constant 0 : index
    %17 = vector.load %arg7[%c0_14, %c0_15] : memref<1x256xf32, #tpu.memory_space<vmem>>, vector<1x256xf32>
    %18 = vector.broadcast %17 : vector<1x256xf32> to vector<2x256xf32>
    %19 = arith.addf %16, %18 : vector<2x256xf32>
    %cst_16 = arith.constant 0.000000e+00 : f32
    %20 = vector.broadcast %cst_16 : f32 to vector<2x256xf32>
    %21 = arith.maximumf %19, %20 : vector<2x256xf32>
    %22 = arith.truncf %21 : vector<2x256xf32> to vector<2x256xbf16>
    %c0_17 = arith.constant 0 : index
    %c0_18 = arith.constant 0 : index
    %23 = vector.load %arg8[%c0_17, %c0_18] : memref<256x2048xbf16, #tpu.memory_space<vmem>>, vector<256x2048xbf16>
    %cst_19 = arith.constant dense<0.000000e+00> : vector<2x2048xf32>
    %24 = tpu.matmul %22, %23, %cst_19 {dimension_numbers = #tpu.dot_dimension_numbers<[1], [0], [0], [1], [0, 0, 1, 1], [], []>} : vector<2x256xbf16>, vector<256x2048xbf16>, vector<2x2048xf32> -> vector<2x2048xf32>
    %c0_20 = arith.constant 0 : index
    %c0_21 = arith.constant 0 : index
    %25 = vector.load %arg9[%c0_20, %c0_21] : memref<1x2048xf32, #tpu.memory_space<vmem>>, vector<1x2048xf32>
    %26 = vector.broadcast %25 : vector<1x2048xf32> to vector<2x2048xf32>
    %27 = arith.addf %24, %26 : vector<2x2048xf32>
    %cst_22 = arith.constant 0.000000e+00 : f32
    %28 = vector.broadcast %cst_22 : f32 to vector<2x2048xf32>
    %29 = arith.maximumf %27, %28 : vector<2x2048xf32>
    %30 = arith.truncf %29 : vector<2x2048xf32> to vector<2x2048xbf16>
    %c0_23 = arith.constant 0 : index
    %c0_24 = arith.constant 0 : index
    %31 = vector.load %arg10[%c0_23, %c0_24] : memref<2x2048xbf16, #tpu.memory_space<vmem>>, vector<2x2048xbf16>
    tpu.vector_store %arg10[%c0_23, %c0_24], %30 {strides = array<i32>} : memref<2x2048xbf16, #tpu.memory_space<vmem>>, vector<2x2048xbf16>,
    return
  }
  func.func @transform_0(%arg0: i32) -> (i32, i32) {
    %c0_i32 = arith.constant 0 : i32
    %c0_i32_0 = arith.constant 0 : i32
    %c0_i32_1 = arith.constant 0 : i32
    return %c0_i32, %c0_i32_0 : i32, i32
  }
  func.func @transform_1(%arg0: i32) -> (i32, i32) {
    %c0_i32 = arith.constant 0 : i32
    %c0_i32_0 = arith.constant 0 : i32
    %c0_i32_1 = arith.constant 0 : i32
    return %c0_i32, %c0_i32_0 : i32, i32
  }
  func.func @transform_2(%arg0: i32) -> (i32, i32) {
    %c0_i32 = arith.constant 0 : i32
    %c0_i32_0 = arith.constant 0 : i32
    %c0_i32_1 = arith.constant 0 : i32
    return %c0_i32, %c0_i32_0 : i32, i32
  }
  func.func @transform_3(%arg0: i32) -> (i32, i32) {
    %c0_i32 = arith.constant 0 : i32
    %c0_i32_0 = arith.constant 0 : i32
    %c0_i32_1 = arith.constant 0 : i32
    return %c0_i32, %c0_i32_0 : i32, i32
  }
  func.func @transform_4(%arg0: i32) -> (i32, i32) {
    %c0_i32 = arith.constant 0 : i32
    %c0_i32_0 = arith.constant 0 : i32
    %c0_i32_1 = arith.constant 0 : i32
    return %c0_i32, %c0_i32_0 : i32, i32
  }
  func.func @transform_5(%arg0: i32) -> (i32, i32) {
    %c0_i32 = arith.constant 0 : i32
    %c0_i32_0 = arith.constant 0 : i32
    %c0_i32_1 = arith.constant 0 : i32
    return %c0_i32, %c0_i32_0 : i32, i32
  }
  func.func @transform_6(%arg0: i32) -> (i32, i32) {
    %c0_i32 = arith.constant 0 : i32
    %c0_i32_0 = arith.constant 0 : i32
    %c0_i32_1 = arith.constant 0 : i32
    return %c0_i32, %c0_i32_0 : i32, i32
  }
  func.func @transform_7(%arg0: i32) -> (i32, i32) {
    %c0_i32 = arith.constant 0 : i32
    %c0_i32_0 = arith.constant 0 : i32
    %c0_i32_1 = arith.constant 0 : i32
    return %c0_i32, %c0_i32_0 : i32, i32
  }
  func.func @transform_8(%arg0: i32) -> (i32, i32) {
    %c0_i32 = arith.constant 0 : i32
    %c0_i32_0 = arith.constant 0 : i32
    %c0_i32_1 = arith.constant 0 : i32
    return %c0_i32, %c0_i32_0 : i32, i32
  }
  func.func @transform_9(%arg0: i32) -> (i32, i32) {
    %c0_i32 = arith.constant 0 : i32
    %c0_i32_0 = arith.constant 0 : i32
    %c0_i32_1 = arith.constant 0 : i32
    return %c0_i32, %c0_i32_0 : i32, i32
  }
}

module attributes {stable_mosaic.version = 11 : i64} {
  func.func @_matmul_bias_act_kernel(%arg0: i32, %arg1: memref<128x288xbf16, #tpu.memory_space<vmem>>, %arg2: memref<288x64xbf16, #tpu.memory_space<vmem>>, %arg3: memref<1x64xf32, #tpu.memory_space<vmem>>, %arg4: memref<128x64xbf16, #tpu.memory_space<vmem>>) attributes {dimension_semantics = [#tpu.dimension_semantics<parallel>], iteration_bounds = array<i64: 1>, scalar_prefetch = 0 : i64, scratch_operands = 0 : i64, tpu.core_type = #tpu.core_type<tc>, window_params = [{transform_indices = @transform_0, window_bounds = array<i64: 128, 288>}, {pipeline_mode = #tpu.pipeline_mode<synchronous>, transform_indices = @transform_1, window_bounds = array<i64: 288, 64>}, {pipeline_mode = #tpu.pipeline_mode<synchronous>, transform_indices = @transform_2, window_bounds = array<i64: 1, 64>}, {transform_indices = @transform_3, window_bounds = array<i64: 128, 64>}]} {
    %c0 = arith.constant 0 : index
    %c0_0 = arith.constant 0 : index
    %0 = vector.load %arg1[%c0, %c0_0] : memref<128x288xbf16, #tpu.memory_space<vmem>>, vector<128x288xbf16>
    %c0_1 = arith.constant 0 : index
    %c0_2 = arith.constant 0 : index
    %1 = vector.load %arg2[%c0_1, %c0_2] : memref<288x64xbf16, #tpu.memory_space<vmem>>, vector<288x64xbf16>
    %cst = arith.constant dense<0.000000e+00> : vector<128x64xf32>
    %2 = tpu.matmul %0, %1, %cst {dimension_numbers = #tpu.dot_dimension_numbers<[1], [0], [0], [1], [0, 0, 1, 1], [], []>} : vector<128x288xbf16>, vector<288x64xbf16>, vector<128x64xf32> -> vector<128x64xf32>
    %c0_3 = arith.constant 0 : index
    %c0_4 = arith.constant 0 : index
    %3 = vector.load %arg3[%c0_3, %c0_4] : memref<1x64xf32, #tpu.memory_space<vmem>>, vector<1x64xf32>
    %4 = vector.broadcast %3 : vector<1x64xf32> to vector<128x64xf32>
    %5 = arith.addf %2, %4 : vector<128x64xf32>
    %cst_5 = arith.constant 0.000000e+00 : f32
    %6 = vector.broadcast %cst_5 : f32 to vector<128x64xf32>
    %7 = arith.maximumf %5, %6 : vector<128x64xf32>
    %8 = arith.truncf %7 : vector<128x64xf32> to vector<128x64xbf16>
    %c0_6 = arith.constant 0 : index
    %c0_7 = arith.constant 0 : index
    %9 = vector.load %arg4[%c0_6, %c0_7] : memref<128x64xbf16, #tpu.memory_space<vmem>>, vector<128x64xbf16>
    tpu.vector_store %arg4[%c0_6, %c0_7], %8 {strides = array<i32>} : memref<128x64xbf16, #tpu.memory_space<vmem>>, vector<128x64xbf16>,
    return
  }
  func.func @transform_0(%arg0: i32) -> (i32, i32) {
    %c0_i32 = arith.constant 0 : i32
    %c0_i32_0 = arith.constant 0 : i32
    return %arg0, %c0_i32 : i32, i32
  }
  func.func @transform_1(%arg0: i32) -> (i32, i32) {
    %c0_i32 = arith.constant 0 : i32
    %c0_i32_0 = arith.constant 0 : i32
    %c0_i32_1 = arith.constant 0 : i32
    return %c0_i32, %c0_i32_0 : i32, i32
  }
  func.func @transform_2(%arg0: i32) -> (i32, i32) {
    %c0_i32 = arith.constant 0 : i32
    %c0_i32_0 = arith.constant 0 : i32
    %c0_i32_1 = arith.constant 0 : i32
    return %c0_i32, %c0_i32_0 : i32, i32
  }
  func.func @transform_3(%arg0: i32) -> (i32, i32) {
    %c0_i32 = arith.constant 0 : i32
    %c0_i32_0 = arith.constant 0 : i32
    return %arg0, %c0_i32 : i32, i32
  }
}

module attributes {stable_mosaic.version = 11 : i64} {
  func.func @_matmul_bias_act_kernel(%arg0: i32, %arg1: memref<512x144xbf16, #tpu.memory_space<vmem>>, %arg2: memref<144x32xbf16, #tpu.memory_space<vmem>>, %arg3: memref<1x32xf32, #tpu.memory_space<vmem>>, %arg4: memref<512x32xbf16, #tpu.memory_space<vmem>>) attributes {dimension_semantics = [#tpu.dimension_semantics<parallel>], iteration_bounds = array<i64: 1>, scalar_prefetch = 0 : i64, scratch_operands = 0 : i64, tpu.core_type = #tpu.core_type<tc>, window_params = [{transform_indices = @transform_0, window_bounds = array<i64: 512, 144>}, {pipeline_mode = #tpu.pipeline_mode<synchronous>, transform_indices = @transform_1, window_bounds = array<i64: 144, 32>}, {pipeline_mode = #tpu.pipeline_mode<synchronous>, transform_indices = @transform_2, window_bounds = array<i64: 1, 32>}, {transform_indices = @transform_3, window_bounds = array<i64: 512, 32>}]} {
    %c0 = arith.constant 0 : index
    %c0_0 = arith.constant 0 : index
    %0 = vector.load %arg1[%c0, %c0_0] : memref<512x144xbf16, #tpu.memory_space<vmem>>, vector<512x144xbf16>
    %c0_1 = arith.constant 0 : index
    %c0_2 = arith.constant 0 : index
    %1 = vector.load %arg2[%c0_1, %c0_2] : memref<144x32xbf16, #tpu.memory_space<vmem>>, vector<144x32xbf16>
    %cst = arith.constant dense<0.000000e+00> : vector<512x32xf32>
    %2 = tpu.matmul %0, %1, %cst {dimension_numbers = #tpu.dot_dimension_numbers<[1], [0], [0], [1], [0, 0, 1, 1], [], []>} : vector<512x144xbf16>, vector<144x32xbf16>, vector<512x32xf32> -> vector<512x32xf32>
    %c0_3 = arith.constant 0 : index
    %c0_4 = arith.constant 0 : index
    %3 = vector.load %arg3[%c0_3, %c0_4] : memref<1x32xf32, #tpu.memory_space<vmem>>, vector<1x32xf32>
    %4 = vector.broadcast %3 : vector<1x32xf32> to vector<512x32xf32>
    %5 = arith.addf %2, %4 : vector<512x32xf32>
    %cst_5 = arith.constant 0.000000e+00 : f32
    %6 = vector.broadcast %cst_5 : f32 to vector<512x32xf32>
    %7 = arith.maximumf %5, %6 : vector<512x32xf32>
    %8 = arith.truncf %7 : vector<512x32xf32> to vector<512x32xbf16>
    %c0_6 = arith.constant 0 : index
    %c0_7 = arith.constant 0 : index
    %9 = vector.load %arg4[%c0_6, %c0_7] : memref<512x32xbf16, #tpu.memory_space<vmem>>, vector<512x32xbf16>
    tpu.vector_store %arg4[%c0_6, %c0_7], %8 {strides = array<i32>} : memref<512x32xbf16, #tpu.memory_space<vmem>>, vector<512x32xbf16>,
    return
  }
  func.func @transform_0(%arg0: i32) -> (i32, i32) {
    %c0_i32 = arith.constant 0 : i32
    %c0_i32_0 = arith.constant 0 : i32
    return %arg0, %c0_i32 : i32, i32
  }
  func.func @transform_1(%arg0: i32) -> (i32, i32) {
    %c0_i32 = arith.constant 0 : i32
    %c0_i32_0 = arith.constant 0 : i32
    %c0_i32_1 = arith.constant 0 : i32
    return %c0_i32, %c0_i32_0 : i32, i32
  }
  func.func @transform_2(%arg0: i32) -> (i32, i32) {
    %c0_i32 = arith.constant 0 : i32
    %c0_i32_0 = arith.constant 0 : i32
    %c0_i32_1 = arith.constant 0 : i32
    return %c0_i32, %c0_i32_0 : i32, i32
  }
  func.func @transform_3(%arg0: i32) -> (i32, i32) {
    %c0_i32 = arith.constant 0 : i32
    %c0_i32_0 = arith.constant 0 : i32
    return %arg0, %c0_i32 : i32, i32
  }
}

module attributes {stable_mosaic.version = 11 : i64} {
  func.func @_matmul_bias_act_kernel(%arg0: i32, %arg1: memref<1024x72xbf16, #tpu.memory_space<vmem>>, %arg2: memref<72x12xbf16, #tpu.memory_space<vmem>>, %arg3: memref<1x12xf32, #tpu.memory_space<vmem>>, %arg4: memref<1024x12xf32, #tpu.memory_space<vmem>>) attributes {dimension_semantics = [#tpu.dimension_semantics<parallel>], iteration_bounds = array<i64: 2>, scalar_prefetch = 0 : i64, scratch_operands = 0 : i64, tpu.core_type = #tpu.core_type<tc>, window_params = [{transform_indices = @transform_0, window_bounds = array<i64: 1024, 72>}, {pipeline_mode = #tpu.pipeline_mode<synchronous>, transform_indices = @transform_1, window_bounds = array<i64: 72, 12>}, {pipeline_mode = #tpu.pipeline_mode<synchronous>, transform_indices = @transform_2, window_bounds = array<i64: 1, 12>}, {transform_indices = @transform_3, window_bounds = array<i64: 1024, 12>}]} {
    %c0 = arith.constant 0 : index
    %c0_0 = arith.constant 0 : index
    %0 = vector.load %arg1[%c0, %c0_0] : memref<1024x72xbf16, #tpu.memory_space<vmem>>, vector<1024x72xbf16>
    %c0_1 = arith.constant 0 : index
    %c0_2 = arith.constant 0 : index
    %1 = vector.load %arg2[%c0_1, %c0_2] : memref<72x12xbf16, #tpu.memory_space<vmem>>, vector<72x12xbf16>
    %cst = arith.constant dense<0.000000e+00> : vector<1024x12xf32>
    %2 = tpu.matmul %0, %1, %cst {dimension_numbers = #tpu.dot_dimension_numbers<[1], [0], [0], [1], [0, 0, 1, 1], [], []>} : vector<1024x72xbf16>, vector<72x12xbf16>, vector<1024x12xf32> -> vector<1024x12xf32>
    %c0_3 = arith.constant 0 : index
    %c0_4 = arith.constant 0 : index
    %3 = vector.load %arg3[%c0_3, %c0_4] : memref<1x12xf32, #tpu.memory_space<vmem>>, vector<1x12xf32>
    %4 = vector.broadcast %3 : vector<1x12xf32> to vector<1024x12xf32>
    %5 = arith.addf %2, %4 : vector<1024x12xf32>
    %6 = arith.negf %5 : vector<1024x12xf32>
    %7 = math.exp %6 : vector<1024x12xf32>
    %cst_5 = arith.constant 1.000000e+00 : f32
    %8 = vector.broadcast %cst_5 : f32 to vector<1024x12xf32>
    %9 = arith.addf %8, %7 : vector<1024x12xf32>
    %10 = arith.divf %8, %9 : vector<1024x12xf32>
    %c0_6 = arith.constant 0 : index
    %c0_7 = arith.constant 0 : index
    %11 = vector.load %arg4[%c0_6, %c0_7] : memref<1024x12xf32, #tpu.memory_space<vmem>>, vector<1024x12xf32>
    tpu.vector_store %arg4[%c0_6, %c0_7], %10 {strides = array<i32>} : memref<1024x12xf32, #tpu.memory_space<vmem>>, vector<1024x12xf32>,
    return
  }
  func.func @transform_0(%arg0: i32) -> (i32, i32) {
    %c0_i32 = arith.constant 0 : i32
    %c0_i32_0 = arith.constant 0 : i32
    return %arg0, %c0_i32 : i32, i32
  }
  func.func @transform_1(%arg0: i32) -> (i32, i32) {
    %c0_i32 = arith.constant 0 : i32
    %c0_i32_0 = arith.constant 0 : i32
    %c0_i32_1 = arith.constant 0 : i32
    return %c0_i32, %c0_i32_0 : i32, i32
  }
  func.func @transform_2(%arg0: i32) -> (i32, i32) {
    %c0_i32 = arith.constant 0 : i32
    %c0_i32_0 = arith.constant 0 : i32
    %c0_i32_1 = arith.constant 0 : i32
    return %c0_i32, %c0_i32_0 : i32, i32
  }
  func.func @transform_3(%arg0: i32) -> (i32, i32) {
    %c0_i32 = arith.constant 0 : i32
    %c0_i32_0 = arith.constant 0 : i32
    return %arg0, %c0_i32 : i32, i32
  }
}

</mosaic_0001>

<bundles_post_ra>
// kernel: tile.19
= control target key start
LH: loop header
LB: loop body
LE: loop exit
PB: predicated region body
PF: predicated region fallthrough
CT: control target
= control target key end

     0   :  { %vm8_vm0 = vcmask 130048   ;;  %s40_s8 = smov 16   ;;  %s41_s9 = smov 32   ;;  %vm14_vm1 = vcmask 523648   ;;  %vm20_vm2 = vcmask 392448   ;;  %vm26_vm3 = vcmask 261248   ;;  %s58_s0 = inlined_call_operand.vmem [shape: f32[4,16], index: 0, kind: input, shape index: {}]   ;;  %s59_s1 = inlined_call_operand.vmem [shape: f32[1,64], index: 1, kind: output, shape index: {}]  }
   0x1   :  { %v5_v0 = vld [vmem:[%s58_s0] sm:$0xf]  ;;  %s39_s0 = smov 48  }
   0x2   :  { %6 = vst [vmem:[#allocation1] sm:$0xf] %v5_v0 }
   0x9   :  { %v11_v1 = vld [vmem:[#allocation1 + $0x3] sm:$0x1]   ;;  %v23_v2 = vld [vmem:[#allocation1 + $0x1] sm:$0x1]   ;;  %v7_v3 = vld [vmem:[#allocation1] sm:$0x1]  }
   0xa   :  { %12 = vrot.lane.b32.xlu0 %v11_v1, %s39_s0  ;;  %24 = vrot.lane.b32.xlu1 %v23_v2, %s40_s8  ;;  %v17_v4 = vld [vmem:[#allocation1 + $0x2] sm:$0x1]   ;;  %9 = vst.msk [vmem:[#allocation0] sm:$0x1] %vm8_vm0, %v7_v3  }
   0xe   :  { %18 = vrot.lane.b32.xlu0 %v17_v4, %s41_s9 }
  0x7c   :  { %v13_v5 = vpop.permute.xlu0 %12   ;;  %v25_v6 = vpop.permute.xlu1 %24  }
  0x7d   :  { %15 = vst.msk [vmem:[#allocation0] sm:$0x1] %vm14_vm1, %v13_v5  }
  0x80   :  { %v19_v7 = vpop.permute.xlu0 %18  }
  0x81   :  { %21 = vst.msk [vmem:[#allocation0] sm:$0x1] %vm20_vm2, %v19_v7  }
  0x82   :  { %27 = vst.msk [vmem:[#allocation0] sm:$0x1] %vm26_vm3, %v25_v6  }
  0x89   :  { %v32_v8 = vld [vmem:[#allocation0] sm:$0x1] }
  0x8a   :  { %35 = vst [vmem:[%s59_s1] sm:$0x1] %v32_v8 }

// kernel: tile.24
= control target key start
LH: loop header
LB: loop body
LE: loop exit
PB: predicated region body
PF: predicated region fallthrough
CT: control target
= control target key end

     0   :  { %vm8_vm0 = vcmask 64512   ;;  %s40_s8 = smov 8   ;;  %s41_s9 = smov 16   ;;  %vm14_vm1 = vcmask 261312   ;;  %vm20_vm2 = vcmask 195712   ;;  %vm26_vm3 = vcmask 130112   ;;  %s58_s0 = inlined_call_operand.vmem [shape: f32[4,8], index: 0, kind: input, shape index: {}]   ;;  %s59_s1 = inlined_call_operand.vmem [shape: f32[1,32], index: 1, kind: output, shape index: {}]  }
   0x1   :  { %v5_v0 = vld [vmem:[%s58_s0] sm:$0xf]  ;;  %s39_s0 = smov 24  }
   0x2   :  { %6 = vst [vmem:[#allocation1] sm:$0xf] %v5_v0 }
   0x9   :  { %v11_v1 = vld [vmem:[#allocation1 + $0x3] sm:$0x1]   ;;  %v23_v2 = vld [vmem:[#allocation1 + $0x1] sm:$0x1]   ;;  %v7_v3 = vld [vmem:[#allocation1] sm:$0x1]  }
   0xa   :  { %12 = vrot.lane.b32.xlu0 %v11_v1, %s39_s0  ;;  %24 = vrot.lane.b32.xlu1 %v23_v2, %s40_s8  ;;  %v17_v4 = vld [vmem:[#allocation1 + $0x2] sm:$0x1]   ;;  %9 = vst.msk [vmem:[#allocation0] sm:$0x1] %vm8_vm0, %v7_v3  }
   0xe   :  { %18 = vrot.lane.b32.xlu0 %v17_v4, %s41_s9 }
  0x7c   :  { %v13_v5 = vpop.permute.xlu0 %12   ;;  %v25_v6 = vpop.permute.xlu1 %24  }
  0x7d   :  { %15 = vst.msk [vmem:[#allocation0] sm:$0x1] %vm14_vm1, %v13_v5  }
  0x80   :  { %v19_v7 = vpop.permute.xlu0 %18  }
  0x81   :  { %21 = vst.msk [vmem:[#allocation0] sm:$0x1] %vm20_vm2, %v19_v7  }
  0x82   :  { %27 = vst.msk [vmem:[#allocation0] sm:$0x1] %vm26_vm3, %v25_v6  }
  0x89   :  { %v32_v8 = vld [vmem:[#allocation0] sm:$0x1] }
  0x8a   :  { %35 = vst [vmem:[%s59_s1] sm:$0x1] %v32_v8 }

// kernel: tile.18
= control target key start
LH: loop header
LB: loop body
LE: loop exit
PB: predicated region body
PF: predicated region fallthrough
CT: control target
= control target key end

     0   :  { %2 = vsyncpa [#allocation1], 0  ;;  %s42_s6 = smov [#allocation0]   ;;  %s59_s0 = inlined_call_operand.hbm [shape: f32[16], index: 0, kind: input, shape index: {}]   ;;  %s60_s1 = inlined_call_operand.vmem [shape: f32[4,16], index: 1, kind: output, shape index: {}]  }
   0x1   :  { %s9_s7 = sshll.u32 %s42_s6, 4  ;;  %s10_s7 = int_to_ptr.vmem [resolvable:$true] %s9_s7 }
   0x2   :  { %s28_s8 = scalar_lea.vmem %s10_s7, 16  ;;  %s32_s9 = scalar_lea.vmem %s10_s7, 32 }
   0x3   :  { %p29_p0 = scmp.ne.s32.totalorder %s10_s7, %s28_s8  ;;  %p33_p1 = scmp.lt.s32.totalorder %s10_s7, %s10_s7 }
   0x4   :  { %p34_p2 = scmp.lt.s32.totalorder %s32_s9, %s28_s8 }
   0x6   :  { %p35_p3 = por %p34_p2, %p33_p1 }
   0x8   :  { %p36_p4 = pnand %p35_p3, %p29_p0 }
   0xa   :  { %39 = shalt.err (!%p36_p4)
}
   0xb   :  { %12 = dma.hbm_to_vmem [thread:$0]  %s59_s0, 16, %s10_s7, [#allocation1]  }
   0xc   :  { %40 = dma.done.wait [#allocation1], 16  }
   0xd   :  { %41 = vsyncadd [#allocation1], 4294967280  ;;  %v16_v0 = vld [vmem:[#allocation0] ss:$0 sm:$0xff] }
   0xe   :  { %17 = vst [vmem:[%s60_s1] sm:$0xf] %v16_v0 }
   0xf   :  { %18 = vsyncpa [#allocation1], 1 }

// kernel: tile.23
= control target key start
LH: loop header
LB: loop body
LE: loop exit
PB: predicated region body
PF: predicated region fallthrough
CT: control target
= control target key end

     0   :  { %2 = vsyncpa [#allocation1], 0  ;;  %s42_s6 = smov [#allocation0]   ;;  %s59_s0 = inlined_call_operand.hbm [shape: f32[8], index: 0, kind: input, shape index: {}]   ;;  %s60_s1 = inlined_call_operand.vmem [shape: f32[4,8], index: 1, kind: output, shape index: {}]  }
   0x1   :  { %s9_s7 = sshll.u32 %s42_s6, 4  ;;  %s10_s7 = int_to_ptr.vmem [resolvable:$true] %s9_s7 }
   0x2   :  { %s28_s8 = scalar_lea.vmem %s10_s7, 16  ;;  %s32_s9 = scalar_lea.vmem %s10_s7, 32 }
   0x3   :  { %p29_p0 = scmp.ne.s32.totalorder %s10_s7, %s28_s8  ;;  %p33_p1 = scmp.lt.s32.totalorder %s10_s7, %s10_s7 }
   0x4   :  { %p34_p2 = scmp.lt.s32.totalorder %s32_s9, %s28_s8 }
   0x6   :  { %p35_p3 = por %p34_p2, %p33_p1 }
   0x8   :  { %p36_p4 = pnand %p35_p3, %p29_p0 }
   0xa   :  { %39 = shalt.err (!%p36_p4)
}
   0xb   :  { %12 = dma.hbm_to_vmem [thread:$0]  %s59_s0, 16, %s10_s7, [#allocation1]  }
   0xc   :  { %40 = dma.done.wait [#allocation1], 16  }
   0xd   :  { %41 = vsyncadd [#allocation1], 4294967280  ;;  %v16_v0 = vld [vmem:[#allocation0] ss:$0 sm:$0xff] }
   0xe   :  { %17 = vst [vmem:[%s60_s1] sm:$0xf] %v16_v0 }
   0xf   :  { %18 = vsyncpa [#allocation1], 1 }

// kernel: tile.29
= control target key start
LH: loop header
LB: loop body
LE: loop exit
PB: predicated region body
PF: predicated region fallthrough
CT: control target
= control target key end

     0   :  { %vm8_vm0 = vcmask 23552   ;;  %s40_s8 = smov 3   ;;  %s41_s9 = smov 6   ;;  %vm14_vm1 = vcmask 97352   ;;  %vm20_vm2 = vcmask 72752   ;;  %vm26_vm3 = vcmask 48152   ;;  %s58_s0 = inlined_call_operand.vmem [shape: f32[4,3], index: 0, kind: input, shape index: {}]   ;;  %s59_s1 = inlined_call_operand.vmem [shape: f32[1,12], index: 1, kind: output, shape index: {}]  }
   0x1   :  { %v5_v0 = vld [vmem:[%s58_s0] sm:$0xf]  ;;  %s39_s0 = smov 9  }
   0x2   :  { %6 = vst [vmem:[#allocation1] sm:$0xf] %v5_v0 }
   0x9   :  { %v11_v1 = vld [vmem:[#allocation1 + $0x3] sm:$0x1]   ;;  %v23_v2 = vld [vmem:[#allocation1 + $0x1] sm:$0x1]   ;;  %v7_v3 = vld [vmem:[#allocation1] sm:$0x1]  }
   0xa   :  { %12 = vrot.lane.b32.xlu0 %v11_v1, %s39_s0  ;;  %24 = vrot.lane.b32.xlu1 %v23_v2, %s40_s8  ;;  %v17_v4 = vld [vmem:[#allocation1 + $0x2] sm:$0x1]   ;;  %9 = vst.msk [vmem:[#allocation0] sm:$0x1] %vm8_vm0, %v7_v3  }
   0xe   :  { %18 = vrot.lane.b32.xlu0 %v17_v4, %s41_s9 }
  0x7c   :  { %v13_v5 = vpop.permute.xlu0 %12   ;;  %v25_v6 = vpop.permute.xlu1 %24  }
  0x7d   :  { %15 = vst.msk [vmem:[#allocation0] sm:$0x1] %vm14_vm1, %v13_v5  }
  0x80   :  { %v19_v7 = vpop.permute.xlu0 %18  }
  0x81   :  { %21 = vst.msk [vmem:[#allocation0] sm:$0x1] %vm20_vm2, %v19_v7  }
  0x82   :  { %27 = vst.msk [vmem:[#allocation0] sm:$0x1] %vm26_vm3, %v25_v6  }
  0x89   :  { %v32_v8 = vld [vmem:[#allocation0] sm:$0x1] }
  0x8a   :  { %35 = vst [vmem:[%s59_s1] sm:$0x1] %v32_v8 }

// kernel: tile.28
= control target key start
LH: loop header
LB: loop body
LE: loop exit
PB: predicated region body
PF: predicated region fallthrough
CT: control target
= control target key end

     0   :  { %2 = vsyncpa [#allocation1], 0  ;;  %s42_s6 = smov [#allocation0]   ;;  %s59_s0 = inlined_call_operand.hbm [shape: f32[3], index: 0, kind: input, shape index: {}]   ;;  %s60_s1 = inlined_call_operand.vmem [shape: f32[4,3], index: 1, kind: output, shape index: {}]  }
   0x1   :  { %s9_s7 = sshll.u32 %s42_s6, 4  ;;  %s10_s7 = int_to_ptr.vmem [resolvable:$true] %s9_s7 }
   0x2   :  { %s28_s8 = scalar_lea.vmem %s10_s7, 16  ;;  %s32_s9 = scalar_lea.vmem %s10_s7, 32 }
   0x3   :  { %p29_p0 = scmp.ne.s32.totalorder %s10_s7, %s28_s8  ;;  %p33_p1 = scmp.lt.s32.totalorder %s10_s7, %s10_s7 }
   0x4   :  { %p34_p2 = scmp.lt.s32.totalorder %s32_s9, %s28_s8 }
   0x6   :  { %p35_p3 = por %p34_p2, %p33_p1 }
   0x8   :  { %p36_p4 = pnand %p35_p3, %p29_p0 }
   0xa   :  { %39 = shalt.err (!%p36_p4)
}
   0xb   :  { %12 = dma.hbm_to_vmem [thread:$0]  %s59_s0, 16, %s10_s7, [#allocation1]  }
   0xc   :  { %40 = dma.done.wait [#allocation1], 16  }
   0xd   :  { %41 = vsyncadd [#allocation1], 4294967280  ;;  %v16_v0 = vld [vmem:[#allocation0] ss:$0 sm:$0xff] }
   0xe   :  { %17 = vst [vmem:[%s60_s1] sm:$0xf] %v16_v0 }
   0xf   :  { %18 = vsyncpa [#allocation1], 1 }

// kernel: autoencoder_forward.7
= control target key start
LH: loop header
LB: loop body
LE: loop exit
PB: predicated region body
PF: predicated region fallthrough
CT: control target
= control target key end

     0   :  { %8 = vsyncpa [#allocation3], 0  ;;  %s2996_s12 = smov 0   ;;  %s3570_s0 = inlined_call_operand.vmem [shape: bf16[2048,48], index: 0, kind: input, shape index: {}]   ;;  %s3571_s1 = inlined_call_operand.vmem [shape: bf16[48,8], index: 1, kind: input, shape index: {}]   ;;  %s3572_s2 = inlined_call_operand.hbm [shape: f32[1,8], index: 2, kind: input, shape index: {}]   ;;  %s3573_s3 = inlined_call_operand.vmem [shape: bf16[2048,8], index: 3, kind: output, shape index: {}]  }
   0x1 LB: > { %s2242_s13 = sadd.s32 4294967295, %s2973_s12   ;;  %p2244_p0 = scmp.ge.s32.totalorder %s2973_s12, 1  ;;  %s2973_s12 = sphi %s2996_s12, %s14_s12  }
   0x2   : > { %p113_p1 = scmp.lt.s32.totalorder %s2973_s12, 3  ;;  %p3008_p3 = scmp.eq.s32.totalorder %s2242_s13, 0 }
   0x3   : > { %s2975_s16 = smov [#allocation2]  }
   0x4   : > { %p3004_p2 = pnand %p2244_p0, %p113_p1  ;;  %s129_s17 = sshll.u32 %s2975_s16, 4  ;;  %s130_s17 = int_to_ptr.vmem [resolvable:$true] %s129_s17 }
   0x5   : > { %s2948_s18 = scalar_lea.vmem %s130_s17, 16  ;;  %s2955_s19 = scalar_lea.vmem %s130_s17, 32 }
   0x6   : > { %p2854_p4 = pneg %p3004_p2  ;;  %p2949_p7 = scmp.ne.s32.totalorder %s130_s17, %s2948_s18 }
   0x7   : > { %p2956_p10 = scmp.lt.s32.totalorder %s130_s17, %s130_s17  ;;  %p2957_p11 = scmp.lt.s32.totalorder %s2955_s19, %s2948_s18 }
   0x8   : > { %p2855_p5 = pnand %p3008_p3, %p2854_p4 }
   0x9   : > { %p2958_p12 = por %p2957_p11, %p2956_p10 }
   0xa   : > { %p2939_p6 = pneg %p2855_p5 }
   0xc   : > { %p2951_p8 = pnand %p2949_p7, %p2939_p6 }
   0xe   : > { %p2952_p9 = pneg %p2951_p8 }
  0x10   : > { %p2959_p13 = pnand %p2958_p12, %p2952_p9 }
  0x12   : > { %2962 = shalt.err (!%p2959_p13)
}
  0x13   : > { %2857 = dma.hbm_to_vmem [thread:$0]  (!%p2855_p5), %s3572_s2, 16, %s130_s17, [#allocation3]  }
  0x14   : > { %151 = sbr.rel (%p3004_p2) target bundleno = 366 (0x16e), region = 32 }
  0x19   : > { %2968 = dma.done.wait (%p3008_p3), [#allocation3], 16  }
  0x1a   : > { %2970 = vsyncadd (%p3008_p3), [#allocation3], 4294967280  ;;  %s2249_s22 = sshll.u32 %s2242_s13, 7  ;;  %v2869_v0 = vld [vmem:[%s3571_s1 + $0x10] sm:$0xff]   ;;  %v2870_v1 = vld [vmem:[%s3571_s1 + $0x8] sm:$0xff]   ;;  %vm667_vm0 = vcmask 392192  }
  0x1b   : > { %p176_p0 = scmp.lt.s32.totalorder %s2249_s22, 255  ;;  %2710 = vmatprep.subr.bf16.mxu0 %v2869_v0  ;;  %2844 = vmatprep.subr.bf16.mxu1 %v2869_v0  ;;  %v2871_v2 = vld [vmem:[%s3571_s1] sm:$0xff]   ;;  %vm2045_vm1 = vcmask 60416  }
  0x1c   : > { %2711 = vmatpush3.bf16.msra.mxu0 %v2869_v0  ;;  %2847 = vmatpush3.bf16.msra.mxu1 %v2869_v0 }
  0x1d   : > { %s3577_s22 = smov (!%p176_p0, %s2249_s22), 255  ;;  %2712 = vmatprep.subr.bf16.mxu0 %v2870_v1  ;;  %2845 = vmatprep.subr.bf16.mxu1 %v2870_v1 }
  0x1e   : > { %s2250_s23 = sshll.u32 %s3577_s22, 2 }
  0x1f   : > { %s3036_s28 = scalar_lea.vmem %s3570_s0, %s2250_s23  ;;  %s3183_s8 = scalar_lea.vmem %s3573_s3, %s2250_s23 }
  0x20   : > { %v2872_v3 = vld [vmem:[%s3036_s28] sm:$0xff]   ;;  %2713 = vmatpush3.bf16.msra.mxu0 %v2870_v1  ;;  %2848 = vmatpush3.bf16.msra.mxu1 %v2870_v1  ;;  %v2874_v5 = vld [vmem:[%s3036_s28 + $0x8] sm:$0xff]   ;;  %v2876_v7 = vld [vmem:[%s3036_s28 + $0x10] sm:$0xff]  }
  0x21   : > { %v2873_v4 = vld [vmem:[%s3036_s28 + $0x100] sm:$0xff]   ;;  %2716 = vmatprep.mubr.msk.bf16.mxu0 %vm667_vm0, %v2872_v3  ;;  %2714 = vmatprep.subr.bf16.mxu0 %v2871_v2  ;;  %v2875_v6 = vld [vmem:[%s3036_s28 + $0x108] sm:$0xff]   ;;  %v2877_v8 = vld [vmem:[%s3036_s28 + $0x110] sm:$0xff]  }
  0x22   : > { %2780 = vmatprep.mubr.msk.bf16.mxu1 %vm667_vm0, %v2873_v4  ;;  %2846 = vmatprep.subr.bf16.mxu1 %v2871_v2  ;;  %v2878_v9 = vld [vmem:[%s3036_s28 + $0x18] sm:$0xff]   ;;  %v2880_v11 = vld [vmem:[%s3036_s28 + $0x20] sm:$0xff]   ;;  %v2882_v13 = vld [vmem:[%s3036_s28 + $0x28] sm:$0xff]  }
  0x23   : > { %v2879_v10 = vld [vmem:[%s3036_s28 + $0x118] sm:$0xff]   ;;  %v2881_v12 = vld [vmem:[%s3036_s28 + $0x120] sm:$0xff]   ;;  %v2883_v14 = vld [vmem:[%s3036_s28 + $0x128] sm:$0xff]  }
  0x24   : > { %2715 = vmatpush3.bf16.msra.mxu0 %v2871_v2  ;;  %2849 = vmatpush3.bf16.msra.mxu1 %v2871_v2  ;;  %v2884_v15 = vld [vmem:[%s3036_s28 + $0x30] sm:$0xff]   ;;  %v2886_v17 = vld [vmem:[%s3036_s28 + $0x38] sm:$0xff]   ;;  %v2888_v19 = vld [vmem:[%s3036_s28 + $0x40] sm:$0xff]  }
  0x25   : > { %v2885_v16 = vld [vmem:[%s3036_s28 + $0x130] sm:$0xff]   ;;  %v2887_v18 = vld [vmem:[%s3036_s28 + $0x138] sm:$0xff]   ;;  %v2889_v20 = vld [vmem:[%s3036_s28 + $0x140] sm:$0xff]  }
  0x26   : > { %v2890_v21 = vld [vmem:[%s3036_s28 + $0x48] sm:$0xff]   ;;  %v2892_v23 = vld [vmem:[%s3036_s28 + $0x50] sm:$0xff]   ;;  %v2894_v25 = vld [vmem:[%s3036_s28 + $0x58] sm:$0xff]  }
  0x27   : > { %2717 = vmatmul.mubr.msk.bf16.vlgmr.msra.gmra.mxu0 %vm667_vm0, %v2874_v5  ;;  %2781 = vmatmul.mubr.msk.bf16.vlgmr.msra.gmra.mxu1 %vm667_vm0, %v2875_v6  ;;  %v2891_v22 = vld [vmem:[%s3036_s28 + $0x148] sm:$0xff]   ;;  %v2893_v24 = vld [vmem:[%s3036_s28 + $0x150] sm:$0xff]   ;;  %v2895_v26 = vld [vmem:[%s3036_s28 + $0x158] sm:$0xff]  }
  0x28   : > { %2720 = vmatprep.mubr.msk.bf16.mxu0 %vm667_vm0, %v2876_v7  ;;  %2784 = vmatprep.mubr.msk.bf16.mxu1 %vm667_vm0, %v2877_v8  ;;  %v2896_v27 = vld [vmem:[%s3036_s28 + $0x60] sm:$0xff]   ;;  %v2898_v29 = vld [vmem:[%s3036_s28 + $0x68] sm:$0xff]   ;;  %v2900_v31 = vld [vmem:[%s3036_s28 + $0x70] sm:$0xff]  }
  0x29   : > { %v2897_v28 = vld [vmem:[%s3036_s28 + $0x160] sm:$0xff]   ;;  %v2899_v30 = vld [vmem:[%s3036_s28 + $0x168] sm:$0xff]   ;;  %v2901_v32 = vld [vmem:[%s3036_s28 + $0x170] sm:$0xff]  }
  0x2a   : > { %v2902_v33 = vld [vmem:[%s3036_s28 + $0x78] sm:$0xff]   ;;  %v2904_v35 = vld [vmem:[%s3036_s28 + $0x80] sm:$0xff]   ;;  %v2906_v37 = vld [vmem:[%s3036_s28 + $0x88] sm:$0xff]  }
  0x2b   : > { %v2903_v34 = vld [vmem:[%s3036_s28 + $0x178] sm:$0xff]   ;;  %v2905_v36 = vld [vmem:[%s3036_s28 + $0x180] sm:$0xff]   ;;  %v2907_v38 = vld [vmem:[%s3036_s28 + $0x188] sm:$0xff]  }
  0x2c   : > { %v2908_v39 = vld [vmem:[%s3036_s28 + $0x90] sm:$0xff]   ;;  %v2910_v41 = vld [vmem:[%s3036_s28 + $0x98] sm:$0xff]   ;;  %v2912_v43 = vld [vmem:[%s3036_s28 + $0xa0] sm:$0xff]  }
  0x2d   : > { %v2909_v40 = vld [vmem:[%s3036_s28 + $0x190] sm:$0xff]   ;;  %v2911_v42 = vld [vmem:[%s3036_s28 + $0x198] sm:$0xff]   ;;  %v2913_v44 = vld [vmem:[%s3036_s28 + $0x1a0] sm:$0xff]  }
  0x2e   : > { %v2914_v45 = vld [vmem:[%s3036_s28 + $0xa8] sm:$0xff]   ;;  %v2916_v47 = vld [vmem:[%s3036_s28 + $0xb0] sm:$0xff]   ;;  %v2918_v49 = vld [vmem:[%s3036_s28 + $0xb8] sm:$0xff]  }
  0x2f   : > { %2721 = vmatmul.mubr.msk.bf16.gmra.mxu0 %vm667_vm0, %v2878_v9  ;;  %2785 = vmatmul.mubr.msk.bf16.gmra.mxu1 %vm667_vm0, %v2879_v10  ;;  %v2915_v46 = vld [vmem:[%s3036_s28 + $0x1a8] sm:$0xff]   ;;  %v2917_v48 = vld [vmem:[%s3036_s28 + $0x1b0] sm:$0xff]   ;;  %v2919_v50 = vld [vmem:[%s3036_s28 + $0x1b8] sm:$0xff]  }
  0x30   : > { %2724 = vmatprep.mubr.msk.bf16.mxu0 %vm667_vm0, %v2880_v11  ;;  %2788 = vmatprep.mubr.msk.bf16.mxu1 %vm667_vm0, %v2881_v12  ;;  %v2920_v51 = vld [vmem:[%s3036_s28 + $0xc0] sm:$0xff]   ;;  %v2922_v53 = vld [vmem:[%s3036_s28 + $0xc8] sm:$0xff]   ;;  %v2924_v55 = vld [vmem:[%s3036_s28 + $0xd0] sm:$0xff]  }
  0x31   : > { %v2921_v52 = vld [vmem:[%s3036_s28 + $0x1c0] sm:$0xff]   ;;  %v2923_v54 = vld [vmem:[%s3036_s28 + $0x1c8] sm:$0xff]   ;;  %v2925_v56 = vld [vmem:[%s3036_s28 + $0x1d0] sm:$0xff]  }
  0x32   : > { %v2926_v57 = vld [vmem:[%s3036_s28 + $0xd8] sm:$0xff]   ;;  %v2928_v59 = vld [vmem:[%s3036_s28 + $0xe0] sm:$0xff]   ;;  %v2930_v61 = vld [vmem:[%s3036_s28 + $0xe8] sm:$0xff]  }
  0x33   : > { %v2927_v58 = vld [vmem:[%s3036_s28 + $0x1d8] sm:$0xff]   ;;  %v2929_v60 = vld [vmem:[%s3036_s28 + $0x1e0] sm:$0xff]   ;;  %v2931_v62 = vld [vmem:[%s3036_s28 + $0x1e8] sm:$0xff]  }
  0x34   : > { %v2932_v63 = vld [vmem:[%s3036_s28 + $0xf0] sm:$0xff]   ;;  %v2934_v1 = vld [vmem:[%s3036_s28 + $0xf8] sm:$0xff]   ;;  %v3172_v3 = vld [vmem:[#allocation2] ss:$0 sm:$0xff] }
  0x35   : > { %v2933_v0 = vld [vmem:[%s3036_s28 + $0x1f0] sm:$0xff]   ;;  %v2935_v2 = vld [vmem:[%s3036_s28 + $0x1f8] sm:$0xff]  }
  0x37   : > { %2725 = vmatmul.mubr.msk.bf16.gmra.mxu0 %vm667_vm0, %v2882_v13  ;;  %2789 = vmatmul.mubr.msk.bf16.gmra.mxu1 %vm667_vm0, %v2883_v14 }
  0x38   : > { %2728 = vmatprep.mubr.msk.bf16.mxu0 %vm667_vm0, %v2884_v15  ;;  %2792 = vmatprep.mubr.msk.bf16.mxu1 %vm667_vm0, %v2885_v16 }
  0x3f   : > { %2729 = vmatmul.mubr.msk.bf16.gmra.mxu0 %vm667_vm0, %v2886_v17  ;;  %2793 = vmatmul.mubr.msk.bf16.gmra.mxu1 %vm667_vm0, %v2887_v18 }
  0x40   : > { %2732 = vmatprep.mubr.msk.bf16.mxu0 %vm667_vm0, %v2888_v19  ;;  %2796 = vmatprep.mubr.msk.bf16.mxu1 %vm667_vm0, %v2889_v20 }
  0x47   : > { %2733 = vmatmul.mubr.msk.bf16.gmra.mxu0 %vm667_vm0, %v2890_v21  ;;  %2797 = vmatmul.mubr.msk.bf16.gmra.mxu1 %vm667_vm0, %v2891_v22 }
  0x48   : > { %2736 = vmatprep.mubr.msk.bf16.mxu0 %vm667_vm0, %v2892_v23  ;;  %2800 = vmatprep.mubr.msk.bf16.mxu1 %vm667_vm0, %v2893_v24 }
  0x4f   : > { %2737 = vmatmul.mubr.msk.bf16.gmra.mxu0 %vm667_vm0, %v2894_v25  ;;  %2801 = vmatmul.mubr.msk.bf16.gmra.mxu1 %vm667_vm0, %v2895_v26 }
  0x50   : > { %2740 = vmatprep.mubr.msk.bf16.mxu0 %vm667_vm0, %v2896_v27  ;;  %2804 = vmatprep.mubr.msk.bf16.mxu1 %vm667_vm0, %v2897_v28 }
  0x57   : > { %2741 = vmatmul.mubr.msk.bf16.gmra.mxu0 %vm667_vm0, %v2898_v29  ;;  %2805 = vmatmul.mubr.msk.bf16.gmra.mxu1 %vm667_vm0, %v2899_v30 }
  0x58   : > { %2744 = vmatprep.mubr.msk.bf16.mxu0 %vm667_vm0, %v2900_v31  ;;  %2808 = vmatprep.mubr.msk.bf16.mxu1 %vm667_vm0, %v2901_v32 }
  0x5f   : > { %2745 = vmatmul.mubr.msk.bf16.gmra.mxu0 %vm667_vm0, %v2902_v33  ;;  %2809 = vmatmul.mubr.msk.bf16.gmra.mxu1 %vm667_vm0, %v2903_v34 }
  0x60   : > { %2748 = vmatprep.mubr.msk.bf16.mxu0 %vm667_vm0, %v2904_v35  ;;  %2812 = vmatprep.mubr.msk.bf16.mxu1 %vm667_vm0, %v2905_v36 }
  0x67   : > { %2749 = vmatmul.mubr.msk.bf16.gmra.mxu0 %vm667_vm0, %v2906_v37  ;;  %2813 = vmatmul.mubr.msk.bf16.gmra.mxu1 %vm667_vm0, %v2907_v38 }
  0x68   : > { %2752 = vmatprep.mubr.msk.bf16.mxu0 %vm667_vm0, %v2908_v39  ;;  %2816 = vmatprep.mubr.msk.bf16.mxu1 %vm667_vm0, %v2909_v40 }
  0x6f   : > { %2753 = vmatmul.mubr.msk.bf16.gmra.mxu0 %vm667_vm0, %v2910_v41  ;;  %2817 = vmatmul.mubr.msk.bf16.gmra.mxu1 %vm667_vm0, %v2911_v42 }
  0x70   : > { %2756 = vmatprep.mubr.msk.bf16.mxu0 %vm667_vm0, %v2912_v43  ;;  %2820 = vmatprep.mubr.msk.bf16.mxu1 %vm667_vm0, %v2913_v44 }
  0x77   : > { %2757 = vmatmul.mubr.msk.bf16.gmra.mxu0 %vm667_vm0, %v2914_v45  ;;  %2821 = vmatmul.mubr.msk.bf16.gmra.mxu1 %vm667_vm0, %v2915_v46 }
  0x78   : > { %2760 = vmatprep.mubr.msk.bf16.mxu0 %vm667_vm0, %v2916_v47  ;;  %2824 = vmatprep.mubr.msk.bf16.mxu1 %vm667_vm0, %v2917_v48 }
  0x7f   : > { %2761 = vmatmul.mubr.msk.bf16.gmra.mxu0 %vm667_vm0, %v2918_v49  ;;  %2825 = vmatmul.mubr.msk.bf16.gmra.mxu1 %vm667_vm0, %v2919_v50 }
  0x80   : > { %2764 = vmatprep.mubr.msk.bf16.mxu0 %vm667_vm0, %v2920_v51  ;;  %2828 = vmatprep.mubr.msk.bf16.mxu1 %vm667_vm0, %v2921_v52 }
  0x87   : > { %2765 = vmatmul.mubr.msk.bf16.gmra.mxu0 %vm667_vm0, %v2922_v53  ;;  %2829 = vmatmul.mubr.msk.bf16.gmra.mxu1 %vm667_vm0, %v2923_v54 }
  0x88   : > { %2768 = vmatprep.mubr.msk.bf16.mxu0 %vm667_vm0, %v2924_v55  ;;  %2832 = vmatprep.mubr.msk.bf16.mxu1 %vm667_vm0, %v2925_v56 }
  0x8f   : > { %2769 = vmatmul.mubr.msk.bf16.gmra.mxu0 %vm667_vm0, %v2926_v57  ;;  %2833 = vmatmul.mubr.msk.bf16.gmra.mxu1 %vm667_vm0, %v2927_v58 }
  0x90   : > { %2772 = vmatprep.mubr.msk.bf16.mxu0 %vm667_vm0, %v2928_v59  ;;  %2836 = vmatprep.mubr.msk.bf16.mxu1 %vm667_vm0, %v2929_v60 }
  0x97   : > { %2773 = vmatmul.mubr.msk.bf16.gmra.mxu0 %vm667_vm0, %v2930_v61  ;;  %2837 = vmatmul.mubr.msk.bf16.gmra.mxu1 %vm667_vm0, %v2931_v62 }
  0x98   : > { %2776 = vmatprep.mubr.msk.bf16.mxu0 %vm667_vm0, %v2932_v63  ;;  %2840 = vmatprep.mubr.msk.bf16.mxu1 %vm667_vm0, %v2933_v0 }
  0x9f   : > { %2777 = vmatmul.mubr.msk.bf16.gmra.mxu0 %vm667_vm0, %v2934_v1  ;;  %2841 = vmatmul.mubr.msk.bf16.gmra.mxu1 %vm667_vm0, %v2935_v2 }
  0xe7   : > { %v2718_v4 = vpop.f32.mrf.mxu0  ;;  %v2782_v5 = vpop.f32.mrf.mxu1 }
  0xe8   : > { %v903_v6 = vadd.f32 %v2718_v4, %v3172_v3  ;;  %v1159_v7 = vadd.f32 %v2782_v5, %v3172_v3 }
  0xe9   : > { %v894_v8 = vpop.f32.mrf.mxu0  ;;  %v1150_v9 = vpop.f32.mrf.mxu1 }
  0xea   : > { %v1407_v10 = vmax.f32 %v903_v6, 0.0  ;;  %v1471_v11 = vmax.f32 %v1159_v7, 0.0  ;;  %v895_v12 = vadd.f32 %v3172_v3, %v894_v8  ;;  %v1151_v13 = vadd.f32 %v3172_v3, %v1150_v9 }
  0xeb   : > { %v2719_v14 = vpop.f32.mrf.mxu0  ;;  %v2783_v15 = vpop.f32.mrf.mxu1 }
  0xec   : > { %v2517_v16 = vpack.c.bf16 %v1407_v10, %v1407_v10  ;;  %v2581_v17 = vpack.c.bf16 %v1471_v11, %v1471_v11  ;;  %v1405_v18 = vmax.f32 %v895_v12, 0.0  ;;  %v1469_v19 = vmax.f32 %v1151_v13, 0.0 }
  0xed   : > { %v906_v20 = vadd.f32 %v2719_v14, %v3172_v3  ;;  %v1162_v21 = vadd.f32 %v2783_v15, %v3172_v3  ;;  %v897_v22 = vpop.f32.mrf.mxu0  ;;  %v1153_v23 = vpop.f32.mrf.mxu1 }
  0xee   : > { %2048 = vst.msk [vmem:[%s3183_s8 + $0x8] sm:$0xf] %vm2045_vm1, %v2517_v16  ;;  %2112 = vst.msk [vmem:[%s3183_s8 + $0x108] sm:$0xf] %vm2045_vm1, %v2581_v17  ;;  %v2515_v24 = vpack.c.bf16 %v1405_v18, %v1405_v18  ;;  %v2579_v25 = vpack.c.bf16 %v1469_v19, %v1469_v19  ;;  %v898_v26 = vadd.f32 %v3172_v3, %v897_v22 }
  0xef   : > { %v1154_v27 = vadd.f32 %v3172_v3, %v1153_v23  ;;  %v1408_v28 = vmax.f32 %v906_v20, 0.0  ;;  %v1472_v29 = vmax.f32 %v1162_v21, 0.0  ;;  %v2722_v30 = vpop.f32.mrf.mxu0  ;;  %v2786_v31 = vpop.f32.mrf.mxu1 }
  0xf0   : > { %2046 = vst.msk [vmem:[%s3183_s8] sm:$0xf] %vm2045_vm1, %v2515_v24  ;;  %2110 = vst.msk [vmem:[%s3183_s8 + $0x100] sm:$0xf] %vm2045_vm1, %v2579_v25  ;;  %v1406_v32 = vmax.f32 %v898_v26, 0.0  ;;  %v919_v34 = vadd.f32 %v2722_v30, %v3172_v3  ;;  %v1175_v35 = vadd.f32 %v2786_v31, %v3172_v3 }
  0xf1   : > { %v1470_v33 = vmax.f32 %v1154_v27, 0.0  ;;  %v2518_v36 = vpack.c.bf16 %v1408_v28, %v1408_v28  ;;  %v2582_v37 = vpack.c.bf16 %v1472_v29, %v1472_v29  ;;  %v910_v38 = vpop.f32.mrf.mxu0  ;;  %v1166_v39 = vpop.f32.mrf.mxu1 }
  0xf2   : > { %v2516_v40 = vpack.c.bf16 %v1406_v32, %v1406_v32  ;;  %v1411_v42 = vmax.f32 %v919_v34, 0.0  ;;  %v1475_v43 = vmax.f32 %v1175_v35, 0.0  ;;  %v911_v44 = vadd.f32 %v3172_v3, %v910_v38 }
  0xf3   : > { %v2580_v41 = vpack.c.bf16 %v1470_v33, %v1470_v33  ;;  %2049 = vst.msk [vmem:[%s3183_s8 + $0xc] sm:$0xf] %vm2045_vm1, %v2518_v36  ;;  %2113 = vst.msk [vmem:[%s3183_s8 + $0x10c] sm:$0xf] %vm2045_vm1, %v2582_v37  ;;  %v1167_v45 = vadd.f32 %v3172_v3, %v1166_v39  ;;  %v2723_v46 = vpop.f32.mrf.mxu0  ;;  %v2787_v47 = vpop.f32.mrf.mxu1 }
  0xf4   : > { %2047 = vst.msk [vmem:[%s3183_s8 + $0x4] sm:$0xf] %vm2045_vm1, %v2516_v40  ;;  %v2521_v48 = vpack.c.bf16 %v1411_v42, %v1411_v42  ;;  %v2585_v49 = vpack.c.bf16 %v1475_v43, %v1475_v43  ;;  %v922_v50 = vadd.f32 %v2723_v46, %v3172_v3  ;;  %v1178_v51 = vadd.f32 %v2787_v47, %v3172_v3 }
  0xf5   : > { %2111 = vst.msk [vmem:[%s3183_s8 + $0x104] sm:$0xf] %vm2045_vm1, %v2580_v41  ;;  %v1409_v52 = vmax.f32 %v911_v44, 0.0  ;;  %v1473_v53 = vmax.f32 %v1167_v45, 0.0  ;;  %v913_v54 = vpop.f32.mrf.mxu0  ;;  %v1169_v55 = vpop.f32.mrf.mxu1 }
  0xf6   : > { %2052 = vst.msk [vmem:[%s3183_s8 + $0x18] sm:$0xf] %vm2045_vm1, %v2521_v48  ;;  %2116 = vst.msk [vmem:[%s3183_s8 + $0x118] sm:$0xf] %vm2045_vm1, %v2585_v49  ;;  %v1412_v56 = vmax.f32 %v922_v50, 0.0  ;;  %v1476_v57 = vmax.f32 %v1178_v51, 0.0  ;;  %v914_v58 = vadd.f32 %v3172_v3, %v913_v54  ;;  %v1170_v59 = vadd.f32 %v3172_v3, %v1169_v55 }
  0xf7   : > { %v2519_v60 = vpack.c.bf16 %v1409_v52, %v1409_v52  ;;  %v2583_v61 = vpack.c.bf16 %v1473_v53, %v1473_v53  ;;  %v2726_v62 = vpop.f32.mrf.mxu0  ;;  %v2790_v63 = vpop.f32.mrf.mxu1 }
  0xf8   : > { %v2522_v0 = vpack.c.bf16 %v1412_v56, %v1412_v56  ;;  %v2586_v1 = vpack.c.bf16 %v1476_v57, %v1476_v57  ;;  %v1410_v2 = vmax.f32 %v914_v58, 0.0  ;;  %v1474_v4 = vmax.f32 %v1170_v59, 0.0 }
  0xf9   : > { %2050 = vst.msk [vmem:[%s3183_s8 + $0x10] sm:$0xf] %vm2045_vm1, %v2519_v60  ;;  %2114 = vst.msk [vmem:[%s3183_s8 + $0x110] sm:$0xf] %vm2045_vm1, %v2583_v61  ;;  %v935_v5 = vadd.f32 %v2726_v62, %v3172_v3  ;;  %v1191_v6 = vadd.f32 %v2790_v63, %v3172_v3  ;;  %v926_v7 = vpop.f32.mrf.mxu0  ;;  %v1182_v8 = vpop.f32.mrf.mxu1 }
  0xfa   : > { %2053 = vst.msk [vmem:[%s3183_s8 + $0x1c] sm:$0xf] %vm2045_vm1, %v2522_v0  ;;  %2117 = vst.msk [vmem:[%s3183_s8 + $0x11c] sm:$0xf] %vm2045_vm1, %v2586_v1  ;;  %v2520_v9 = vpack.c.bf16 %v1410_v2, %v1410_v2  ;;  %v2584_v10 = vpack.c.bf16 %v1474_v4, %v1474_v4  ;;  %v927_v11 = vadd.f32 %v3172_v3, %v926_v7 }
  0xfb   : > { %v1183_v12 = vadd.f32 %v3172_v3, %v1182_v8  ;;  %v1415_v13 = vmax.f32 %v935_v5, 0.0  ;;  %v1479_v14 = vmax.f32 %v1191_v6, 0.0  ;;  %v2727_v15 = vpop.f32.mrf.mxu0  ;;  %v2791_v16 = vpop.f32.mrf.mxu1 }
  0xfc   : > { %2051 = vst.msk [vmem:[%s3183_s8 + $0x14] sm:$0xf] %vm2045_vm1, %v2520_v9  ;;  %2115 = vst.msk [vmem:[%s3183_s8 + $0x114] sm:$0xf] %vm2045_vm1, %v2584_v10  ;;  %v1413_v17 = vmax.f32 %v927_v11, 0.0  ;;  %v938_v19 = vadd.f32 %v2727_v15, %v3172_v3  ;;  %v1194_v20 = vadd.f32 %v2791_v16, %v3172_v3 }
  0xfd   : > { %v1477_v18 = vmax.f32 %v1183_v12, 0.0  ;;  %v2525_v21 = vpack.c.bf16 %v1415_v13, %v1415_v13  ;;  %v2589_v22 = vpack.c.bf16 %v1479_v14, %v1479_v14  ;;  %v929_v23 = vpop.f32.mrf.mxu0  ;;  %v1185_v24 = vpop.f32.mrf.mxu1 }
  0xfe   : > { %v2523_v25 = vpack.c.bf16 %v1413_v17, %v1413_v17  ;;  %v1416_v27 = vmax.f32 %v938_v19, 0.0  ;;  %v1480_v28 = vmax.f32 %v1194_v20, 0.0  ;;  %v930_v29 = vadd.f32 %v3172_v3, %v929_v23 }
  0xff   : > { %v2587_v26 = vpack.c.bf16 %v1477_v18, %v1477_v18  ;;  %2056 = vst.msk [vmem:[%s3183_s8 + $0x28] sm:$0xf] %vm2045_vm1, %v2525_v21  ;;  %2120 = vst.msk [vmem:[%s3183_s8 + $0x128] sm:$0xf] %vm2045_vm1, %v2589_v22  ;;  %v1186_v30 = vadd.f32 %v3172_v3, %v1185_v24  ;;  %v2730_v31 = vpop.f32.mrf.mxu0  ;;  %v2794_v32 = vpop.f32.mrf.mxu1 }
 0x100   : > { %2054 = vst.msk [vmem:[%s3183_s8 + $0x20] sm:$0xf] %vm2045_vm1, %v2523_v25  ;;  %v2526_v33 = vpack.c.bf16 %v1416_v27, %v1416_v27  ;;  %v2590_v34 = vpack.c.bf16 %v1480_v28, %v1480_v28  ;;  %v951_v35 = vadd.f32 %v2730_v31, %v3172_v3  ;;  %v1207_v36 = vadd.f32 %v2794_v32, %v3172_v3 }
 0x101   : > { %2118 = vst.msk [vmem:[%s3183_s8 + $0x120] sm:$0xf] %vm2045_vm1, %v2587_v26  ;;  %v1414_v37 = vmax.f32 %v930_v29, 0.0  ;;  %v1478_v38 = vmax.f32 %v1186_v30, 0.0  ;;  %v942_v39 = vpop.f32.mrf.mxu0  ;;  %v1198_v40 = vpop.f32.mrf.mxu1 }
 0x102   : > { %2057 = vst.msk [vmem:[%s3183_s8 + $0x2c] sm:$0xf] %vm2045_vm1, %v2526_v33  ;;  %2121 = vst.msk [vmem:[%s3183_s8 + $0x12c] sm:$0xf] %vm2045_vm1, %v2590_v34  ;;  %v1419_v41 = vmax.f32 %v951_v35, 0.0  ;;  %v1483_v42 = vmax.f32 %v1207_v36, 0.0  ;;  %v943_v43 = vadd.f32 %v3172_v3, %v942_v39  ;;  %v1199_v44 = vadd.f32 %v3172_v3, %v1198_v40 }
 0x103   : > { %v2524_v45 = vpack.c.bf16 %v1414_v37, %v1414_v37  ;;  %v2588_v46 = vpack.c.bf16 %v1478_v38, %v1478_v38  ;;  %v2731_v47 = vpop.f32.mrf.mxu0  ;;  %v2795_v48 = vpop.f32.mrf.mxu1 }
 0x104   : > { %v2529_v49 = vpack.c.bf16 %v1419_v41, %v1419_v41  ;;  %v2593_v50 = vpack.c.bf16 %v1483_v42, %v1483_v42  ;;  %v1417_v51 = vmax.f32 %v943_v43, 0.0  ;;  %v1481_v52 = vmax.f32 %v1199_v44, 0.0 }
 0x105   : > { %2055 = vst.msk [vmem:[%s3183_s8 + $0x24] sm:$0xf] %vm2045_vm1, %v2524_v45  ;;  %2119 = vst.msk [vmem:[%s3183_s8 + $0x124] sm:$0xf] %vm2045_vm1, %v2588_v46  ;;  %v954_v53 = vadd.f32 %v2731_v47, %v3172_v3  ;;  %v1210_v54 = vadd.f32 %v2795_v48, %v3172_v3  ;;  %v945_v55 = vpop.f32.mrf.mxu0  ;;  %v1201_v56 = vpop.f32.mrf.mxu1 }
 0x106   : > { %2060 = vst.msk [vmem:[%s3183_s8 + $0x38] sm:$0xf] %vm2045_vm1, %v2529_v49  ;;  %2124 = vst.msk [vmem:[%s3183_s8 + $0x138] sm:$0xf] %vm2045_vm1, %v2593_v50  ;;  %v2527_v57 = vpack.c.bf16 %v1417_v51, %v1417_v51  ;;  %v2591_v58 = vpack.c.bf16 %v1481_v52, %v1481_v52  ;;  %v946_v59 = vadd.f32 %v3172_v3, %v945_v55 }
 0x107   : > { %v1202_v60 = vadd.f32 %v3172_v3, %v1201_v56  ;;  %v1420_v61 = vmax.f32 %v954_v53, 0.0  ;;  %v1484_v62 = vmax.f32 %v1210_v54, 0.0  ;;  %v2734_v63 = vpop.f32.mrf.mxu0  ;;  %v2798_v0 = vpop.f32.mrf.mxu1 }
 0x108   : > { %2058 = vst.msk [vmem:[%s3183_s8 + $0x30] sm:$0xf] %vm2045_vm1, %v2527_v57  ;;  %2122 = vst.msk [vmem:[%s3183_s8 + $0x130] sm:$0xf] %vm2045_vm1, %v2591_v58  ;;  %v1418_v1 = vmax.f32 %v946_v59, 0.0  ;;  %v967_v4 = vadd.f32 %v2734_v63, %v3172_v3  ;;  %v1223_v5 = vadd.f32 %v2798_v0, %v3172_v3 }
 0x109   : > { %v1482_v2 = vmax.f32 %v1202_v60, 0.0  ;;  %v2530_v6 = vpack.c.bf16 %v1420_v61, %v1420_v61  ;;  %v2594_v7 = vpack.c.bf16 %v1484_v62, %v1484_v62  ;;  %v958_v8 = vpop.f32.mrf.mxu0  ;;  %v1214_v9 = vpop.f32.mrf.mxu1 }
 0x10a   : > { %v2528_v10 = vpack.c.bf16 %v1418_v1, %v1418_v1  ;;  %v1423_v12 = vmax.f32 %v967_v4, 0.0  ;;  %v1487_v13 = vmax.f32 %v1223_v5, 0.0  ;;  %v959_v14 = vadd.f32 %v3172_v3, %v958_v8 }
 0x10b   : > { %v2592_v11 = vpack.c.bf16 %v1482_v2, %v1482_v2  ;;  %2061 = vst.msk [vmem:[%s3183_s8 + $0x3c] sm:$0xf] %vm2045_vm1, %v2530_v6  ;;  %2125 = vst.msk [vmem:[%s3183_s8 + $0x13c] sm:$0xf] %vm2045_vm1, %v2594_v7  ;;  %v1215_v15 = vadd.f32 %v3172_v3, %v1214_v9  ;;  %v2735_v16 = vpop.f32.mrf.mxu0  ;;  %v2799_v17 = vpop.f32.mrf.mxu1 }
 0x10c   : > { %2059 = vst.msk [vmem:[%s3183_s8 + $0x34] sm:$0xf] %vm2045_vm1, %v2528_v10  ;;  %v2533_v18 = vpack.c.bf16 %v1423_v12, %v1423_v12  ;;  %v2597_v19 = vpack.c.bf16 %v1487_v13, %v1487_v13  ;;  %v970_v20 = vadd.f32 %v2735_v16, %v3172_v3  ;;  %v1226_v21 = vadd.f32 %v2799_v17, %v3172_v3 }
 0x10d   : > { %2123 = vst.msk [vmem:[%s3183_s8 + $0x134] sm:$0xf] %vm2045_vm1, %v2592_v11  ;;  %v1421_v22 = vmax.f32 %v959_v14, 0.0  ;;  %v1485_v23 = vmax.f32 %v1215_v15, 0.0  ;;  %v961_v24 = vpop.f32.mrf.mxu0  ;;  %v1217_v25 = vpop.f32.mrf.mxu1 }
 0x10e   : > { %2064 = vst.msk [vmem:[%s3183_s8 + $0x48] sm:$0xf] %vm2045_vm1, %v2533_v18  ;;  %2128 = vst.msk [vmem:[%s3183_s8 + $0x148] sm:$0xf] %vm2045_vm1, %v2597_v19  ;;  %v1424_v26 = vmax.f32 %v970_v20, 0.0  ;;  %v1488_v27 = vmax.f32 %v1226_v21, 0.0  ;;  %v962_v28 = vadd.f32 %v3172_v3, %v961_v24  ;;  %v1218_v29 = vadd.f32 %v3172_v3, %v1217_v25 }
 0x10f   : > { %v2531_v30 = vpack.c.bf16 %v1421_v22, %v1421_v22  ;;  %v2595_v31 = vpack.c.bf16 %v1485_v23, %v1485_v23  ;;  %v2738_v32 = vpop.f32.mrf.mxu0  ;;  %v2802_v33 = vpop.f32.mrf.mxu1 }
 0x110   : > { %v2534_v34 = vpack.c.bf16 %v1424_v26, %v1424_v26  ;;  %v2598_v35 = vpack.c.bf16 %v1488_v27, %v1488_v27  ;;  %v1422_v36 = vmax.f32 %v962_v28, 0.0  ;;  %v1486_v37 = vmax.f32 %v1218_v29, 0.0 }
 0x111   : > { %2062 = vst.msk [vmem:[%s3183_s8 + $0x40] sm:$0xf] %vm2045_vm1, %v2531_v30  ;;  %2126 = vst.msk [vmem:[%s3183_s8 + $0x140] sm:$0xf] %vm2045_vm1, %v2595_v31  ;;  %v983_v38 = vadd.f32 %v2738_v32, %v3172_v3  ;;  %v1239_v39 = vadd.f32 %v2802_v33, %v3172_v3  ;;  %v974_v40 = vpop.f32.mrf.mxu0  ;;  %v1230_v41 = vpop.f32.mrf.mxu1 }
 0x112   : > { %2065 = vst.msk [vmem:[%s3183_s8 + $0x4c] sm:$0xf] %vm2045_vm1, %v2534_v34  ;;  %2129 = vst.msk [vmem:[%s3183_s8 + $0x14c] sm:$0xf] %vm2045_vm1, %v2598_v35  ;;  %v2532_v42 = vpack.c.bf16 %v1422_v36, %v1422_v36  ;;  %v2596_v43 = vpack.c.bf16 %v1486_v37, %v1486_v37  ;;  %v975_v44 = vadd.f32 %v3172_v3, %v974_v40 }
 0x113   : > { %v1231_v45 = vadd.f32 %v3172_v3, %v1230_v41  ;;  %v1427_v46 = vmax.f32 %v983_v38, 0.0  ;;  %v1491_v47 = vmax.f32 %v1239_v39, 0.0  ;;  %v2739_v48 = vpop.f32.mrf.mxu0  ;;  %v2803_v49 = vpop.f32.mrf.mxu1 }
 0x114   : > { %2063 = vst.msk [vmem:[%s3183_s8 + $0x44] sm:$0xf] %vm2045_vm1, %v2532_v42  ;;  %2127 = vst.msk [vmem:[%s3183_s8 + $0x144] sm:$0xf] %vm2045_vm1, %v2596_v43  ;;  %v1425_v50 = vmax.f32 %v975_v44, 0.0  ;;  %v986_v52 = vadd.f32 %v2739_v48, %v3172_v3  ;;  %v1242_v53 = vadd.f32 %v2803_v49, %v3172_v3 }
 0x115   : > { %v1489_v51 = vmax.f32 %v1231_v45, 0.0  ;;  %v2537_v54 = vpack.c.bf16 %v1427_v46, %v1427_v46  ;;  %v2601_v55 = vpack.c.bf16 %v1491_v47, %v1491_v47  ;;  %v977_v56 = vpop.f32.mrf.mxu0  ;;  %v1233_v57 = vpop.f32.mrf.mxu1 }
 0x116   : > { %v2535_v58 = vpack.c.bf16 %v1425_v50, %v1425_v50  ;;  %v1428_v60 = vmax.f32 %v986_v52, 0.0  ;;  %v1492_v61 = vmax.f32 %v1242_v53, 0.0  ;;  %v978_v62 = vadd.f32 %v3172_v3, %v977_v56 }
 0x117   : > { %v2599_v59 = vpack.c.bf16 %v1489_v51, %v1489_v51  ;;  %2068 = vst.msk [vmem:[%s3183_s8 + $0x58] sm:$0xf] %vm2045_vm1, %v2537_v54  ;;  %2132 = vst.msk [vmem:[%s3183_s8 + $0x158] sm:$0xf] %vm2045_vm1, %v2601_v55  ;;  %v1234_v63 = vadd.f32 %v3172_v3, %v1233_v57  ;;  %v2742_v0 = vpop.f32.mrf.mxu0  ;;  %v2806_v1 = vpop.f32.mrf.mxu1 }
 0x118   : > { %2066 = vst.msk [vmem:[%s3183_s8 + $0x50] sm:$0xf] %vm2045_vm1, %v2535_v58  ;;  %v2538_v2 = vpack.c.bf16 %v1428_v60, %v1428_v60  ;;  %v2602_v4 = vpack.c.bf16 %v1492_v61, %v1492_v61  ;;  %v999_v5 = vadd.f32 %v2742_v0, %v3172_v3  ;;  %v1255_v6 = vadd.f32 %v2806_v1, %v3172_v3 }
 0x119   : > { %2130 = vst.msk [vmem:[%s3183_s8 + $0x150] sm:$0xf] %vm2045_vm1, %v2599_v59  ;;  %v1426_v7 = vmax.f32 %v978_v62, 0.0  ;;  %v1490_v8 = vmax.f32 %v1234_v63, 0.0  ;;  %v990_v9 = vpop.f32.mrf.mxu0  ;;  %v1246_v10 = vpop.f32.mrf.mxu1 }
 0x11a   : > { %2069 = vst.msk [vmem:[%s3183_s8 + $0x5c] sm:$0xf] %vm2045_vm1, %v2538_v2  ;;  %2133 = vst.msk [vmem:[%s3183_s8 + $0x15c] sm:$0xf] %vm2045_vm1, %v2602_v4  ;;  %v1431_v11 = vmax.f32 %v999_v5, 0.0  ;;  %v1495_v12 = vmax.f32 %v1255_v6, 0.0  ;;  %v991_v13 = vadd.f32 %v3172_v3, %v990_v9  ;;  %v1247_v14 = vadd.f32 %v3172_v3, %v1246_v10 }
 0x11b   : > { %v2536_v15 = vpack.c.bf16 %v1426_v7, %v1426_v7  ;;  %v2600_v16 = vpack.c.bf16 %v1490_v8, %v1490_v8  ;;  %v2743_v17 = vpop.f32.mrf.mxu0  ;;  %v2807_v18 = vpop.f32.mrf.mxu1 }
 0x11c   : > { %v2541_v19 = vpack.c.bf16 %v1431_v11, %v1431_v11  ;;  %v2605_v20 = vpack.c.bf16 %v1495_v12, %v1495_v12  ;;  %v1429_v21 = vmax.f32 %v991_v13, 0.0  ;;  %v1493_v22 = vmax.f32 %v1247_v14, 0.0 }
 0x11d   : > { %2067 = vst.msk [vmem:[%s3183_s8 + $0x54] sm:$0xf] %vm2045_vm1, %v2536_v15  ;;  %2131 = vst.msk [vmem:[%s3183_s8 + $0x154] sm:$0xf] %vm2045_vm1, %v2600_v16  ;;  %v1002_v23 = vadd.f32 %v2743_v17, %v3172_v3  ;;  %v1258_v24 = vadd.f32 %v2807_v18, %v3172_v3  ;;  %v993_v25 = vpop.f32.mrf.mxu0  ;;  %v1249_v26 = vpop.f32.mrf.mxu1 }
 0x11e   : > { %2072 = vst.msk [vmem:[%s3183_s8 + $0x68] sm:$0xf] %vm2045_vm1, %v2541_v19  ;;  %2136 = vst.msk [vmem:[%s3183_s8 + $0x168] sm:$0xf] %vm2045_vm1, %v2605_v20  ;;  %v2539_v27 = vpack.c.bf16 %v1429_v21, %v1429_v21  ;;  %v2603_v28 = vpack.c.bf16 %v1493_v22, %v1493_v22  ;;  %v994_v29 = vadd.f32 %v3172_v3, %v993_v25 }
 0x11f   : > { %v1250_v30 = vadd.f32 %v3172_v3, %v1249_v26  ;;  %v1432_v31 = vmax.f32 %v1002_v23, 0.0  ;;  %v1496_v32 = vmax.f32 %v1258_v24, 0.0  ;;  %v2746_v33 = vpop.f32.mrf.mxu0  ;;  %v2810_v34 = vpop.f32.mrf.mxu1 }
 0x120   : > { %2070 = vst.msk [vmem:[%s3183_s8 + $0x60] sm:$0xf] %vm2045_vm1, %v2539_v27  ;;  %2134 = vst.msk [vmem:[%s3183_s8 + $0x160] sm:$0xf] %vm2045_vm1, %v2603_v28  ;;  %v1430_v35 = vmax.f32 %v994_v29, 0.0  ;;  %v1015_v37 = vadd.f32 %v2746_v33, %v3172_v3  ;;  %v1271_v38 = vadd.f32 %v2810_v34, %v3172_v3 }
 0x121   : > { %v1494_v36 = vmax.f32 %v1250_v30, 0.0  ;;  %v2542_v39 = vpack.c.bf16 %v1432_v31, %v1432_v31  ;;  %v2606_v40 = vpack.c.bf16 %v1496_v32, %v1496_v32  ;;  %v1006_v41 = vpop.f32.mrf.mxu0  ;;  %v1262_v42 = vpop.f32.mrf.mxu1 }
 0x122   : > { %v2540_v43 = vpack.c.bf16 %v1430_v35, %v1430_v35  ;;  %v1435_v45 = vmax.f32 %v1015_v37, 0.0  ;;  %v1499_v46 = vmax.f32 %v1271_v38, 0.0  ;;  %v1007_v47 = vadd.f32 %v3172_v3, %v1006_v41 }
 0x123   : > { %v2604_v44 = vpack.c.bf16 %v1494_v36, %v1494_v36  ;;  %2073 = vst.msk [vmem:[%s3183_s8 + $0x6c] sm:$0xf] %vm2045_vm1, %v2542_v39  ;;  %2137 = vst.msk [vmem:[%s3183_s8 + $0x16c] sm:$0xf] %vm2045_vm1, %v2606_v40  ;;  %v1263_v48 = vadd.f32 %v3172_v3, %v1262_v42  ;;  %v2747_v49 = vpop.f32.mrf.mxu0  ;;  %v2811_v50 = vpop.f32.mrf.mxu1 }
 0x124   : > { %2071 = vst.msk [vmem:[%s3183_s8 + $0x64] sm:$0xf] %vm2045_vm1, %v2540_v43  ;;  %v2545_v51 = vpack.c.bf16 %v1435_v45, %v1435_v45  ;;  %v2609_v52 = vpack.c.bf16 %v1499_v46, %v1499_v46  ;;  %v1018_v53 = vadd.f32 %v2747_v49, %v3172_v3  ;;  %v1274_v54 = vadd.f32 %v2811_v50, %v3172_v3 }
 0x125   : > { %2135 = vst.msk [vmem:[%s3183_s8 + $0x164] sm:$0xf] %vm2045_vm1, %v2604_v44  ;;  %v1433_v55 = vmax.f32 %v1007_v47, 0.0  ;;  %v1497_v56 = vmax.f32 %v1263_v48, 0.0  ;;  %v1009_v57 = vpop.f32.mrf.mxu0  ;;  %v1265_v58 = vpop.f32.mrf.mxu1 }
 0x126   : > { %2076 = vst.msk [vmem:[%s3183_s8 + $0x78] sm:$0xf] %vm2045_vm1, %v2545_v51  ;;  %2140 = vst.msk [vmem:[%s3183_s8 + $0x178] sm:$0xf] %vm2045_vm1, %v2609_v52  ;;  %v1436_v59 = vmax.f32 %v1018_v53, 0.0  ;;  %v1500_v60 = vmax.f32 %v1274_v54, 0.0  ;;  %v1010_v61 = vadd.f32 %v3172_v3, %v1009_v57  ;;  %v1266_v62 = vadd.f32 %v3172_v3, %v1265_v58 }
 0x127   : > { %v2543_v63 = vpack.c.bf16 %v1433_v55, %v1433_v55  ;;  %v2607_v0 = vpack.c.bf16 %v1497_v56, %v1497_v56  ;;  %v2750_v1 = vpop.f32.mrf.mxu0  ;;  %v2814_v2 = vpop.f32.mrf.mxu1 }
 0x128   : > { %v2546_v4 = vpack.c.bf16 %v1436_v59, %v1436_v59  ;;  %v2610_v5 = vpack.c.bf16 %v1500_v60, %v1500_v60  ;;  %v1434_v6 = vmax.f32 %v1010_v61, 0.0  ;;  %v1498_v7 = vmax.f32 %v1266_v62, 0.0 }
 0x129   : > { %2074 = vst.msk [vmem:[%s3183_s8 + $0x70] sm:$0xf] %vm2045_vm1, %v2543_v63  ;;  %2138 = vst.msk [vmem:[%s3183_s8 + $0x170] sm:$0xf] %vm2045_vm1, %v2607_v0  ;;  %v1031_v8 = vadd.f32 %v2750_v1, %v3172_v3  ;;  %v1287_v9 = vadd.f32 %v2814_v2, %v3172_v3  ;;  %v1022_v10 = vpop.f32.mrf.mxu0  ;;  %v1278_v11 = vpop.f32.mrf.mxu1 }
 0x12a   : > { %2077 = vst.msk [vmem:[%s3183_s8 + $0x7c] sm:$0xf] %vm2045_vm1, %v2546_v4  ;;  %2141 = vst.msk [vmem:[%s3183_s8 + $0x17c] sm:$0xf] %vm2045_vm1, %v2610_v5  ;;  %v2544_v12 = vpack.c.bf16 %v1434_v6, %v1434_v6  ;;  %v2608_v13 = vpack.c.bf16 %v1498_v7, %v1498_v7  ;;  %v1023_v14 = vadd.f32 %v3172_v3, %v1022_v10 }
 0x12b   : > { %v1279_v15 = vadd.f32 %v3172_v3, %v1278_v11  ;;  %v1439_v16 = vmax.f32 %v1031_v8, 0.0  ;;  %v1503_v17 = vmax.f32 %v1287_v9, 0.0  ;;  %v2751_v18 = vpop.f32.mrf.mxu0  ;;  %v2815_v19 = vpop.f32.mrf.mxu1 }
 0x12c   : > { %2075 = vst.msk [vmem:[%s3183_s8 + $0x74] sm:$0xf] %vm2045_vm1, %v2544_v12  ;;  %2139 = vst.msk [vmem:[%s3183_s8 + $0x174] sm:$0xf] %vm2045_vm1, %v2608_v13  ;;  %v1437_v20 = vmax.f32 %v1023_v14, 0.0  ;;  %v1034_v22 = vadd.f32 %v2751_v18, %v3172_v3  ;;  %v1290_v23 = vadd.f32 %v2815_v19, %v3172_v3 }
 0x12d   : > { %v1501_v21 = vmax.f32 %v1279_v15, 0.0  ;;  %v2549_v24 = vpack.c.bf16 %v1439_v16, %v1439_v16  ;;  %v2613_v25 = vpack.c.bf16 %v1503_v17, %v1503_v17  ;;  %v1025_v26 = vpop.f32.mrf.mxu0  ;;  %v1281_v27 = vpop.f32.mrf.mxu1 }
 0x12e   : > { %v2547_v28 = vpack.c.bf16 %v1437_v20, %v1437_v20  ;;  %v1440_v30 = vmax.f32 %v1034_v22, 0.0  ;;  %v1504_v31 = vmax.f32 %v1290_v23, 0.0  ;;  %v1026_v32 = vadd.f32 %v3172_v3, %v1025_v26 }
 0x12f   : > { %v2611_v29 = vpack.c.bf16 %v1501_v21, %v1501_v21  ;;  %2080 = vst.msk [vmem:[%s3183_s8 + $0x88] sm:$0xf] %vm2045_vm1, %v2549_v24  ;;  %2144 = vst.msk [vmem:[%s3183_s8 + $0x188] sm:$0xf] %vm2045_vm1, %v2613_v25  ;;  %v1282_v33 = vadd.f32 %v3172_v3, %v1281_v27  ;;  %v2754_v34 = vpop.f32.mrf.mxu0  ;;  %v2818_v35 = vpop.f32.mrf.mxu1 }
 0x130   : > { %2078 = vst.msk [vmem:[%s3183_s8 + $0x80] sm:$0xf] %vm2045_vm1, %v2547_v28  ;;  %v2550_v36 = vpack.c.bf16 %v1440_v30, %v1440_v30  ;;  %v2614_v37 = vpack.c.bf16 %v1504_v31, %v1504_v31  ;;  %v1047_v38 = vadd.f32 %v2754_v34, %v3172_v3  ;;  %v1303_v39 = vadd.f32 %v2818_v35, %v3172_v3 }
 0x131   : > { %2142 = vst.msk [vmem:[%s3183_s8 + $0x180] sm:$0xf] %vm2045_vm1, %v2611_v29  ;;  %v1438_v40 = vmax.f32 %v1026_v32, 0.0  ;;  %v1502_v41 = vmax.f32 %v1282_v33, 0.0  ;;  %v1038_v42 = vpop.f32.mrf.mxu0  ;;  %v1294_v43 = vpop.f32.mrf.mxu1 }
 0x132   : > { %2081 = vst.msk [vmem:[%s3183_s8 + $0x8c] sm:$0xf] %vm2045_vm1, %v2550_v36  ;;  %2145 = vst.msk [vmem:[%s3183_s8 + $0x18c] sm:$0xf] %vm2045_vm1, %v2614_v37  ;;  %v1443_v44 = vmax.f32 %v1047_v38, 0.0  ;;  %v1507_v45 = vmax.f32 %v1303_v39, 0.0  ;;  %v1039_v46 = vadd.f32 %v3172_v3, %v1038_v42  ;;  %v1295_v47 = vadd.f32 %v3172_v3, %v1294_v43 }
 0x133   : > { %v2548_v48 = vpack.c.bf16 %v1438_v40, %v1438_v40  ;;  %v2612_v49 = vpack.c.bf16 %v1502_v41, %v1502_v41  ;;  %v2755_v50 = vpop.f32.mrf.mxu0  ;;  %v2819_v51 = vpop.f32.mrf.mxu1 }
 0x134   : > { %v2553_v52 = vpack.c.bf16 %v1443_v44, %v1443_v44  ;;  %v2617_v53 = vpack.c.bf16 %v1507_v45, %v1507_v45  ;;  %v1441_v54 = vmax.f32 %v1039_v46, 0.0  ;;  %v1505_v55 = vmax.f32 %v1295_v47, 0.0 }
 0x135   : > { %2079 = vst.msk [vmem:[%s3183_s8 + $0x84] sm:$0xf] %vm2045_vm1, %v2548_v48  ;;  %2143 = vst.msk [vmem:[%s3183_s8 + $0x184] sm:$0xf] %vm2045_vm1, %v2612_v49  ;;  %v1050_v56 = vadd.f32 %v2755_v50, %v3172_v3  ;;  %v1306_v57 = vadd.f32 %v2819_v51, %v3172_v3  ;;  %v1041_v58 = vpop.f32.mrf.mxu0  ;;  %v1297_v59 = vpop.f32.mrf.mxu1 }
 0x136   : > { %2084 = vst.msk [vmem:[%s3183_s8 + $0x98] sm:$0xf] %vm2045_vm1, %v2553_v52  ;;  %2148 = vst.msk [vmem:[%s3183_s8 + $0x198] sm:$0xf] %vm2045_vm1, %v2617_v53  ;;  %v2551_v60 = vpack.c.bf16 %v1441_v54, %v1441_v54  ;;  %v2615_v61 = vpack.c.bf16 %v1505_v55, %v1505_v55  ;;  %v1042_v62 = vadd.f32 %v3172_v3, %v1041_v58 }
 0x137   : > { %v1298_v63 = vadd.f32 %v3172_v3, %v1297_v59  ;;  %v1444_v0 = vmax.f32 %v1050_v56, 0.0  ;;  %v1508_v1 = vmax.f32 %v1306_v57, 0.0  ;;  %v2758_v2 = vpop.f32.mrf.mxu0  ;;  %v2822_v4 = vpop.f32.mrf.mxu1 }
 0x138   : > { %2082 = vst.msk [vmem:[%s3183_s8 + $0x90] sm:$0xf] %vm2045_vm1, %v2551_v60  ;;  %2146 = vst.msk [vmem:[%s3183_s8 + $0x190] sm:$0xf] %vm2045_vm1, %v2615_v61  ;;  %v1442_v5 = vmax.f32 %v1042_v62, 0.0  ;;  %v1063_v7 = vadd.f32 %v2758_v2, %v3172_v3  ;;  %v1319_v8 = vadd.f32 %v2822_v4, %v3172_v3 }
 0x139   : > { %v1506_v6 = vmax.f32 %v1298_v63, 0.0  ;;  %v2554_v9 = vpack.c.bf16 %v1444_v0, %v1444_v0  ;;  %v2618_v10 = vpack.c.bf16 %v1508_v1, %v1508_v1  ;;  %v1054_v11 = vpop.f32.mrf.mxu0  ;;  %v1310_v12 = vpop.f32.mrf.mxu1 }
 0x13a   : > { %v2552_v13 = vpack.c.bf16 %v1442_v5, %v1442_v5  ;;  %v1447_v15 = vmax.f32 %v1063_v7, 0.0  ;;  %v1511_v16 = vmax.f32 %v1319_v8, 0.0  ;;  %v1055_v17 = vadd.f32 %v3172_v3, %v1054_v11 }
 0x13b   : > { %v2616_v14 = vpack.c.bf16 %v1506_v6, %v1506_v6  ;;  %2085 = vst.msk [vmem:[%s3183_s8 + $0x9c] sm:$0xf] %vm2045_vm1, %v2554_v9  ;;  %2149 = vst.msk [vmem:[%s3183_s8 + $0x19c] sm:$0xf] %vm2045_vm1, %v2618_v10  ;;  %v1311_v18 = vadd.f32 %v3172_v3, %v1310_v12  ;;  %v2759_v19 = vpop.f32.mrf.mxu0  ;;  %v2823_v20 = vpop.f32.mrf.mxu1 }
 0x13c   : > { %2083 = vst.msk [vmem:[%s3183_s8 + $0x94] sm:$0xf] %vm2045_vm1, %v2552_v13  ;;  %v2557_v21 = vpack.c.bf16 %v1447_v15, %v1447_v15  ;;  %v2621_v22 = vpack.c.bf16 %v1511_v16, %v1511_v16  ;;  %v1066_v23 = vadd.f32 %v2759_v19, %v3172_v3  ;;  %v1322_v24 = vadd.f32 %v2823_v20, %v3172_v3 }
 0x13d   : > { %2147 = vst.msk [vmem:[%s3183_s8 + $0x194] sm:$0xf] %vm2045_vm1, %v2616_v14  ;;  %v1445_v25 = vmax.f32 %v1055_v17, 0.0  ;;  %v1509_v26 = vmax.f32 %v1311_v18, 0.0  ;;  %v1057_v27 = vpop.f32.mrf.mxu0  ;;  %v1313_v28 = vpop.f32.mrf.mxu1 }
 0x13e   : > { %2088 = vst.msk [vmem:[%s3183_s8 + $0xa8] sm:$0xf] %vm2045_vm1, %v2557_v21  ;;  %2152 = vst.msk [vmem:[%s3183_s8 + $0x1a8] sm:$0xf] %vm2045_vm1, %v2621_v22  ;;  %v1448_v29 = vmax.f32 %v1066_v23, 0.0  ;;  %v1512_v30 = vmax.f32 %v1322_v24, 0.0  ;;  %v1058_v31 = vadd.f32 %v3172_v3, %v1057_v27  ;;  %v1314_v32 = vadd.f32 %v3172_v3, %v1313_v28 }
 0x13f   : > { %v2555_v33 = vpack.c.bf16 %v1445_v25, %v1445_v25  ;;  %v2619_v34 = vpack.c.bf16 %v1509_v26, %v1509_v26  ;;  %v2762_v35 = vpop.f32.mrf.mxu0  ;;  %v2826_v36 = vpop.f32.mrf.mxu1 }
 0x140   : > { %v2558_v37 = vpack.c.bf16 %v1448_v29, %v1448_v29  ;;  %v2622_v38 = vpack.c.bf16 %v1512_v30, %v1512_v30  ;;  %v1446_v39 = vmax.f32 %v1058_v31, 0.0  ;;  %v1510_v40 = vmax.f32 %v1314_v32, 0.0 }
 0x141   : > { %2086 = vst.msk [vmem:[%s3183_s8 + $0xa0] sm:$0xf] %vm2045_vm1, %v2555_v33  ;;  %2150 = vst.msk [vmem:[%s3183_s8 + $0x1a0] sm:$0xf] %vm2045_vm1, %v2619_v34  ;;  %v1079_v41 = vadd.f32 %v2762_v35, %v3172_v3  ;;  %v1335_v42 = vadd.f32 %v2826_v36, %v3172_v3  ;;  %v1070_v43 = vpop.f32.mrf.mxu0  ;;  %v1326_v44 = vpop.f32.mrf.mxu1 }
 0x142   : > { %2089 = vst.msk [vmem:[%s3183_s8 + $0xac] sm:$0xf] %vm2045_vm1, %v2558_v37  ;;  %2153 = vst.msk [vmem:[%s3183_s8 + $0x1ac] sm:$0xf] %vm2045_vm1, %v2622_v38  ;;  %v2556_v45 = vpack.c.bf16 %v1446_v39, %v1446_v39  ;;  %v2620_v46 = vpack.c.bf16 %v1510_v40, %v1510_v40  ;;  %v1071_v47 = vadd.f32 %v3172_v3, %v1070_v43  ;;  %v3485_v40 = vld [vmem:[#allocation2] ss:$0 sm:$0xff] }
 0x143   : > { %v1327_v48 = vadd.f32 %v3172_v3, %v1326_v44  ;;  %v1451_v49 = vmax.f32 %v1079_v41, 0.0  ;;  %v1515_v50 = vmax.f32 %v1335_v42, 0.0  ;;  %v2763_v51 = vpop.f32.mrf.mxu0  ;;  %v2827_v52 = vpop.f32.mrf.mxu1 }
 0x144   : > { %2087 = vst.msk [vmem:[%s3183_s8 + $0xa4] sm:$0xf] %vm2045_vm1, %v2556_v45  ;;  %2151 = vst.msk [vmem:[%s3183_s8 + $0x1a4] sm:$0xf] %vm2045_vm1, %v2620_v46  ;;  %v1449_v53 = vmax.f32 %v1071_v47, 0.0  ;;  %v1082_v55 = vadd.f32 %v2763_v51, %v3172_v3  ;;  %v1338_v56 = vadd.f32 %v2827_v52, %v3172_v3 }
 0x145   : > { %v1513_v54 = vmax.f32 %v1327_v48, 0.0  ;;  %v2561_v57 = vpack.c.bf16 %v1451_v49, %v1451_v49  ;;  %v2625_v58 = vpack.c.bf16 %v1515_v50, %v1515_v50  ;;  %v1073_v59 = vpop.f32.mrf.mxu0  ;;  %v1329_v60 = vpop.f32.mrf.mxu1 }
 0x146   : > { %v2559_v61 = vpack.c.bf16 %v1449_v53, %v1449_v53  ;;  %v1452_v63 = vmax.f32 %v1082_v55, 0.0  ;;  %v1516_v0 = vmax.f32 %v1338_v56, 0.0  ;;  %v1074_v1 = vadd.f32 %v3172_v3, %v1073_v59 }
 0x147   : > { %v2623_v62 = vpack.c.bf16 %v1513_v54, %v1513_v54  ;;  %2092 = vst.msk [vmem:[%s3183_s8 + $0xb8] sm:$0xf] %vm2045_vm1, %v2561_v57  ;;  %2156 = vst.msk [vmem:[%s3183_s8 + $0x1b8] sm:$0xf] %vm2045_vm1, %v2625_v58  ;;  %v1330_v2 = vadd.f32 %v3172_v3, %v1329_v60  ;;  %v2766_v4 = vpop.f32.mrf.mxu0  ;;  %v2830_v5 = vpop.f32.mrf.mxu1 }
 0x148   : > { %2090 = vst.msk [vmem:[%s3183_s8 + $0xb0] sm:$0xf] %vm2045_vm1, %v2559_v61  ;;  %v2562_v6 = vpack.c.bf16 %v1452_v63, %v1452_v63  ;;  %v2626_v7 = vpack.c.bf16 %v1516_v0, %v1516_v0  ;;  %v1095_v8 = vadd.f32 %v2766_v4, %v3172_v3  ;;  %v1351_v9 = vadd.f32 %v2830_v5, %v3172_v3 }
 0x149   : > { %2154 = vst.msk [vmem:[%s3183_s8 + $0x1b0] sm:$0xf] %vm2045_vm1, %v2623_v62  ;;  %v1450_v10 = vmax.f32 %v1074_v1, 0.0  ;;  %v1514_v11 = vmax.f32 %v1330_v2, 0.0  ;;  %v1086_v12 = vpop.f32.mrf.mxu0  ;;  %v1342_v13 = vpop.f32.mrf.mxu1 }
 0x14a   : > { %2093 = vst.msk [vmem:[%s3183_s8 + $0xbc] sm:$0xf] %vm2045_vm1, %v2562_v6  ;;  %2157 = vst.msk [vmem:[%s3183_s8 + $0x1bc] sm:$0xf] %vm2045_vm1, %v2626_v7  ;;  %v1455_v14 = vmax.f32 %v1095_v8, 0.0  ;;  %v1519_v15 = vmax.f32 %v1351_v9, 0.0  ;;  %v1087_v16 = vadd.f32 %v3172_v3, %v1086_v12  ;;  %v1343_v17 = vadd.f32 %v3172_v3, %v1342_v13 }
 0x14b   : > { %v2560_v18 = vpack.c.bf16 %v1450_v10, %v1450_v10  ;;  %v2624_v19 = vpack.c.bf16 %v1514_v11, %v1514_v11  ;;  %v2767_v20 = vpop.f32.mrf.mxu0  ;;  %v2831_v21 = vpop.f32.mrf.mxu1 }
 0x14c   : > { %v2565_v22 = vpack.c.bf16 %v1455_v14, %v1455_v14  ;;  %v2629_v23 = vpack.c.bf16 %v1519_v15, %v1519_v15  ;;  %v1453_v24 = vmax.f32 %v1087_v16, 0.0  ;;  %v1517_v25 = vmax.f32 %v1343_v17, 0.0 }
 0x14d   : > { %2091 = vst.msk [vmem:[%s3183_s8 + $0xb4] sm:$0xf] %vm2045_vm1, %v2560_v18  ;;  %2155 = vst.msk [vmem:[%s3183_s8 + $0x1b4] sm:$0xf] %vm2045_vm1, %v2624_v19  ;;  %v1098_v26 = vadd.f32 %v2767_v20, %v3172_v3  ;;  %v1354_v27 = vadd.f32 %v2831_v21, %v3172_v3  ;;  %v1089_v28 = vpop.f32.mrf.mxu0  ;;  %v1345_v29 = vpop.f32.mrf.mxu1 }
 0x14e   : > { %2096 = vst.msk [vmem:[%s3183_s8 + $0xc8] sm:$0xf] %vm2045_vm1, %v2565_v22  ;;  %2160 = vst.msk [vmem:[%s3183_s8 + $0x1c8] sm:$0xf] %vm2045_vm1, %v2629_v23  ;;  %v2563_v30 = vpack.c.bf16 %v1453_v24, %v1453_v24  ;;  %v2627_v31 = vpack.c.bf16 %v1517_v25, %v1517_v25  ;;  %v1090_v32 = vadd.f32 %v3172_v3, %v1089_v28 }
 0x14f   : > { %v1346_v33 = vadd.f32 %v3172_v3, %v1345_v29  ;;  %v1456_v34 = vmax.f32 %v1098_v26, 0.0  ;;  %v1520_v35 = vmax.f32 %v1354_v27, 0.0  ;;  %v2770_v36 = vpop.f32.mrf.mxu0  ;;  %v2834_v37 = vpop.f32.mrf.mxu1 }
 0x150   : > { %2094 = vst.msk [vmem:[%s3183_s8 + $0xc0] sm:$0xf] %vm2045_vm1, %v2563_v30  ;;  %2158 = vst.msk [vmem:[%s3183_s8 + $0x1c0] sm:$0xf] %vm2045_vm1, %v2627_v31  ;;  %v1454_v38 = vmax.f32 %v1090_v32, 0.0  ;;  %v1111_v41 = vadd.f32 %v3485_v40, %v2770_v36  ;;  %v1367_v42 = vadd.f32 %v3485_v40, %v2834_v37 }
 0x151   : > { %v1518_v39 = vmax.f32 %v1346_v33, 0.0  ;;  %v2566_v3 = vpack.c.bf16 %v1456_v34, %v1456_v34  ;;  %v2630_v43 = vpack.c.bf16 %v1520_v35, %v1520_v35  ;;  %v1102_v44 = vpop.f32.mrf.mxu0  ;;  %v1358_v45 = vpop.f32.mrf.mxu1 }
 0x152   : > { %v2564_v46 = vpack.c.bf16 %v1454_v38, %v1454_v38  ;;  %v1459_v48 = vmax.f32 %v1111_v41, 0.0  ;;  %v1523_v49 = vmax.f32 %v1367_v42, 0.0  ;;  %v1103_v50 = vadd.f32 %v3485_v40, %v1102_v44 }
 0x153   : > { %v2628_v47 = vpack.c.bf16 %v1518_v39, %v1518_v39  ;;  %2097 = vst.msk [vmem:[%s3183_s8 + $0xcc] sm:$0xf] %vm2045_vm1, %v2566_v3  ;;  %2161 = vst.msk [vmem:[%s3183_s8 + $0x1cc] sm:$0xf] %vm2045_vm1, %v2630_v43  ;;  %v1359_v51 = vadd.f32 %v3485_v40, %v1358_v45  ;;  %v2771_v52 = vpop.f32.mrf.mxu0  ;;  %v2835_v53 = vpop.f32.mrf.mxu1 }
 0x154   : > { %2095 = vst.msk [vmem:[%s3183_s8 + $0xc4] sm:$0xf] %vm2045_vm1, %v2564_v46  ;;  %v2569_v54 = vpack.c.bf16 %v1459_v48, %v1459_v48  ;;  %v2633_v55 = vpack.c.bf16 %v1523_v49, %v1523_v49  ;;  %v1114_v56 = vadd.f32 %v3485_v40, %v2771_v52  ;;  %v1370_v57 = vadd.f32 %v3485_v40, %v2835_v53 }
 0x155   : > { %2159 = vst.msk [vmem:[%s3183_s8 + $0x1c4] sm:$0xf] %vm2045_vm1, %v2628_v47  ;;  %v1457_v58 = vmax.f32 %v1103_v50, 0.0  ;;  %v1521_v59 = vmax.f32 %v1359_v51, 0.0  ;;  %v1105_v60 = vpop.f32.mrf.mxu0  ;;  %v1361_v61 = vpop.f32.mrf.mxu1 }
 0x156   : > { %2100 = vst.msk [vmem:[%s3183_s8 + $0xd8] sm:$0xf] %vm2045_vm1, %v2569_v54  ;;  %2164 = vst.msk [vmem:[%s3183_s8 + $0x1d8] sm:$0xf] %vm2045_vm1, %v2633_v55  ;;  %v1460_v62 = vmax.f32 %v1114_v56, 0.0  ;;  %v1524_v63 = vmax.f32 %v1370_v57, 0.0  ;;  %v1106_v0 = vadd.f32 %v3485_v40, %v1105_v60  ;;  %v1362_v1 = vadd.f32 %v3485_v40, %v1361_v61 }
 0x157   : > { %v2567_v2 = vpack.c.bf16 %v1457_v58, %v1457_v58  ;;  %v2631_v4 = vpack.c.bf16 %v1521_v59, %v1521_v59  ;;  %v2774_v5 = vpop.f32.mrf.mxu0  ;;  %v2838_v6 = vpop.f32.mrf.mxu1 }
 0x158   : > { %v2570_v7 = vpack.c.bf16 %v1460_v62, %v1460_v62  ;;  %v2634_v8 = vpack.c.bf16 %v1524_v63, %v1524_v63  ;;  %v1458_v9 = vmax.f32 %v1106_v0, 0.0  ;;  %v1522_v10 = vmax.f32 %v1362_v1, 0.0 }
 0x159   : > { %2098 = vst.msk [vmem:[%s3183_s8 + $0xd0] sm:$0xf] %vm2045_vm1, %v2567_v2  ;;  %2162 = vst.msk [vmem:[%s3183_s8 + $0x1d0] sm:$0xf] %vm2045_vm1, %v2631_v4  ;;  %v1127_v11 = vadd.f32 %v3485_v40, %v2774_v5  ;;  %v1383_v12 = vadd.f32 %v3485_v40, %v2838_v6  ;;  %v1118_v13 = vpop.f32.mrf.mxu0  ;;  %v1374_v14 = vpop.f32.mrf.mxu1 }
 0x15a   : > { %2101 = vst.msk [vmem:[%s3183_s8 + $0xdc] sm:$0xf] %vm2045_vm1, %v2570_v7  ;;  %2165 = vst.msk [vmem:[%s3183_s8 + $0x1dc] sm:$0xf] %vm2045_vm1, %v2634_v8  ;;  %v2568_v15 = vpack.c.bf16 %v1458_v9, %v1458_v9  ;;  %v2632_v16 = vpack.c.bf16 %v1522_v10, %v1522_v10  ;;  %v1119_v17 = vadd.f32 %v3485_v40, %v1118_v13 }
 0x15b   : > { %v1375_v18 = vadd.f32 %v3485_v40, %v1374_v14  ;;  %v1463_v19 = vmax.f32 %v1127_v11, 0.0  ;;  %v1527_v20 = vmax.f32 %v1383_v12, 0.0  ;;  %v2775_v21 = vpop.f32.mrf.mxu0  ;;  %v2839_v22 = vpop.f32.mrf.mxu1 }
 0x15c   : > { %2099 = vst.msk [vmem:[%s3183_s8 + $0xd4] sm:$0xf] %vm2045_vm1, %v2568_v15  ;;  %2163 = vst.msk [vmem:[%s3183_s8 + $0x1d4] sm:$0xf] %vm2045_vm1, %v2632_v16  ;;  %v1461_v23 = vmax.f32 %v1119_v17, 0.0  ;;  %v1130_v25 = vadd.f32 %v3485_v40, %v2775_v21  ;;  %v1386_v26 = vadd.f32 %v3485_v40, %v2839_v22 }
 0x15d   : > { %v1525_v24 = vmax.f32 %v1375_v18, 0.0  ;;  %v2573_v27 = vpack.c.bf16 %v1463_v19, %v1463_v19  ;;  %v2637_v28 = vpack.c.bf16 %v1527_v20, %v1527_v20  ;;  %v1121_v29 = vpop.f32.mrf.mxu0  ;;  %v1377_v30 = vpop.f32.mrf.mxu1 }
 0x15e   : > { %v2571_v31 = vpack.c.bf16 %v1461_v23, %v1461_v23  ;;  %v1464_v33 = vmax.f32 %v1130_v25, 0.0  ;;  %v1528_v34 = vmax.f32 %v1386_v26, 0.0  ;;  %v1122_v35 = vadd.f32 %v3485_v40, %v1121_v29 }
 0x15f   : > { %v2635_v32 = vpack.c.bf16 %v1525_v24, %v1525_v24  ;;  %2104 = vst.msk [vmem:[%s3183_s8 + $0xe8] sm:$0xf] %vm2045_vm1, %v2573_v27  ;;  %2168 = vst.msk [vmem:[%s3183_s8 + $0x1e8] sm:$0xf] %vm2045_vm1, %v2637_v28  ;;  %v1378_v36 = vadd.f32 %v3485_v40, %v1377_v30  ;;  %v2778_v37 = vpop.f32.mrf.mxu0  ;;  %v2842_v38 = vpop.f32.mrf.mxu1 }
 0x160   : > { %2102 = vst.msk [vmem:[%s3183_s8 + $0xe0] sm:$0xf] %vm2045_vm1, %v2571_v31  ;;  %v2574_v39 = vpack.c.bf16 %v1464_v33, %v1464_v33  ;;  %v2638_v41 = vpack.c.bf16 %v1528_v34, %v1528_v34  ;;  %v1143_v42 = vadd.f32 %v3485_v40, %v2778_v37  ;;  %v1399_v3 = vadd.f32 %v3485_v40, %v2842_v38 }
 0x161   : > { %2166 = vst.msk [vmem:[%s3183_s8 + $0x1e0] sm:$0xf] %vm2045_vm1, %v2635_v32  ;;  %v1462_v43 = vmax.f32 %v1122_v35, 0.0  ;;  %v1526_v44 = vmax.f32 %v1378_v36, 0.0  ;;  %v1134_v45 = vpop.f32.mrf.mxu0  ;;  %v1390_v46 = vpop.f32.mrf.mxu1 }
 0x162   : > { %2105 = vst.msk [vmem:[%s3183_s8 + $0xec] sm:$0xf] %vm2045_vm1, %v2574_v39  ;;  %2169 = vst.msk [vmem:[%s3183_s8 + $0x1ec] sm:$0xf] %vm2045_vm1, %v2638_v41  ;;  %v1467_v47 = vmax.f32 %v1143_v42, 0.0  ;;  %v1531_v48 = vmax.f32 %v1399_v3, 0.0  ;;  %v1135_v49 = vadd.f32 %v3485_v40, %v1134_v45  ;;  %v1391_v50 = vadd.f32 %v3485_v40, %v1390_v46 }
 0x163   : > { %v2572_v51 = vpack.c.bf16 %v1462_v43, %v1462_v43  ;;  %v2636_v52 = vpack.c.bf16 %v1526_v44, %v1526_v44  ;;  %v2779_v53 = vpop.f32.mrf.mxu0  ;;  %v2843_v54 = vpop.f32.mrf.mxu1 }
 0x164   : > { %v2577_v55 = vpack.c.bf16 %v1467_v47, %v1467_v47  ;;  %v2641_v56 = vpack.c.bf16 %v1531_v48, %v1531_v48  ;;  %v1465_v57 = vmax.f32 %v1135_v49, 0.0  ;;  %v1529_v58 = vmax.f32 %v1391_v50, 0.0 }
 0x165   : > { %2103 = vst.msk [vmem:[%s3183_s8 + $0xe4] sm:$0xf] %vm2045_vm1, %v2572_v51  ;;  %2167 = vst.msk [vmem:[%s3183_s8 + $0x1e4] sm:$0xf] %vm2045_vm1, %v2636_v52  ;;  %v1146_v59 = vadd.f32 %v3485_v40, %v2779_v53  ;;  %v1402_v60 = vadd.f32 %v3485_v40, %v2843_v54  ;;  %v1137_v61 = vpop.f32.mrf.mxu0  ;;  %v1393_v62 = vpop.f32.mrf.mxu1 }
 0x166   : > { %2108 = vst.msk [vmem:[%s3183_s8 + $0xf8] sm:$0xf] %vm2045_vm1, %v2577_v55  ;;  %2172 = vst.msk [vmem:[%s3183_s8 + $0x1f8] sm:$0xf] %vm2045_vm1, %v2641_v56  ;;  %v2575_v63 = vpack.c.bf16 %v1465_v57, %v1465_v57  ;;  %v2639_v0 = vpack.c.bf16 %v1529_v58, %v1529_v58  ;;  %v1138_v1 = vadd.f32 %v3485_v40, %v1137_v61 }
 0x167   : > { %v1394_v2 = vadd.f32 %v3485_v40, %v1393_v62  ;;  %v1468_v4 = vmax.f32 %v1146_v59, 0.0  ;;  %v1532_v5 = vmax.f32 %v1402_v60, 0.0 }
 0x168   : > { %2106 = vst.msk [vmem:[%s3183_s8 + $0xf0] sm:$0xf] %vm2045_vm1, %v2575_v63  ;;  %2170 = vst.msk [vmem:[%s3183_s8 + $0x1f0] sm:$0xf] %vm2045_vm1, %v2639_v0  ;;  %v1466_v6 = vmax.f32 %v1138_v1, 0.0 }
 0x169   : > { %v1530_v7 = vmax.f32 %v1394_v2, 0.0  ;;  %v2578_v8 = vpack.c.bf16 %v1468_v4, %v1468_v4  ;;  %v2642_v9 = vpack.c.bf16 %v1532_v5, %v1532_v5 }
 0x16a   : > { %v2576_v10 = vpack.c.bf16 %v1466_v6, %v1466_v6 }
 0x16b   : > { %v2640_v11 = vpack.c.bf16 %v1530_v7, %v1530_v7  ;;  %2109 = vst.msk [vmem:[%s3183_s8 + $0xfc] sm:$0xf] %vm2045_vm1, %v2578_v8  ;;  %2173 = vst.msk [vmem:[%s3183_s8 + $0x1fc] sm:$0xf] %vm2045_vm1, %v2642_v9 }
 0x16c   : > { %2107 = vst.msk [vmem:[%s3183_s8 + $0xf4] sm:$0xf] %vm2045_vm1, %v2576_v10 }
 0x16d   : > { %2171 = vst.msk [vmem:[%s3183_s8 + $0x1f4] sm:$0xf] %vm2045_vm1, %v2640_v11 }
 0x16e PF: > { %s14_s12 = sadd.s32 1, %s2973_s12  }
 0x16f   : > { %p11_p1 = scmp.ge.s32.totalorder %s14_s12, 4  }
 0x171   :  { %13 = sbr.rel (!%p11_p1) target bundleno = 1 (0x1), region = 67 }
 0x176   :  { %2196 = vsyncpa [#allocation3], 1 }
 0x177   :  { %2198 = vsyncpa [#allocation3 + $0x1], 1 }

// kernel: autoencoder_forward.8
= control target key start
LH: loop header
LB: loop body
LE: loop exit
PB: predicated region body
PF: predicated region fallthrough
CT: control target
= control target key end

     0   :  { %vm951_vm0 = vcmask 125952   ;;  %s1830_s1 = inlined_call_operand.vmem [shape: bf16[128,16], index: 1, kind: input, shape index: {}]   ;;  %s1831_s0 = inlined_call_operand.vmem [shape: bf16[512,128], index: 0, kind: input, shape index: {}]   ;;  %s1832_s2 = inlined_call_operand.vmem [shape: f32[1,16], index: 2, kind: input, shape index: {}]   ;;  %s1833_s3 = inlined_call_operand.vmem [shape: bf16[512,16], index: 3, kind: output, shape index: {}]  }
   0x1   :  { %v1325_v0 = vld [vmem:[%s1830_s1 + $0x38] sm:$0xff]   ;;  %v1326_v1 = vld [vmem:[%s1830_s1 + $0x30] sm:$0xff]   ;;  %v1327_v2 = vld [vmem:[%s1830_s1 + $0x28] sm:$0xff]  }
   0x2   :  { %1229 = vmatprep.subr.bf16.mxu0 %v1325_v0  ;;  %1309 = vmatprep.subr.bf16.mxu1 %v1325_v0  ;;  %v1328_v3 = vld [vmem:[%s1830_s1 + $0x20] sm:$0xff]   ;;  %v1329_v6 = vld [vmem:[%s1830_s1 + $0x18] sm:$0xff]   ;;  %v1330_v7 = vld [vmem:[%s1830_s1 + $0x10] sm:$0xff]  }
   0x3   :  { %1230 = vmatpush3.bf16.msra.mxu0 %v1325_v0  ;;  %1317 = vmatpush3.bf16.msra.mxu1 %v1325_v0  ;;  %v1333_v4 = vld [vmem:[%s1831_s0] sm:$0xff]   ;;  %v1331_v8 = vld [vmem:[%s1830_s1 + $0x8] sm:$0xff]   ;;  %v1337_v12 = vld [vmem:[%s1831_s0 + $0x10] sm:$0xff]  }
   0x4   :  { %1231 = vmatprep.subr.bf16.mxu0 %v1326_v1  ;;  %1310 = vmatprep.subr.bf16.mxu1 %v1326_v1  ;;  %v1334_v5 = vld [vmem:[%s1831_s0 + $0x80] sm:$0xff]   ;;  %v1335_v10 = vld [vmem:[%s1831_s0 + $0x8] sm:$0xff]   ;;  %v1338_v13 = vld [vmem:[%s1831_s0 + $0x90] sm:$0xff]  }
   0x5   :  { %1245 = vmatprep.mubr.bf16.mxu0 %v1333_v4  ;;  %1277 = vmatprep.mubr.bf16.mxu1 %v1334_v5  ;;  %v1332_v9 = vld [vmem:[%s1830_s1] sm:$0xff]   ;;  %v1336_v11 = vld [vmem:[%s1831_s0 + $0x88] sm:$0xff]   ;;  %v1339_v14 = vld [vmem:[%s1831_s0 + $0x18] sm:$0xff]  }
   0x6   :  { %v1340_v15 = vld [vmem:[%s1831_s0 + $0x98] sm:$0xff]   ;;  %v1341_v16 = vld [vmem:[%s1831_s0 + $0x20] sm:$0xff]   ;;  %v1343_v18 = vld [vmem:[%s1831_s0 + $0x28] sm:$0xff]  }
   0x7   :  { %1232 = vmatpush3.bf16.msra.mxu0 %v1326_v1  ;;  %1318 = vmatpush3.bf16.msra.mxu1 %v1326_v1  ;;  %v1342_v17 = vld [vmem:[%s1831_s0 + $0xa0] sm:$0xff]   ;;  %v1344_v19 = vld [vmem:[%s1831_s0 + $0xa8] sm:$0xff]   ;;  %v1345_v20 = vld [vmem:[%s1831_s0 + $0x30] sm:$0xff]  }
   0x8   :  { %1233 = vmatprep.subr.bf16.mxu0 %v1327_v2  ;;  %1311 = vmatprep.subr.bf16.mxu1 %v1327_v2  ;;  %v1346_v21 = vld [vmem:[%s1831_s0 + $0xb0] sm:$0xff]   ;;  %v1347_v22 = vld [vmem:[%s1831_s0 + $0x38] sm:$0xff]   ;;  %v1349_v24 = vld [vmem:[%s1831_s0 + $0x40] sm:$0xff]  }
   0x9   :  { %v1348_v23 = vld [vmem:[%s1831_s0 + $0xb8] sm:$0xff]   ;;  %v1350_v25 = vld [vmem:[%s1831_s0 + $0xc0] sm:$0xff]   ;;  %v1351_v26 = vld [vmem:[%s1831_s0 + $0x48] sm:$0xff]  }
   0xa   :  { %v1352_v27 = vld [vmem:[%s1831_s0 + $0xc8] sm:$0xff]   ;;  %v1353_v28 = vld [vmem:[%s1831_s0 + $0x50] sm:$0xff]   ;;  %v1355_v30 = vld [vmem:[%s1831_s0 + $0x58] sm:$0xff]  }
   0xb   :  { %1234 = vmatpush3.bf16.msra.mxu0 %v1327_v2  ;;  %1319 = vmatpush3.bf16.msra.mxu1 %v1327_v2  ;;  %v1354_v29 = vld [vmem:[%s1831_s0 + $0xd0] sm:$0xff]   ;;  %v1356_v31 = vld [vmem:[%s1831_s0 + $0xd8] sm:$0xff]   ;;  %v1357_v32 = vld [vmem:[%s1831_s0 + $0x60] sm:$0xff]  }
   0xc   :  { %1235 = vmatprep.subr.bf16.mxu0 %v1328_v3  ;;  %1312 = vmatprep.subr.bf16.mxu1 %v1328_v3  ;;  %v1358_v33 = vld [vmem:[%s1831_s0 + $0xe0] sm:$0xff]   ;;  %v1359_v34 = vld [vmem:[%s1831_s0 + $0x68] sm:$0xff]   ;;  %v1361_v36 = vld [vmem:[%s1831_s0 + $0x70] sm:$0xff]  }
   0xd   :  { %v1360_v35 = vld [vmem:[%s1831_s0 + $0xe8] sm:$0xff]   ;;  %v1362_v37 = vld [vmem:[%s1831_s0 + $0xf0] sm:$0xff]   ;;  %v1363_v38 = vld [vmem:[%s1831_s0 + $0x78] sm:$0xff]  }
   0xe   :  { %v1364_v39 = vld [vmem:[%s1831_s0 + $0xf8] sm:$0xff]   ;;  %v1508_v40 = vld [vmem:[%s1832_s2] ss:$0 sm:$0xff] }
   0xf   :  { %1236 = vmatpush3.bf16.msra.mxu0 %v1328_v3  ;;  %1320 = vmatpush3.bf16.msra.mxu1 %v1328_v3 }
  0x10   :  { %1237 = vmatprep.subr.bf16.mxu0 %v1329_v6  ;;  %1313 = vmatprep.subr.bf16.mxu1 %v1329_v6 }
  0x13   :  { %1238 = vmatpush3.bf16.msra.mxu0 %v1329_v6  ;;  %1321 = vmatpush3.bf16.msra.mxu1 %v1329_v6 }
  0x14   :  { %1239 = vmatprep.subr.bf16.mxu0 %v1330_v7  ;;  %1314 = vmatprep.subr.bf16.mxu1 %v1330_v7 }
  0x17   :  { %1240 = vmatpush3.bf16.msra.mxu0 %v1330_v7  ;;  %1322 = vmatpush3.bf16.msra.mxu1 %v1330_v7 }
  0x18   :  { %1241 = vmatprep.subr.bf16.mxu0 %v1331_v8  ;;  %1315 = vmatprep.subr.bf16.mxu1 %v1331_v8 }
  0x1b   :  { %1242 = vmatpush3.bf16.msra.mxu0 %v1331_v8  ;;  %1323 = vmatpush3.bf16.msra.mxu1 %v1331_v8 }
  0x1c   :  { %1243 = vmatprep.subr.bf16.mxu0 %v1332_v9  ;;  %1316 = vmatprep.subr.bf16.mxu1 %v1332_v9 }
  0x1f   :  { %1244 = vmatpush3.bf16.msra.mxu0 %v1332_v9  ;;  %1324 = vmatpush3.bf16.msra.mxu1 %v1332_v9 }
  0x22   :  { %1246 = vmatmul.mubr.bf16.vlgmr.msra.gmra.mxu0 %v1335_v10  ;;  %1278 = vmatmul.mubr.bf16.vlgmr.msra.gmra.mxu1 %v1336_v11 }
  0x23   :  { %1249 = vmatprep.mubr.bf16.mxu0 %v1337_v12  ;;  %1281 = vmatprep.mubr.bf16.mxu1 %v1338_v13 }
  0x2a   :  { %1250 = vmatmul.mubr.bf16.gmra.mxu0 %v1339_v14  ;;  %1282 = vmatmul.mubr.bf16.gmra.mxu1 %v1340_v15 }
  0x2b   :  { %1253 = vmatprep.mubr.bf16.mxu0 %v1341_v16  ;;  %1285 = vmatprep.mubr.bf16.mxu1 %v1342_v17 }
  0x32   :  { %1254 = vmatmul.mubr.bf16.gmra.mxu0 %v1343_v18  ;;  %1286 = vmatmul.mubr.bf16.gmra.mxu1 %v1344_v19 }
  0x33   :  { %1257 = vmatprep.mubr.bf16.mxu0 %v1345_v20  ;;  %1289 = vmatprep.mubr.bf16.mxu1 %v1346_v21 }
  0x3a   :  { %1258 = vmatmul.mubr.bf16.gmra.mxu0 %v1347_v22  ;;  %1290 = vmatmul.mubr.bf16.gmra.mxu1 %v1348_v23 }
  0x3b   :  { %1261 = vmatprep.mubr.bf16.mxu0 %v1349_v24  ;;  %1293 = vmatprep.mubr.bf16.mxu1 %v1350_v25 }
  0x42   :  { %1262 = vmatmul.mubr.bf16.gmra.mxu0 %v1351_v26  ;;  %1294 = vmatmul.mubr.bf16.gmra.mxu1 %v1352_v27 }
  0x43   :  { %1265 = vmatprep.mubr.bf16.mxu0 %v1353_v28  ;;  %1297 = vmatprep.mubr.bf16.mxu1 %v1354_v29 }
  0x4a   :  { %1266 = vmatmul.mubr.bf16.gmra.mxu0 %v1355_v30  ;;  %1298 = vmatmul.mubr.bf16.gmra.mxu1 %v1356_v31 }
  0x4b   :  { %1269 = vmatprep.mubr.bf16.mxu0 %v1357_v32  ;;  %1301 = vmatprep.mubr.bf16.mxu1 %v1358_v33 }
  0x52   :  { %1270 = vmatmul.mubr.bf16.gmra.mxu0 %v1359_v34  ;;  %1302 = vmatmul.mubr.bf16.gmra.mxu1 %v1360_v35 }
  0x53   :  { %1273 = vmatprep.mubr.bf16.mxu0 %v1361_v36  ;;  %1305 = vmatprep.mubr.bf16.mxu1 %v1362_v37 }
  0x5a   :  { %1274 = vmatmul.mubr.bf16.gmra.mxu0 %v1363_v38  ;;  %1306 = vmatmul.mubr.bf16.gmra.mxu1 %v1364_v39 }
  0xe2   :  { %v1247_v41 = vpop.f32.mrf.mxu0  ;;  %v1279_v42 = vpop.f32.mrf.mxu1 }
  0xe3   :  { %v385_v43 = vadd.f32 %v1247_v41, %v1508_v40  ;;  %v513_v44 = vadd.f32 %v1279_v42, %v1508_v40 }
  0xe4   :  { %v376_v45 = vpop.f32.mrf.mxu0  ;;  %v504_v46 = vpop.f32.mrf.mxu1 }
  0xe5   :  { %v633_v47 = vmax.f32 %v385_v43, 0.0  ;;  %v665_v48 = vmax.f32 %v513_v44, 0.0  ;;  %v377_v49 = vadd.f32 %v1508_v40, %v376_v45  ;;  %v505_v50 = vadd.f32 %v1508_v40, %v504_v46 }
  0xe6   :  { %v1248_v51 = vpop.f32.mrf.mxu0  ;;  %v1280_v52 = vpop.f32.mrf.mxu1 }
  0xe7   :  { %v1127_v53 = vpack.c.bf16 %v633_v47, %v633_v47  ;;  %v1159_v54 = vpack.c.bf16 %v665_v48, %v665_v48  ;;  %v631_v55 = vmax.f32 %v377_v49, 0.0  ;;  %v663_v56 = vmax.f32 %v505_v50, 0.0 }
  0xe8   :  { %v388_v57 = vadd.f32 %v1248_v51, %v1508_v40  ;;  %v516_v58 = vadd.f32 %v1280_v52, %v1508_v40  ;;  %v379_v59 = vpop.f32.mrf.mxu0  ;;  %v507_v60 = vpop.f32.mrf.mxu1 }
  0xe9   :  { %954 = vst.msk [vmem:[%s1833_s3 + $0x8] sm:$0xf] %vm951_vm0, %v1127_v53  ;;  %986 = vst.msk [vmem:[%s1833_s3 + $0x88] sm:$0xf] %vm951_vm0, %v1159_v54  ;;  %v1125_v61 = vpack.c.bf16 %v631_v55, %v631_v55  ;;  %v1157_v62 = vpack.c.bf16 %v663_v56, %v663_v56  ;;  %v380_v63 = vadd.f32 %v1508_v40, %v379_v59 }
  0xea   :  { %v508_v0 = vadd.f32 %v1508_v40, %v507_v60  ;;  %v634_v1 = vmax.f32 %v388_v57, 0.0  ;;  %v666_v2 = vmax.f32 %v516_v58, 0.0  ;;  %v1251_v3 = vpop.f32.mrf.mxu0  ;;  %v1283_v4 = vpop.f32.mrf.mxu1 }
  0xeb   :  { %952 = vst.msk [vmem:[%s1833_s3] sm:$0xf] %vm951_vm0, %v1125_v61  ;;  %984 = vst.msk [vmem:[%s1833_s3 + $0x80] sm:$0xf] %vm951_vm0, %v1157_v62  ;;  %v632_v5 = vmax.f32 %v380_v63, 0.0  ;;  %v401_v7 = vadd.f32 %v1251_v3, %v1508_v40  ;;  %v529_v8 = vadd.f32 %v1283_v4, %v1508_v40 }
  0xec   :  { %v664_v6 = vmax.f32 %v508_v0, 0.0  ;;  %v1128_v9 = vpack.c.bf16 %v634_v1, %v634_v1  ;;  %v1160_v10 = vpack.c.bf16 %v666_v2, %v666_v2  ;;  %v392_v11 = vpop.f32.mrf.mxu0  ;;  %v520_v12 = vpop.f32.mrf.mxu1 }
  0xed   :  { %v1126_v13 = vpack.c.bf16 %v632_v5, %v632_v5  ;;  %v637_v15 = vmax.f32 %v401_v7, 0.0  ;;  %v669_v16 = vmax.f32 %v529_v8, 0.0  ;;  %v393_v17 = vadd.f32 %v1508_v40, %v392_v11 }
  0xee   :  { %v1158_v14 = vpack.c.bf16 %v664_v6, %v664_v6  ;;  %955 = vst.msk [vmem:[%s1833_s3 + $0xc] sm:$0xf] %vm951_vm0, %v1128_v9  ;;  %987 = vst.msk [vmem:[%s1833_s3 + $0x8c] sm:$0xf] %vm951_vm0, %v1160_v10  ;;  %v521_v18 = vadd.f32 %v1508_v40, %v520_v12  ;;  %v1252_v19 = vpop.f32.mrf.mxu0  ;;  %v1284_v20 = vpop.f32.mrf.mxu1 }
  0xef   :  { %953 = vst.msk [vmem:[%s1833_s3 + $0x4] sm:$0xf] %vm951_vm0, %v1126_v13  ;;  %v1131_v21 = vpack.c.bf16 %v637_v15, %v637_v15  ;;  %v1163_v22 = vpack.c.bf16 %v669_v16, %v669_v16  ;;  %v404_v23 = vadd.f32 %v1252_v19, %v1508_v40  ;;  %v532_v24 = vadd.f32 %v1284_v20, %v1508_v40 }
  0xf0   :  { %985 = vst.msk [vmem:[%s1833_s3 + $0x84] sm:$0xf] %vm951_vm0, %v1158_v14  ;;  %v635_v25 = vmax.f32 %v393_v17, 0.0  ;;  %v667_v26 = vmax.f32 %v521_v18, 0.0  ;;  %v395_v27 = vpop.f32.mrf.mxu0  ;;  %v523_v28 = vpop.f32.mrf.mxu1 }
  0xf1   :  { %958 = vst.msk [vmem:[%s1833_s3 + $0x18] sm:$0xf] %vm951_vm0, %v1131_v21  ;;  %990 = vst.msk [vmem:[%s1833_s3 + $0x98] sm:$0xf] %vm951_vm0, %v1163_v22  ;;  %v638_v29 = vmax.f32 %v404_v23, 0.0  ;;  %v670_v30 = vmax.f32 %v532_v24, 0.0  ;;  %v396_v31 = vadd.f32 %v1508_v40, %v395_v27  ;;  %v524_v32 = vadd.f32 %v1508_v40, %v523_v28 }
  0xf2   :  { %v1129_v33 = vpack.c.bf16 %v635_v25, %v635_v25  ;;  %v1161_v34 = vpack.c.bf16 %v667_v26, %v667_v26  ;;  %v1255_v35 = vpop.f32.mrf.mxu0  ;;  %v1287_v36 = vpop.f32.mrf.mxu1 }
  0xf3   :  { %v1132_v37 = vpack.c.bf16 %v638_v29, %v638_v29  ;;  %v1164_v38 = vpack.c.bf16 %v670_v30, %v670_v30  ;;  %v636_v39 = vmax.f32 %v396_v31, 0.0  ;;  %v668_v41 = vmax.f32 %v524_v32, 0.0 }
  0xf4   :  { %956 = vst.msk [vmem:[%s1833_s3 + $0x10] sm:$0xf] %vm951_vm0, %v1129_v33  ;;  %988 = vst.msk [vmem:[%s1833_s3 + $0x90] sm:$0xf] %vm951_vm0, %v1161_v34  ;;  %v417_v42 = vadd.f32 %v1255_v35, %v1508_v40  ;;  %v545_v43 = vadd.f32 %v1287_v36, %v1508_v40  ;;  %v408_v44 = vpop.f32.mrf.mxu0  ;;  %v536_v45 = vpop.f32.mrf.mxu1 }
  0xf5   :  { %959 = vst.msk [vmem:[%s1833_s3 + $0x1c] sm:$0xf] %vm951_vm0, %v1132_v37  ;;  %991 = vst.msk [vmem:[%s1833_s3 + $0x9c] sm:$0xf] %vm951_vm0, %v1164_v38  ;;  %v1130_v46 = vpack.c.bf16 %v636_v39, %v636_v39  ;;  %v1162_v47 = vpack.c.bf16 %v668_v41, %v668_v41  ;;  %v409_v48 = vadd.f32 %v1508_v40, %v408_v44 }
  0xf6   :  { %v537_v49 = vadd.f32 %v1508_v40, %v536_v45  ;;  %v641_v50 = vmax.f32 %v417_v42, 0.0  ;;  %v673_v51 = vmax.f32 %v545_v43, 0.0  ;;  %v1256_v52 = vpop.f32.mrf.mxu0  ;;  %v1288_v53 = vpop.f32.mrf.mxu1 }
  0xf7   :  { %957 = vst.msk [vmem:[%s1833_s3 + $0x14] sm:$0xf] %vm951_vm0, %v1130_v46  ;;  %989 = vst.msk [vmem:[%s1833_s3 + $0x94] sm:$0xf] %vm951_vm0, %v1162_v47  ;;  %v639_v54 = vmax.f32 %v409_v48, 0.0  ;;  %v420_v56 = vadd.f32 %v1256_v52, %v1508_v40  ;;  %v548_v57 = vadd.f32 %v1288_v53, %v1508_v40 }
  0xf8   :  { %v671_v55 = vmax.f32 %v537_v49, 0.0  ;;  %v1135_v58 = vpack.c.bf16 %v641_v50, %v641_v50  ;;  %v1167_v59 = vpack.c.bf16 %v673_v51, %v673_v51  ;;  %v411_v60 = vpop.f32.mrf.mxu0  ;;  %v539_v61 = vpop.f32.mrf.mxu1 }
  0xf9   :  { %v1133_v62 = vpack.c.bf16 %v639_v54, %v639_v54  ;;  %v642_v0 = vmax.f32 %v420_v56, 0.0  ;;  %v674_v1 = vmax.f32 %v548_v57, 0.0  ;;  %v412_v2 = vadd.f32 %v1508_v40, %v411_v60 }
  0xfa   :  { %v1165_v63 = vpack.c.bf16 %v671_v55, %v671_v55  ;;  %962 = vst.msk [vmem:[%s1833_s3 + $0x28] sm:$0xf] %vm951_vm0, %v1135_v58  ;;  %994 = vst.msk [vmem:[%s1833_s3 + $0xa8] sm:$0xf] %vm951_vm0, %v1167_v59  ;;  %v540_v3 = vadd.f32 %v1508_v40, %v539_v61  ;;  %v1259_v4 = vpop.f32.mrf.mxu0  ;;  %v1291_v5 = vpop.f32.mrf.mxu1 }
  0xfb   :  { %960 = vst.msk [vmem:[%s1833_s3 + $0x20] sm:$0xf] %vm951_vm0, %v1133_v62  ;;  %v1136_v6 = vpack.c.bf16 %v642_v0, %v642_v0  ;;  %v1168_v7 = vpack.c.bf16 %v674_v1, %v674_v1  ;;  %v433_v8 = vadd.f32 %v1259_v4, %v1508_v40  ;;  %v561_v9 = vadd.f32 %v1291_v5, %v1508_v40 }
  0xfc   :  { %992 = vst.msk [vmem:[%s1833_s3 + $0xa0] sm:$0xf] %vm951_vm0, %v1165_v63  ;;  %v640_v10 = vmax.f32 %v412_v2, 0.0  ;;  %v672_v11 = vmax.f32 %v540_v3, 0.0  ;;  %v424_v12 = vpop.f32.mrf.mxu0  ;;  %v552_v13 = vpop.f32.mrf.mxu1 }
  0xfd   :  { %963 = vst.msk [vmem:[%s1833_s3 + $0x2c] sm:$0xf] %vm951_vm0, %v1136_v6  ;;  %995 = vst.msk [vmem:[%s1833_s3 + $0xac] sm:$0xf] %vm951_vm0, %v1168_v7  ;;  %v645_v14 = vmax.f32 %v433_v8, 0.0  ;;  %v677_v15 = vmax.f32 %v561_v9, 0.0  ;;  %v425_v16 = vadd.f32 %v1508_v40, %v424_v12  ;;  %v553_v17 = vadd.f32 %v1508_v40, %v552_v13 }
  0xfe   :  { %v1134_v18 = vpack.c.bf16 %v640_v10, %v640_v10  ;;  %v1166_v19 = vpack.c.bf16 %v672_v11, %v672_v11  ;;  %v1260_v20 = vpop.f32.mrf.mxu0  ;;  %v1292_v21 = vpop.f32.mrf.mxu1 }
  0xff   :  { %v1139_v22 = vpack.c.bf16 %v645_v14, %v645_v14  ;;  %v1171_v23 = vpack.c.bf16 %v677_v15, %v677_v15  ;;  %v643_v24 = vmax.f32 %v425_v16, 0.0  ;;  %v675_v25 = vmax.f32 %v553_v17, 0.0 }
 0x100   :  { %961 = vst.msk [vmem:[%s1833_s3 + $0x24] sm:$0xf] %vm951_vm0, %v1134_v18  ;;  %993 = vst.msk [vmem:[%s1833_s3 + $0xa4] sm:$0xf] %vm951_vm0, %v1166_v19  ;;  %v436_v26 = vadd.f32 %v1260_v20, %v1508_v40  ;;  %v564_v27 = vadd.f32 %v1292_v21, %v1508_v40  ;;  %v427_v28 = vpop.f32.mrf.mxu0  ;;  %v555_v29 = vpop.f32.mrf.mxu1 }
 0x101   :  { %966 = vst.msk [vmem:[%s1833_s3 + $0x38] sm:$0xf] %vm951_vm0, %v1139_v22  ;;  %998 = vst.msk [vmem:[%s1833_s3 + $0xb8] sm:$0xf] %vm951_vm0, %v1171_v23  ;;  %v1137_v30 = vpack.c.bf16 %v643_v24, %v643_v24  ;;  %v1169_v31 = vpack.c.bf16 %v675_v25, %v675_v25  ;;  %v428_v32 = vadd.f32 %v1508_v40, %v427_v28 }
 0x102   :  { %v556_v33 = vadd.f32 %v1508_v40, %v555_v29  ;;  %v646_v34 = vmax.f32 %v436_v26, 0.0  ;;  %v678_v35 = vmax.f32 %v564_v27, 0.0  ;;  %v1263_v36 = vpop.f32.mrf.mxu0  ;;  %v1295_v37 = vpop.f32.mrf.mxu1 }
 0x103   :  { %964 = vst.msk [vmem:[%s1833_s3 + $0x30] sm:$0xf] %vm951_vm0, %v1137_v30  ;;  %996 = vst.msk [vmem:[%s1833_s3 + $0xb0] sm:$0xf] %vm951_vm0, %v1169_v31  ;;  %v644_v38 = vmax.f32 %v428_v32, 0.0  ;;  %v449_v41 = vadd.f32 %v1263_v36, %v1508_v40  ;;  %v577_v42 = vadd.f32 %v1295_v37, %v1508_v40 }
 0x104   :  { %v676_v39 = vmax.f32 %v556_v33, 0.0  ;;  %v1140_v43 = vpack.c.bf16 %v646_v34, %v646_v34  ;;  %v1172_v44 = vpack.c.bf16 %v678_v35, %v678_v35  ;;  %v440_v45 = vpop.f32.mrf.mxu0  ;;  %v568_v46 = vpop.f32.mrf.mxu1 }
 0x105   :  { %v1138_v47 = vpack.c.bf16 %v644_v38, %v644_v38  ;;  %v649_v49 = vmax.f32 %v449_v41, 0.0  ;;  %v681_v50 = vmax.f32 %v577_v42, 0.0  ;;  %v441_v51 = vadd.f32 %v1508_v40, %v440_v45 }
 0x106   :  { %v1170_v48 = vpack.c.bf16 %v676_v39, %v676_v39  ;;  %967 = vst.msk [vmem:[%s1833_s3 + $0x3c] sm:$0xf] %vm951_vm0, %v1140_v43  ;;  %999 = vst.msk [vmem:[%s1833_s3 + $0xbc] sm:$0xf] %vm951_vm0, %v1172_v44  ;;  %v569_v52 = vadd.f32 %v1508_v40, %v568_v46  ;;  %v1264_v53 = vpop.f32.mrf.mxu0  ;;  %v1296_v54 = vpop.f32.mrf.mxu1 }
 0x107   :  { %965 = vst.msk [vmem:[%s1833_s3 + $0x34] sm:$0xf] %vm951_vm0, %v1138_v47  ;;  %v1143_v55 = vpack.c.bf16 %v649_v49, %v649_v49  ;;  %v1175_v56 = vpack.c.bf16 %v681_v50, %v681_v50  ;;  %v452_v57 = vadd.f32 %v1264_v53, %v1508_v40  ;;  %v580_v58 = vadd.f32 %v1296_v54, %v1508_v40 }
 0x108   :  { %997 = vst.msk [vmem:[%s1833_s3 + $0xb4] sm:$0xf] %vm951_vm0, %v1170_v48  ;;  %v647_v59 = vmax.f32 %v441_v51, 0.0  ;;  %v679_v60 = vmax.f32 %v569_v52, 0.0  ;;  %v443_v61 = vpop.f32.mrf.mxu0  ;;  %v571_v62 = vpop.f32.mrf.mxu1 }
 0x109   :  { %970 = vst.msk [vmem:[%s1833_s3 + $0x48] sm:$0xf] %vm951_vm0, %v1143_v55  ;;  %1002 = vst.msk [vmem:[%s1833_s3 + $0xc8] sm:$0xf] %vm951_vm0, %v1175_v56  ;;  %v650_v63 = vmax.f32 %v452_v57, 0.0  ;;  %v682_v0 = vmax.f32 %v580_v58, 0.0  ;;  %v444_v1 = vadd.f32 %v1508_v40, %v443_v61  ;;  %v572_v2 = vadd.f32 %v1508_v40, %v571_v62 }
 0x10a   :  { %v1141_v3 = vpack.c.bf16 %v647_v59, %v647_v59  ;;  %v1173_v4 = vpack.c.bf16 %v679_v60, %v679_v60  ;;  %v1267_v5 = vpop.f32.mrf.mxu0  ;;  %v1299_v6 = vpop.f32.mrf.mxu1 }
 0x10b   :  { %v1144_v7 = vpack.c.bf16 %v650_v63, %v650_v63  ;;  %v1176_v8 = vpack.c.bf16 %v682_v0, %v682_v0  ;;  %v648_v9 = vmax.f32 %v444_v1, 0.0  ;;  %v680_v10 = vmax.f32 %v572_v2, 0.0 }
 0x10c   :  { %968 = vst.msk [vmem:[%s1833_s3 + $0x40] sm:$0xf] %vm951_vm0, %v1141_v3  ;;  %1000 = vst.msk [vmem:[%s1833_s3 + $0xc0] sm:$0xf] %vm951_vm0, %v1173_v4  ;;  %v465_v11 = vadd.f32 %v1267_v5, %v1508_v40  ;;  %v593_v12 = vadd.f32 %v1299_v6, %v1508_v40  ;;  %v456_v13 = vpop.f32.mrf.mxu0  ;;  %v584_v14 = vpop.f32.mrf.mxu1 }
 0x10d   :  { %971 = vst.msk [vmem:[%s1833_s3 + $0x4c] sm:$0xf] %vm951_vm0, %v1144_v7  ;;  %1003 = vst.msk [vmem:[%s1833_s3 + $0xcc] sm:$0xf] %vm951_vm0, %v1176_v8  ;;  %v1142_v15 = vpack.c.bf16 %v648_v9, %v648_v9  ;;  %v1174_v16 = vpack.c.bf16 %v680_v10, %v680_v10  ;;  %v457_v17 = vadd.f32 %v1508_v40, %v456_v13 }
 0x10e   :  { %v585_v18 = vadd.f32 %v1508_v40, %v584_v14  ;;  %v653_v19 = vmax.f32 %v465_v11, 0.0  ;;  %v685_v20 = vmax.f32 %v593_v12, 0.0  ;;  %v1268_v21 = vpop.f32.mrf.mxu0  ;;  %v1300_v22 = vpop.f32.mrf.mxu1 }
 0x10f   :  { %969 = vst.msk [vmem:[%s1833_s3 + $0x44] sm:$0xf] %vm951_vm0, %v1142_v15  ;;  %1001 = vst.msk [vmem:[%s1833_s3 + $0xc4] sm:$0xf] %vm951_vm0, %v1174_v16  ;;  %v651_v23 = vmax.f32 %v457_v17, 0.0  ;;  %v468_v25 = vadd.f32 %v1268_v21, %v1508_v40  ;;  %v596_v26 = vadd.f32 %v1300_v22, %v1508_v40 }
 0x110   :  { %v683_v24 = vmax.f32 %v585_v18, 0.0  ;;  %v1147_v27 = vpack.c.bf16 %v653_v19, %v653_v19  ;;  %v1179_v28 = vpack.c.bf16 %v685_v20, %v685_v20  ;;  %v459_v29 = vpop.f32.mrf.mxu0  ;;  %v587_v30 = vpop.f32.mrf.mxu1 }
 0x111   :  { %v1145_v31 = vpack.c.bf16 %v651_v23, %v651_v23  ;;  %v654_v33 = vmax.f32 %v468_v25, 0.0  ;;  %v686_v34 = vmax.f32 %v596_v26, 0.0  ;;  %v460_v35 = vadd.f32 %v1508_v40, %v459_v29 }
 0x112   :  { %v1177_v32 = vpack.c.bf16 %v683_v24, %v683_v24  ;;  %974 = vst.msk [vmem:[%s1833_s3 + $0x58] sm:$0xf] %vm951_vm0, %v1147_v27  ;;  %1006 = vst.msk [vmem:[%s1833_s3 + $0xd8] sm:$0xf] %vm951_vm0, %v1179_v28  ;;  %v588_v36 = vadd.f32 %v1508_v40, %v587_v30  ;;  %v1271_v37 = vpop.f32.mrf.mxu0  ;;  %v1303_v38 = vpop.f32.mrf.mxu1 }
 0x113   :  { %972 = vst.msk [vmem:[%s1833_s3 + $0x50] sm:$0xf] %vm951_vm0, %v1145_v31  ;;  %v1148_v39 = vpack.c.bf16 %v654_v33, %v654_v33  ;;  %v1180_v41 = vpack.c.bf16 %v686_v34, %v686_v34  ;;  %v481_v42 = vadd.f32 %v1271_v37, %v1508_v40  ;;  %v609_v43 = vadd.f32 %v1303_v38, %v1508_v40 }
 0x114   :  { %1004 = vst.msk [vmem:[%s1833_s3 + $0xd0] sm:$0xf] %vm951_vm0, %v1177_v32  ;;  %v652_v44 = vmax.f32 %v460_v35, 0.0  ;;  %v684_v45 = vmax.f32 %v588_v36, 0.0  ;;  %v472_v46 = vpop.f32.mrf.mxu0  ;;  %v600_v47 = vpop.f32.mrf.mxu1 }
 0x115   :  { %975 = vst.msk [vmem:[%s1833_s3 + $0x5c] sm:$0xf] %vm951_vm0, %v1148_v39  ;;  %1007 = vst.msk [vmem:[%s1833_s3 + $0xdc] sm:$0xf] %vm951_vm0, %v1180_v41  ;;  %v657_v48 = vmax.f32 %v481_v42, 0.0  ;;  %v689_v49 = vmax.f32 %v609_v43, 0.0  ;;  %v473_v50 = vadd.f32 %v1508_v40, %v472_v46  ;;  %v601_v51 = vadd.f32 %v1508_v40, %v600_v47 }
 0x116   :  { %v1146_v52 = vpack.c.bf16 %v652_v44, %v652_v44  ;;  %v1178_v53 = vpack.c.bf16 %v684_v45, %v684_v45  ;;  %v1272_v54 = vpop.f32.mrf.mxu0  ;;  %v1304_v55 = vpop.f32.mrf.mxu1 }
 0x117   :  { %v1151_v56 = vpack.c.bf16 %v657_v48, %v657_v48  ;;  %v1183_v57 = vpack.c.bf16 %v689_v49, %v689_v49  ;;  %v655_v58 = vmax.f32 %v473_v50, 0.0  ;;  %v687_v59 = vmax.f32 %v601_v51, 0.0 }
 0x118   :  { %973 = vst.msk [vmem:[%s1833_s3 + $0x54] sm:$0xf] %vm951_vm0, %v1146_v52  ;;  %1005 = vst.msk [vmem:[%s1833_s3 + $0xd4] sm:$0xf] %vm951_vm0, %v1178_v53  ;;  %v484_v60 = vadd.f32 %v1272_v54, %v1508_v40  ;;  %v612_v61 = vadd.f32 %v1304_v55, %v1508_v40  ;;  %v475_v62 = vpop.f32.mrf.mxu0  ;;  %v603_v63 = vpop.f32.mrf.mxu1 }
 0x119   :  { %978 = vst.msk [vmem:[%s1833_s3 + $0x68] sm:$0xf] %vm951_vm0, %v1151_v56  ;;  %1010 = vst.msk [vmem:[%s1833_s3 + $0xe8] sm:$0xf] %vm951_vm0, %v1183_v57  ;;  %v1149_v0 = vpack.c.bf16 %v655_v58, %v655_v58  ;;  %v1181_v1 = vpack.c.bf16 %v687_v59, %v687_v59  ;;  %v476_v2 = vadd.f32 %v1508_v40, %v475_v62 }
 0x11a   :  { %v604_v3 = vadd.f32 %v1508_v40, %v603_v63  ;;  %v658_v4 = vmax.f32 %v484_v60, 0.0  ;;  %v690_v5 = vmax.f32 %v612_v61, 0.0  ;;  %v1275_v6 = vpop.f32.mrf.mxu0  ;;  %v1307_v7 = vpop.f32.mrf.mxu1 }
 0x11b   :  { %976 = vst.msk [vmem:[%s1833_s3 + $0x60] sm:$0xf] %vm951_vm0, %v1149_v0  ;;  %1008 = vst.msk [vmem:[%s1833_s3 + $0xe0] sm:$0xf] %vm951_vm0, %v1181_v1  ;;  %v656_v8 = vmax.f32 %v476_v2, 0.0  ;;  %v497_v10 = vadd.f32 %v1275_v6, %v1508_v40  ;;  %v625_v11 = vadd.f32 %v1307_v7, %v1508_v40 }
 0x11c   :  { %v688_v9 = vmax.f32 %v604_v3, 0.0  ;;  %v1152_v12 = vpack.c.bf16 %v658_v4, %v658_v4  ;;  %v1184_v13 = vpack.c.bf16 %v690_v5, %v690_v5  ;;  %v488_v14 = vpop.f32.mrf.mxu0  ;;  %v616_v15 = vpop.f32.mrf.mxu1 }
 0x11d   :  { %v1150_v16 = vpack.c.bf16 %v656_v8, %v656_v8  ;;  %v661_v18 = vmax.f32 %v497_v10, 0.0  ;;  %v693_v19 = vmax.f32 %v625_v11, 0.0  ;;  %v489_v20 = vadd.f32 %v1508_v40, %v488_v14 }
 0x11e   :  { %v1182_v17 = vpack.c.bf16 %v688_v9, %v688_v9  ;;  %979 = vst.msk [vmem:[%s1833_s3 + $0x6c] sm:$0xf] %vm951_vm0, %v1152_v12  ;;  %1011 = vst.msk [vmem:[%s1833_s3 + $0xec] sm:$0xf] %vm951_vm0, %v1184_v13  ;;  %v617_v21 = vadd.f32 %v1508_v40, %v616_v15  ;;  %v1276_v22 = vpop.f32.mrf.mxu0  ;;  %v1308_v23 = vpop.f32.mrf.mxu1 }
 0x11f   :  { %977 = vst.msk [vmem:[%s1833_s3 + $0x64] sm:$0xf] %vm951_vm0, %v1150_v16  ;;  %v1155_v24 = vpack.c.bf16 %v661_v18, %v661_v18  ;;  %v1187_v25 = vpack.c.bf16 %v693_v19, %v693_v19  ;;  %v500_v26 = vadd.f32 %v1276_v22, %v1508_v40  ;;  %v628_v27 = vadd.f32 %v1308_v23, %v1508_v40 }
 0x120   :  { %1009 = vst.msk [vmem:[%s1833_s3 + $0xe4] sm:$0xf] %vm951_vm0, %v1182_v17  ;;  %v659_v28 = vmax.f32 %v489_v20, 0.0  ;;  %v691_v29 = vmax.f32 %v617_v21, 0.0  ;;  %v491_v30 = vpop.f32.mrf.mxu0  ;;  %v619_v31 = vpop.f32.mrf.mxu1 }
 0x121   :  { %982 = vst.msk [vmem:[%s1833_s3 + $0x78] sm:$0xf] %vm951_vm0, %v1155_v24  ;;  %1014 = vst.msk [vmem:[%s1833_s3 + $0xf8] sm:$0xf] %vm951_vm0, %v1187_v25  ;;  %v662_v32 = vmax.f32 %v500_v26, 0.0  ;;  %v694_v33 = vmax.f32 %v628_v27, 0.0  ;;  %v492_v34 = vadd.f32 %v1508_v40, %v491_v30  ;;  %v620_v35 = vadd.f32 %v1508_v40, %v619_v31 }
 0x122   :  { %v1153_v36 = vpack.c.bf16 %v659_v28, %v659_v28  ;;  %v1185_v37 = vpack.c.bf16 %v691_v29, %v691_v29 }
 0x123   :  { %v1156_v38 = vpack.c.bf16 %v662_v32, %v662_v32  ;;  %v1188_v39 = vpack.c.bf16 %v694_v33, %v694_v33  ;;  %v660_v41 = vmax.f32 %v492_v34, 0.0  ;;  %v692_v42 = vmax.f32 %v620_v35, 0.0 }
 0x124   :  { %980 = vst.msk [vmem:[%s1833_s3 + $0x70] sm:$0xf] %vm951_vm0, %v1153_v36  ;;  %1012 = vst.msk [vmem:[%s1833_s3 + $0xf0] sm:$0xf] %vm951_vm0, %v1185_v37 }
 0x125   :  { %983 = vst.msk [vmem:[%s1833_s3 + $0x7c] sm:$0xf] %vm951_vm0, %v1156_v38  ;;  %1015 = vst.msk [vmem:[%s1833_s3 + $0xfc] sm:$0xf] %vm951_vm0, %v1188_v39  ;;  %v1154_v40 = vpack.c.bf16 %v660_v41, %v660_v41  ;;  %v1186_v43 = vpack.c.bf16 %v692_v42, %v692_v42 }
 0x127   :  { %981 = vst.msk [vmem:[%s1833_s3 + $0x74] sm:$0xf] %vm951_vm0, %v1154_v40  ;;  %1013 = vst.msk [vmem:[%s1833_s3 + $0xf4] sm:$0xf] %vm951_vm0, %v1186_v43 }

// kernel: autoencoder_forward.9
= control target key start
LH: loop header
LB: loop body
LE: loop exit
PB: predicated region body
PF: predicated region fallthrough
CT: control target
= control target key end

     0   :  { %vm423_vm0 = vcmask 257024   ;;  %s830_s1 = inlined_call_operand.vmem [shape: bf16[256,32], index: 1, kind: input, shape index: {}]   ;;  %s831_s0 = inlined_call_operand.vmem [shape: bf16[128,256], index: 0, kind: input, shape index: {}]   ;;  %s832_s2 = inlined_call_operand.vmem [shape: f32[1,32], index: 2, kind: input, shape index: {}]   ;;  %s833_s3 = inlined_call_operand.vmem [shape: bf16[128,32], index: 3, kind: output, shape index: {}]  }
   0x1   :  { %v589_v0 = vld [vmem:[%s830_s1 + $0x78] sm:$0xff]   ;;  %v591_v2 = vld [vmem:[%s830_s1 + $0x70] sm:$0xff]   ;;  %v593_v4 = vld [vmem:[%s830_s1 + $0x68] sm:$0xff]  }
   0x2   :  { %v590_v1 = vld [vmem:[%s830_s1 + $0x38] sm:$0xff]   ;;  %509 = vmatprep.subr.bf16.mxu0 %v589_v0  ;;  %573 = vmatprep.subr.bf16.mxu1 %v589_v0  ;;  %v592_v3 = vld [vmem:[%s830_s1 + $0x30] sm:$0xff]   ;;  %v594_v5 = vld [vmem:[%s830_s1 + $0x28] sm:$0xff]  }
   0x3   :  { %510 = vmatpush3.bf16.msra.mxu0 %v590_v1  ;;  %581 = vmatpush3.bf16.msra.mxu1 %v590_v1  ;;  %v595_v6 = vld [vmem:[%s830_s1 + $0x60] sm:$0xff]   ;;  %v597_v8 = vld [vmem:[%s830_s1 + $0x58] sm:$0xff]   ;;  %v599_v10 = vld [vmem:[%s830_s1 + $0x50] sm:$0xff]  }
   0x4   :  { %511 = vmatprep.subr.bf16.mxu0 %v591_v2  ;;  %574 = vmatprep.subr.bf16.mxu1 %v591_v2  ;;  %v596_v7 = vld [vmem:[%s830_s1 + $0x20] sm:$0xff]   ;;  %v598_v9 = vld [vmem:[%s830_s1 + $0x18] sm:$0xff]   ;;  %v600_v13 = vld [vmem:[%s830_s1 + $0x10] sm:$0xff]  }
   0x5   :  { %v607_v11 = vld [vmem:[%s831_s0 + $0x4] ss:$8 sps:$4 sm:$0xff]   ;;  %v605_v18 = vld [vmem:[%s831_s0] ss:$8 sps:$4 sm:$0xff]   ;;  %v611_v20 = vld [vmem:[%s831_s0 + $0x14] ss:$8 sps:$4 sm:$0xff]  }
   0x6   :  { %v610_v12 = vld [vmem:[%s831_s0 + $0x44] ss:$8 sps:$4 sm:$0xff]   ;;  %278 = vmatprep.mubr.bf16.mxu0 %v607_v11  ;;  %v608_v19 = vld [vmem:[%s831_s0 + $0x40] ss:$8 sps:$4 sm:$0xff]   ;;  %v613_v21 = vld [vmem:[%s831_s0 + $0x54] ss:$8 sps:$4 sm:$0xff]  }
   0x7   :  { %512 = vmatpush3.bf16.msra.mxu0 %v592_v3  ;;  %582 = vmatpush3.bf16.msra.mxu1 %v592_v3  ;;  %v601_v14 = vld [vmem:[%s830_s1 + $0x48] sm:$0xff]   ;;  %v603_v16 = vld [vmem:[%s830_s1 + $0x40] sm:$0xff]   ;;  %v615_v22 = vld [vmem:[%s831_s0 + $0x10] ss:$8 sps:$4 sm:$0xff]  }
   0x8   :  { %513 = vmatprep.subr.bf16.mxu0 %v593_v4  ;;  %575 = vmatprep.subr.bf16.mxu1 %v593_v4  ;;  %v602_v15 = vld [vmem:[%s830_s1 + $0x8] sm:$0xff]   ;;  %v604_v17 = vld [vmem:[%s830_s1] sm:$0xff]   ;;  %v616_v23 = vld [vmem:[%s831_s0 + $0x50] ss:$8 sps:$4 sm:$0xff]  }
   0x9   :  { %310 = vmatprep.mubr.bf16.mxu1 %v610_v12  ;;  %v617_v24 = vld [vmem:[%s831_s0 + $0x24] ss:$8 sps:$4 sm:$0xff]   ;;  %v621_v26 = vld [vmem:[%s831_s0 + $0x20] ss:$8 sps:$4 sm:$0xff]   ;;  %v623_v28 = vld [vmem:[%s831_s0 + $0x34] ss:$8 sps:$4 sm:$0xff]  }
   0xa   :  { %v619_v25 = vld [vmem:[%s831_s0 + $0x64] ss:$8 sps:$4 sm:$0xff]   ;;  %v622_v27 = vld [vmem:[%s831_s0 + $0x60] ss:$8 sps:$4 sm:$0xff]   ;;  %v625_v29 = vld [vmem:[%s831_s0 + $0x74] ss:$8 sps:$4 sm:$0xff]  }
   0xb   :  { %514 = vmatpush3.bf16.msra.mxu0 %v594_v5  ;;  %583 = vmatpush3.bf16.msra.mxu1 %v594_v5  ;;  %v627_v30 = vld [vmem:[%s831_s0 + $0x30] ss:$8 sps:$4 sm:$0xff]   ;;  %v748_v34 = vld [vmem:[%s832_s2] ss:$0 sm:$0xff] }
   0xc   :  { %515 = vmatprep.subr.bf16.mxu0 %v595_v6  ;;  %576 = vmatprep.subr.bf16.mxu1 %v595_v6  ;;  %v628_v31 = vld [vmem:[%s831_s0 + $0x70] ss:$8 sps:$4 sm:$0xff]  }
   0xf   :  { %516 = vmatpush3.bf16.msra.mxu0 %v596_v7  ;;  %584 = vmatpush3.bf16.msra.mxu1 %v596_v7 }
  0x10   :  { %517 = vmatprep.subr.bf16.mxu0 %v597_v8  ;;  %577 = vmatprep.subr.bf16.mxu1 %v597_v8 }
  0x13   :  { %518 = vmatpush3.bf16.msra.mxu0 %v598_v9  ;;  %585 = vmatpush3.bf16.msra.mxu1 %v598_v9 }
  0x14   :  { %519 = vmatprep.subr.bf16.mxu0 %v599_v10  ;;  %578 = vmatprep.subr.bf16.mxu1 %v599_v10 }
  0x17   :  { %520 = vmatpush3.bf16.msra.mxu0 %v600_v13  ;;  %586 = vmatpush3.bf16.msra.mxu1 %v600_v13 }
  0x18   :  { %521 = vmatprep.subr.bf16.mxu0 %v601_v14  ;;  %579 = vmatprep.subr.bf16.mxu1 %v601_v14 }
  0x1b   :  { %522 = vmatpush3.bf16.msra.mxu0 %v602_v15  ;;  %587 = vmatpush3.bf16.msra.mxu1 %v602_v15 }
  0x1c   :  { %523 = vmatprep.subr.bf16.mxu0 %v603_v16  ;;  %580 = vmatprep.subr.bf16.mxu1 %v603_v16 }
  0x1f   :  { %524 = vmatpush3.bf16.msra.mxu0 %v604_v17  ;;  %588 = vmatpush3.bf16.msra.mxu1 %v604_v17 }
  0x22   :  { %279 = vmatmul.mubr.bf16.vlgmr.msra.gmra.mxu0 %v605_v18  ;;  %311 = vmatmul.mubr.bf16.vlgmr.msra.gmra.mxu1 %v608_v19 }
  0x23   :  { %286 = vmatprep.mubr.bf16.mxu0 %v611_v20  ;;  %318 = vmatprep.mubr.bf16.mxu1 %v613_v21 }
  0x2a   :  { %287 = vmatmul.mubr.bf16.gmra.mxu0 %v615_v22  ;;  %319 = vmatmul.mubr.bf16.gmra.mxu1 %v616_v23 }
  0x2b   :  { %294 = vmatprep.mubr.bf16.mxu0 %v617_v24  ;;  %326 = vmatprep.mubr.bf16.mxu1 %v619_v25 }
  0x32   :  { %295 = vmatmul.mubr.bf16.gmra.mxu0 %v621_v26  ;;  %327 = vmatmul.mubr.bf16.gmra.mxu1 %v622_v27 }
  0x33   :  { %302 = vmatprep.mubr.bf16.mxu0 %v623_v28  ;;  %334 = vmatprep.mubr.bf16.mxu1 %v625_v29 }
  0x3a   :  { %303 = vmatmul.mubr.bf16.gmra.mxu0 %v627_v30  ;;  %335 = vmatmul.mubr.bf16.gmra.mxu1 %v628_v31 }
  0xe2   :  { %v525_v32 = vpop.f32.mrf.mxu0  ;;  %v549_v33 = vpop.f32.mrf.mxu1 }
  0xe4   :  { %v526_v35 = vpop.f32.mrf.mxu0  ;;  %v550_v36 = vpop.f32.mrf.mxu1 }
  0xe5   :  { %v527_v37 = vadd.f32 %v526_v35, %v525_v32  ;;  %v551_v38 = vadd.f32 %v550_v36, %v549_v33 }
  0xe6   :  { %v528_v39 = vpop.f32.mrf.mxu0  ;;  %v552_v40 = vpop.f32.mrf.mxu1 }
  0xe7   :  { %v281_v41 = vadd.f32 %v527_v37, %v748_v34  ;;  %v313_v42 = vadd.f32 %v551_v38, %v748_v34 }
  0xe8   :  { %v529_v43 = vpop.f32.mrf.mxu0  ;;  %v553_v44 = vpop.f32.mrf.mxu1 }
  0xe9   :  { %v343_v45 = vmax.f32 %v281_v41, 0.0  ;;  %v351_v46 = vmax.f32 %v313_v42, 0.0  ;;  %v530_v47 = vadd.f32 %v529_v43, %v528_v39  ;;  %v554_v48 = vadd.f32 %v553_v44, %v552_v40 }
  0xea   :  { %v531_v49 = vpop.f32.mrf.mxu0  ;;  %v555_v50 = vpop.f32.mrf.mxu1 }
  0xeb   :  { %v493_v51 = vpack.c.bf16 %v343_v45, %v343_v45  ;;  %v501_v52 = vpack.c.bf16 %v351_v46, %v351_v46  ;;  %v284_v53 = vadd.f32 %v530_v47, %v748_v34  ;;  %v316_v54 = vadd.f32 %v554_v48, %v748_v34 }
  0xec   :  { %v532_v55 = vpop.f32.mrf.mxu0  ;;  %v556_v56 = vpop.f32.mrf.mxu1 }
  0xed   :  { %424 = vst.msk [vmem:[%s833_s3] sm:$0xf] %vm423_vm0, %v493_v51  ;;  %432 = vst.msk [vmem:[%s833_s3 + $0x20] sm:$0xf] %vm423_vm0, %v501_v52  ;;  %v344_v57 = vmax.f32 %v284_v53, 0.0  ;;  %v352_v58 = vmax.f32 %v316_v54, 0.0  ;;  %v533_v59 = vadd.f32 %v532_v55, %v531_v49  ;;  %v557_v60 = vadd.f32 %v556_v56, %v555_v50 }
  0xee   :  { %v534_v61 = vpop.f32.mrf.mxu0  ;;  %v558_v62 = vpop.f32.mrf.mxu1 }
  0xef   :  { %v494_v63 = vpack.c.bf16 %v344_v57, %v344_v57  ;;  %v502_v0 = vpack.c.bf16 %v352_v58, %v352_v58  ;;  %v289_v1 = vadd.f32 %v533_v59, %v748_v34  ;;  %v321_v2 = vadd.f32 %v557_v60, %v748_v34 }
  0xf0   :  { %v535_v3 = vpop.f32.mrf.mxu0  ;;  %v559_v4 = vpop.f32.mrf.mxu1 }
  0xf1   :  { %425 = vst.msk [vmem:[%s833_s3 + $0x4] sm:$0xf] %vm423_vm0, %v494_v63  ;;  %433 = vst.msk [vmem:[%s833_s3 + $0x24] sm:$0xf] %vm423_vm0, %v502_v0  ;;  %v345_v5 = vmax.f32 %v289_v1, 0.0  ;;  %v353_v6 = vmax.f32 %v321_v2, 0.0  ;;  %v536_v7 = vadd.f32 %v535_v3, %v534_v61  ;;  %v560_v8 = vadd.f32 %v559_v4, %v558_v62 }
  0xf2   :  { %v537_v9 = vpop.f32.mrf.mxu0  ;;  %v561_v10 = vpop.f32.mrf.mxu1 }
  0xf3   :  { %v495_v11 = vpack.c.bf16 %v345_v5, %v345_v5  ;;  %v503_v12 = vpack.c.bf16 %v353_v6, %v353_v6  ;;  %v292_v13 = vadd.f32 %v536_v7, %v748_v34  ;;  %v324_v14 = vadd.f32 %v560_v8, %v748_v34 }
  0xf4   :  { %v538_v15 = vpop.f32.mrf.mxu0  ;;  %v562_v16 = vpop.f32.mrf.mxu1 }
  0xf5   :  { %426 = vst.msk [vmem:[%s833_s3 + $0x8] sm:$0xf] %vm423_vm0, %v495_v11  ;;  %434 = vst.msk [vmem:[%s833_s3 + $0x28] sm:$0xf] %vm423_vm0, %v503_v12  ;;  %v346_v17 = vmax.f32 %v292_v13, 0.0  ;;  %v354_v18 = vmax.f32 %v324_v14, 0.0  ;;  %v539_v19 = vadd.f32 %v538_v15, %v537_v9  ;;  %v563_v20 = vadd.f32 %v562_v16, %v561_v10 }
  0xf6   :  { %v540_v21 = vpop.f32.mrf.mxu0  ;;  %v564_v22 = vpop.f32.mrf.mxu1 }
  0xf7   :  { %v496_v23 = vpack.c.bf16 %v346_v17, %v346_v17  ;;  %v504_v24 = vpack.c.bf16 %v354_v18, %v354_v18  ;;  %v297_v25 = vadd.f32 %v539_v19, %v748_v34  ;;  %v329_v26 = vadd.f32 %v563_v20, %v748_v34 }
  0xf8   :  { %v541_v27 = vpop.f32.mrf.mxu0  ;;  %v565_v28 = vpop.f32.mrf.mxu1 }
  0xf9   :  { %427 = vst.msk [vmem:[%s833_s3 + $0xc] sm:$0xf] %vm423_vm0, %v496_v23  ;;  %435 = vst.msk [vmem:[%s833_s3 + $0x2c] sm:$0xf] %vm423_vm0, %v504_v24  ;;  %v347_v29 = vmax.f32 %v297_v25, 0.0  ;;  %v355_v30 = vmax.f32 %v329_v26, 0.0  ;;  %v542_v31 = vadd.f32 %v541_v27, %v540_v21  ;;  %v566_v32 = vadd.f32 %v565_v28, %v564_v22 }
  0xfa   :  { %v543_v33 = vpop.f32.mrf.mxu0  ;;  %v567_v35 = vpop.f32.mrf.mxu1 }
  0xfb   :  { %v497_v36 = vpack.c.bf16 %v347_v29, %v347_v29  ;;  %v505_v37 = vpack.c.bf16 %v355_v30, %v355_v30  ;;  %v300_v38 = vadd.f32 %v542_v31, %v748_v34  ;;  %v332_v39 = vadd.f32 %v566_v32, %v748_v34 }
  0xfc   :  { %v544_v40 = vpop.f32.mrf.mxu0  ;;  %v568_v41 = vpop.f32.mrf.mxu1 }
  0xfd   :  { %428 = vst.msk [vmem:[%s833_s3 + $0x10] sm:$0xf] %vm423_vm0, %v497_v36  ;;  %436 = vst.msk [vmem:[%s833_s3 + $0x30] sm:$0xf] %vm423_vm0, %v505_v37  ;;  %v348_v42 = vmax.f32 %v300_v38, 0.0  ;;  %v356_v43 = vmax.f32 %v332_v39, 0.0  ;;  %v545_v44 = vadd.f32 %v544_v40, %v543_v33  ;;  %v569_v45 = vadd.f32 %v568_v41, %v567_v35 }
  0xfe   :  { %v546_v46 = vpop.f32.mrf.mxu0  ;;  %v570_v47 = vpop.f32.mrf.mxu1 }
  0xff   :  { %v498_v48 = vpack.c.bf16 %v348_v42, %v348_v42  ;;  %v506_v49 = vpack.c.bf16 %v356_v43, %v356_v43  ;;  %v305_v50 = vadd.f32 %v545_v44, %v748_v34  ;;  %v337_v51 = vadd.f32 %v569_v45, %v748_v34 }
 0x100   :  { %v547_v52 = vpop.f32.mrf.mxu0  ;;  %v571_v53 = vpop.f32.mrf.mxu1 }
 0x101   :  { %429 = vst.msk [vmem:[%s833_s3 + $0x14] sm:$0xf] %vm423_vm0, %v498_v48  ;;  %437 = vst.msk [vmem:[%s833_s3 + $0x34] sm:$0xf] %vm423_vm0, %v506_v49  ;;  %v349_v54 = vmax.f32 %v305_v50, 0.0  ;;  %v357_v55 = vmax.f32 %v337_v51, 0.0  ;;  %v548_v56 = vadd.f32 %v547_v52, %v546_v46  ;;  %v572_v57 = vadd.f32 %v571_v53, %v570_v47 }
 0x103   :  { %v499_v58 = vpack.c.bf16 %v349_v54, %v349_v54  ;;  %v507_v59 = vpack.c.bf16 %v357_v55, %v357_v55  ;;  %v308_v60 = vadd.f32 %v548_v56, %v748_v34  ;;  %v340_v61 = vadd.f32 %v572_v57, %v748_v34 }
 0x105   :  { %430 = vst.msk [vmem:[%s833_s3 + $0x18] sm:$0xf] %vm423_vm0, %v499_v58  ;;  %438 = vst.msk [vmem:[%s833_s3 + $0x38] sm:$0xf] %vm423_vm0, %v507_v59  ;;  %v350_v62 = vmax.f32 %v308_v60, 0.0  ;;  %v358_v63 = vmax.f32 %v340_v61, 0.0 }
 0x107   :  { %v500_v0 = vpack.c.bf16 %v350_v62, %v350_v62  ;;  %v508_v1 = vpack.c.bf16 %v358_v63, %v358_v63 }
 0x109   :  { %431 = vst.msk [vmem:[%s833_s3 + $0x1c] sm:$0xf] %vm423_vm0, %v500_v0  ;;  %439 = vst.msk [vmem:[%s833_s3 + $0x3c] sm:$0xf] %vm423_vm0, %v508_v1 }

// kernel: autoencoder_forward.11
= control target key start
LH: loop header
LB: loop body
LE: loop exit
PB: predicated region body
PF: predicated region fallthrough
CT: control target
= control target key end

     0   :  { %vm318_vm0 = vcmask 261120   ;;  %vm617_vm1 = vcmask 519168   ;;  %s1144_s1 = inlined_call_operand.vmem [shape: bf16[288,64], index: 1, kind: input, shape index: {}]   ;;  %s1145_s0 = inlined_call_operand.vmem [shape: bf16[128,288], index: 0, kind: input, shape index: {}]   ;;  %s1146_s2 = inlined_call_operand.vmem [shape: f32[1,64], index: 2, kind: input, shape index: {}]   ;;  %s1147_s3 = inlined_call_operand.vmem [shape: bf16[128,64], index: 3, kind: output, shape index: {}]  }
   0x1   :  { %v831_v0 = vld [vmem:[%s1144_s1 + $0x78] sm:$0xff]   ;;  %v833_v2 = vld [vmem:[%s1144_s1 + $0x70] sm:$0xff]   ;;  %v835_v4 = vld [vmem:[%s1144_s1 + $0x68] sm:$0xff]  }
   0x2   :  { %v832_v1 = vld [vmem:[%s1144_s1 + $0x38] sm:$0xff]   ;;  %721 = vmatprep.subr.bf16.mxu0 %v831_v0  ;;  %815 = vmatprep.subr.bf16.mxu1 %v831_v0  ;;  %v834_v3 = vld [vmem:[%s1144_s1 + $0x30] sm:$0xff]   ;;  %v836_v5 = vld [vmem:[%s1144_s1 + $0x28] sm:$0xff]  }
   0x3   :  { %722 = vmatpush3.bf16.msra.mxu0 %v832_v1  ;;  %823 = vmatpush3.bf16.msra.mxu1 %v832_v1  ;;  %v837_v6 = vld [vmem:[%s1144_s1 + $0x60] sm:$0xff]   ;;  %v839_v8 = vld [vmem:[%s1144_s1 + $0x58] sm:$0xff]   ;;  %v841_v10 = vld [vmem:[%s1144_s1 + $0x50] sm:$0xff]  }
   0x4   :  { %723 = vmatprep.subr.bf16.mxu0 %v833_v2  ;;  %816 = vmatprep.subr.bf16.mxu1 %v833_v2  ;;  %v838_v7 = vld [vmem:[%s1144_s1 + $0x20] sm:$0xff]   ;;  %v840_v9 = vld [vmem:[%s1144_s1 + $0x18] sm:$0xff]   ;;  %v842_v13 = vld [vmem:[%s1144_s1 + $0x10] sm:$0xff]  }
   0x5   :  { %v849_v11 = vld [vmem:[%s1145_s0 + $0x4] ss:$12 sps:$4 sm:$0xff]   ;;  %v852_v12 = vld [vmem:[%s1145_s0 + $0x94] ss:$12 sps:$4 sm:$0xff]   ;;  %v843_v14 = vld [vmem:[%s1144_s1 + $0x48] sm:$0xff]  }
   0x6   :  { %375 = vmatprep.mubr.bf16.mxu0 %v849_v11  ;;  %423 = vmatprep.mubr.bf16.mxu1 %v852_v12  ;;  %v844_v15 = vld [vmem:[%s1144_s1 + $0x8] sm:$0xff]   ;;  %v845_v16 = vld [vmem:[%s1144_s1 + $0x40] sm:$0xff]   ;;  %v850_v20 = vld [vmem:[%s1145_s0 + $0x90] ss:$12 sps:$4 sm:$0xff]  }
   0x7   :  { %724 = vmatpush3.bf16.msra.mxu0 %v834_v3  ;;  %824 = vmatpush3.bf16.msra.mxu1 %v834_v3  ;;  %v846_v17 = vld [vmem:[%s1144_s1] sm:$0xff]   ;;  %v853_v19 = vld [vmem:[%s1144_s1 + $0x88] sm:$0xff]   ;;  %v864_v28 = vld [vmem:[%s1145_s0 + $0x30] ss:$12 sps:$4 sm:$0xff]  }
   0x8   :  { %725 = vmatprep.subr.bf16.mxu0 %v835_v4  ;;  %817 = vmatprep.subr.bf16.mxu1 %v835_v4  ;;  %v847_v18 = vld [vmem:[%s1145_s0] ss:$12 sps:$4 sm:$0xff]   ;;  %v854_v21 = vld [vmem:[%s1145_s0 + $0x1c] ss:$12 sps:$4 sm:$0xff]   ;;  %v858_v24 = vld [vmem:[%s1145_s0 + $0x18] ss:$12 sps:$4 sm:$0xff]  }
   0x9   :  { %v856_v22 = vld [vmem:[%s1145_s0 + $0xac] ss:$12 sps:$4 sm:$0xff]   ;;  %v860_v23 = vld [vmem:[%s1144_s1 + $0x80] sm:$0xff]   ;;  %v859_v25 = vld [vmem:[%s1145_s0 + $0xa8] ss:$12 sps:$4 sm:$0xff]  }
   0xa   :  { %v861_v26 = vld [vmem:[%s1145_s0 + $0x34] ss:$12 sps:$4 sm:$0xff]   ;;  %v866_v30 = vld [vmem:[%s1145_s0 + $0x4c] ss:$12 sps:$4 sm:$0xff]   ;;  %v870_v33 = vld [vmem:[%s1145_s0 + $0x50] ss:$12 sps:$4 sm:$0xff]  }
   0xb   :  { %726 = vmatpush3.bf16.msra.mxu0 %v836_v5  ;;  %825 = vmatpush3.bf16.msra.mxu1 %v836_v5  ;;  %v863_v27 = vld [vmem:[%s1145_s0 + $0x8] ss:$12 sps:$4 sm:$0xff]   ;;  %v865_v29 = vld [vmem:[%s1145_s0 + $0x20] ss:$12 sps:$4 sm:$0xff]   ;;  %v868_v31 = vld [vmem:[%s1145_s0 + $0x38] ss:$12 sps:$4 sm:$0xff]  }
   0xc   :  { %727 = vmatprep.subr.bf16.mxu0 %v837_v6  ;;  %818 = vmatprep.subr.bf16.mxu1 %v837_v6  ;;  %v869_v32 = vld [vmem:[%s1145_s0 + $0x48] ss:$12 sps:$4 sm:$0xff]   ;;  %v871_v34 = vld [vmem:[%s1145_s0 + $0x64] ss:$12 sps:$4 sm:$0xff]   ;;  %v874_v36 = vld [vmem:[%s1145_s0 + $0x60] ss:$12 sps:$4 sm:$0xff]  }
   0xd   :  { %v873_v35 = vld [vmem:[%s1145_s0 + $0x68] ss:$12 sps:$4 sm:$0xff]   ;;  %v875_v37 = vld [vmem:[%s1145_s0 + $0x80] ss:$12 sps:$4 sm:$0xff]   ;;  %v878_v39 = vld [vmem:[%s1145_s0 + $0x98] ss:$12 sps:$4 sm:$0xff]  }
   0xe   :  { %v876_v38 = vld [vmem:[%s1145_s0 + $0x7c] ss:$12 sps:$4 sm:$0xff]   ;;  %v879_v40 = vld [vmem:[%s1145_s0 + $0x78] ss:$12 sps:$4 sm:$0xff]   ;;  %v1054_v60 = vld [vmem:[%s1146_s2] ss:$0 sm:$0xff] }
   0xf   :  { %728 = vmatpush3.bf16.msra.mxu0 %v838_v7  ;;  %826 = vmatpush3.bf16.msra.mxu1 %v838_v7  ;;  %v880_v41 = vld [vmem:[%s1145_s0 + $0xb0] ss:$12 sps:$4 sm:$0xff]  }
  0x10   :  { %729 = vmatprep.subr.bf16.mxu0 %v839_v8  ;;  %819 = vmatprep.subr.bf16.mxu1 %v839_v8 }
  0x13   :  { %730 = vmatpush3.bf16.msra.mxu0 %v840_v9  ;;  %827 = vmatpush3.bf16.msra.mxu1 %v840_v9 }
  0x14   :  { %731 = vmatprep.subr.bf16.mxu0 %v841_v10  ;;  %820 = vmatprep.subr.bf16.mxu1 %v841_v10 }
  0x17   :  { %732 = vmatpush3.bf16.msra.mxu0 %v842_v13  ;;  %828 = vmatpush3.bf16.msra.mxu1 %v842_v13 }
  0x18   :  { %733 = vmatprep.subr.bf16.mxu0 %v843_v14  ;;  %821 = vmatprep.subr.bf16.mxu1 %v843_v14 }
  0x1b   :  { %734 = vmatpush3.bf16.msra.mxu0 %v844_v15  ;;  %829 = vmatpush3.bf16.msra.mxu1 %v844_v15 }
  0x1c   :  { %735 = vmatprep.subr.bf16.mxu0 %v845_v16  ;;  %822 = vmatprep.subr.bf16.mxu1 %v845_v16 }
  0x1f   :  { %736 = vmatpush3.bf16.msra.mxu0 %v846_v17  ;;  %830 = vmatpush3.bf16.msra.mxu1 %v846_v17 }
  0x20   :  { %795 = vmatprep.subr.bf16.mxu1 %v853_v19 }
  0x22   :  { %376 = vmatmul.mubr.bf16.vlgmr.msra.gmra.mxu0 %v847_v18  ;;  %424 = vmatmul.mubr.bf16.vlgmr.msra.gmra.mxu1 %v850_v20 }
  0x23   :  { %796 = vmatpush3.bf16.msra.mxu1 %v853_v19  ;;  %383 = vmatprep.mubr.bf16.mxu0 %v854_v21 }
  0x24   :  { %431 = vmatprep.mubr.bf16.mxu1 %v856_v22  ;;  %797 = vmatprep.subr.bf16.mxu1 %v860_v23 }
  0x27   :  { %798 = vmatpush3.bf16.msra.mxu1 %v860_v23 }
  0x2a   :  { %384 = vmatmul.mubr.bf16.gmra.mxu0 %v858_v24  ;;  %432 = vmatmul.mubr.bf16.gmra.mxu1 %v859_v25 }
  0x2b   :  { %391 = vmatprep.mubr.bf16.mxu0 %v861_v26  ;;  %799 = vmatprep.mubr.msk.bf16.mxu1 %vm318_vm0, %v863_v27 }
  0x32   :  { %392 = vmatmul.mubr.bf16.gmra.mxu0 %v864_v28  ;;  %800 = vmatmul.mubr.msk.bf16.vlgmr.msra.gmra.mxu1 %vm318_vm0, %v865_v29 }
  0x33   :  { %399 = vmatprep.mubr.bf16.mxu0 %v866_v30  ;;  %803 = vmatprep.mubr.msk.bf16.mxu1 %vm318_vm0, %v868_v31 }
  0x3a   :  { %400 = vmatmul.mubr.bf16.gmra.mxu0 %v869_v32  ;;  %804 = vmatmul.mubr.msk.bf16.gmra.mxu1 %vm318_vm0, %v870_v33 }
  0x3b   :  { %407 = vmatprep.mubr.bf16.mxu0 %v871_v34  ;;  %807 = vmatprep.mubr.msk.bf16.mxu1 %vm318_vm0, %v873_v35 }
  0x42   :  { %408 = vmatmul.mubr.bf16.gmra.mxu0 %v874_v36  ;;  %808 = vmatmul.mubr.msk.bf16.gmra.mxu1 %vm318_vm0, %v875_v37 }
  0x43   :  { %415 = vmatprep.mubr.bf16.mxu0 %v876_v38  ;;  %811 = vmatprep.mubr.msk.bf16.mxu1 %vm318_vm0, %v878_v39 }
  0x4a   :  { %416 = vmatmul.mubr.bf16.gmra.mxu0 %v879_v40  ;;  %812 = vmatmul.mubr.msk.bf16.gmra.mxu1 %vm318_vm0, %v880_v41 }
  0xe2   :  { %v737_v42 = vpop.f32.mrf.mxu0  ;;  %v1035_v43 = vpop.f32.mrf.mxu1 }
  0xe4   :  { %v738_v44 = vpop.f32.mrf.mxu0  ;;  %v1037_v45 = vpop.f32.mrf.mxu1 }
  0xe5   :  { %v739_v57 = vadd.f32 %v738_v44, %v737_v42 }
  0xe6   :  { %v740_v46 = vpop.f32.mrf.mxu0  ;;  %v1039_v47 = vpop.f32.mrf.mxu1 }
  0xe7   :  { %v378_v3 = vadd.f32 %v739_v57, %v1054_v60 }
  0xe8   :  { %v741_v48 = vpop.f32.mrf.mxu0  ;;  %v1041_v49 = vpop.f32.mrf.mxu1 }
  0xe9   :  { %v742_v63 = vadd.f32 %v741_v48, %v740_v46 }
  0xea   :  { %v743_v50 = vpop.f32.mrf.mxu0  ;;  %v1043_v51 = vpop.f32.mrf.mxu1 }
  0xeb   :  { %v381_v11 = vadd.f32 %v742_v63, %v1054_v60 }
  0xec   :  { %v744_v52 = vpop.f32.mrf.mxu0  ;;  %v1045_v53 = vpop.f32.mrf.mxu1 }
  0xed   :  { %v745_v54 = vadd.f32 %v744_v52, %v743_v50 }
  0xee   :  { %v746_v55 = vpop.f32.mrf.mxu0  ;;  %v1047_v56 = vpop.f32.mrf.mxu1 }
  0xef   :  { %v386_v62 = vadd.f32 %v745_v54, %v1054_v60  ;;  %v781_v54 = vadd.f32 %v1045_v53, %v1043_v51  ;;  %v775_v53 = vadd.f32 %v1037_v45, %v1035_v43 }
  0xf0   :  { %v747_v58 = vpop.f32.mrf.mxu0  ;;  %v1049_v59 = vpop.f32.mrf.mxu1 }
  0xf1   :  { %v748_v61 = vadd.f32 %v747_v58, %v746_v55 }
  0xf2   :  { %v749_v0 = vpop.f32.mrf.mxu0  ;;  %v801_v1 = vpop.f32.mrf.mxu1 }
  0xf3   :  { %v483_v2 = vadd.f32 %v801_v1, %v386_v62  ;;  %v389_v8 = vadd.f32 %v748_v61, %v1054_v60 }
  0xf4   :  { %v750_v4 = vpop.f32.mrf.mxu0  ;;  %v474_v5 = vpop.f32.mrf.mxu1 }
  0xf5   :  { %v539_v6 = vmax.f32 %v483_v2, 0.0  ;;  %v475_v7 = vadd.f32 %v474_v5, %v378_v3  ;;  %v751_v13 = vadd.f32 %v750_v4, %v749_v0  ;;  %v784_v3 = vadd.f32 %v1049_v59, %v1047_v56 }
  0xf6   :  { %v752_v9 = vpop.f32.mrf.mxu0  ;;  %v802_v10 = vpop.f32.mrf.mxu1  ;;  %v778_v56 = vadd.f32 %v1041_v49, %v1039_v47 }
  0xf7   :  { %v707_v12 = vpack.c.bf16 %v539_v6, %v539_v6  ;;  %v537_v14 = vmax.f32 %v475_v7, 0.0  ;;  %v486_v15 = vadd.f32 %v802_v10, %v389_v8  ;;  %v394_v26 = vadd.f32 %v751_v13, %v1054_v60 }
  0xf8   :  { %v753_v16 = vpop.f32.mrf.mxu0  ;;  %v477_v17 = vpop.f32.mrf.mxu1  ;;  %v426_v13 = vadd.f32 %v775_v53, %v1054_v60 }
  0xf9   :  { %620 = vst.msk [vmem:[%s1147_s3 + $0x8] sm:$0xf] %vm617_vm1, %v707_v12  ;;  %v705_v18 = vpack.c.bf16 %v537_v14, %v537_v14  ;;  %v540_v19 = vmax.f32 %v486_v15, 0.0  ;;  %v478_v20 = vadd.f32 %v477_v17, %v381_v11  ;;  %v754_v24 = vadd.f32 %v753_v16, %v752_v9 }
  0xfa   :  { %v755_v21 = vpop.f32.mrf.mxu0  ;;  %v805_v22 = vpop.f32.mrf.mxu1  ;;  %v434_v9 = vadd.f32 %v781_v54, %v1054_v60  ;;  %v437_v15 = vadd.f32 %v784_v3, %v1054_v60 }
  0xfb   :  { %618 = vst.msk [vmem:[%s1147_s3] sm:$0xf] %vm617_vm1, %v705_v18  ;;  %v708_v23 = vpack.c.bf16 %v540_v19, %v540_v19  ;;  %v538_v25 = vmax.f32 %v478_v20, 0.0  ;;  %v397_v36 = vadd.f32 %v754_v24, %v1054_v60 }
  0xfc   :  { %v756_v27 = vpop.f32.mrf.mxu0  ;;  %v490_v28 = vpop.f32.mrf.mxu1 }
  0xfd   :  { %621 = vst.msk [vmem:[%s1147_s3 + $0xc] sm:$0xf] %vm617_vm1, %v708_v23  ;;  %v706_v29 = vpack.c.bf16 %v538_v25, %v538_v25  ;;  %v757_v30 = vadd.f32 %v756_v27, %v755_v21  ;;  %v491_v31 = vadd.f32 %v490_v28, %v394_v26  ;;  %v429_v27 = vadd.f32 %v778_v56, %v1054_v60 }
  0xfe   :  { %v758_v32 = vpop.f32.mrf.mxu0  ;;  %v806_v33 = vpop.f32.mrf.mxu1 }
  0xff   :  { %619 = vst.msk [vmem:[%s1147_s3 + $0x4] sm:$0xf] %vm617_vm1, %v706_v29  ;;  %v402_v34 = vadd.f32 %v757_v30, %v1054_v60  ;;  %v541_v35 = vmax.f32 %v491_v31, 0.0 }
 0x100   :  { %v759_v37 = vpop.f32.mrf.mxu0  ;;  %v493_v38 = vpop.f32.mrf.mxu1 }
 0x101   :  { %v499_v39 = vadd.f32 %v805_v22, %v402_v34  ;;  %v709_v40 = vpack.c.bf16 %v541_v35, %v541_v35  ;;  %v760_v41 = vadd.f32 %v759_v37, %v758_v32  ;;  %v494_v42 = vadd.f32 %v493_v38, %v397_v36 }
 0x102   :  { %v761_v44 = vpop.f32.mrf.mxu0  ;;  %v809_v46 = vpop.f32.mrf.mxu1 }
 0x103   :  { %v543_v48 = vmax.f32 %v499_v39, 0.0  ;;  %622 = vst.msk [vmem:[%s1147_s3 + $0x10] sm:$0xf] %vm617_vm1, %v709_v40  ;;  %v405_v50 = vadd.f32 %v760_v41, %v1054_v60  ;;  %v542_v52 = vmax.f32 %v494_v42, 0.0 }
 0x104   :  { %v762_v55 = vpop.f32.mrf.mxu0  ;;  %v506_v57 = vpop.f32.mrf.mxu1 }
 0x105   :  { %v711_v58 = vpack.c.bf16 %v543_v48, %v543_v48  ;;  %v502_v61 = vadd.f32 %v806_v33, %v405_v50  ;;  %v710_v62 = vpack.c.bf16 %v542_v52, %v542_v52  ;;  %v763_v63 = vadd.f32 %v762_v55, %v761_v44 }
 0x106   :  { %v764_v0 = vpop.f32.mrf.mxu0  ;;  %v810_v1 = vpop.f32.mrf.mxu1 }
 0x107   :  { %624 = vst.msk [vmem:[%s1147_s3 + $0x18] sm:$0xf] %vm617_vm1, %v711_v58  ;;  %v544_v2 = vmax.f32 %v502_v61, 0.0  ;;  %623 = vst.msk [vmem:[%s1147_s3 + $0x14] sm:$0xf] %vm617_vm1, %v710_v62  ;;  %v410_v51 = vadd.f32 %v763_v63, %v1054_v60 }
 0x108   :  { %v765_v4 = vpop.f32.mrf.mxu0  ;;  %v509_v5 = vpop.f32.mrf.mxu1 }
 0x109   :  { %v712_v6 = vpack.c.bf16 %v544_v2, %v544_v2  ;;  %v507_v7 = vadd.f32 %v506_v57, %v410_v51  ;;  %v766_v8 = vadd.f32 %v765_v4, %v764_v0 }
 0x10a   :  { %v767_v10 = vpop.f32.mrf.mxu0  ;;  %v813_v11 = vpop.f32.mrf.mxu1 }
 0x10b   :  { %625 = vst.msk [vmem:[%s1147_s3 + $0x1c] sm:$0xf] %vm617_vm1, %v712_v6  ;;  %v545_v12 = vmax.f32 %v507_v7, 0.0  ;;  %v413_v43 = vadd.f32 %v766_v8, %v1054_v60  ;;  %v531_v45 = vadd.f32 %v813_v11, %v434_v9 }
 0x10c   :  { %v768_v59 = vpop.f32.mrf.mxu0  ;;  %v522_v14 = vpop.f32.mrf.mxu1 }
 0x10d   :  { %v713_v16 = vpack.c.bf16 %v545_v12, %v545_v12  ;;  %v510_v17 = vadd.f32 %v509_v5, %v413_v43  ;;  %v551_v18 = vmax.f32 %v531_v45, 0.0  ;;  %v769_v19 = vadd.f32 %v768_v59, %v767_v10 }
 0x10e   :  { %v523_v20 = vadd.f32 %v522_v14, %v426_v13  ;;  %v770_v21 = vpop.f32.mrf.mxu0  ;;  %v814_v22 = vpop.f32.mrf.mxu1 }
 0x10f   :  { %626 = vst.msk [vmem:[%s1147_s3 + $0x20] sm:$0xf] %vm617_vm1, %v713_v16  ;;  %v546_v23 = vmax.f32 %v510_v17, 0.0  ;;  %v719_v47 = vpack.c.bf16 %v551_v18, %v551_v18  ;;  %v418_v49 = vadd.f32 %v769_v19, %v1054_v60  ;;  %v534_v24 = vadd.f32 %v814_v22, %v437_v15 }
 0x110   :  { %v549_v25 = vmax.f32 %v523_v20, 0.0  ;;  %v771_v26 = vpop.f32.mrf.mxu0  ;;  %v525_v28 = vpop.f32.mrf.mxu1 }
 0x111   :  { %v714_v29 = vpack.c.bf16 %v546_v23, %v546_v23  ;;  %632 = vst.msk [vmem:[%s1147_s3 + $0x38] sm:$0xf] %vm617_vm1, %v719_v47  ;;  %v515_v30 = vadd.f32 %v809_v46, %v418_v49  ;;  %v552_v31 = vmax.f32 %v534_v24, 0.0  ;;  %v772_v32 = vadd.f32 %v771_v26, %v770_v21 }
 0x112   :  { %v717_v33 = vpack.c.bf16 %v549_v25, %v549_v25  ;;  %v526_v34 = vadd.f32 %v525_v28, %v429_v27 }
 0x113   :  { %627 = vst.msk [vmem:[%s1147_s3 + $0x24] sm:$0xf] %vm617_vm1, %v714_v29  ;;  %v547_v35 = vmax.f32 %v515_v30, 0.0  ;;  %v720_v36 = vpack.c.bf16 %v552_v31, %v552_v31  ;;  %v421_v37 = vadd.f32 %v772_v32, %v1054_v60 }
 0x114   :  { %630 = vst.msk [vmem:[%s1147_s3 + $0x30] sm:$0xf] %vm617_vm1, %v717_v33  ;;  %v550_v38 = vmax.f32 %v526_v34, 0.0 }
 0x115   :  { %v715_v39 = vpack.c.bf16 %v547_v35, %v547_v35  ;;  %633 = vst.msk [vmem:[%s1147_s3 + $0x3c] sm:$0xf] %vm617_vm1, %v720_v36  ;;  %v518_v40 = vadd.f32 %v810_v1, %v421_v37 }
 0x116   :  { %v718_v41 = vpack.c.bf16 %v550_v38, %v550_v38 }
 0x117   :  { %628 = vst.msk [vmem:[%s1147_s3 + $0x28] sm:$0xf] %vm617_vm1, %v715_v39  ;;  %v548_v60 = vmax.f32 %v518_v40, 0.0 }
 0x118   :  { %631 = vst.msk [vmem:[%s1147_s3 + $0x34] sm:$0xf] %vm617_vm1, %v718_v41 }
 0x119   :  { %v716_v42 = vpack.c.bf16 %v548_v60, %v548_v60 }
 0x11b   :  { %629 = vst.msk [vmem:[%s1147_s3 + $0x2c] sm:$0xf] %vm617_vm1, %v716_v42 }

// kernel: autoencoder_forward.10
= control target key start
LH: loop header
LB: loop body
LE: loop exit
PB: predicated region body
PF: predicated region fallthrough
CT: control target
= control target key end

     0   :  { %v293_v36 = vlaneseq  ;;  %v5465_v37 = vmov 1966171168   ;;  %s7284_s1 = inlined_call_operand.vmem [shape: bf16[2048,256], index: 1, kind: input, shape index: {}]   ;;  %s7285_s0 = inlined_call_operand.vmem [shape: bf16[2,2048], index: 0, kind: input, shape index: {}]   ;;  %s7286_s2 = inlined_call_operand.vmem [shape: f32[1,256], index: 2, kind: input, shape index: {}]   ;;  %s7287_s3 = inlined_call_operand.vmem [shape: bf16[256,128], index: 3, kind: input, shape index: {}]   ;;  %s7288_s5 = inlined_call_operand.vmem [shape: bf16[128,256], index: 5, kind: input, shape index: {}]   ;;  %s7289_s7 = inlined_call_operand.vmem [shape: bf16[256,2048], index: 7, kind: input, shape index: {}]   ;;  %s7290_s4 = inlined_call_operand.vmem [shape: f32[1,128], index: 4, kind: input, shape index: {}]   ;;  %s7291_s6 = inlined_call_operand.vmem [shape: f32[1,256], index: 6, kind: input, shape index: {}]   ;;  %s7292_s8 = inlined_call_operand.vmem [shape: f32[1,2048], index: 8, kind: input, shape index: {}]   ;;  %s7293_s9 = inlined_call_operand.vmem [shape: bf16[2,2048], index: 9, kind: output, shape index: {}]  }
   0x1   :  { %v5039_v0 = vld [vmem:[%s7284_s1 + $0x74] ss:$8 sps:$4 sm:$0xff]   ;;  %v5043_v2 = vld [vmem:[%s7284_s1 + $0x70] ss:$8 sps:$4 sm:$0xff]   ;;  %v5045_v4 = vld [vmem:[%s7284_s1 + $0x64] ss:$8 sps:$4 sm:$0xff]   ;;  %v307_v38 = vunpack.c.l.s4 %v5465_v37 }
   0x2   :  { %v5041_v1 = vld [vmem:[%s7284_s1 + $0x174] ss:$8 sps:$4 sm:$0xff]   ;;  %1699 = vmatprep.subr.bf16.mxu0 %v5039_v0  ;;  %v5044_v3 = vld [vmem:[%s7284_s1 + $0x170] ss:$8 sps:$4 sm:$0xff]   ;;  %v5047_v5 = vld [vmem:[%s7284_s1 + $0x164] ss:$8 sps:$4 sm:$0xff]  }
   0x3   :  { %1740 = vmatprep.subr.bf16.mxu1 %v5041_v1  ;;  %1700 = vmatpush1.bf16.msra.mxu0 %v5043_v2  ;;  %v5049_v6 = vld [vmem:[%s7284_s1 + $0x60] ss:$8 sps:$4 sm:$0xff]   ;;  %v5051_v8 = vld [vmem:[%s7284_s1 + $0x54] ss:$8 sps:$4 sm:$0xff]   ;;  %v5055_v10 = vld [vmem:[%s7284_s1 + $0x50] ss:$8 sps:$4 sm:$0xff]   ;;  %v308_v43 = vunpack.c.0.s8 %v307_v38 }
   0x4   :  { %1741 = vmatpush1.bf16.msra.mxu1 %v5044_v3  ;;  %1701 = vmatprep.subr.bf16.mxu0 %v5045_v4  ;;  %v5050_v7 = vld [vmem:[%s7284_s1 + $0x160] ss:$8 sps:$4 sm:$0xff]   ;;  %v5053_v9 = vld [vmem:[%s7284_s1 + $0x154] ss:$8 sps:$4 sm:$0xff]   ;;  %v5056_v11 = vld [vmem:[%s7284_s1 + $0x150] ss:$8 sps:$4 sm:$0xff]  }
   0x5   :  { %1742 = vmatprep.subr.bf16.mxu1 %v5047_v5  ;;  %v5057_v12 = vld [vmem:[%s7284_s1 + $0x44] ss:$8 sps:$4 sm:$0xff]   ;;  %v5061_v14 = vld [vmem:[%s7284_s1 + $0x40] ss:$8 sps:$4 sm:$0xff]   ;;  %v5063_v16 = vld [vmem:[%s7284_s1 + $0x34] ss:$8 sps:$4 sm:$0xff]  }
   0x6   :  { %v5059_v13 = vld [vmem:[%s7284_s1 + $0x144] ss:$8 sps:$4 sm:$0xff]   ;;  %v5062_v15 = vld [vmem:[%s7284_s1 + $0x140] ss:$8 sps:$4 sm:$0xff]   ;;  %v5065_v17 = vld [vmem:[%s7284_s1 + $0x134] ss:$8 sps:$4 sm:$0xff]  }
   0x7   :  { %1702 = vmatpush1.bf16.msra.mxu0 %v5049_v6  ;;  %v5067_v18 = vld [vmem:[%s7284_s1 + $0x30] ss:$8 sps:$4 sm:$0xff]   ;;  %v5069_v20 = vld [vmem:[%s7284_s1 + $0x24] ss:$8 sps:$4 sm:$0xff]   ;;  %v5073_v22 = vld [vmem:[%s7284_s1 + $0x20] ss:$8 sps:$4 sm:$0xff]  }
   0x8   :  { %1743 = vmatpush1.bf16.msra.mxu1 %v5050_v7  ;;  %1703 = vmatprep.subr.bf16.mxu0 %v5051_v8  ;;  %v5068_v19 = vld [vmem:[%s7284_s1 + $0x130] ss:$8 sps:$4 sm:$0xff]   ;;  %v5071_v21 = vld [vmem:[%s7284_s1 + $0x124] ss:$8 sps:$4 sm:$0xff]   ;;  %v5074_v23 = vld [vmem:[%s7284_s1 + $0x120] ss:$8 sps:$4 sm:$0xff]  }
   0x9   :  { %1744 = vmatprep.subr.bf16.mxu1 %v5053_v9  ;;  %v5075_v24 = vld [vmem:[%s7284_s1 + $0x14] ss:$8 sps:$4 sm:$0xff]   ;;  %v5079_v26 = vld [vmem:[%s7284_s1 + $0x10] ss:$8 sps:$4 sm:$0xff]   ;;  %v5081_v28 = vld [vmem:[%s7284_s1 + $0x4] ss:$8 sps:$4 sm:$0xff]  }
   0xa   :  { %v5077_v25 = vld [vmem:[%s7284_s1 + $0x114] ss:$8 sps:$4 sm:$0xff]   ;;  %v5080_v27 = vld [vmem:[%s7284_s1 + $0x110] ss:$8 sps:$4 sm:$0xff]   ;;  %v5083_v29 = vld [vmem:[%s7284_s1 + $0x104] ss:$8 sps:$4 sm:$0xff]  }
   0xb   :  { %1704 = vmatpush1.bf16.msra.mxu0 %v5055_v10  ;;  %v5085_v30 = vld [vmem:[%s7284_s1] ss:$8 sps:$4 sm:$0xff]   ;;  %v5087_v32 = vld [vmem:[%s7284_s1 + $0xf4] ss:$8 sps:$4 sm:$0xff]   ;;  %v5091_v34 = vld [vmem:[%s7284_s1 + $0xf0] ss:$8 sps:$4 sm:$0xff]  }
   0xc   :  { %1745 = vmatpush1.bf16.msra.mxu1 %v5056_v11  ;;  %1705 = vmatprep.subr.bf16.mxu0 %v5057_v12  ;;  %v5086_v31 = vld [vmem:[%s7284_s1 + $0x100] ss:$8 sps:$4 sm:$0xff]   ;;  %v5089_v33 = vld [vmem:[%s7284_s1 + $0x1f4] ss:$8 sps:$4 sm:$0xff]   ;;  %v5092_v35 = vld [vmem:[%s7284_s1 + $0x1f0] ss:$8 sps:$4 sm:$0xff]  }
   0xd   :  { %1746 = vmatprep.subr.bf16.mxu1 %v5059_v13  ;;  %v5093_v39 = vld [vmem:[%s7284_s1 + $0xe4] ss:$8 sps:$4 sm:$0xff]   ;;  %v5097_v41 = vld [vmem:[%s7284_s1 + $0xe0] ss:$8 sps:$4 sm:$0xff]   ;;  %v5634_v42 = vshrl.u32 %v293_v36, 7 }
   0xe   :  { %v5095_v40 = vld [vmem:[%s7284_s1 + $0x1e4] ss:$8 sps:$4 sm:$0xff]   ;;  %v5098_v44 = vld [vmem:[%s7284_s1 + $0x1e0] ss:$8 sps:$4 sm:$0xff]   ;;  %v5099_v45 = vld [vmem:[%s7284_s1 + $0xd4] ss:$8 sps:$4 sm:$0xff]  }
   0xf   :  { %1706 = vmatpush1.bf16.msra.mxu0 %v5061_v14  ;;  %v5101_v46 = vld [vmem:[%s7284_s1 + $0x1d4] ss:$8 sps:$4 sm:$0xff]   ;;  %v5103_v47 = vld [vmem:[%s7284_s1 + $0xd0] ss:$8 sps:$4 sm:$0xff]   ;;  %v5652_v49 = vsub.s32 %v308_v43, %v5634_v42  ;;  %v5105_v50 = vld [vmem:[%s7284_s1 + $0xc4] ss:$8 sps:$4 sm:$0xff]  }
  0x10   :  { %1747 = vmatpush1.bf16.msra.mxu1 %v5062_v15  ;;  %1707 = vmatprep.subr.bf16.mxu0 %v5063_v16  ;;  %v5104_v48 = vld [vmem:[%s7284_s1 + $0x1d0] ss:$8 sps:$4 sm:$0xff]   ;;  %v5107_v51 = vld [vmem:[%s7284_s1 + $0x1c4] ss:$8 sps:$4 sm:$0xff]   ;;  %v5109_v54 = vld [vmem:[%s7284_s1 + $0xc0] ss:$8 sps:$4 sm:$0xff]  }
  0x11   :  { %1748 = vmatprep.subr.bf16.mxu1 %v5065_v17  ;;  %v33_v52 = vld [vmem:[%s7285_s0] sm:$0xff]  ;;  %v5111_v56 = vld [vmem:[%s7284_s1 + $0xb4] ss:$8 sps:$4 sm:$0xff]   ;;  %v5115_v60 = vld [vmem:[%s7284_s1 + $0xb0] ss:$8 sps:$4 sm:$0xff]  }
  0x12   :  { %v312_v53 = vrot.slane %v33_v52, %v5652_v49  ;;  %v5110_v55 = vld [vmem:[%s7284_s1 + $0x1c0] ss:$8 sps:$4 sm:$0xff]   ;;  %v5113_v57 = vld [vmem:[%s7284_s1 + $0x1b4] ss:$8 sps:$4 sm:$0xff]   ;;  %v5116_v61 = vld [vmem:[%s7284_s1 + $0x1b0] ss:$8 sps:$4 sm:$0xff]   ;;  %v305_v1 = vcombine.high %v33_v52, %v33_v52 }
  0x13   :  { %1708 = vmatpush1.bf16.msra.mxu0 %v5067_v18  ;;  %v5117_v62 = vld [vmem:[%s7284_s1 + $0xa4] ss:$8 sps:$4 sm:$0xff]   ;;  %v5121_v2 = vld [vmem:[%s7284_s1 + $0xa0] ss:$8 sps:$4 sm:$0xff]   ;;  %v5123_v4 = vld [vmem:[%s7284_s1 + $0x94] ss:$8 sps:$4 sm:$0xff]  }
  0x14   :  { %1749 = vmatpush1.bf16.msra.mxu1 %v5068_v19  ;;  %1709 = vmatprep.subr.bf16.mxu0 %v5069_v20  ;;  %v320_v58 = vcombine.high %v312_v53, %v312_v53  ;;  %v5119_v63 = vld [vmem:[%s7284_s1 + $0x1a4] ss:$8 sps:$4 sm:$0xff]   ;;  %v5122_v3 = vld [vmem:[%s7284_s1 + $0x1a0] ss:$8 sps:$4 sm:$0xff]   ;;  %v5125_v5 = vld [vmem:[%s7284_s1 + $0x194] ss:$8 sps:$4 sm:$0xff]   ;;  %v5702_v6 = vrot.slane %v305_v1, %v5652_v49  ;;  %v328_v12 = vrot.slane %v312_v53, %v5652_v49 }
  0x15   :  { %1750 = vmatprep.subr.bf16.mxu1 %v5071_v21  ;;  %v5127_v7 = vld [vmem:[%s7284_s1 + $0x90] ss:$8 sps:$4 sm:$0xff]   ;;  %v5129_v9 = vld [vmem:[%s7284_s1 + $0x84] ss:$8 sps:$4 sm:$0xff]   ;;  %v5133_v13 = vld [vmem:[%s7284_s1 + $0x80] ss:$8 sps:$4 sm:$0xff]  }
  0x16   :  { %v342_v59 = vrot.slane %v320_v58, %v5652_v49  ;;  %v5128_v8 = vld [vmem:[%s7284_s1 + $0x190] ss:$8 sps:$4 sm:$0xff]   ;;  %v5131_v10 = vld [vmem:[%s7284_s1 + $0x184] ss:$8 sps:$4 sm:$0xff]   ;;  %v321_v11 = vcombine.high %v5702_v6, %v5702_v6  ;;  %v5134_v14 = vld [vmem:[%s7284_s1 + $0x180] ss:$8 sps:$4 sm:$0xff]   ;;  %v350_v18 = vcombine.high %v328_v12, %v328_v12 }
  0x17   :  { %1710 = vmatpush1.bf16.msra.mxu0 %v5073_v22  ;;  %v5139_v15 = vld [vmem:[%s7284_s1 + $0x274] ss:$8 sps:$4 sm:$0xff]   ;;  %v5137_v19 = vld [vmem:[%s7284_s1 + $0x270] ss:$8 sps:$4 sm:$0xff]   ;;  %v5145_v21 = vld [vmem:[%s7284_s1 + $0x264] ss:$8 sps:$4 sm:$0xff]  }
  0x18   :  { %1751 = vmatpush1.bf16.msra.mxu1 %v5074_v23  ;;  %1711 = vmatprep.subr.bf16.mxu0 %v5075_v24  ;;  %v352_v0 = vcombine.high %v342_v59, %v342_v59  ;;  %v5142_v16 = vld [vmem:[%s7284_s1 + $0x374] ss:$8 sps:$4 sm:$0xff]   ;;  %v349_v17 = vrot.slane %v321_v11, %v5652_v49  ;;  %v5140_v20 = vld [vmem:[%s7284_s1 + $0x370] ss:$8 sps:$4 sm:$0xff]   ;;  %v5148_v22 = vld [vmem:[%s7284_s1 + $0x364] ss:$8 sps:$4 sm:$0xff]  }
  0x19   :  { %1752 = vmatprep.subr.bf16.mxu1 %v5077_v25  ;;  %1731 = vmatprep.mubr.bf16.mxu0 %v342_v59  ;;  %v5143_v24 = vld [vmem:[%s7284_s1 + $0x260] ss:$8 sps:$4 sm:$0xff]   ;;  %v5161_v36 = vld [vmem:[%s7284_s1 + $0x230] ss:$8 sps:$4 sm:$0xff]   ;;  %v5169_v38 = vld [vmem:[%s7284_s1 + $0x224] ss:$8 sps:$4 sm:$0xff]  }
  0x1a   :  { %1772 = vmatprep.mubr.bf16.mxu1 %v352_v0  ;;  %v353_v23 = vcombine.high %v349_v17, %v349_v17  ;;  %v5146_v25 = vld [vmem:[%s7284_s1 + $0x360] ss:$8 sps:$4 sm:$0xff]   ;;  %v5164_v37 = vld [vmem:[%s7284_s1 + $0x330] ss:$8 sps:$4 sm:$0xff]   ;;  %v5175_v43 = vld [vmem:[%s7284_s1 + $0x214] ss:$8 sps:$4 sm:$0xff]  }
  0x1b   :  { %1712 = vmatpush1.bf16.msra.mxu0 %v5079_v26  ;;  %v5151_v26 = vld [vmem:[%s7284_s1 + $0x254] ss:$8 sps:$4 sm:$0xff]   ;;  %v5191_v58 = vld [vmem:[%s7284_s1 + $0x2e0] ss:$8 sps:$4 sm:$0xff]   ;;  %v5205_v0 = vld [vmem:[%s7284_s1 + $0x2c4] ss:$8 sps:$4 sm:$0xff]  }
  0x1c   :  { %1753 = vmatpush1.bf16.msra.mxu1 %v5080_v27  ;;  %1713 = vmatprep.subr.bf16.mxu0 %v5081_v28  ;;  %v5154_v27 = vld [vmem:[%s7284_s1 + $0x354] ss:$8 sps:$4 sm:$0xff]   ;;  %v5149_v28 = vld [vmem:[%s7284_s1 + $0x250] ss:$8 sps:$4 sm:$0xff]   ;;  %v5194_v59 = vld [vmem:[%s7284_s1 + $0x3e0] ss:$8 sps:$4 sm:$0xff]  }
  0x1d   :  { %1754 = vmatprep.subr.bf16.mxu1 %v5083_v29  ;;  %v5152_v29 = vld [vmem:[%s7284_s1 + $0x350] ss:$8 sps:$4 sm:$0xff]   ;;  %v5187_v52 = vld [vmem:[%s7284_s1 + $0x2f4] ss:$8 sps:$4 sm:$0xff]   ;;  %v5208_v1 = vld [vmem:[%s7284_s1 + $0x3c4] ss:$8 sps:$4 sm:$0xff]  }
  0x1e   :  { %v5190_v53 = vld [vmem:[%s7284_s1 + $0x3f4] ss:$8 sps:$4 sm:$0xff]   ;;  %v5891_v11 = vld [vmem:[%s7285_s0 + $0x8] sm:$0xff] }
  0x1f   :  { %1714 = vmatpush1.bf16.msra.mxu0 %v5085_v30  ;;  %v5157_v30 = vld [vmem:[%s7284_s1 + $0x244] ss:$8 sps:$4 sm:$0xff]  }
  0x20   :  { %1755 = vmatpush1.bf16.msra.mxu1 %v5086_v31  ;;  %1715 = vmatprep.subr.bf16.mxu0 %v5087_v32  ;;  %v5160_v31 = vld [vmem:[%s7284_s1 + $0x344] ss:$8 sps:$4 sm:$0xff]   ;;  %v5155_v32 = vld [vmem:[%s7284_s1 + $0x240] ss:$8 sps:$4 sm:$0xff]  }
  0x21   :  { %1756 = vmatprep.subr.bf16.mxu1 %v5089_v33  ;;  %v5158_v33 = vld [vmem:[%s7284_s1 + $0x340] ss:$8 sps:$4 sm:$0xff]  }
  0x23   :  { %1716 = vmatpush2.bf16.msra.mxu0 %v5091_v34  ;;  %v5163_v34 = vld [vmem:[%s7284_s1 + $0x234] ss:$8 sps:$4 sm:$0xff]  }
  0x24   :  { %1757 = vmatpush2.bf16.msra.mxu1 %v5092_v35  ;;  %1717 = vmatprep.subr.bf16.mxu0 %v5093_v39  ;;  %v5166_v35 = vld [vmem:[%s7284_s1 + $0x334] ss:$8 sps:$4 sm:$0xff]   ;;  %v5172_v39 = vld [vmem:[%s7284_s1 + $0x324] ss:$8 sps:$4 sm:$0xff]  }
  0x25   :  { %1758 = vmatprep.subr.bf16.mxu1 %v5095_v40  ;;  %v5167_v40 = vld [vmem:[%s7284_s1 + $0x220] ss:$8 sps:$4 sm:$0xff]  }
  0x27   :  { %1718 = vmatpush2.bf16.msra.mxu0 %v5097_v41  ;;  %v5170_v41 = vld [vmem:[%s7284_s1 + $0x320] ss:$8 sps:$4 sm:$0xff]  }
  0x28   :  { %1759 = vmatpush2.bf16.msra.mxu1 %v5098_v44  ;;  %1719 = vmatprep.subr.bf16.mxu0 %v5099_v45  ;;  %v5178_v44 = vld [vmem:[%s7284_s1 + $0x314] ss:$8 sps:$4 sm:$0xff]   ;;  %v5173_v45 = vld [vmem:[%s7284_s1 + $0x210] ss:$8 sps:$4 sm:$0xff]  }
  0x29   :  { %1760 = vmatprep.subr.bf16.mxu1 %v5101_v46  ;;  %v5176_v46 = vld [vmem:[%s7284_s1 + $0x310] ss:$8 sps:$4 sm:$0xff]  }
  0x2b   :  { %1720 = vmatpush2.bf16.msra.mxu0 %v5103_v47  ;;  %v5181_v47 = vld [vmem:[%s7284_s1 + $0x204] ss:$8 sps:$4 sm:$0xff]  }
  0x2c   :  { %1761 = vmatpush2.bf16.msra.mxu1 %v5104_v48  ;;  %1721 = vmatprep.subr.bf16.mxu0 %v5105_v50  ;;  %v5184_v48 = vld [vmem:[%s7284_s1 + $0x304] ss:$8 sps:$4 sm:$0xff]   ;;  %v5179_v50 = vld [vmem:[%s7284_s1 + $0x200] ss:$8 sps:$4 sm:$0xff]  }
  0x2d   :  { %1762 = vmatprep.subr.bf16.mxu1 %v5107_v51  ;;  %v5182_v51 = vld [vmem:[%s7284_s1 + $0x300] ss:$8 sps:$4 sm:$0xff]  }
  0x2f   :  { %1722 = vmatpush2.bf16.msra.mxu0 %v5109_v54  ;;  %v5185_v54 = vld [vmem:[%s7284_s1 + $0x2f0] ss:$8 sps:$4 sm:$0xff]  }
  0x30   :  { %1763 = vmatpush2.bf16.msra.mxu1 %v5110_v55  ;;  %1723 = vmatprep.subr.bf16.mxu0 %v5111_v56  ;;  %v5188_v55 = vld [vmem:[%s7284_s1 + $0x3f0] ss:$8 sps:$4 sm:$0xff]   ;;  %v5193_v56 = vld [vmem:[%s7284_s1 + $0x2e4] ss:$8 sps:$4 sm:$0xff]  }
  0x31   :  { %1764 = vmatprep.subr.bf16.mxu1 %v5113_v57  ;;  %v5196_v57 = vld [vmem:[%s7284_s1 + $0x3e4] ss:$8 sps:$4 sm:$0xff]  }
  0x33   :  { %1724 = vmatpush2.bf16.msra.mxu0 %v5115_v60  ;;  %v5199_v60 = vld [vmem:[%s7284_s1 + $0x2d4] ss:$8 sps:$4 sm:$0xff]  }
  0x34   :  { %1765 = vmatpush2.bf16.msra.mxu1 %v5116_v61  ;;  %1725 = vmatprep.subr.bf16.mxu0 %v5117_v62  ;;  %v5202_v61 = vld [vmem:[%s7284_s1 + $0x3d4] ss:$8 sps:$4 sm:$0xff]   ;;  %v5197_v62 = vld [vmem:[%s7284_s1 + $0x2d0] ss:$8 sps:$4 sm:$0xff]  }
  0x35   :  { %1766 = vmatprep.subr.bf16.mxu1 %v5119_v63  ;;  %v5200_v63 = vld [vmem:[%s7284_s1 + $0x3d0] ss:$8 sps:$4 sm:$0xff]  }
  0x37   :  { %1726 = vmatpush2.bf16.msra.mxu0 %v5121_v2  ;;  %v5203_v2 = vld [vmem:[%s7284_s1 + $0x2c0] ss:$8 sps:$4 sm:$0xff]  }
  0x38   :  { %1767 = vmatpush2.bf16.msra.mxu1 %v5122_v3  ;;  %1727 = vmatprep.subr.bf16.mxu0 %v5123_v4  ;;  %v5206_v3 = vld [vmem:[%s7284_s1 + $0x3c0] ss:$8 sps:$4 sm:$0xff]   ;;  %v5211_v4 = vld [vmem:[%s7284_s1 + $0x2b4] ss:$8 sps:$4 sm:$0xff]  }
  0x39   :  { %1768 = vmatprep.subr.bf16.mxu1 %v5125_v5  ;;  %v5214_v5 = vld [vmem:[%s7284_s1 + $0x3b4] ss:$8 sps:$4 sm:$0xff]  }
  0x3b   :  { %1728 = vmatpush2.bf16.msra.mxu0 %v5127_v7  ;;  %v5209_v7 = vld [vmem:[%s7284_s1 + $0x2b0] ss:$8 sps:$4 sm:$0xff]  }
  0x3c   :  { %1769 = vmatpush2.bf16.msra.mxu1 %v5128_v8  ;;  %1729 = vmatprep.subr.bf16.mxu0 %v5129_v9  ;;  %v5212_v8 = vld [vmem:[%s7284_s1 + $0x3b0] ss:$8 sps:$4 sm:$0xff]   ;;  %v5217_v9 = vld [vmem:[%s7284_s1 + $0x2a4] ss:$8 sps:$4 sm:$0xff]  }
  0x3d   :  { %1770 = vmatprep.subr.bf16.mxu1 %v5131_v10  ;;  %v5220_v10 = vld [vmem:[%s7284_s1 + $0x3a4] ss:$8 sps:$4 sm:$0xff]  }
  0x3f   :  { %1730 = vmatpush2.bf16.msra.mxu0 %v5133_v13  ;;  %v5218_v13 = vld [vmem:[%s7284_s1 + $0x3a0] ss:$8 sps:$4 sm:$0xff]  }
  0x40   :  { %1771 = vmatpush2.bf16.msra.mxu1 %v5134_v14  ;;  %1781 = vmatprep.subr.bf16.mxu0 %v5139_v15  ;;  %v5223_v14 = vld [vmem:[%s7284_s1 + $0x294] ss:$8 sps:$4 sm:$0xff]  }
  0x41   :  { %1822 = vmatprep.subr.bf16.mxu1 %v5142_v16  ;;  %v5226_v15 = vld [vmem:[%s7284_s1 + $0x394] ss:$8 sps:$4 sm:$0xff]   ;;  %v5907_v16 = vrot.slane %v5891_v11, %v5652_v49 }
  0x42   :  { %1732 = vmatmul.mubr.bf16.vlgmr.msra.gmra.mxu0 %v328_v12  ;;  %v5215_v12 = vld [vmem:[%s7284_s1 + $0x2a0] ss:$8 sps:$4 sm:$0xff]  }
  0x43   :  { %1773 = vmatmul.mubr.bf16.vlgmr.msra.gmra.mxu1 %v350_v18  ;;  %1782 = vmatpush1.bf16.msra.mxu0 %v5137_v19  ;;  %v5224_v18 = vld [vmem:[%s7284_s1 + $0x390] ss:$8 sps:$4 sm:$0xff]   ;;  %v5229_v19 = vld [vmem:[%s7284_s1 + $0x284] ss:$8 sps:$4 sm:$0xff]  }
  0x44   :  { %1823 = vmatpush1.bf16.msra.mxu1 %v5140_v20  ;;  %1783 = vmatprep.subr.bf16.mxu0 %v5145_v21  ;;  %v5232_v20 = vld [vmem:[%s7284_s1 + $0x384] ss:$8 sps:$4 sm:$0xff]   ;;  %v369_v21 = vcombine.high %v5907_v16, %v5907_v16 }
  0x45   :  { %1824 = vmatprep.subr.bf16.mxu1 %v5148_v22  ;;  %1813 = vmatprep.mubr.bf16.mxu0 %v349_v17  ;;  %v5221_v17 = vld [vmem:[%s7284_s1 + $0x290] ss:$8 sps:$4 sm:$0xff]   ;;  %v335_v22 = vrot.slane %v5702_v6, %v5652_v49  ;;  %v5238_v6 = vld [vmem:[%s7284_s1 + $0x574] ss:$8 sps:$4 sm:$0xff]  }
  0x46   :  { %1854 = vmatprep.mubr.bf16.mxu1 %v353_v23  ;;  %v5227_v23 = vld [vmem:[%s7284_s1 + $0x280] ss:$8 sps:$4 sm:$0xff]  }
  0x47   :  { %1784 = vmatpush1.bf16.msra.mxu0 %v5143_v24  ;;  %v5230_v24 = vld [vmem:[%s7284_s1 + $0x380] ss:$8 sps:$4 sm:$0xff]  }
  0x48   :  { %1825 = vmatpush1.bf16.msra.mxu1 %v5146_v25  ;;  %1785 = vmatprep.subr.bf16.mxu0 %v5151_v26  ;;  %v5235_v25 = vld [vmem:[%s7284_s1 + $0x474] ss:$8 sps:$4 sm:$0xff]   ;;  %v391_v26 = vrot.slane %v369_v21, %v5652_v49  ;;  %v5316_v21 = vld [vmem:[%s7284_s1 + $0x5a4] ss:$8 sps:$4 sm:$0xff]  }
  0x49   :  { %1826 = vmatprep.subr.bf16.mxu1 %v5154_v27  ;;  %v351_v27 = vcombine.high %v335_v22, %v335_v22 }
  0x4b   :  { %1786 = vmatpush1.bf16.msra.mxu0 %v5149_v28  ;;  %v5233_v28 = vld [vmem:[%s7284_s1 + $0x470] ss:$8 sps:$4 sm:$0xff]  }
  0x4c   :  { %1827 = vmatpush1.bf16.msra.mxu1 %v5152_v29  ;;  %1787 = vmatprep.subr.bf16.mxu0 %v5157_v30  ;;  %v5236_v29 = vld [vmem:[%s7284_s1 + $0x570] ss:$8 sps:$4 sm:$0xff]   ;;  %v5241_v30 = vld [vmem:[%s7284_s1 + $0x464] ss:$8 sps:$4 sm:$0xff]  }
  0x4d   :  { %1828 = vmatprep.subr.bf16.mxu1 %v5160_v31  ;;  %v5244_v31 = vld [vmem:[%s7284_s1 + $0x564] ss:$8 sps:$4 sm:$0xff]  }
  0x4f   :  { %1788 = vmatpush1.bf16.msra.mxu0 %v5155_v32  ;;  %v401_v32 = vcombine.high %v391_v26, %v391_v26 }
  0x50   :  { %1829 = vmatpush1.bf16.msra.mxu1 %v5158_v33  ;;  %1789 = vmatprep.subr.bf16.mxu0 %v5163_v34  ;;  %v5239_v33 = vld [vmem:[%s7284_s1 + $0x460] ss:$8 sps:$4 sm:$0xff]  }
  0x51   :  { %1830 = vmatprep.subr.bf16.mxu1 %v5166_v35  ;;  %v5242_v34 = vld [vmem:[%s7284_s1 + $0x560] ss:$8 sps:$4 sm:$0xff]   ;;  %v5247_v35 = vld [vmem:[%s7284_s1 + $0x454] ss:$8 sps:$4 sm:$0xff]  }
  0x53   :  { %1790 = vmatpush1.bf16.msra.mxu0 %v5161_v36  ;;  %v5250_v36 = vld [vmem:[%s7284_s1 + $0x554] ss:$8 sps:$4 sm:$0xff]  }
  0x54   :  { %1831 = vmatpush1.bf16.msra.mxu1 %v5164_v37  ;;  %1791 = vmatprep.subr.bf16.mxu0 %v5169_v38  ;;  %v5245_v37 = vld [vmem:[%s7284_s1 + $0x450] ss:$8 sps:$4 sm:$0xff]  }
  0x55   :  { %1832 = vmatprep.subr.bf16.mxu1 %v5172_v39  ;;  %v5248_v38 = vld [vmem:[%s7284_s1 + $0x550] ss:$8 sps:$4 sm:$0xff]   ;;  %v5253_v39 = vld [vmem:[%s7284_s1 + $0x444] ss:$8 sps:$4 sm:$0xff]  }
  0x57   :  { %1792 = vmatpush1.bf16.msra.mxu0 %v5167_v40  ;;  %v5256_v40 = vld [vmem:[%s7284_s1 + $0x544] ss:$8 sps:$4 sm:$0xff]  }
  0x58   :  { %1833 = vmatpush1.bf16.msra.mxu1 %v5170_v41  ;;  %1793 = vmatprep.subr.bf16.mxu0 %v5175_v43  ;;  %v5251_v41 = vld [vmem:[%s7284_s1 + $0x440] ss:$8 sps:$4 sm:$0xff]  }
  0x59   :  { %1834 = vmatprep.subr.bf16.mxu1 %v5178_v44  ;;  %v5254_v43 = vld [vmem:[%s7284_s1 + $0x540] ss:$8 sps:$4 sm:$0xff]   ;;  %v5259_v44 = vld [vmem:[%s7284_s1 + $0x434] ss:$8 sps:$4 sm:$0xff]  }
  0x5b   :  { %1794 = vmatpush1.bf16.msra.mxu0 %v5173_v45  ;;  %v5262_v45 = vld [vmem:[%s7284_s1 + $0x534] ss:$8 sps:$4 sm:$0xff]  }
  0x5c   :  { %1835 = vmatpush1.bf16.msra.mxu1 %v5176_v46  ;;  %1795 = vmatprep.subr.bf16.mxu0 %v5181_v47  ;;  %v5257_v46 = vld [vmem:[%s7284_s1 + $0x430] ss:$8 sps:$4 sm:$0xff]  }
  0x5d   :  { %1836 = vmatprep.subr.bf16.mxu1 %v5184_v48  ;;  %v5260_v47 = vld [vmem:[%s7284_s1 + $0x530] ss:$8 sps:$4 sm:$0xff]   ;;  %v5265_v48 = vld [vmem:[%s7284_s1 + $0x424] ss:$8 sps:$4 sm:$0xff]  }
  0x5f   :  { %1796 = vmatpush1.bf16.msra.mxu0 %v5179_v50  ;;  %v5268_v50 = vld [vmem:[%s7284_s1 + $0x524] ss:$8 sps:$4 sm:$0xff]  }
  0x60   :  { %1837 = vmatpush1.bf16.msra.mxu1 %v5182_v51  ;;  %1797 = vmatprep.subr.bf16.mxu0 %v5187_v52  ;;  %v5263_v51 = vld [vmem:[%s7284_s1 + $0x420] ss:$8 sps:$4 sm:$0xff]  }
  0x61   :  { %1838 = vmatprep.subr.bf16.mxu1 %v5190_v53  ;;  %v5266_v52 = vld [vmem:[%s7284_s1 + $0x520] ss:$8 sps:$4 sm:$0xff]   ;;  %v5271_v53 = vld [vmem:[%s7284_s1 + $0x414] ss:$8 sps:$4 sm:$0xff]  }
  0x63   :  { %1798 = vmatpush2.bf16.msra.mxu0 %v5185_v54  ;;  %v5274_v54 = vld [vmem:[%s7284_s1 + $0x514] ss:$8 sps:$4 sm:$0xff]  }
  0x64   :  { %1839 = vmatpush2.bf16.msra.mxu1 %v5188_v55  ;;  %1799 = vmatprep.subr.bf16.mxu0 %v5193_v56  ;;  %v5269_v55 = vld [vmem:[%s7284_s1 + $0x410] ss:$8 sps:$4 sm:$0xff]  }
  0x65   :  { %1840 = vmatprep.subr.bf16.mxu1 %v5196_v57  ;;  %v5272_v56 = vld [vmem:[%s7284_s1 + $0x510] ss:$8 sps:$4 sm:$0xff]   ;;  %v5277_v57 = vld [vmem:[%s7284_s1 + $0x404] ss:$8 sps:$4 sm:$0xff]  }
  0x67   :  { %1800 = vmatpush2.bf16.msra.mxu0 %v5191_v58  ;;  %v5280_v58 = vld [vmem:[%s7284_s1 + $0x504] ss:$8 sps:$4 sm:$0xff]  }
  0x68   :  { %1841 = vmatpush2.bf16.msra.mxu1 %v5194_v59  ;;  %1801 = vmatprep.subr.bf16.mxu0 %v5199_v60  ;;  %v5275_v59 = vld [vmem:[%s7284_s1 + $0x400] ss:$8 sps:$4 sm:$0xff]  }
  0x69   :  { %1842 = vmatprep.subr.bf16.mxu1 %v5202_v61  ;;  %v5278_v60 = vld [vmem:[%s7284_s1 + $0x500] ss:$8 sps:$4 sm:$0xff]   ;;  %v5283_v61 = vld [vmem:[%s7284_s1 + $0x4f4] ss:$8 sps:$4 sm:$0xff]  }
  0x6b   :  { %1802 = vmatpush2.bf16.msra.mxu0 %v5197_v62  ;;  %v5286_v62 = vld [vmem:[%s7284_s1 + $0x5f4] ss:$8 sps:$4 sm:$0xff]  }
  0x6c   :  { %1843 = vmatpush2.bf16.msra.mxu1 %v5200_v63  ;;  %1803 = vmatprep.subr.bf16.mxu0 %v5205_v0  ;;  %v5281_v63 = vld [vmem:[%s7284_s1 + $0x4f0] ss:$8 sps:$4 sm:$0xff]  }
  0x6d   :  { %1844 = vmatprep.subr.bf16.mxu1 %v5208_v1  ;;  %v5284_v0 = vld [vmem:[%s7284_s1 + $0x5f0] ss:$8 sps:$4 sm:$0xff]   ;;  %v5289_v1 = vld [vmem:[%s7284_s1 + $0x4e4] ss:$8 sps:$4 sm:$0xff]  }
  0x6f   :  { %1804 = vmatpush2.bf16.msra.mxu0 %v5203_v2  ;;  %v5292_v2 = vld [vmem:[%s7284_s1 + $0x5e4] ss:$8 sps:$4 sm:$0xff]  }
  0x70   :  { %1845 = vmatpush2.bf16.msra.mxu1 %v5206_v3  ;;  %1805 = vmatprep.subr.bf16.mxu0 %v5211_v4  ;;  %v5287_v3 = vld [vmem:[%s7284_s1 + $0x4e0] ss:$8 sps:$4 sm:$0xff]  }
  0x71   :  { %1846 = vmatprep.subr.bf16.mxu1 %v5214_v5  ;;  %v5290_v4 = vld [vmem:[%s7284_s1 + $0x5e0] ss:$8 sps:$4 sm:$0xff]   ;;  %v5295_v5 = vld [vmem:[%s7284_s1 + $0x4d4] ss:$8 sps:$4 sm:$0xff]  }
  0x73   :  { %1806 = vmatpush2.bf16.msra.mxu0 %v5209_v7  ;;  %v5298_v7 = vld [vmem:[%s7284_s1 + $0x5d4] ss:$8 sps:$4 sm:$0xff]  }
  0x74   :  { %1847 = vmatpush2.bf16.msra.mxu1 %v5212_v8  ;;  %1807 = vmatprep.subr.bf16.mxu0 %v5217_v9  ;;  %v5293_v8 = vld [vmem:[%s7284_s1 + $0x4d0] ss:$8 sps:$4 sm:$0xff]  }
  0x75   :  { %1848 = vmatprep.subr.bf16.mxu1 %v5220_v10  ;;  %v5296_v9 = vld [vmem:[%s7284_s1 + $0x5d0] ss:$8 sps:$4 sm:$0xff]   ;;  %v5301_v10 = vld [vmem:[%s7284_s1 + $0x4c4] ss:$8 sps:$4 sm:$0xff]  }
  0x77   :  { %1808 = vmatpush2.bf16.msra.mxu0 %v5215_v12  ;;  %v5304_v12 = vld [vmem:[%s7284_s1 + $0x5c4] ss:$8 sps:$4 sm:$0xff]  }
  0x78   :  { %1849 = vmatpush2.bf16.msra.mxu1 %v5218_v13  ;;  %1809 = vmatprep.subr.bf16.mxu0 %v5223_v14  ;;  %v5299_v13 = vld [vmem:[%s7284_s1 + $0x4c0] ss:$8 sps:$4 sm:$0xff]  }
  0x79   :  { %1850 = vmatprep.subr.bf16.mxu1 %v5226_v15  ;;  %v5302_v14 = vld [vmem:[%s7284_s1 + $0x5c0] ss:$8 sps:$4 sm:$0xff]   ;;  %v5307_v15 = vld [vmem:[%s7284_s1 + $0x4b4] ss:$8 sps:$4 sm:$0xff]  }
  0x7b   :  { %1810 = vmatpush2.bf16.msra.mxu0 %v5221_v17  ;;  %v5310_v17 = vld [vmem:[%s7284_s1 + $0x5b4] ss:$8 sps:$4 sm:$0xff]  }
  0x7c   :  { %1851 = vmatpush2.bf16.msra.mxu1 %v5224_v18  ;;  %1811 = vmatprep.subr.bf16.mxu0 %v5229_v19  ;;  %v5305_v18 = vld [vmem:[%s7284_s1 + $0x4b0] ss:$8 sps:$4 sm:$0xff]  }
  0x7d   :  { %1852 = vmatprep.subr.bf16.mxu1 %v5232_v20  ;;  %v5308_v19 = vld [vmem:[%s7284_s1 + $0x5b0] ss:$8 sps:$4 sm:$0xff]   ;;  %v5313_v20 = vld [vmem:[%s7284_s1 + $0x4a4] ss:$8 sps:$4 sm:$0xff]  }
  0x7f   :  { %1812 = vmatpush2.bf16.msra.mxu0 %v5227_v23  ;;  %v5311_v23 = vld [vmem:[%s7284_s1 + $0x4a0] ss:$8 sps:$4 sm:$0xff]  }
  0x80   :  { %1853 = vmatpush2.bf16.msra.mxu1 %v5230_v24  ;;  %1863 = vmatprep.subr.bf16.mxu0 %v5235_v25  ;;  %v5314_v24 = vld [vmem:[%s7284_s1 + $0x5a0] ss:$8 sps:$4 sm:$0xff]   ;;  %v5319_v25 = vld [vmem:[%s7284_s1 + $0x494] ss:$8 sps:$4 sm:$0xff]  }
  0x81   :  { %1904 = vmatprep.subr.bf16.mxu1 %v5238_v6 }
  0x82   :  { %1814 = vmatmul.mubr.bf16.vlgmr.msra.gmra.mxu0 %v335_v22  ;;  %v354_v22 = vcombine.high %v5891_v11, %v5891_v11  ;;  %v5322_v11 = vld [vmem:[%s7284_s1 + $0x594] ss:$8 sps:$4 sm:$0xff]  }
  0x83   :  { %1855 = vmatmul.mubr.bf16.vlgmr.msra.gmra.mxu1 %v351_v27  ;;  %1864 = vmatpush1.bf16.msra.mxu0 %v5233_v28  ;;  %v5320_v27 = vld [vmem:[%s7284_s1 + $0x590] ss:$8 sps:$4 sm:$0xff]   ;;  %v5325_v28 = vld [vmem:[%s7284_s1 + $0x484] ss:$8 sps:$4 sm:$0xff]  }
  0x84   :  { %1905 = vmatpush1.bf16.msra.mxu1 %v5236_v29  ;;  %1865 = vmatprep.subr.bf16.mxu0 %v5241_v30  ;;  %v6109_v6 = vrot.slane %v354_v22, %v5652_v49  ;;  %v5328_v29 = vld [vmem:[%s7284_s1 + $0x584] ss:$8 sps:$4 sm:$0xff]  }
  0x85   :  { %1906 = vmatprep.subr.bf16.mxu1 %v5244_v31  ;;  %1895 = vmatprep.mubr.bf16.mxu0 %v391_v26  ;;  %v5317_v26 = vld [vmem:[%s7284_s1 + $0x490] ss:$8 sps:$4 sm:$0xff]   ;;  %v377_v31 = vrot.slane %v5907_v16, %v5652_v49  ;;  %v5334_v16 = vld [vmem:[%s7284_s1 + $0x774] ss:$8 sps:$4 sm:$0xff]   ;;  %v5400_v22 = vld [vmem:[%s7284_s1 + $0x7c4] ss:$8 sps:$4 sm:$0xff]  }
  0x86   :  { %1936 = vmatprep.mubr.bf16.mxu1 %v401_v32  ;;  %v370_v30 = vcombine.high %v6109_v6, %v6109_v6  ;;  %v5323_v32 = vld [vmem:[%s7284_s1 + $0x480] ss:$8 sps:$4 sm:$0xff]  }
  0x87   :  { %1866 = vmatpush1.bf16.msra.mxu0 %v5239_v33  ;;  %v5326_v33 = vld [vmem:[%s7284_s1 + $0x580] ss:$8 sps:$4 sm:$0xff]  }
  0x88   :  { %1907 = vmatpush1.bf16.msra.mxu1 %v5242_v34  ;;  %1867 = vmatprep.subr.bf16.mxu0 %v5247_v35  ;;  %v5331_v34 = vld [vmem:[%s7284_s1 + $0x674] ss:$8 sps:$4 sm:$0xff]   ;;  %v398_v35 = vrot.slane %v370_v30, %v5652_v49  ;;  %v5407_v30 = vld [vmem:[%s7284_s1 + $0x6a0] ss:$8 sps:$4 sm:$0xff]  }
  0x89   :  { %1908 = vmatprep.subr.bf16.mxu1 %v5250_v36  ;;  %v399_v36 = vcombine.high %v377_v31, %v377_v31 }
  0x8b   :  { %1868 = vmatpush1.bf16.msra.mxu0 %v5245_v37  ;;  %v5329_v37 = vld [vmem:[%s7284_s1 + $0x670] ss:$8 sps:$4 sm:$0xff]  }
  0x8c   :  { %1909 = vmatpush1.bf16.msra.mxu1 %v5248_v38  ;;  %1869 = vmatprep.subr.bf16.mxu0 %v5253_v39  ;;  %v5332_v38 = vld [vmem:[%s7284_s1 + $0x770] ss:$8 sps:$4 sm:$0xff]   ;;  %v5337_v39 = vld [vmem:[%s7284_s1 + $0x664] ss:$8 sps:$4 sm:$0xff]  }
  0x8d   :  { %1910 = vmatprep.subr.bf16.mxu1 %v5256_v40  ;;  %v5340_v40 = vld [vmem:[%s7284_s1 + $0x764] ss:$8 sps:$4 sm:$0xff]  }
  0x8f   :  { %1870 = vmatpush1.bf16.msra.mxu0 %v5251_v41  ;;  %v402_v41 = vcombine.high %v398_v35, %v398_v35 }
  0x90   :  { %1911 = vmatpush1.bf16.msra.mxu1 %v5254_v43  ;;  %1871 = vmatprep.subr.bf16.mxu0 %v5259_v44  ;;  %v5335_v43 = vld [vmem:[%s7284_s1 + $0x660] ss:$8 sps:$4 sm:$0xff]  }
  0x91   :  { %1912 = vmatprep.subr.bf16.mxu1 %v5262_v45  ;;  %v5338_v44 = vld [vmem:[%s7284_s1 + $0x760] ss:$8 sps:$4 sm:$0xff]   ;;  %v5343_v45 = vld [vmem:[%s7284_s1 + $0x654] ss:$8 sps:$4 sm:$0xff]  }
  0x93   :  { %1872 = vmatpush1.bf16.msra.mxu0 %v5257_v46  ;;  %v5346_v46 = vld [vmem:[%s7284_s1 + $0x754] ss:$8 sps:$4 sm:$0xff]  }
  0x94   :  { %1913 = vmatpush1.bf16.msra.mxu1 %v5260_v47  ;;  %1873 = vmatprep.subr.bf16.mxu0 %v5265_v48  ;;  %v5341_v47 = vld [vmem:[%s7284_s1 + $0x650] ss:$8 sps:$4 sm:$0xff]  }
  0x95   :  { %1914 = vmatprep.subr.bf16.mxu1 %v5268_v50  ;;  %v5344_v48 = vld [vmem:[%s7284_s1 + $0x750] ss:$8 sps:$4 sm:$0xff]   ;;  %v5349_v50 = vld [vmem:[%s7284_s1 + $0x644] ss:$8 sps:$4 sm:$0xff]  }
  0x97   :  { %1874 = vmatpush1.bf16.msra.mxu0 %v5263_v51  ;;  %v5352_v51 = vld [vmem:[%s7284_s1 + $0x744] ss:$8 sps:$4 sm:$0xff]  }
  0x98   :  { %1915 = vmatpush1.bf16.msra.mxu1 %v5266_v52  ;;  %1875 = vmatprep.subr.bf16.mxu0 %v5271_v53  ;;  %v5347_v52 = vld [vmem:[%s7284_s1 + $0x640] ss:$8 sps:$4 sm:$0xff]  }
  0x99   :  { %1916 = vmatprep.subr.bf16.mxu1 %v5274_v54  ;;  %v5350_v53 = vld [vmem:[%s7284_s1 + $0x740] ss:$8 sps:$4 sm:$0xff]   ;;  %v5355_v54 = vld [vmem:[%s7284_s1 + $0x634] ss:$8 sps:$4 sm:$0xff]  }
  0x9b   :  { %1876 = vmatpush1.bf16.msra.mxu0 %v5269_v55  ;;  %v5358_v55 = vld [vmem:[%s7284_s1 + $0x734] ss:$8 sps:$4 sm:$0xff]  }
  0x9c   :  { %1917 = vmatpush1.bf16.msra.mxu1 %v5272_v56  ;;  %1877 = vmatprep.subr.bf16.mxu0 %v5277_v57  ;;  %v5353_v56 = vld [vmem:[%s7284_s1 + $0x630] ss:$8 sps:$4 sm:$0xff]  }
  0x9d   :  { %1918 = vmatprep.subr.bf16.mxu1 %v5280_v58  ;;  %v5356_v57 = vld [vmem:[%s7284_s1 + $0x730] ss:$8 sps:$4 sm:$0xff]   ;;  %v5361_v58 = vld [vmem:[%s7284_s1 + $0x624] ss:$8 sps:$4 sm:$0xff]  }
  0x9f   :  { %1878 = vmatpush1.bf16.msra.mxu0 %v5275_v59  ;;  %v5364_v59 = vld [vmem:[%s7284_s1 + $0x724] ss:$8 sps:$4 sm:$0xff]  }
  0xa0   :  { %1919 = vmatpush1.bf16.msra.mxu1 %v5278_v60  ;;  %1879 = vmatprep.subr.bf16.mxu0 %v5283_v61  ;;  %v5359_v60 = vld [vmem:[%s7284_s1 + $0x620] ss:$8 sps:$4 sm:$0xff]  }
  0xa1   :  { %1920 = vmatprep.subr.bf16.mxu1 %v5286_v62  ;;  %v5362_v61 = vld [vmem:[%s7284_s1 + $0x720] ss:$8 sps:$4 sm:$0xff]   ;;  %v5367_v62 = vld [vmem:[%s7284_s1 + $0x614] ss:$8 sps:$4 sm:$0xff]  }
  0xa3   :  { %1880 = vmatpush2.bf16.msra.mxu0 %v5281_v63  ;;  %v5370_v63 = vld [vmem:[%s7284_s1 + $0x714] ss:$8 sps:$4 sm:$0xff]  }
  0xa4   :  { %1921 = vmatpush2.bf16.msra.mxu1 %v5284_v0  ;;  %1881 = vmatprep.subr.bf16.mxu0 %v5289_v1  ;;  %v5365_v0 = vld [vmem:[%s7284_s1 + $0x610] ss:$8 sps:$4 sm:$0xff]  }
  0xa5   :  { %1922 = vmatprep.subr.bf16.mxu1 %v5292_v2  ;;  %v5368_v1 = vld [vmem:[%s7284_s1 + $0x710] ss:$8 sps:$4 sm:$0xff]   ;;  %v5373_v2 = vld [vmem:[%s7284_s1 + $0x604] ss:$8 sps:$4 sm:$0xff]  }
  0xa7   :  { %1882 = vmatpush2.bf16.msra.mxu0 %v5287_v3  ;;  %v5376_v3 = vld [vmem:[%s7284_s1 + $0x704] ss:$8 sps:$4 sm:$0xff]  }
  0xa8   :  { %1923 = vmatpush2.bf16.msra.mxu1 %v5290_v4  ;;  %1883 = vmatprep.subr.bf16.mxu0 %v5295_v5  ;;  %v5371_v4 = vld [vmem:[%s7284_s1 + $0x600] ss:$8 sps:$4 sm:$0xff]  }
  0xa9   :  { %1924 = vmatprep.subr.bf16.mxu1 %v5298_v7  ;;  %v5374_v5 = vld [vmem:[%s7284_s1 + $0x700] ss:$8 sps:$4 sm:$0xff]   ;;  %v5379_v7 = vld [vmem:[%s7284_s1 + $0x6f4] ss:$8 sps:$4 sm:$0xff]  }
  0xab   :  { %1884 = vmatpush2.bf16.msra.mxu0 %v5293_v8  ;;  %v5382_v8 = vld [vmem:[%s7284_s1 + $0x7f4] ss:$8 sps:$4 sm:$0xff]  }
  0xac   :  { %1925 = vmatpush2.bf16.msra.mxu1 %v5296_v9  ;;  %1885 = vmatprep.subr.bf16.mxu0 %v5301_v10  ;;  %v5377_v9 = vld [vmem:[%s7284_s1 + $0x6f0] ss:$8 sps:$4 sm:$0xff]  }
  0xad   :  { %1926 = vmatprep.subr.bf16.mxu1 %v5304_v12  ;;  %v5380_v10 = vld [vmem:[%s7284_s1 + $0x7f0] ss:$8 sps:$4 sm:$0xff]   ;;  %v5385_v12 = vld [vmem:[%s7284_s1 + $0x6e4] ss:$8 sps:$4 sm:$0xff]  }
  0xaf   :  { %1886 = vmatpush2.bf16.msra.mxu0 %v5299_v13  ;;  %v5388_v13 = vld [vmem:[%s7284_s1 + $0x7e4] ss:$8 sps:$4 sm:$0xff]  }
  0xb0   :  { %1927 = vmatpush2.bf16.msra.mxu1 %v5302_v14  ;;  %1887 = vmatprep.subr.bf16.mxu0 %v5307_v15  ;;  %v5383_v14 = vld [vmem:[%s7284_s1 + $0x6e0] ss:$8 sps:$4 sm:$0xff]  }
  0xb1   :  { %1928 = vmatprep.subr.bf16.mxu1 %v5310_v17  ;;  %v5386_v15 = vld [vmem:[%s7284_s1 + $0x7e0] ss:$8 sps:$4 sm:$0xff]   ;;  %v5391_v17 = vld [vmem:[%s7284_s1 + $0x6d4] ss:$8 sps:$4 sm:$0xff]  }
  0xb3   :  { %1888 = vmatpush2.bf16.msra.mxu0 %v5305_v18  ;;  %v5394_v18 = vld [vmem:[%s7284_s1 + $0x7d4] ss:$8 sps:$4 sm:$0xff]  }
  0xb4   :  { %1929 = vmatpush2.bf16.msra.mxu1 %v5308_v19  ;;  %1889 = vmatprep.subr.bf16.mxu0 %v5313_v20  ;;  %v5389_v19 = vld [vmem:[%s7284_s1 + $0x6d0] ss:$8 sps:$4 sm:$0xff]  }
  0xb5   :  { %1930 = vmatprep.subr.bf16.mxu1 %v5316_v21  ;;  %v5392_v20 = vld [vmem:[%s7284_s1 + $0x7d0] ss:$8 sps:$4 sm:$0xff]   ;;  %v5397_v21 = vld [vmem:[%s7284_s1 + $0x6c4] ss:$8 sps:$4 sm:$0xff]  }
  0xb7   :  { %1890 = vmatpush2.bf16.msra.mxu0 %v5311_v23  ;;  %v5395_v23 = vld [vmem:[%s7284_s1 + $0x6c0] ss:$8 sps:$4 sm:$0xff]  }
  0xb8   :  { %1931 = vmatpush2.bf16.msra.mxu1 %v5314_v24  ;;  %1891 = vmatprep.subr.bf16.mxu0 %v5319_v25  ;;  %v5398_v24 = vld [vmem:[%s7284_s1 + $0x7c0] ss:$8 sps:$4 sm:$0xff]   ;;  %v5403_v25 = vld [vmem:[%s7284_s1 + $0x6b4] ss:$8 sps:$4 sm:$0xff]  }
  0xb9   :  { %1932 = vmatprep.subr.bf16.mxu1 %v5322_v11  ;;  %v5406_v11 = vld [vmem:[%s7284_s1 + $0x7b4] ss:$8 sps:$4 sm:$0xff]  }
  0xbb   :  { %1892 = vmatpush2.bf16.msra.mxu0 %v5317_v26  ;;  %v5401_v26 = vld [vmem:[%s7284_s1 + $0x6b0] ss:$8 sps:$4 sm:$0xff]  }
  0xbc   :  { %1933 = vmatpush2.bf16.msra.mxu1 %v5320_v27  ;;  %1893 = vmatprep.subr.bf16.mxu0 %v5325_v28  ;;  %v5404_v27 = vld [vmem:[%s7284_s1 + $0x7b0] ss:$8 sps:$4 sm:$0xff]   ;;  %v5409_v28 = vld [vmem:[%s7284_s1 + $0x6a4] ss:$8 sps:$4 sm:$0xff]  }
  0xbd   :  { %1934 = vmatprep.subr.bf16.mxu1 %v5328_v29  ;;  %v5412_v29 = vld [vmem:[%s7284_s1 + $0x7a4] ss:$8 sps:$4 sm:$0xff]  }
  0xbf   :  { %1894 = vmatpush2.bf16.msra.mxu0 %v5323_v32  ;;  %v5415_v32 = vld [vmem:[%s7284_s1 + $0x694] ss:$8 sps:$4 sm:$0xff]  }
  0xc0   :  { %1935 = vmatpush2.bf16.msra.mxu1 %v5326_v33  ;;  %1945 = vmatprep.subr.bf16.mxu0 %v5331_v34  ;;  %v5418_v33 = vld [vmem:[%s7284_s1 + $0x794] ss:$8 sps:$4 sm:$0xff]   ;;  %v5413_v34 = vld [vmem:[%s7284_s1 + $0x690] ss:$8 sps:$4 sm:$0xff]  }
  0xc1   :  { %1986 = vmatprep.subr.bf16.mxu1 %v5334_v16  ;;  %v5416_v16 = vld [vmem:[%s7284_s1 + $0x790] ss:$8 sps:$4 sm:$0xff]  }
  0xc2   :  { %1896 = vmatmul.mubr.bf16.vlgmr.msra.gmra.mxu0 %v377_v31  ;;  %v5410_v31 = vld [vmem:[%s7284_s1 + $0x7a0] ss:$8 sps:$4 sm:$0xff]  }
  0xc3   :  { %1937 = vmatmul.mubr.bf16.vlgmr.msra.gmra.mxu1 %v399_v36  ;;  %1946 = vmatpush1.bf16.msra.mxu0 %v5329_v37  ;;  %v5424_v36 = vld [vmem:[%s7284_s1 + $0x784] ss:$8 sps:$4 sm:$0xff]   ;;  %v384_v37 = vrot.slane %v6109_v6, %v5652_v49  ;;  %v6335_v6 = vsub.s32 1, %v5634_v42 }
  0xc4   :  { %1987 = vmatpush1.bf16.msra.mxu1 %v5332_v38  ;;  %1947 = vmatprep.subr.bf16.mxu0 %v5337_v39  ;;  %v5419_v38 = vld [vmem:[%s7284_s1 + $0x680] ss:$8 sps:$4 sm:$0xff]  }
  0xc5   :  { %1988 = vmatprep.subr.bf16.mxu1 %v5340_v40  ;;  %1977 = vmatprep.mubr.bf16.mxu0 %v398_v35  ;;  %v5421_v35 = vld [vmem:[%s7284_s1 + $0x684] ss:$8 sps:$4 sm:$0xff]   ;;  %v5422_v39 = vld [vmem:[%s7284_s1 + $0x780] ss:$8 sps:$4 sm:$0xff]   ;;  %v6329_v40 = vsub.s32 0, %v5634_v42 }
  0xc6   :  { %2018 = vmatprep.mubr.bf16.mxu1 %v402_v41  ;;  %v291_v41 = vld [vmem:[%s7286_s2] sm:$0x3] }
  0xc7   :  { %1948 = vmatpush1.bf16.msra.mxu0 %v5335_v43  ;;  %v400_v43 = vcombine.high %v384_v37, %v384_v37 }
  0xc8   :  { %1989 = vmatpush1.bf16.msra.mxu1 %v5338_v44  ;;  %1949 = vmatprep.subr.bf16.mxu0 %v5343_v45  ;;  %v296_v44 = vrot.slane %v291_v41, %v6329_v40  ;;  %v300_v45 = vrot.slane %v291_v41, %v6335_v6 }
  0xc9   :  { %1990 = vmatprep.subr.bf16.mxu1 %v5346_v46 }
  0xcb   :  { %1950 = vmatpush1.bf16.msra.mxu0 %v5341_v47 }
  0xcc   :  { %1991 = vmatpush1.bf16.msra.mxu1 %v5344_v48  ;;  %1951 = vmatprep.subr.bf16.mxu0 %v5349_v50 }
  0xcd   :  { %1992 = vmatprep.subr.bf16.mxu1 %v5352_v51 }
  0xcf   :  { %1952 = vmatpush1.bf16.msra.mxu0 %v5347_v52 }
  0xd0   :  { %1993 = vmatpush1.bf16.msra.mxu1 %v5350_v53  ;;  %1953 = vmatprep.subr.bf16.mxu0 %v5355_v54 }
  0xd1   :  { %1994 = vmatprep.subr.bf16.mxu1 %v5358_v55 }
  0xd3   :  { %1954 = vmatpush1.bf16.msra.mxu0 %v5353_v56 }
  0xd4   :  { %1995 = vmatpush1.bf16.msra.mxu1 %v5356_v57  ;;  %1955 = vmatprep.subr.bf16.mxu0 %v5361_v58 }
  0xd5   :  { %1996 = vmatprep.subr.bf16.mxu1 %v5364_v59  ;;  %v5425_v59 = vld [vmem:[%s7287_s3 + $0x78] sm:$0xff]  }
  0xd7   :  { %1956 = vmatpush1.bf16.msra.mxu0 %v5359_v60  ;;  %v5426_v60 = vld [vmem:[%s7287_s3 + $0x38] sm:$0xff]  }
  0xd8   :  { %1997 = vmatpush1.bf16.msra.mxu1 %v5362_v61  ;;  %1957 = vmatprep.subr.bf16.mxu0 %v5367_v62  ;;  %v5427_v61 = vld [vmem:[%s7287_s3 + $0x70] sm:$0xff]  }
  0xd9   :  { %1998 = vmatprep.subr.bf16.mxu1 %v5370_v63  ;;  %v5428_v62 = vld [vmem:[%s7287_s3 + $0x30] sm:$0xff]   ;;  %v5429_v63 = vld [vmem:[%s7287_s3 + $0x68] sm:$0xff]  }
  0xdb   :  { %1958 = vmatpush1.bf16.msra.mxu0 %v5365_v0  ;;  %v5430_v0 = vld [vmem:[%s7287_s3 + $0x28] sm:$0xff]  }
  0xdc   :  { %1999 = vmatpush1.bf16.msra.mxu1 %v5368_v1  ;;  %1959 = vmatprep.subr.bf16.mxu0 %v5373_v2  ;;  %v5431_v1 = vld [vmem:[%s7287_s3 + $0x60] sm:$0xff]  }
  0xdd   :  { %2000 = vmatprep.subr.bf16.mxu1 %v5376_v3  ;;  %v5432_v2 = vld [vmem:[%s7287_s3 + $0x20] sm:$0xff]   ;;  %v5433_v3 = vld [vmem:[%s7287_s3 + $0x58] sm:$0xff]  }
  0xdf   :  { %1960 = vmatpush1.bf16.msra.mxu0 %v5371_v4  ;;  %v5434_v4 = vld [vmem:[%s7287_s3 + $0x18] sm:$0xff]  }
  0xe0   :  { %2001 = vmatpush1.bf16.msra.mxu1 %v5374_v5  ;;  %1961 = vmatprep.subr.bf16.mxu0 %v5379_v7  ;;  %v5435_v5 = vld [vmem:[%s7287_s3 + $0x50] sm:$0xff]  }
  0xe1   :  { %2002 = vmatprep.subr.bf16.mxu1 %v5382_v8  ;;  %v5436_v7 = vld [vmem:[%s7287_s3 + $0x10] sm:$0xff]  }
  0xe3   :  { %1962 = vmatpush2.bf16.msra.mxu0 %v5377_v9 }
  0xe4   :  { %2003 = vmatpush2.bf16.msra.mxu1 %v5380_v10  ;;  %1963 = vmatprep.subr.bf16.mxu0 %v5385_v12 }
  0xe5   :  { %2004 = vmatprep.subr.bf16.mxu1 %v5388_v13 }
  0xe7   :  { %1964 = vmatpush2.bf16.msra.mxu0 %v5383_v14  ;;  %v5437_v14 = vld [vmem:[%s7287_s3 + $0x48] sm:$0xff]  }
  0xe8   :  { %2005 = vmatpush2.bf16.msra.mxu1 %v5386_v15  ;;  %1965 = vmatprep.subr.bf16.mxu0 %v5391_v17 }
  0xe9   :  { %2006 = vmatprep.subr.bf16.mxu1 %v5394_v18  ;;  %v5438_v18 = vld [vmem:[%s7287_s3 + $0x8] sm:$0xff]  }
  0xeb   :  { %1966 = vmatpush2.bf16.msra.mxu0 %v5389_v19 }
  0xec   :  { %2007 = vmatpush2.bf16.msra.mxu1 %v5392_v20  ;;  %1967 = vmatprep.subr.bf16.mxu0 %v5397_v21 }
  0xed   :  { %2008 = vmatprep.subr.bf16.mxu1 %v5400_v22 }
  0xef   :  { %1968 = vmatpush2.bf16.msra.mxu0 %v5395_v23 }
  0xf0   :  { %2009 = vmatpush2.bf16.msra.mxu1 %v5398_v24  ;;  %1969 = vmatprep.subr.bf16.mxu0 %v5403_v25  ;;  %v5439_v24 = vld [vmem:[%s7287_s3 + $0x40] sm:$0xff]  }
  0xf1   :  { %2010 = vmatprep.subr.bf16.mxu1 %v5406_v11  ;;  %v5440_v25 = vld [vmem:[%s7287_s3] sm:$0xff]   ;;  %v5441_v11 = vld [vmem:[%s7288_s5 + $0x70] ss:$8 sps:$4 sm:$0xff]  }
  0xf3   :  { %1970 = vmatpush2.bf16.msra.mxu0 %v5401_v26  ;;  %v5443_v26 = vld [vmem:[%s7288_s5 + $0x74] ss:$8 sps:$4 sm:$0xff]  }
  0xf4   :  { %2011 = vmatpush2.bf16.msra.mxu1 %v5404_v27  ;;  %1971 = vmatprep.subr.bf16.mxu0 %v5409_v28  ;;  %v5446_v27 = vld [vmem:[%s7288_s5 + $0x64] ss:$8 sps:$4 sm:$0xff]   ;;  %v5444_v28 = vld [vmem:[%s7288_s5 + $0x60] ss:$8 sps:$4 sm:$0xff]  }
  0xf5   :  { %2012 = vmatprep.subr.bf16.mxu1 %v5412_v29  ;;  %v5449_v29 = vld [vmem:[%s7288_s5 + $0x54] ss:$8 sps:$4 sm:$0xff]  }
  0xf7   :  { %1972 = vmatpush2.bf16.msra.mxu0 %v5407_v30  ;;  %v5447_v30 = vld [vmem:[%s7288_s5 + $0x50] ss:$8 sps:$4 sm:$0xff]  }
  0xf8   :  { %2013 = vmatpush2.bf16.msra.mxu1 %v5410_v31  ;;  %1973 = vmatprep.subr.bf16.mxu0 %v5415_v32  ;;  %v5452_v31 = vld [vmem:[%s7288_s5 + $0x44] ss:$8 sps:$4 sm:$0xff]   ;;  %v5450_v32 = vld [vmem:[%s7288_s5 + $0x40] ss:$8 sps:$4 sm:$0xff]  }
  0xf9   :  { %2014 = vmatprep.subr.bf16.mxu1 %v5418_v33  ;;  %v5455_v33 = vld [vmem:[%s7288_s5 + $0x34] ss:$8 sps:$4 sm:$0xff]  }
  0xfb   :  { %1974 = vmatpush2.bf16.msra.mxu0 %v5413_v34  ;;  %v5453_v34 = vld [vmem:[%s7288_s5 + $0x30] ss:$8 sps:$4 sm:$0xff]  }
  0xfc   :  { %2015 = vmatpush2.bf16.msra.mxu1 %v5416_v16  ;;  %1975 = vmatprep.subr.bf16.mxu0 %v5421_v35  ;;  %v5458_v16 = vld [vmem:[%s7288_s5 + $0x24] ss:$8 sps:$4 sm:$0xff]   ;;  %v5456_v35 = vld [vmem:[%s7288_s5 + $0x20] ss:$8 sps:$4 sm:$0xff]  }
  0xfd   :  { %2016 = vmatprep.subr.bf16.mxu1 %v5424_v36 }
  0xff   :  { %1976 = vmatpush2.bf16.msra.mxu0 %v5419_v38 }
 0x100   :  { %2017 = vmatpush2.bf16.msra.mxu1 %v5422_v39  ;;  %5015 = vmatprep.subr.bf16.mxu0 %v5425_v59 }
 0x101   :  { %2315 = vmatprep.subr.bf16.mxu1 %v5443_v26  ;;  %v2424_v26 = vld [vmem:[%s7289_s7 + $0x200] sm:$0xff] }
 0x102   :  { %v1733_v46 = vpop.f32.mrf.mxu0  ;;  %1978 = vmatmul.mubr.bf16.vlgmr.msra.gmra.mxu0 %v384_v37 }
 0x103   :  { %v1774_v47 = vpop.f32.mrf.mxu1  ;;  %2019 = vmatmul.mubr.bf16.vlgmr.msra.gmra.mxu1 %v400_v43  ;;  %v1734_v48 = vadd.f32 %v1733_v46, %v296_v44  ;;  %5016 = vmatpush3.bf16.msra.mxu0 %v5426_v60 }
 0x104   :  { %v1735_v50 = vpop.f32.mrf.mxu0  ;;  %5017 = vmatprep.subr.bf16.mxu0 %v5427_v61  ;;  %2316 = vmatpush1.bf16.msra.mxu1 %v5441_v11 }
 0x105   :  { %v1776_v51 = vpop.f32.mrf.mxu1  ;;  %v1775_v52 = vadd.f32 %v1774_v47, %v1734_v48  ;;  %v1736_v53 = vadd.f32 %v1735_v50, %v300_v45  ;;  %2317 = vmatprep.subr.bf16.mxu1 %v5446_v27  ;;  %v2432_v27 = vld [vmem:[%s7289_s7 + $0x240] sm:$0xff] }
 0x106   :  { %v1737_v54 = vpop.f32.mrf.mxu0 }
 0x107   :  { %v1778_v55 = vpop.f32.mrf.mxu1  ;;  %v1777_v56 = vadd.f32 %v1776_v51, %v1736_v53  ;;  %5018 = vmatpush3.bf16.msra.mxu0 %v5428_v62 }
 0x108   :  { %v1738_v57 = vpop.f32.mrf.mxu0  ;;  %5019 = vmatprep.subr.bf16.mxu0 %v5429_v63  ;;  %2318 = vmatpush1.bf16.msra.mxu1 %v5444_v28  ;;  %v4816_v28 = vcombine.high %v2424_v26, %v2432_v27 }
 0x109   :  { %v1779_v58 = vpop.f32.mrf.mxu1  ;;  %2319 = vmatprep.subr.bf16.mxu1 %v5449_v29  ;;  %v4815_v29 = vcombine.low %v2424_v26, %v2432_v27 }
 0x10b   :  { %5020 = vmatpush3.bf16.msra.mxu0 %v5430_v0 }
 0x10c   :  { %5021 = vmatprep.subr.bf16.mxu0 %v5431_v1  ;;  %2320 = vmatpush1.bf16.msra.mxu1 %v5447_v30  ;;  %v2408_v30 = vld [vmem:[%s7289_s7 + $0x180] sm:$0xff] }
 0x10d   :  { %2321 = vmatprep.subr.bf16.mxu1 %v5452_v31  ;;  %v2416_v31 = vld [vmem:[%s7289_s7 + $0x1c0] sm:$0xff] }
 0x10f   :  { %5022 = vmatpush3.bf16.msra.mxu0 %v5432_v2 }
 0x110   :  { %5023 = vmatprep.subr.bf16.mxu0 %v5433_v3  ;;  %2322 = vmatpush1.bf16.msra.mxu1 %v5450_v32  ;;  %v5461_v3 = vld [vmem:[%s7288_s5 + $0x14] ss:$8 sps:$4 sm:$0xff]   ;;  %v4800_v32 = vcombine.high %v2408_v30, %v2416_v31 }
 0x111   :  { %2323 = vmatprep.subr.bf16.mxu1 %v5455_v33  ;;  %v4799_v33 = vcombine.low %v2408_v30, %v2416_v31 }
 0x113   :  { %5024 = vmatpush3.bf16.msra.mxu0 %v5434_v4  ;;  %v5459_v4 = vld [vmem:[%s7288_s5 + $0x10] ss:$8 sps:$4 sm:$0xff]  }
 0x114   :  { %5025 = vmatprep.subr.bf16.mxu0 %v5435_v5  ;;  %2324 = vmatpush1.bf16.msra.mxu1 %v5453_v34  ;;  %v5464_v5 = vld [vmem:[%s7288_s5 + $0x4] ss:$8 sps:$4 sm:$0xff]  }
 0x115   :  { %2325 = vmatprep.subr.bf16.mxu1 %v5458_v16  ;;  %v2392_v34 = vld [vmem:[%s7289_s7 + $0x100] sm:$0xff] }
 0x116   :  { %v2400_v16 = vld [vmem:[%s7289_s7 + $0x140] sm:$0xff] }
 0x117   :  { %5026 = vmatpush3.bf16.msra.mxu0 %v5436_v7  ;;  %v5462_v7 = vld [vmem:[%s7288_s5] ss:$8 sps:$4 sm:$0xff]  }
 0x118   :  { %5027 = vmatprep.subr.bf16.mxu0 %v5437_v14  ;;  %2326 = vmatpush1.bf16.msra.mxu1 %v5456_v35  ;;  %v4784_v35 = vcombine.high %v2392_v34, %v2400_v16 }
 0x119   :  { %2327 = vmatprep.subr.bf16.mxu1 %v5461_v3 }
 0x11b   :  { %5028 = vmatpush3.bf16.msra.mxu0 %v5438_v18  ;;  %v2464_v18 = vld [vmem:[%s7289_s7 + $0x340] sm:$0xff] }
 0x11c   :  { %5029 = vmatprep.subr.bf16.mxu0 %v5439_v24  ;;  %2328 = vmatpush1.bf16.msra.mxu1 %v5459_v4  ;;  %v2448_v24 = vld [vmem:[%s7289_s7 + $0x2c0] sm:$0xff] }
 0x11d   :  { %2329 = vmatprep.subr.bf16.mxu1 %v5464_v5  ;;  %v2520_v4 = vld [vmem:[%s7289_s7 + $0x500] sm:$0xff] }
 0x11e   :  { %v2528_v5 = vld [vmem:[%s7289_s7 + $0x540] sm:$0xff] }
 0x11f   :  { %5030 = vmatpush3.bf16.msra.mxu0 %v5440_v25 }
 0x120   :  { %2330 = vmatpush1.bf16.msra.mxu1 %v5462_v7  ;;  %v4912_v7 = vcombine.high %v2520_v4, %v2528_v5 }
 0x142   :  { %v1815_v8 = vpop.f32.mrf.mxu0 }
 0x143   :  { %v1856_v9 = vpop.f32.mrf.mxu1  ;;  %v1816_v10 = vadd.f32 %v1815_v8, %v1775_v52  ;;  %v5466_v8 = vmov 0  }
 0x144   :  { %v1817_v12 = vpop.f32.mrf.mxu0  ;;  %2347 = vmatprep.mubr.bf16.mxu1 %v5466_v8  ;;  %v4911_v8 = vcombine.low %v2520_v4, %v2528_v5  ;;  %v2529_v4 = vld [vmem:[%s7289_s7 + $0x548] sm:$0xff] }
 0x145   :  { %v1858_v13 = vpop.f32.mrf.mxu1  ;;  %v1857_v15 = vadd.f32 %v1856_v9, %v1816_v10  ;;  %v1818_v17 = vadd.f32 %v1817_v12, %v1777_v56  ;;  %v2472_v9 = vld [vmem:[%s7289_s7 + $0x380] sm:$0xff]  ;;  %v6444_v12 = vld [vmem:[%s7289_s7 + $0x388] sm:$0xff] }
 0x146   :  { %v1819_v19 = vpop.f32.mrf.mxu0  ;;  %v2480_v10 = vld [vmem:[%s7289_s7 + $0x3c0] sm:$0xff] }
 0x147   :  { %v1860_v20 = vpop.f32.mrf.mxu1  ;;  %v1859_v21 = vadd.f32 %v1858_v13, %v1818_v17  ;;  %v4863_v13 = vcombine.low %v2472_v9, %v2480_v10  ;;  %v4864_v14 = vcombine.high %v2472_v9, %v2480_v10  ;;  %v2456_v17 = vld [vmem:[%s7289_s7 + $0x300] sm:$0xff] }
 0x148   :  { %v1820_v22 = vpop.f32.mrf.mxu0  ;;  %v4718_v10 = vld [vmem:[%s7290_s4] ss:$0 sm:$0xff] }
 0x149   :  { %v1861_v23 = vpop.f32.mrf.mxu1  ;;  %3980 = vmatprep.subr.bf16.mxu0 %v4864_v14  ;;  %v4847_v22 = vcombine.low %v2456_v17, %v2464_v18 }
 0x14a   :  { %v2440_v23 = vld [vmem:[%s7289_s7 + $0x280] sm:$0xff] }
 0x14b   :  { %v4832_v25 = vcombine.high %v2440_v23, %v2448_v24  ;;  %v4831_v11 = vcombine.low %v2440_v23, %v2448_v24 }
 0x182   :  { %v1897_v36 = vpop.f32.mrf.mxu0 }
 0x183   :  { %v1938_v37 = vpop.f32.mrf.mxu1  ;;  %v1898_v38 = vadd.f32 %v1897_v36, %v1857_v15  ;;  %v6449_v15 = vld [vmem:[%s7289_s7 + $0x3c8] sm:$0xff]  ;;  %v4783_v36 = vcombine.low %v2392_v34, %v2400_v16 }
 0x184   :  { %v1899_v39 = vpop.f32.mrf.mxu0  ;;  %v4865_v19 = vcombine.low %v6444_v12, %v6449_v15  ;;  %v4866_v20 = vcombine.high %v6444_v12, %v6449_v15  ;;  %v2409_v12 = vld [vmem:[%s7289_s7 + $0x188] sm:$0xff] }
 0x185   :  { %v1940_v41 = vpop.f32.mrf.mxu1  ;;  %v1939_v43 = vadd.f32 %v1938_v37, %v1898_v38  ;;  %v1900_v48 = vadd.f32 %v1899_v39, %v1859_v21  ;;  %v4848_v21 = vcombine.high %v2456_v17, %v2464_v18  ;;  %v2376_v37 = vld [vmem:[%s7289_s7 + $0x80] sm:$0xff]  ;;  %v2457_v18 = vld [vmem:[%s7289_s7 + $0x308] sm:$0xff] }
 0x186   :  { %v1901_v44 = vpop.f32.mrf.mxu0  ;;  %4021 = vmatprep.subr.bf16.mxu1 %v4866_v20  ;;  %v2384_v38 = vld [vmem:[%s7289_s7 + $0xc0] sm:$0xff]  ;;  %v2465_v20 = vld [vmem:[%s7289_s7 + $0x348] sm:$0xff] }
 0x187   :  { %v1942_v45 = vpop.f32.mrf.mxu1  ;;  %v1941_v52 = vadd.f32 %v1940_v41, %v1900_v48  ;;  %v4768_v39 = vcombine.high %v2376_v37, %v2384_v38  ;;  %v4767_v41 = vcombine.low %v2376_v37, %v2384_v38  ;;  %v2368_v44 = vld [vmem:[%s7289_s7 + $0x40] sm:$0xff]  ;;  %v4850_v24 = vcombine.high %v2457_v18, %v2465_v20  ;;  %v2417_v15 = vld [vmem:[%s7289_s7 + $0x1c8] sm:$0xff] }
 0x188   :  { %v1902_v46 = vpop.f32.mrf.mxu0  ;;  %v2608_v48 = vld [vmem:[%s7289_s7 + $0x7c0] sm:$0xff]  ;;  %v4849_v26 = vcombine.low %v2457_v18, %v2465_v20  ;;  %v2401_v34 = vld [vmem:[%s7289_s7 + $0x148] sm:$0xff]  ;;  %v4801_v16 = vcombine.low %v2409_v12, %v2417_v15 }
 0x189   :  { %v1943_v47 = vpop.f32.mrf.mxu1  ;;  %v2385_v37 = vld [vmem:[%s7289_s7 + $0xc8] sm:$0xff] }
 0x18a   :  { %v2600_v47 = vld [vmem:[%s7289_s7 + $0x780] sm:$0xff] }
 0x1c2   :  { %v1979_v50 = vpop.f32.mrf.mxu0 }
 0x1c3   :  { %v2020_v51 = vpop.f32.mrf.mxu1  ;;  %v1980_v53 = vadd.f32 %v1979_v50, %v1939_v43  ;;  %v2360_v43 = vld [vmem:[%s7289_s7] sm:$0xff]  ;;  %v4992_v50 = vcombine.high %v2600_v47, %v2608_v48 }
 0x1c4   :  { %v1981_v54 = vpop.f32.mrf.mxu0  ;;  %v4752_v45 = vcombine.high %v2360_v43, %v2368_v44  ;;  %v4751_v46 = vcombine.low %v2360_v43, %v2368_v44  ;;  %v2369_v43 = vld [vmem:[%s7289_s7 + $0x48] sm:$0xff] }
 0x1c5   :  { %v2022_v55 = vpop.f32.mrf.mxu1  ;;  %v2021_v56 = vadd.f32 %v2020_v51, %v1980_v53  ;;  %v1982_v57 = vadd.f32 %v1981_v54, %v1941_v52  ;;  %v4991_v51 = vcombine.low %v2600_v47, %v2608_v48  ;;  %v2584_v52 = vld [vmem:[%s7289_s7 + $0x700] sm:$0xff]  ;;  %v2609_v47 = vld [vmem:[%s7289_s7 + $0x7c8] sm:$0xff] }
 0x1c6   :  { %v1983_v58 = vpop.f32.mrf.mxu0  ;;  %v2592_v53 = vld [vmem:[%s7289_s7 + $0x740] sm:$0xff] }
 0x1c7   :  { %v2024_v59 = vpop.f32.mrf.mxu1  ;;  %v2023_v60 = vadd.f32 %v2022_v55, %v1982_v57  ;;  %v2027_v61 = vmax.f32 %v2021_v56, 0.0  ;;  %v4976_v54 = vcombine.high %v2584_v52, %v2592_v53  ;;  %v4975_v55 = vcombine.low %v2584_v52, %v2592_v53  ;;  %v2568_v56 = vld [vmem:[%s7289_s7 + $0x680] sm:$0xff]  ;;  %v2593_v52 = vld [vmem:[%s7289_s7 + $0x748] sm:$0xff] }
 0x1c8   :  { %v1984_v62 = vpop.f32.mrf.mxu0  ;;  %v2576_v57 = vld [vmem:[%s7289_s7 + $0x6c0] sm:$0xff] }
 0x1c9   :  { %v2025_v63 = vpop.f32.mrf.mxu1  ;;  %v2028_v0 = vmax.f32 %v2023_v60, 0.0  ;;  %v2029_v2 = vpack.c.bf16 %v2027_v61, %v2027_v61  ;;  %v4960_v58 = vcombine.high %v2568_v56, %v2576_v57  ;;  %v4959_v59 = vcombine.low %v2568_v56, %v2576_v57  ;;  %v2552_v60 = vld [vmem:[%s7289_s7 + $0x600] sm:$0xff]  ;;  %v2577_v56 = vld [vmem:[%s7289_s7 + $0x6c8] sm:$0xff] }
 0x1ca   :  { %v2560_v61 = vld [vmem:[%s7289_s7 + $0x640] sm:$0xff] }
 0x1cb   :  { %v2030_v1 = vpack.c.bf16 %v2028_v0, %v2028_v0  ;;  %v4944_v62 = vcombine.high %v2552_v60, %v2560_v61  ;;  %v4943_v63 = vcombine.low %v2552_v60, %v2560_v61  ;;  %v2536_v0 = vld [vmem:[%s7289_s7 + $0x580] sm:$0xff]  ;;  %v2561_v60 = vld [vmem:[%s7289_s7 + $0x648] sm:$0xff] }
 0x1cd   :  { %2198 = vmatprep.mubr.bf16.mxu0 %v2030_v1  ;;  %v2544_v1 = vld [vmem:[%s7289_s7 + $0x5c0] sm:$0xff] }
 0x1ce   :  { %2199 = vmatmul.mubr.bf16.vlgmr.msra.gmra.mxu0 %v2029_v2  ;;  %v4928_v2 = vcombine.high %v2536_v0, %v2544_v1  ;;  %v4927_v3 = vcombine.low %v2536_v0, %v2544_v1  ;;  %v2545_v0 = vld [vmem:[%s7289_s7 + $0x5c8] sm:$0xff] }
 0x1cf   :  { %3981 = vmatpush1.bf16.msra.mxu0 %v4863_v13 }
 0x1d0   :  { %3982 = vmatprep.subr.bf16.mxu0 %v4848_v21 }
 0x1d3   :  { %3983 = vmatpush1.bf16.msra.mxu0 %v4847_v22 }
 0x1d4   :  { %3984 = vmatprep.subr.bf16.mxu0 %v4832_v25  ;;  %v2441_v25 = vld [vmem:[%s7289_s7 + $0x288] sm:$0xff] }
 0x1d7   :  { %3985 = vmatpush1.bf16.msra.mxu0 %v4831_v11  ;;  %v2449_v11 = vld [vmem:[%s7289_s7 + $0x2c8] sm:$0xff] }
 0x1d8   :  { %3986 = vmatprep.subr.bf16.mxu0 %v4816_v28  ;;  %v4834_v27 = vcombine.high %v2441_v25, %v2449_v11  ;;  %v2425_v28 = vld [vmem:[%s7289_s7 + $0x208] sm:$0xff]  ;;  %v4833_v30 = vcombine.low %v2441_v25, %v2449_v11 }
 0x1d9   :  { %v2497_v11 = vld [vmem:[%s7289_s7 + $0x448] sm:$0xff] }
 0x1db   :  { %3987 = vmatpush1.bf16.msra.mxu0 %v4815_v29  ;;  %v2433_v29 = vld [vmem:[%s7289_s7 + $0x248] sm:$0xff] }
 0x1dc   :  { %3988 = vmatprep.subr.bf16.mxu0 %v4800_v32  ;;  %v4818_v31 = vcombine.high %v2425_v28, %v2433_v29  ;;  %v4802_v32 = vcombine.high %v2409_v12, %v2417_v15  ;;  %v2483_v15 = vld [vmem:[%s7289_s7 + $0x3d8] sm:$0xff] }
 0x1df   :  { %3989 = vmatpush1.bf16.msra.mxu0 %v4799_v33  ;;  %v2393_v33 = vld [vmem:[%s7289_s7 + $0x108] sm:$0xff] }
 0x1e0   :  { %3990 = vmatprep.subr.bf16.mxu0 %v4784_v35  ;;  %v4786_v35 = vcombine.high %v2393_v33, %v2401_v34  ;;  %v4785_v38 = vcombine.low %v2393_v33, %v2401_v34  ;;  %v2223_v34 = vld [vmem:[%s7291_s6] sm:$0x3] }
 0x1e3   :  { %3991 = vmatpush1.bf16.msra.mxu0 %v4783_v36  ;;  %v2377_v36 = vld [vmem:[%s7289_s7 + $0x88] sm:$0xff] }
 0x1e4   :  { %3992 = vmatprep.subr.bf16.mxu0 %v4768_v39  ;;  %v4770_v39 = vcombine.high %v2377_v36, %v2385_v37  ;;  %v4769_v44 = vcombine.low %v2377_v36, %v2385_v37 }
 0x1e7   :  { %3993 = vmatpush1.bf16.msra.mxu0 %v4767_v41  ;;  %v2361_v41 = vld [vmem:[%s7289_s7 + $0x8] sm:$0xff] }
 0x1e8   :  { %3994 = vmatprep.subr.bf16.mxu0 %v4752_v45  ;;  %v4754_v45 = vcombine.high %v2361_v41, %v2369_v43  ;;  %v4753_v48 = vcombine.low %v2361_v41, %v2369_v43 }
 0x1eb   :  { %3995 = vmatpush1.bf16.msra.mxu0 %v4751_v46  ;;  %v2601_v46 = vld [vmem:[%s7289_s7 + $0x788] sm:$0xff] }
 0x1ec   :  { %3996 = vmatprep.subr.bf16.mxu0 %v4992_v50  ;;  %v4994_v50 = vcombine.high %v2601_v46, %v2609_v47  ;;  %v4993_v53 = vcombine.low %v2601_v46, %v2609_v47  ;;  %v2466_v47 = vld [vmem:[%s7289_s7 + $0x350] sm:$0xff] }
 0x1ef   :  { %3997 = vmatpush2.bf16.msra.mxu0 %v4991_v51  ;;  %v2585_v51 = vld [vmem:[%s7289_s7 + $0x708] sm:$0xff] }
 0x1f0   :  { %3998 = vmatprep.subr.bf16.mxu0 %v4976_v54  ;;  %v4978_v54 = vcombine.high %v2585_v51, %v2593_v52  ;;  %v4977_v57 = vcombine.low %v2585_v51, %v2593_v52 }
 0x1f3   :  { %3999 = vmatpush2.bf16.msra.mxu0 %v4975_v55  ;;  %v2569_v55 = vld [vmem:[%s7289_s7 + $0x688] sm:$0xff] }
 0x1f4   :  { %4000 = vmatprep.subr.bf16.mxu0 %v4960_v58  ;;  %v4962_v58 = vcombine.high %v2569_v55, %v2577_v56  ;;  %v4961_v61 = vcombine.low %v2569_v55, %v2577_v56  ;;  %v2450_v56 = vld [vmem:[%s7289_s7 + $0x2d0] sm:$0xff] }
 0x1f7   :  { %4001 = vmatpush2.bf16.msra.mxu0 %v4959_v59  ;;  %v2553_v59 = vld [vmem:[%s7289_s7 + $0x608] sm:$0xff] }
 0x1f8   :  { %4002 = vmatprep.subr.bf16.mxu0 %v4944_v62  ;;  %v4946_v62 = vcombine.high %v2553_v59, %v2561_v60  ;;  %v4945_v1 = vcombine.low %v2553_v59, %v2561_v60 }
 0x1fb   :  { %4003 = vmatpush2.bf16.msra.mxu0 %v4943_v63  ;;  %v2537_v63 = vld [vmem:[%s7289_s7 + $0x588] sm:$0xff] }
 0x1fc   :  { %4004 = vmatprep.subr.bf16.mxu0 %v4928_v2  ;;  %v4930_v2 = vcombine.high %v2537_v63, %v2545_v0  ;;  %v4929_v5 = vcombine.low %v2537_v63, %v2545_v0  ;;  %v2426_v63 = vld [vmem:[%s7289_s7 + $0x210] sm:$0xff] }
 0x1fd   :  { %v2434_v0 = vld [vmem:[%s7289_s7 + $0x250] sm:$0xff] }
 0x1ff   :  { %4005 = vmatpush2.bf16.msra.mxu0 %v4927_v3  ;;  %v2521_v3 = vld [vmem:[%s7289_s7 + $0x508] sm:$0xff] }
 0x200   :  { %4006 = vmatprep.subr.bf16.mxu0 %v4912_v7  ;;  %v4914_v7 = vcombine.high %v2521_v3, %v2529_v4 }
 0x203   :  { %4007 = vmatpush2.bf16.msra.mxu0 %v4911_v8  ;;  %v4913_v8 = vcombine.low %v2521_v3, %v2529_v4 }
 0x28e   :  { %v5031_v9 = vpop.f32.mrf.mxu0 }
 0x290   :  { %v5032_v13 = vpop.f32.mrf.mxu0 }
 0x291   :  { %v5033_v14 = vadd.f32 %v5032_v13, %v5031_v9  ;;  %v2504_v9 = vld [vmem:[%s7289_s7 + $0x480] sm:$0xff]  ;;  %v2505_v13 = vld [vmem:[%s7289_s7 + $0x488] sm:$0xff] }
 0x292   :  { %v5034_v17 = vpop.f32.mrf.mxu0 }
 0x293   :  { %v2201_v21 = vadd.f32 %v5033_v14, %v4718_v10  ;;  %v2512_v10 = vld [vmem:[%s7289_s7 + $0x4c0] sm:$0xff]  ;;  %v2513_v17 = vld [vmem:[%s7289_s7 + $0x4c8] sm:$0xff] }
 0x294   :  { %v5035_v22 = vpop.f32.mrf.mxu0  ;;  %v4896_v14 = vcombine.high %v2504_v9, %v2512_v10  ;;  %v4895_v18 = vcombine.low %v2504_v9, %v2512_v10  ;;  %v4897_v20 = vcombine.low %v2505_v13, %v2513_v17  ;;  %v2418_v9 = vld [vmem:[%s7289_s7 + $0x1d0] sm:$0xff]  ;;  %v2411_v10 = vld [vmem:[%s7289_s7 + $0x198] sm:$0xff] }
 0x295   :  { %v2206_v23 = vpack.c.bf16 %v2201_v21, %v2201_v21  ;;  %v4898_v21 = vcombine.high %v2505_v13, %v2513_v17  ;;  %v2488_v22 = vld [vmem:[%s7289_s7 + $0x400] sm:$0xff]  ;;  %v2419_v13 = vld [vmem:[%s7289_s7 + $0x1d8] sm:$0xff] }
 0x296   :  { %4008 = vmatprep.subr.bf16.mxu0 %v4896_v14  ;;  %v4819_v14 = vcombine.low %v2426_v63, %v2434_v0 }
 0x297   :  { %2348 = vmatmul.mubr.bf16.vlgmr.msra.gmra.mxu1 %v2206_v23  ;;  %4009 = vmatpush2.bf16.msra.mxu0 %v4895_v18  ;;  %v2496_v23 = vld [vmem:[%s7289_s7 + $0x440] sm:$0xff] }
 0x298   :  { %4022 = vmatpush1.bf16.msra.mxu1 %v4865_v19  ;;  %v4817_v19 = vcombine.low %v2425_v28, %v2433_v29  ;;  %v4880_v25 = vcombine.high %v2488_v22, %v2496_v23  ;;  %v2474_v29 = vld [vmem:[%s7289_s7 + $0x390] sm:$0xff] }
 0x299   :  { %4023 = vmatprep.subr.bf16.mxu1 %v4850_v24  ;;  %v2489_v24 = vld [vmem:[%s7289_s7 + $0x408] sm:$0xff] }
 0x29a   :  { %v4882_v28 = vcombine.high %v2489_v24, %v2497_v11  ;;  %4010 = vmatprep.subr.bf16.mxu0 %v4880_v25 }
 0x29c   :  { %4024 = vmatpush1.bf16.msra.mxu1 %v4849_v26  ;;  %v4879_v26 = vcombine.low %v2488_v22, %v2496_v23  ;;  %v2402_v22 = vld [vmem:[%s7289_s7 + $0x150] sm:$0xff]  ;;  %v2395_v23 = vld [vmem:[%s7289_s7 + $0x118] sm:$0xff] }
 0x29d   :  { %4025 = vmatprep.subr.bf16.mxu1 %v4834_v27  ;;  %v4881_v27 = vcombine.low %v2489_v24, %v2497_v11  ;;  %v2403_v24 = vld [vmem:[%s7289_s7 + $0x158] sm:$0xff]  ;;  %v4805_v11 = vcombine.low %v2411_v10, %v2419_v13 }
 0x29e   :  { %4011 = vmatpush2.bf16.msra.mxu0 %v4879_v26 }
 0x2a0   :  { %4026 = vmatpush1.bf16.msra.mxu1 %v4833_v30  ;;  %v2482_v30 = vld [vmem:[%s7289_s7 + $0x3d0] sm:$0xff] }
 0x2a1   :  { %4027 = vmatprep.subr.bf16.mxu1 %v4818_v31  ;;  %v2475_v31 = vld [vmem:[%s7289_s7 + $0x398] sm:$0xff]  ;;  %v4868_v12 = vcombine.high %v2474_v29, %v2482_v30 }
 0x2a2   :  { %v4870_v33 = vcombine.high %v2475_v31, %v2483_v15 }
 0x2a3   :  { %4062 = vmatprep.subr.bf16.mxu0 %v4868_v12 }
 0x2a4   :  { %4028 = vmatpush1.bf16.msra.mxu1 %v4817_v19  ;;  %v4867_v19 = vcombine.low %v2474_v29, %v2482_v30  ;;  %v2386_v29 = vld [vmem:[%s7289_s7 + $0xd0] sm:$0xff]  ;;  %v2379_v30 = vld [vmem:[%s7289_s7 + $0x98] sm:$0xff] }
 0x2a5   :  { %4029 = vmatprep.subr.bf16.mxu1 %v4802_v32  ;;  %v4869_v32 = vcombine.low %v2475_v31, %v2483_v15  ;;  %v2387_v31 = vld [vmem:[%s7289_s7 + $0xd8] sm:$0xff]  ;;  %v4789_v15 = vcombine.low %v2395_v23, %v2403_v24 }
 0x2a8   :  { %4030 = vmatpush1.bf16.msra.mxu1 %v4801_v16  ;;  %v2228_v16 = vrot.slane %v2223_v34, %v6329_v40 }
 0x2a9   :  { %4031 = vmatprep.subr.bf16.mxu1 %v4786_v35  ;;  %v2232_v35 = vrot.slane %v2223_v34, %v6335_v6  ;;  %v2370_v34 = vld [vmem:[%s7289_s7 + $0x50] sm:$0xff] }
 0x2ac   :  { %4032 = vmatpush1.bf16.msra.mxu1 %v4785_v38 }
 0x2ad   :  { %4033 = vmatprep.subr.bf16.mxu1 %v4770_v39 }
 0x2b0   :  { %4034 = vmatpush1.bf16.msra.mxu1 %v4769_v44 }
 0x2b1   :  { %4035 = vmatprep.subr.bf16.mxu1 %v4754_v45  ;;  %v2458_v45 = vld [vmem:[%s7289_s7 + $0x310] sm:$0xff] }
 0x2b2   :  { %v4851_v59 = vcombine.low %v2458_v45, %v2466_v47 }
 0x2b4   :  { %4036 = vmatpush1.bf16.msra.mxu1 %v4753_v48  ;;  %v2459_v48 = vld [vmem:[%s7289_s7 + $0x318] sm:$0xff] }
 0x2b5   :  { %4037 = vmatprep.subr.bf16.mxu1 %v4994_v50  ;;  %v2467_v50 = vld [vmem:[%s7289_s7 + $0x358] sm:$0xff] }
 0x2b6   :  { %v4854_v55 = vcombine.high %v2459_v48, %v2467_v50  ;;  %v4853_v60 = vcombine.low %v2459_v48, %v2467_v50 }
 0x2b8   :  { %4038 = vmatpush2.bf16.msra.mxu1 %v4993_v53  ;;  %v2442_v53 = vld [vmem:[%s7289_s7 + $0x290] sm:$0xff] }
 0x2b9   :  { %4039 = vmatprep.subr.bf16.mxu1 %v4978_v54  ;;  %v4852_v54 = vcombine.high %v2458_v45, %v2466_v47  ;;  %v4835_v3 = vcombine.low %v2442_v53, %v2450_v56  ;;  %v2611_v45 = vld [vmem:[%s7289_s7 + $0x7d8] sm:$0xff] }
 0x2bc   :  { %4040 = vmatpush2.bf16.msra.mxu1 %v4977_v57  ;;  %v2443_v57 = vld [vmem:[%s7289_s7 + $0x298] sm:$0xff] }
 0x2bd   :  { %4041 = vmatprep.subr.bf16.mxu1 %v4962_v58  ;;  %v2451_v58 = vld [vmem:[%s7289_s7 + $0x2d8] sm:$0xff] }
 0x2be   :  { %v4837_v4 = vcombine.low %v2443_v57, %v2451_v58 }
 0x2c0   :  { %4042 = vmatpush2.bf16.msra.mxu1 %v4961_v61  ;;  %v4836_v61 = vcombine.high %v2442_v53, %v2450_v56  ;;  %v2586_v53 = vld [vmem:[%s7289_s7 + $0x710] sm:$0xff]  ;;  %v2595_v56 = vld [vmem:[%s7289_s7 + $0x758] sm:$0xff] }
 0x2c1   :  { %4043 = vmatprep.subr.bf16.mxu1 %v4946_v62  ;;  %v4838_v62 = vcombine.high %v2443_v57, %v2451_v58 }
 0x2c4   :  { %4044 = vmatpush2.bf16.msra.mxu1 %v4945_v1  ;;  %v2427_v1 = vld [vmem:[%s7289_s7 + $0x218] sm:$0xff] }
 0x2c5   :  { %4045 = vmatprep.subr.bf16.mxu1 %v4930_v2  ;;  %v2435_v2 = vld [vmem:[%s7289_s7 + $0x258] sm:$0xff] }
 0x2c6   :  { %v4821_v17 = vcombine.low %v2427_v1, %v2435_v2 }
 0x2c8   :  { %4046 = vmatpush2.bf16.msra.mxu1 %v4929_v5  ;;  %v4820_v5 = vcombine.high %v2426_v63, %v2434_v0  ;;  %v2571_v63 = vld [vmem:[%s7289_s7 + $0x698] sm:$0xff] }
 0x2c9   :  { %4047 = vmatprep.subr.bf16.mxu1 %v4914_v7  ;;  %v4822_v7 = vcombine.high %v2427_v1, %v2435_v2  ;;  %v2579_v0 = vld [vmem:[%s7289_s7 + $0x6d8] sm:$0xff] }
 0x2cc   :  { %4048 = vmatpush2.bf16.msra.mxu1 %v4913_v8  ;;  %v2410_v8 = vld [vmem:[%s7289_s7 + $0x190] sm:$0xff] }
 0x2cd   :  { %4049 = vmatprep.subr.bf16.mxu1 %v4898_v21  ;;  %v4804_v18 = vcombine.high %v2410_v8, %v2418_v9  ;;  %v2394_v21 = vld [vmem:[%s7289_s7 + $0x110] sm:$0xff]  ;;  %v4803_v25 = vcombine.low %v2410_v8, %v2418_v9  ;;  %v2555_v8 = vld [vmem:[%s7289_s7 + $0x618] sm:$0xff] }
 0x2ce   :  { %v4788_v26 = vcombine.high %v2394_v21, %v2402_v22  ;;  %v4787_v12 = vcombine.low %v2394_v21, %v2402_v22  ;;  %v2563_v9 = vld [vmem:[%s7289_s7 + $0x658] sm:$0xff] }
 0x2cf   :  { %v2539_v21 = vld [vmem:[%s7289_s7 + $0x598] sm:$0xff] }
 0x2d0   :  { %4050 = vmatpush2.bf16.msra.mxu1 %v4897_v20  ;;  %v4806_v20 = vcombine.high %v2411_v10, %v2419_v13  ;;  %v4965_v13 = vcombine.low %v2571_v63, %v2579_v0  ;;  %v2547_v22 = vld [vmem:[%s7289_s7 + $0x5d8] sm:$0xff] }
 0x2d1   :  { %4051 = vmatprep.subr.bf16.mxu1 %v4882_v28  ;;  %v2378_v28 = vld [vmem:[%s7289_s7 + $0x90] sm:$0xff] }
 0x2d4   :  { %4052 = vmatpush2.bf16.msra.mxu1 %v4881_v27  ;;  %v4790_v27 = vcombine.high %v2395_v23, %v2403_v24  ;;  %v4949_v24 = vcombine.low %v2555_v8, %v2563_v9 }
 0x2d5   :  { %4103 = vmatprep.subr.bf16.mxu1 %v4870_v33  ;;  %v2362_v33 = vld [vmem:[%s7289_s7 + $0x10] sm:$0xff] }
 0x357   :  { %v2349_v36 = vpop.f32.mrf.mxu1 }
 0x358   :  { %v2350_v37 = vadd.f32 %v2349_v36, %v2228_v16  ;;  %v2363_v16 = vld [vmem:[%s7289_s7 + $0x18] sm:$0xff]  ;;  %v4771_v36 = vcombine.low %v2378_v28, %v2386_v29 }
 0x359   :  { %v2351_v38 = vpop.f32.mrf.mxu1 }
 0x35a   :  { %v2352_v39 = vadd.f32 %v2351_v38, %v2232_v35  ;;  %v2356_v41 = vmax.f32 %v2350_v37, 0.0  ;;  %v2371_v35 = vld [vmem:[%s7289_s7 + $0x58] sm:$0xff]  ;;  %v4773_v37 = vcombine.low %v2379_v30, %v2387_v31  ;;  %v4756_v38 = vcombine.high %v2362_v33, %v2370_v34 }
 0x35b   :  { %v2353_v43 = vpop.f32.mrf.mxu1  ;;  %v4757_v47 = vcombine.low %v2363_v16, %v2371_v35 }
 0x35c   :  { %v2357_v44 = vmax.f32 %v2352_v39, 0.0  ;;  %v6672_v52 = vpack.c.bf16 %v2356_v41, %v2356_v41  ;;  %v4758_v39 = vcombine.high %v2363_v16, %v2371_v35  ;;  %v2602_v41 = vld [vmem:[%s7289_s7 + $0x790] sm:$0xff] }
 0x35d   :  { %v2354_v46 = vpop.f32.mrf.mxu1  ;;  %v2610_v43 = vld [vmem:[%s7289_s7 + $0x7d0] sm:$0xff] }
 0x35e   :  { %v6670_v51 = vpack.c.bf16 %v2357_v44, %v2357_v44  ;;  %v2603_v44 = vld [vmem:[%s7289_s7 + $0x798] sm:$0xff]  ;;  %v4755_v46 = vcombine.low %v2362_v33, %v2370_v34  ;;  %v4996_v48 = vcombine.high %v2602_v41, %v2610_v43  ;;  %v4995_v57 = vcombine.low %v2602_v41, %v2610_v43 }
 0x35f   :  { %v4998_v50 = vcombine.high %v2603_v44, %v2611_v45  ;;  %v4997_v58 = vcombine.low %v2603_v44, %v2611_v45  ;;  %v2507_v33 = vld [vmem:[%s7289_s7 + $0x498] sm:$0xff] }
 0x360   :  { %4012 = vmatprep.mubr.bf16.mxu0 %v6670_v51  ;;  %4053 = vmatprep.mubr.bf16.mxu1 %v6670_v51  ;;  %v2515_v34 = vld [vmem:[%s7289_s7 + $0x4d8] sm:$0xff] }
 0x361   :  { %4013 = vmatmul.mubr.bf16.vlgmr.msra.gmra.mxu0 %v6672_v52  ;;  %4054 = vmatmul.mubr.bf16.vlgmr.msra.gmra.mxu1 %v6672_v52  ;;  %v2491_v41 = vld [vmem:[%s7289_s7 + $0x418] sm:$0xff]  ;;  %v4901_v45 = vcombine.low %v2507_v33, %v2515_v34 }
 0x362   :  { %4063 = vmatpush1.bf16.msra.mxu0 %v4867_v19  ;;  %4104 = vmatpush1.bf16.msra.mxu1 %v4869_v32  ;;  %v4772_v19 = vcombine.high %v2378_v28, %v2386_v29  ;;  %v4774_v32 = vcombine.high %v2379_v30, %v2387_v31  ;;  %v2523_v28 = vld [vmem:[%s7289_s7 + $0x518] sm:$0xff]  ;;  %v4933_v31 = vcombine.low %v2539_v21, %v2547_v22 }
 0x363   :  { %4094 = vmatprep.mubr.bf16.mxu0 %v6670_v51  ;;  %4135 = vmatprep.mubr.bf16.mxu1 %v6670_v51  ;;  %v2531_v29 = vld [vmem:[%s7289_s7 + $0x558] sm:$0xff] }
 0x364   :  { %4064 = vmatprep.subr.bf16.mxu0 %v4852_v54  ;;  %4105 = vmatprep.subr.bf16.mxu1 %v4854_v55  ;;  %v2594_v54 = vld [vmem:[%s7289_s7 + $0x750] sm:$0xff]  ;;  %v2587_v55 = vld [vmem:[%s7289_s7 + $0x718] sm:$0xff]  ;;  %v4917_v35 = vcombine.low %v2523_v28, %v2531_v29 }
 0x365   :  { %v4979_v1 = vcombine.low %v2586_v53, %v2594_v54  ;;  %v4981_v2 = vcombine.low %v2587_v55, %v2595_v56  ;;  %v2499_v43 = vld [vmem:[%s7289_s7 + $0x458] sm:$0xff] }
 0x366   :  { %4065 = vmatpush1.bf16.msra.mxu0 %v4851_v59  ;;  %4106 = vmatpush1.bf16.msra.mxu1 %v4853_v60  ;;  %v4980_v59 = vcombine.high %v2586_v53, %v2594_v54  ;;  %v4982_v60 = vcombine.high %v2587_v55, %v2595_v56  ;;  %v2477_v53 = vld [vmem:[%s7289_s7 + $0x3a8] sm:$0xff]  ;;  %v4885_v56 = vcombine.low %v2491_v41, %v2499_v43 }
 0x367   :  { %4066 = vmatprep.subr.bf16.mxu0 %v4836_v61  ;;  %4107 = vmatprep.subr.bf16.mxu1 %v4838_v62  ;;  %v2570_v61 = vld [vmem:[%s7289_s7 + $0x690] sm:$0xff]  ;;  %v2485_v54 = vld [vmem:[%s7289_s7 + $0x3e8] sm:$0xff] }
 0x368   :  { %v2578_v62 = vld [vmem:[%s7289_s7 + $0x6d0] sm:$0xff] }
 0x369   :  { %v4963_v10 = vcombine.low %v2570_v61, %v2578_v62 }
 0x36a   :  { %4067 = vmatpush1.bf16.msra.mxu0 %v4835_v3  ;;  %4108 = vmatpush1.bf16.msra.mxu1 %v4837_v4  ;;  %v4964_v3 = vcombine.high %v2570_v61, %v2578_v62  ;;  %v4966_v4 = vcombine.high %v2571_v63, %v2579_v0  ;;  %v2461_v61 = vld [vmem:[%s7289_s7 + $0x328] sm:$0xff]  ;;  %v4873_v0 = vcombine.low %v2477_v53, %v2485_v54 }
 0x36b   :  { %4068 = vmatprep.subr.bf16.mxu0 %v4820_v5  ;;  %4109 = vmatprep.subr.bf16.mxu1 %v4822_v7  ;;  %v2554_v5 = vld [vmem:[%s7289_s7 + $0x610] sm:$0xff]  ;;  %v2469_v62 = vld [vmem:[%s7289_s7 + $0x368] sm:$0xff] }
 0x36c   :  { %v2562_v7 = vld [vmem:[%s7289_s7 + $0x650] sm:$0xff] }
 0x36d   :  { %v4947_v23 = vcombine.low %v2554_v5, %v2562_v7 }
 0x36e   :  { %4069 = vmatpush1.bf16.msra.mxu0 %v4819_v14  ;;  %4110 = vmatpush1.bf16.msra.mxu1 %v4821_v17  ;;  %v4948_v14 = vcombine.high %v2554_v5, %v2562_v7  ;;  %v4950_v17 = vcombine.high %v2555_v8, %v2563_v9  ;;  %v2445_v5 = vld [vmem:[%s7289_s7 + $0x2a8] sm:$0xff]  ;;  %v4857_v9 = vcombine.low %v2461_v61, %v2469_v62 }
 0x36f   :  { %4070 = vmatprep.subr.bf16.mxu0 %v4804_v18  ;;  %4111 = vmatprep.subr.bf16.mxu1 %v4806_v20  ;;  %v2538_v18 = vld [vmem:[%s7289_s7 + $0x590] sm:$0xff]  ;;  %v2453_v7 = vld [vmem:[%s7289_s7 + $0x2e8] sm:$0xff] }
 0x370   :  { %v2546_v20 = vld [vmem:[%s7289_s7 + $0x5d0] sm:$0xff] }
 0x371   :  { %v4931_v30 = vcombine.low %v2538_v18, %v2546_v20 }
 0x372   :  { %4071 = vmatpush1.bf16.msra.mxu0 %v4803_v25  ;;  %4112 = vmatpush1.bf16.msra.mxu1 %v4805_v11  ;;  %v4932_v25 = vcombine.high %v2538_v18, %v2546_v20  ;;  %v4934_v11 = vcombine.high %v2539_v21, %v2547_v22  ;;  %v2429_v18 = vld [vmem:[%s7289_s7 + $0x228] sm:$0xff]  ;;  %v4841_v22 = vcombine.low %v2445_v5, %v2453_v7 }
 0x373   :  { %4072 = vmatprep.subr.bf16.mxu0 %v4788_v26  ;;  %4113 = vmatprep.subr.bf16.mxu1 %v4790_v27  ;;  %v2522_v26 = vld [vmem:[%s7289_s7 + $0x510] sm:$0xff]  ;;  %v2437_v20 = vld [vmem:[%s7289_s7 + $0x268] sm:$0xff] }
 0x374   :  { %v2530_v27 = vld [vmem:[%s7289_s7 + $0x550] sm:$0xff] }
 0x375   :  { %v4915_v16 = vcombine.low %v2522_v26, %v2530_v27 }
 0x376   :  { %4073 = vmatpush1.bf16.msra.mxu0 %v4787_v12  ;;  %4114 = vmatpush1.bf16.msra.mxu1 %v4789_v15  ;;  %v4916_v12 = vcombine.high %v2522_v26, %v2530_v27  ;;  %v4918_v15 = vcombine.high %v2523_v28, %v2531_v29  ;;  %v2413_v26 = vld [vmem:[%s7289_s7 + $0x1a8] sm:$0xff]  ;;  %v4825_v29 = vcombine.low %v2429_v18, %v2437_v20 }
 0x377   :  { %4074 = vmatprep.subr.bf16.mxu0 %v4772_v19  ;;  %4115 = vmatprep.subr.bf16.mxu1 %v4774_v32  ;;  %v2506_v19 = vld [vmem:[%s7289_s7 + $0x490] sm:$0xff]  ;;  %v2421_v27 = vld [vmem:[%s7289_s7 + $0x1e8] sm:$0xff] }
 0x378   :  { %v2514_v32 = vld [vmem:[%s7289_s7 + $0x4d0] sm:$0xff] }
 0x379   :  { %v4899_v44 = vcombine.low %v2506_v19, %v2514_v32 }
 0x37a   :  { %4075 = vmatpush1.bf16.msra.mxu0 %v4771_v36  ;;  %4116 = vmatpush1.bf16.msra.mxu1 %v4773_v37  ;;  %v4900_v36 = vcombine.high %v2506_v19, %v2514_v32  ;;  %v4902_v37 = vcombine.high %v2507_v33, %v2515_v34  ;;  %v2397_v19 = vld [vmem:[%s7289_s7 + $0x128] sm:$0xff]  ;;  %v4809_v34 = vcombine.low %v2413_v26, %v2421_v27 }
 0x37b   :  { %4076 = vmatprep.subr.bf16.mxu0 %v4756_v38  ;;  %4117 = vmatprep.subr.bf16.mxu1 %v4758_v39  ;;  %v2490_v38 = vld [vmem:[%s7289_s7 + $0x410] sm:$0xff]  ;;  %v2405_v32 = vld [vmem:[%s7289_s7 + $0x168] sm:$0xff] }
 0x37c   :  { %v2498_v39 = vld [vmem:[%s7289_s7 + $0x450] sm:$0xff] }
 0x37d   :  { %v4883_v55 = vcombine.low %v2490_v38, %v2498_v39 }
 0x37e   :  { %4077 = vmatpush1.bf16.msra.mxu0 %v4755_v46  ;;  %4118 = vmatpush1.bf16.msra.mxu1 %v4757_v47  ;;  %v4884_v46 = vcombine.high %v2490_v38, %v2498_v39  ;;  %v4886_v47 = vcombine.high %v2491_v41, %v2499_v43  ;;  %v2381_v38 = vld [vmem:[%s7289_s7 + $0xa8] sm:$0xff]  ;;  %v4793_v43 = vcombine.low %v2397_v19, %v2405_v32 }
 0x37f   :  { %4078 = vmatprep.subr.bf16.mxu0 %v4996_v48  ;;  %4119 = vmatprep.subr.bf16.mxu1 %v4998_v50  ;;  %v2476_v48 = vld [vmem:[%s7289_s7 + $0x3a0] sm:$0xff]  ;;  %v2389_v39 = vld [vmem:[%s7289_s7 + $0xe8] sm:$0xff] }
 0x380   :  { %v2484_v50 = vld [vmem:[%s7289_s7 + $0x3e0] sm:$0xff] }
 0x381   :  { %v4871_v63 = vcombine.low %v2476_v48, %v2484_v50 }
 0x382   :  { %4079 = vmatpush2.bf16.msra.mxu0 %v4995_v57  ;;  %4120 = vmatpush2.bf16.msra.mxu1 %v4997_v58  ;;  %v4872_v57 = vcombine.high %v2476_v48, %v2484_v50  ;;  %v4874_v58 = vcombine.high %v2477_v53, %v2485_v54  ;;  %v2365_v48 = vld [vmem:[%s7289_s7 + $0x28] sm:$0xff]  ;;  %v4777_v54 = vcombine.low %v2381_v38, %v2389_v39 }
 0x383   :  { %4080 = vmatprep.subr.bf16.mxu0 %v4980_v59  ;;  %4121 = vmatprep.subr.bf16.mxu1 %v4982_v60  ;;  %v2460_v59 = vld [vmem:[%s7289_s7 + $0x320] sm:$0xff]  ;;  %v2373_v50 = vld [vmem:[%s7289_s7 + $0x68] sm:$0xff] }
 0x384   :  { %v2468_v60 = vld [vmem:[%s7289_s7 + $0x360] sm:$0xff] }
 0x385   :  { %v4855_v8 = vcombine.low %v2460_v59, %v2468_v60 }
 0x386   :  { %4081 = vmatpush2.bf16.msra.mxu0 %v4979_v1  ;;  %4122 = vmatpush2.bf16.msra.mxu1 %v4981_v2  ;;  %v4856_v1 = vcombine.high %v2460_v59, %v2468_v60  ;;  %v4858_v2 = vcombine.high %v2461_v61, %v2469_v62  ;;  %v2605_v59 = vld [vmem:[%s7289_s7 + $0x7a8] sm:$0xff]  ;;  %v4761_v62 = vcombine.low %v2365_v48, %v2373_v50 }
 0x387   :  { %4082 = vmatprep.subr.bf16.mxu0 %v4964_v3  ;;  %4123 = vmatprep.subr.bf16.mxu1 %v4966_v4  ;;  %v2444_v3 = vld [vmem:[%s7289_s7 + $0x2a0] sm:$0xff]  ;;  %v2613_v60 = vld [vmem:[%s7289_s7 + $0x7e8] sm:$0xff] }
 0x388   :  { %v2452_v4 = vld [vmem:[%s7289_s7 + $0x2e0] sm:$0xff] }
 0x389   :  { %v4839_v21 = vcombine.low %v2444_v3, %v2452_v4 }
 0x38a   :  { %4083 = vmatpush2.bf16.msra.mxu0 %v4963_v10  ;;  %4124 = vmatpush2.bf16.msra.mxu1 %v4965_v13  ;;  %v4840_v10 = vcombine.high %v2444_v3, %v2452_v4  ;;  %v4842_v13 = vcombine.high %v2445_v5, %v2453_v7  ;;  %v2589_v3 = vld [vmem:[%s7289_s7 + $0x728] sm:$0xff]  ;;  %v5001_v7 = vcombine.low %v2605_v59, %v2613_v60 }
 0x38b   :  { %4084 = vmatprep.subr.bf16.mxu0 %v4948_v14  ;;  %4125 = vmatprep.subr.bf16.mxu1 %v4950_v17  ;;  %v2428_v14 = vld [vmem:[%s7289_s7 + $0x220] sm:$0xff]  ;;  %v2597_v4 = vld [vmem:[%s7289_s7 + $0x768] sm:$0xff] }
 0x38c   :  { %v2436_v17 = vld [vmem:[%s7289_s7 + $0x260] sm:$0xff] }
 0x38d   :  { %v4823_v28 = vcombine.low %v2428_v14, %v2436_v17 }
 0x38e   :  { %4085 = vmatpush2.bf16.msra.mxu0 %v4947_v23  ;;  %4126 = vmatpush2.bf16.msra.mxu1 %v4949_v24  ;;  %v4824_v23 = vcombine.high %v2428_v14, %v2436_v17  ;;  %v4826_v24 = vcombine.high %v2429_v18, %v2437_v20  ;;  %v2573_v14 = vld [vmem:[%s7289_s7 + $0x6a8] sm:$0xff]  ;;  %v4985_v20 = vcombine.low %v2589_v3, %v2597_v4 }
 0x38f   :  { %4086 = vmatprep.subr.bf16.mxu0 %v4932_v25  ;;  %4127 = vmatprep.subr.bf16.mxu1 %v4934_v11  ;;  %v2412_v25 = vld [vmem:[%s7289_s7 + $0x1a0] sm:$0xff]  ;;  %v2581_v17 = vld [vmem:[%s7289_s7 + $0x6e8] sm:$0xff] }
 0x390   :  { %v2420_v11 = vld [vmem:[%s7289_s7 + $0x1e0] sm:$0xff] }
 0x391   :  { %v4807_v33 = vcombine.low %v2412_v25, %v2420_v11 }
 0x392   :  { %4087 = vmatpush2.bf16.msra.mxu0 %v4931_v30  ;;  %4128 = vmatpush2.bf16.msra.mxu1 %v4933_v31  ;;  %v4808_v30 = vcombine.high %v2412_v25, %v2420_v11  ;;  %v4810_v31 = vcombine.high %v2413_v26, %v2421_v27  ;;  %v2557_v25 = vld [vmem:[%s7289_s7 + $0x628] sm:$0xff]  ;;  %v4969_v27 = vcombine.low %v2573_v14, %v2581_v17 }
 0x393   :  { %4088 = vmatprep.subr.bf16.mxu0 %v4916_v12  ;;  %4129 = vmatprep.subr.bf16.mxu1 %v4918_v15  ;;  %v2396_v12 = vld [vmem:[%s7289_s7 + $0x120] sm:$0xff]  ;;  %v2565_v11 = vld [vmem:[%s7289_s7 + $0x668] sm:$0xff] }
 0x394   :  { %v2404_v15 = vld [vmem:[%s7289_s7 + $0x160] sm:$0xff] }
 0x395   :  { %v4791_v41 = vcombine.low %v2396_v12, %v2404_v15 }
 0x396   :  { %4089 = vmatpush2.bf16.msra.mxu0 %v4915_v16  ;;  %4130 = vmatpush2.bf16.msra.mxu1 %v4917_v35  ;;  %v4792_v16 = vcombine.high %v2396_v12, %v2404_v15  ;;  %v4794_v35 = vcombine.high %v2397_v19, %v2405_v32  ;;  %v2541_v12 = vld [vmem:[%s7289_s7 + $0x5a8] sm:$0xff]  ;;  %v4953_v32 = vcombine.low %v2557_v25, %v2565_v11 }
 0x397   :  { %4090 = vmatprep.subr.bf16.mxu0 %v4900_v36  ;;  %4131 = vmatprep.subr.bf16.mxu1 %v4902_v37  ;;  %v2380_v36 = vld [vmem:[%s7289_s7 + $0xa0] sm:$0xff]  ;;  %v2549_v15 = vld [vmem:[%s7289_s7 + $0x5e8] sm:$0xff] }
 0x398   :  { %v2388_v37 = vld [vmem:[%s7289_s7 + $0xe0] sm:$0xff] }
 0x399   :  { %v4775_v53 = vcombine.low %v2380_v36, %v2388_v37 }
 0x39a   :  { %4091 = vmatpush2.bf16.msra.mxu0 %v4899_v44  ;;  %4132 = vmatpush2.bf16.msra.mxu1 %v4901_v45  ;;  %v4776_v44 = vcombine.high %v2380_v36, %v2388_v37  ;;  %v4778_v45 = vcombine.high %v2381_v38, %v2389_v39  ;;  %v2525_v36 = vld [vmem:[%s7289_s7 + $0x528] sm:$0xff]  ;;  %v4937_v39 = vcombine.low %v2541_v12, %v2549_v15 }
 0x39b   :  { %4092 = vmatprep.subr.bf16.mxu0 %v4884_v46  ;;  %4133 = vmatprep.subr.bf16.mxu1 %v4886_v47  ;;  %v2364_v46 = vld [vmem:[%s7289_s7 + $0x20] sm:$0xff]  ;;  %v2533_v37 = vld [vmem:[%s7289_s7 + $0x568] sm:$0xff] }
 0x39c   :  { %v2372_v47 = vld [vmem:[%s7289_s7 + $0x60] sm:$0xff] }
 0x39d   :  { %v4759_v61 = vcombine.low %v2364_v46, %v2372_v47 }
 0x39e   :  { %4093 = vmatpush2.bf16.msra.mxu0 %v4883_v55  ;;  %4134 = vmatpush2.bf16.msra.mxu1 %v4885_v56  ;;  %v4760_v55 = vcombine.high %v2364_v46, %v2372_v47  ;;  %v4762_v56 = vcombine.high %v2365_v48, %v2373_v50  ;;  %v2509_v46 = vld [vmem:[%s7289_s7 + $0x4a8] sm:$0xff]  ;;  %v4921_v50 = vcombine.low %v2525_v36, %v2533_v37 }
 0x39f   :  { %4144 = vmatprep.subr.bf16.mxu0 %v4872_v57  ;;  %4185 = vmatprep.subr.bf16.mxu1 %v4874_v58  ;;  %v2604_v57 = vld [vmem:[%s7289_s7 + $0x7a0] sm:$0xff]  ;;  %v2517_v47 = vld [vmem:[%s7289_s7 + $0x4e8] sm:$0xff] }
 0x3a0   :  { %v2612_v58 = vld [vmem:[%s7289_s7 + $0x7e0] sm:$0xff] }
 0x3a1   :  { %4095 = vmatmul.mubr.bf16.vlgmr.msra.gmra.mxu0 %v6672_v52  ;;  %4136 = vmatmul.mubr.bf16.vlgmr.msra.gmra.mxu1 %v6672_v52  ;;  %v4999_v5 = vcombine.low %v2604_v57, %v2612_v58 }
 0x3a2   :  { %4145 = vmatpush1.bf16.msra.mxu0 %v4871_v63  ;;  %4176 = vmatprep.mubr.bf16.mxu0 %v6670_v51  ;;  %v5000_v63 = vcombine.high %v2604_v57, %v2612_v58  ;;  %v2493_v57 = vld [vmem:[%s7289_s7 + $0x428] sm:$0xff] }
 0x3a3   :  { %4186 = vmatpush1.bf16.msra.mxu1 %v4873_v0  ;;  %4217 = vmatprep.mubr.bf16.mxu1 %v6670_v51  ;;  %v5002_v0 = vcombine.high %v2605_v59, %v2613_v60  ;;  %v2501_v58 = vld [vmem:[%s7289_s7 + $0x468] sm:$0xff]  ;;  %v4905_v60 = vcombine.low %v2509_v46, %v2517_v47 }
 0x3a4   :  { %4146 = vmatprep.subr.bf16.mxu0 %v4856_v1  ;;  %4187 = vmatprep.subr.bf16.mxu1 %v4858_v2  ;;  %v2588_v1 = vld [vmem:[%s7289_s7 + $0x720] sm:$0xff] }
 0x3a5   :  { %v2596_v2 = vld [vmem:[%s7289_s7 + $0x760] sm:$0xff] }
 0x3a6   :  { %4147 = vmatpush1.bf16.msra.mxu0 %v4855_v8  ;;  %v4984_v8 = vcombine.high %v2588_v1, %v2596_v2  ;;  %v4983_v18 = vcombine.low %v2588_v1, %v2596_v2  ;;  %v2479_v1 = vld [vmem:[%s7289_s7 + $0x3b8] sm:$0xff] }
 0x3a7   :  { %4188 = vmatpush1.bf16.msra.mxu1 %v4857_v9  ;;  %4148 = vmatprep.subr.bf16.mxu0 %v4840_v10  ;;  %v4986_v9 = vcombine.high %v2589_v3, %v2597_v4  ;;  %v2572_v10 = vld [vmem:[%s7289_s7 + $0x6a0] sm:$0xff]  ;;  %v2487_v2 = vld [vmem:[%s7289_s7 + $0x3f8] sm:$0xff]  ;;  %v4889_v4 = vcombine.low %v2493_v57, %v2501_v58 }
 0x3a8   :  { %4189 = vmatprep.subr.bf16.mxu1 %v4842_v13  ;;  %v2580_v13 = vld [vmem:[%s7289_s7 + $0x6e0] sm:$0xff] }
 0x3a9   :  { %v4967_v26 = vcombine.low %v2572_v10, %v2580_v13 }
 0x3aa   :  { %4149 = vmatpush1.bf16.msra.mxu0 %v4839_v21  ;;  %v4968_v21 = vcombine.high %v2572_v10, %v2580_v13  ;;  %v2463_v13 = vld [vmem:[%s7289_s7 + $0x338] sm:$0xff] }
 0x3ab   :  { %4190 = vmatpush1.bf16.msra.mxu1 %v4841_v22  ;;  %4150 = vmatprep.subr.bf16.mxu0 %v4824_v23  ;;  %v4970_v22 = vcombine.high %v2573_v14, %v2581_v17  ;;  %v2556_v23 = vld [vmem:[%s7289_s7 + $0x620] sm:$0xff]  ;;  %v2471_v14 = vld [vmem:[%s7289_s7 + $0x378] sm:$0xff]  ;;  %v4877_v17 = vcombine.low %v2479_v1, %v2487_v2 }
 0x3ac   :  { %4191 = vmatprep.subr.bf16.mxu1 %v4826_v24  ;;  %v2564_v24 = vld [vmem:[%s7289_s7 + $0x660] sm:$0xff] }
 0x3ad   :  { %v4951_v19 = vcombine.low %v2556_v23, %v2564_v24 }
 0x3ae   :  { %4151 = vmatpush1.bf16.msra.mxu0 %v4823_v28  ;;  %v4952_v28 = vcombine.high %v2556_v23, %v2564_v24  ;;  %v2447_v23 = vld [vmem:[%s7289_s7 + $0x2b8] sm:$0xff] }
 0x3af   :  { %4192 = vmatpush1.bf16.msra.mxu1 %v4825_v29  ;;  %4152 = vmatprep.subr.bf16.mxu0 %v4808_v30  ;;  %v4954_v29 = vcombine.high %v2557_v25, %v2565_v11  ;;  %v2540_v30 = vld [vmem:[%s7289_s7 + $0x5a0] sm:$0xff]  ;;  %v2455_v24 = vld [vmem:[%s7289_s7 + $0x2f8] sm:$0xff]  ;;  %v4861_v11 = vcombine.low %v2463_v13, %v2471_v14 }
 0x3b0   :  { %4193 = vmatprep.subr.bf16.mxu1 %v4810_v31  ;;  %v2548_v31 = vld [vmem:[%s7289_s7 + $0x5e0] sm:$0xff] }
 0x3b1   :  { %v4935_v38 = vcombine.low %v2540_v30, %v2548_v31 }
 0x3b2   :  { %4153 = vmatpush1.bf16.msra.mxu0 %v4807_v33  ;;  %v4936_v33 = vcombine.high %v2540_v30, %v2548_v31  ;;  %v2431_v30 = vld [vmem:[%s7289_s7 + $0x238] sm:$0xff] }
 0x3b3   :  { %4194 = vmatpush1.bf16.msra.mxu1 %v4809_v34  ;;  %4154 = vmatprep.subr.bf16.mxu0 %v4792_v16  ;;  %v4938_v34 = vcombine.high %v2541_v12, %v2549_v15  ;;  %v2524_v16 = vld [vmem:[%s7289_s7 + $0x520] sm:$0xff]  ;;  %v2439_v31 = vld [vmem:[%s7289_s7 + $0x278] sm:$0xff]  ;;  %v4845_v12 = vcombine.low %v2447_v23, %v2455_v24 }
 0x3b4   :  { %4195 = vmatprep.subr.bf16.mxu1 %v4794_v35  ;;  %v2532_v35 = vld [vmem:[%s7289_s7 + $0x560] sm:$0xff] }
 0x3b5   :  { %v4919_v48 = vcombine.low %v2524_v16, %v2532_v35 }
 0x3b6   :  { %4155 = vmatpush1.bf16.msra.mxu0 %v4791_v41  ;;  %v4920_v41 = vcombine.high %v2524_v16, %v2532_v35  ;;  %v2423_v16 = vld [vmem:[%s7289_s7 + $0x1f8] sm:$0xff] }
 0x3b7   :  { %4196 = vmatpush1.bf16.msra.mxu1 %v4793_v43  ;;  %4156 = vmatprep.subr.bf16.mxu0 %v4776_v44  ;;  %v4922_v43 = vcombine.high %v2525_v36, %v2533_v37  ;;  %v2508_v44 = vld [vmem:[%s7289_s7 + $0x4a0] sm:$0xff]  ;;  %v4829_v36 = vcombine.low %v2431_v30, %v2439_v31 }
 0x3b8   :  { %4197 = vmatprep.subr.bf16.mxu1 %v4778_v45  ;;  %v2516_v45 = vld [vmem:[%s7289_s7 + $0x4e0] sm:$0xff] }
 0x3b9   :  { %v4903_v59 = vcombine.low %v2508_v44, %v2516_v45 }
 0x3ba   :  { %4157 = vmatpush1.bf16.msra.mxu0 %v4775_v53  ;;  %v4904_v53 = vcombine.high %v2508_v44, %v2516_v45  ;;  %v2407_v44 = vld [vmem:[%s7289_s7 + $0x178] sm:$0xff] }
 0x3bb   :  { %4198 = vmatpush1.bf16.msra.mxu1 %v4777_v54  ;;  %4158 = vmatprep.subr.bf16.mxu0 %v4760_v55  ;;  %v4906_v54 = vcombine.high %v2509_v46, %v2517_v47  ;;  %v2492_v55 = vld [vmem:[%s7289_s7 + $0x420] sm:$0xff] }
 0x3bc   :  { %4199 = vmatprep.subr.bf16.mxu1 %v4762_v56  ;;  %v2500_v56 = vld [vmem:[%s7289_s7 + $0x460] sm:$0xff] }
 0x3bd   :  { %v4887_v3 = vcombine.low %v2492_v55, %v2500_v56 }
 0x3be   :  { %4159 = vmatpush1.bf16.msra.mxu0 %v4759_v61  ;;  %v4888_v61 = vcombine.high %v2492_v55, %v2500_v56  ;;  %v2391_v55 = vld [vmem:[%s7289_s7 + $0xf8] sm:$0xff] }
 0x3bf   :  { %4200 = vmatpush1.bf16.msra.mxu1 %v4761_v62  ;;  %4160 = vmatprep.subr.bf16.mxu0 %v5000_v63  ;;  %v4890_v62 = vcombine.high %v2493_v57, %v2501_v58  ;;  %v2478_v63 = vld [vmem:[%s7289_s7 + $0x3b0] sm:$0xff] }
 0x3c0   :  { %4201 = vmatprep.subr.bf16.mxu1 %v5002_v0  ;;  %v2486_v0 = vld [vmem:[%s7289_s7 + $0x3f0] sm:$0xff] }
 0x3c1   :  { %v4875_v10 = vcombine.low %v2478_v63, %v2486_v0 }
 0x3c2   :  { %4161 = vmatpush2.bf16.msra.mxu0 %v4999_v5  ;;  %v4876_v5 = vcombine.high %v2478_v63, %v2486_v0  ;;  %v2375_v63 = vld [vmem:[%s7289_s7 + $0x78] sm:$0xff] }
 0x3c3   :  { %4202 = vmatpush2.bf16.msra.mxu1 %v5001_v7  ;;  %4162 = vmatprep.subr.bf16.mxu0 %v4984_v8  ;;  %v4878_v7 = vcombine.high %v2479_v1, %v2487_v2  ;;  %v2462_v8 = vld [vmem:[%s7289_s7 + $0x330] sm:$0xff] }
 0x3c4   :  { %4203 = vmatprep.subr.bf16.mxu1 %v4986_v9  ;;  %v2470_v9 = vld [vmem:[%s7289_s7 + $0x370] sm:$0xff] }
 0x3c5   :  { %v4859_v25 = vcombine.low %v2462_v8, %v2470_v9 }
 0x3c6   :  { %4163 = vmatpush2.bf16.msra.mxu0 %v4983_v18  ;;  %v4860_v18 = vcombine.high %v2462_v8, %v2470_v9  ;;  %v2615_v8 = vld [vmem:[%s7289_s7 + $0x7f8] sm:$0xff] }
 0x3c7   :  { %4204 = vmatpush2.bf16.msra.mxu1 %v4985_v20  ;;  %4164 = vmatprep.subr.bf16.mxu0 %v4968_v21  ;;  %v2446_v20 = vld [vmem:[%s7289_s7 + $0x2b0] sm:$0xff] }
 0x3c8   :  { %4205 = vmatprep.subr.bf16.mxu1 %v4970_v22  ;;  %v2454_v21 = vld [vmem:[%s7289_s7 + $0x2f0] sm:$0xff]  ;;  %v4862_v22 = vcombine.high %v2463_v13, %v2471_v14 }
 0x3ca   :  { %4165 = vmatpush2.bf16.msra.mxu0 %v4967_v26  ;;  %v4844_v26 = vcombine.high %v2446_v20, %v2454_v21 }
 0x3cb   :  { %4206 = vmatpush2.bf16.msra.mxu1 %v4969_v27  ;;  %4166 = vmatprep.subr.bf16.mxu0 %v4952_v28  ;;  %v4846_v27 = vcombine.high %v2447_v23, %v2455_v24  ;;  %v2430_v28 = vld [vmem:[%s7289_s7 + $0x230] sm:$0xff] }
 0x3cc   :  { %4207 = vmatprep.subr.bf16.mxu1 %v4954_v29  ;;  %v2438_v29 = vld [vmem:[%s7289_s7 + $0x270] sm:$0xff] }
 0x3cd   :  { %v4828_v15 = vcombine.high %v2430_v28, %v2438_v29  ;;  %v4827_v35 = vcombine.low %v2430_v28, %v2438_v29  ;;  %v2583_v28 = vld [vmem:[%s7289_s7 + $0x6f8] sm:$0xff] }
 0x3ce   :  { %4167 = vmatpush2.bf16.msra.mxu0 %v4951_v19  ;;  %v4830_v19 = vcombine.high %v2431_v30, %v2439_v31 }
 0x3cf   :  { %4208 = vmatpush2.bf16.msra.mxu1 %v4953_v32  ;;  %4168 = vmatprep.subr.bf16.mxu0 %v4936_v33  ;;  %v2414_v32 = vld [vmem:[%s7289_s7 + $0x1b0] sm:$0xff] }
 0x3d0   :  { %4209 = vmatprep.subr.bf16.mxu1 %v4938_v34  ;;  %v2422_v33 = vld [vmem:[%s7289_s7 + $0x1f0] sm:$0xff]  ;;  %v2415_v34 = vld [vmem:[%s7289_s7 + $0x1b8] sm:$0xff] }
 0x3d1   :  { %v4812_v37 = vcombine.high %v2414_v32, %v2422_v33  ;;  %v4811_v45 = vcombine.low %v2414_v32, %v2422_v33  ;;  %v4813_v46 = vcombine.low %v2415_v34, %v2423_v16  ;;  %v2567_v32 = vld [vmem:[%s7289_s7 + $0x678] sm:$0xff] }
 0x3d2   :  { %4169 = vmatpush2.bf16.msra.mxu0 %v4935_v38  ;;  %v4814_v38 = vcombine.high %v2415_v34, %v2423_v16 }
 0x3d3   :  { %4210 = vmatpush2.bf16.msra.mxu1 %v4937_v39  ;;  %4170 = vmatprep.subr.bf16.mxu0 %v4920_v41  ;;  %v2398_v39 = vld [vmem:[%s7289_s7 + $0x130] sm:$0xff] }
 0x3d4   :  { %4211 = vmatprep.subr.bf16.mxu1 %v4922_v43  ;;  %v2406_v41 = vld [vmem:[%s7289_s7 + $0x170] sm:$0xff]  ;;  %v2399_v43 = vld [vmem:[%s7289_s7 + $0x138] sm:$0xff] }
 0x3d5   :  { %v4796_v47 = vcombine.high %v2398_v39, %v2406_v41  ;;  %v4795_v56 = vcombine.low %v2398_v39, %v2406_v41  ;;  %v4797_v57 = vcombine.low %v2399_v43, %v2407_v44  ;;  %v2551_v39 = vld [vmem:[%s7289_s7 + $0x5f8] sm:$0xff] }
 0x3d6   :  { %4171 = vmatpush2.bf16.msra.mxu0 %v4919_v48  ;;  %v4798_v48 = vcombine.high %v2399_v43, %v2407_v44 }
 0x3d7   :  { %4212 = vmatpush2.bf16.msra.mxu1 %v4921_v50  ;;  %4172 = vmatprep.subr.bf16.mxu0 %v4904_v53  ;;  %v2382_v50 = vld [vmem:[%s7289_s7 + $0xb0] sm:$0xff] }
 0x3d8   :  { %4213 = vmatprep.subr.bf16.mxu1 %v4906_v54  ;;  %v2390_v53 = vld [vmem:[%s7289_s7 + $0xf0] sm:$0xff]  ;;  %v2383_v54 = vld [vmem:[%s7289_s7 + $0xb8] sm:$0xff] }
 0x3d9   :  { %v4780_v58 = vcombine.high %v2382_v50, %v2390_v53  ;;  %v4779_v0 = vcombine.low %v2382_v50, %v2390_v53  ;;  %v4781_v1 = vcombine.low %v2383_v54, %v2391_v55  ;;  %v2535_v50 = vld [vmem:[%s7289_s7 + $0x578] sm:$0xff] }
 0x3da   :  { %4173 = vmatpush2.bf16.msra.mxu0 %v4903_v59  ;;  %v4782_v59 = vcombine.high %v2383_v54, %v2391_v55 }
 0x3db   :  { %4214 = vmatpush2.bf16.msra.mxu1 %v4905_v60  ;;  %4174 = vmatprep.subr.bf16.mxu0 %v4888_v61  ;;  %v2366_v60 = vld [vmem:[%s7289_s7 + $0x30] sm:$0xff] }
 0x3dc   :  { %4215 = vmatprep.subr.bf16.mxu1 %v4890_v62  ;;  %v2374_v61 = vld [vmem:[%s7289_s7 + $0x70] sm:$0xff]  ;;  %v2367_v62 = vld [vmem:[%s7289_s7 + $0x38] sm:$0xff] }
 0x3dd   :  { %v4764_v2 = vcombine.high %v2366_v60, %v2374_v61  ;;  %v4763_v9 = vcombine.low %v2366_v60, %v2374_v61  ;;  %v2519_v60 = vld [vmem:[%s7289_s7 + $0x4f8] sm:$0xff] }
 0x3de   :  { %4175 = vmatpush2.bf16.msra.mxu0 %v4887_v3  ;;  %v4766_v3 = vcombine.high %v2367_v62, %v2375_v63 }
 0x3df   :  { %4216 = vmatpush2.bf16.msra.mxu1 %v4889_v4  ;;  %4226 = vmatprep.subr.bf16.mxu0 %v4876_v5  ;;  %v2606_v4 = vld [vmem:[%s7289_s7 + $0x7b0] sm:$0xff] }
 0x3e0   :  { %4267 = vmatprep.subr.bf16.mxu1 %v4878_v7  ;;  %v2614_v5 = vld [vmem:[%s7289_s7 + $0x7f0] sm:$0xff]  ;;  %v2607_v7 = vld [vmem:[%s7289_s7 + $0x7b8] sm:$0xff] }
 0x3e1   :  { %4177 = vmatmul.mubr.bf16.vlgmr.msra.gmra.mxu0 %v6672_v52  ;;  %v5004_v13 = vcombine.high %v2606_v4, %v2614_v5  ;;  %v5006_v14 = vcombine.high %v2607_v7, %v2615_v8  ;;  %v5005_v23 = vcombine.low %v2607_v7, %v2615_v8 }
 0x3e2   :  { %4218 = vmatmul.mubr.bf16.vlgmr.msra.gmra.mxu1 %v6672_v52  ;;  %4227 = vmatpush1.bf16.msra.mxu0 %v4875_v10  ;;  %v4765_v10 = vcombine.low %v2367_v62, %v2375_v63 }
 0x3e3   :  { %4258 = vmatprep.mubr.bf16.mxu0 %v6670_v51  ;;  %4268 = vmatpush1.bf16.msra.mxu1 %v4877_v17  ;;  %v2590_v17 = vld [vmem:[%s7289_s7 + $0x730] sm:$0xff] }
 0x3e4   :  { %4299 = vmatprep.mubr.bf16.mxu1 %v6670_v51  ;;  %4228 = vmatprep.subr.bf16.mxu0 %v4860_v18  ;;  %v4843_v51 = vcombine.low %v2446_v20, %v2454_v21  ;;  %v2598_v18 = vld [vmem:[%s7289_s7 + $0x770] sm:$0xff]  ;;  %v2591_v20 = vld [vmem:[%s7289_s7 + $0x738] sm:$0xff] }
 0x3e5   :  { %4269 = vmatprep.subr.bf16.mxu1 %v4862_v22  ;;  %v2599_v21 = vld [vmem:[%s7289_s7 + $0x778] sm:$0xff]  ;;  %v5003_v22 = vcombine.low %v2606_v4, %v2614_v5  ;;  %v4988_v24 = vcombine.high %v2590_v17, %v2598_v18  ;;  %v4987_v29 = vcombine.low %v2590_v17, %v2598_v18  ;;  %v2616_v17 = vld [vmem:[%s7292_s8] sm:$0xff]  ;;  %v2634_v18 = vsub.s32 3, %v5634_v42 }
 0x3e6   :  { %4229 = vmatpush1.bf16.msra.mxu0 %v4859_v25  ;;  %v4990_v25 = vcombine.high %v2591_v20, %v2599_v21  ;;  %v4989_v30 = vcombine.low %v2591_v20, %v2599_v21  ;;  %v2503_v4 = vld [vmem:[%s7289_s7 + $0x478] sm:$0xff]  ;;  %v2623_v20 = vrot.slane %v2616_v17, %v6329_v40 }
 0x3e7   :  { %4270 = vmatpush1.bf16.msra.mxu1 %v4861_v11  ;;  %4230 = vmatprep.subr.bf16.mxu0 %v4844_v26  ;;  %v2574_v11 = vld [vmem:[%s7289_s7 + $0x6b0] sm:$0xff] }
 0x3e8   :  { %4271 = vmatprep.subr.bf16.mxu1 %v4846_v27  ;;  %v2582_v26 = vld [vmem:[%s7289_s7 + $0x6f0] sm:$0xff]  ;;  %v2575_v27 = vld [vmem:[%s7289_s7 + $0x6b8] sm:$0xff] }
 0x3e9   :  { %v4972_v31 = vcombine.high %v2574_v11, %v2582_v26  ;;  %v4971_v33 = vcombine.low %v2574_v11, %v2582_v26  ;;  %v4973_v34 = vcombine.low %v2575_v27, %v2583_v28 }
 0x3ea   :  { %4231 = vmatpush1.bf16.msra.mxu0 %v4843_v51  ;;  %v4974_v51 = vcombine.high %v2575_v27, %v2583_v28 }
 0x3eb   :  { %4272 = vmatpush1.bf16.msra.mxu1 %v4845_v12  ;;  %4232 = vmatprep.subr.bf16.mxu0 %v4828_v15  ;;  %v2558_v12 = vld [vmem:[%s7289_s7 + $0x630] sm:$0xff] }
 0x3ec   :  { %4273 = vmatprep.subr.bf16.mxu1 %v4830_v19  ;;  %v2566_v15 = vld [vmem:[%s7289_s7 + $0x670] sm:$0xff]  ;;  %v2559_v19 = vld [vmem:[%s7289_s7 + $0x638] sm:$0xff] }
 0x3ed   :  { %v4956_v16 = vcombine.high %v2558_v12, %v2566_v15  ;;  %v4955_v41 = vcombine.low %v2558_v12, %v2566_v15  ;;  %v4957_v43 = vcombine.low %v2559_v19, %v2567_v32 }
 0x3ee   :  { %4233 = vmatpush1.bf16.msra.mxu0 %v4827_v35  ;;  %v4958_v35 = vcombine.high %v2559_v19, %v2567_v32 }
 0x3ef   :  { %4274 = vmatpush1.bf16.msra.mxu1 %v4829_v36  ;;  %4234 = vmatprep.subr.bf16.mxu0 %v4812_v37  ;;  %v2542_v36 = vld [vmem:[%s7289_s7 + $0x5b0] sm:$0xff] }
 0x3f0   :  { %4275 = vmatprep.subr.bf16.mxu1 %v4814_v38  ;;  %v2550_v37 = vld [vmem:[%s7289_s7 + $0x5f0] sm:$0xff]  ;;  %v2543_v38 = vld [vmem:[%s7289_s7 + $0x5b8] sm:$0xff] }
 0x3f1   :  { %v4940_v44 = vcombine.high %v2542_v36, %v2550_v37  ;;  %v4939_v53 = vcombine.low %v2542_v36, %v2550_v37  ;;  %v4941_v54 = vcombine.low %v2543_v38, %v2551_v39 }
 0x3f2   :  { %4235 = vmatpush1.bf16.msra.mxu0 %v4811_v45  ;;  %v4942_v45 = vcombine.high %v2543_v38, %v2551_v39  ;;  %v2638_v38 = vsub.s32 4, %v5634_v42  ;;  %v2646_v39 = vsub.s32 6, %v5634_v42 }
 0x3f3   :  { %4276 = vmatpush1.bf16.msra.mxu1 %v4813_v46  ;;  %4236 = vmatprep.subr.bf16.mxu0 %v4796_v47  ;;  %v2526_v46 = vld [vmem:[%s7289_s7 + $0x530] sm:$0xff] }
 0x3f4   :  { %4277 = vmatprep.subr.bf16.mxu1 %v4798_v48  ;;  %v2534_v47 = vld [vmem:[%s7289_s7 + $0x570] sm:$0xff]  ;;  %v2527_v48 = vld [vmem:[%s7289_s7 + $0x538] sm:$0xff] }
 0x3f5   :  { %v4924_v55 = vcombine.high %v2526_v46, %v2534_v47  ;;  %v4923_v61 = vcombine.low %v2526_v46, %v2534_v47  ;;  %v4925_v62 = vcombine.low %v2527_v48, %v2535_v50 }
 0x3f6   :  { %4237 = vmatpush1.bf16.msra.mxu0 %v4795_v56  ;;  %v4926_v56 = vcombine.high %v2527_v48, %v2535_v50 }
 0x3f7   :  { %4278 = vmatpush1.bf16.msra.mxu1 %v4797_v57  ;;  %4238 = vmatprep.subr.bf16.mxu0 %v4780_v58  ;;  %v2510_v57 = vld [vmem:[%s7289_s7 + $0x4b0] sm:$0xff] }
 0x3f8   :  { %4279 = vmatprep.subr.bf16.mxu1 %v4782_v59  ;;  %v2518_v58 = vld [vmem:[%s7289_s7 + $0x4f0] sm:$0xff]  ;;  %v2511_v59 = vld [vmem:[%s7289_s7 + $0x4b8] sm:$0xff] }
 0x3f9   :  { %v4908_v63 = vcombine.high %v2510_v57, %v2518_v58  ;;  %v4907_v5 = vcombine.low %v2510_v57, %v2518_v58  ;;  %v4909_v7 = vcombine.low %v2511_v59, %v2519_v60 }
 0x3fa   :  { %4239 = vmatpush1.bf16.msra.mxu0 %v4779_v0  ;;  %v4910_v0 = vcombine.high %v2511_v59, %v2519_v60 }
 0x3fb   :  { %4280 = vmatpush1.bf16.msra.mxu1 %v4781_v1  ;;  %4240 = vmatprep.subr.bf16.mxu0 %v4764_v2  ;;  %v2494_v1 = vld [vmem:[%s7289_s7 + $0x430] sm:$0xff] }
 0x3fc   :  { %4281 = vmatprep.subr.bf16.mxu1 %v4766_v3  ;;  %v2502_v2 = vld [vmem:[%s7289_s7 + $0x470] sm:$0xff]  ;;  %v2495_v3 = vld [vmem:[%s7289_s7 + $0x438] sm:$0xff] }
 0x3fd   :  { %v4892_v8 = vcombine.high %v2494_v1, %v2502_v2 }
 0x3fe   :  { %4241 = vmatpush1.bf16.msra.mxu0 %v4763_v9  ;;  %v4894_v9 = vcombine.high %v2495_v3, %v2503_v4 }
 0x3ff   :  { %4282 = vmatpush1.bf16.msra.mxu1 %v4765_v10  ;;  %4242 = vmatprep.subr.bf16.mxu0 %v5004_v13  ;;  %v4891_v10 = vcombine.low %v2494_v1, %v2502_v2  ;;  %v2630_v13 = vsub.s32 2, %v5634_v42 }
 0x400   :  { %4283 = vmatprep.subr.bf16.mxu1 %v5006_v14  ;;  %v4893_v14 = vcombine.low %v2495_v3, %v2503_v4 }
 0x401   :  { %v2631_v21 = vrot.slane %v2616_v17, %v2630_v13 }
 0x402   :  { %4243 = vmatpush2.bf16.msra.mxu0 %v5003_v22  ;;  %v2627_v22 = vrot.slane %v2616_v17, %v6335_v6 }
 0x403   :  { %4284 = vmatpush2.bf16.msra.mxu1 %v5005_v23  ;;  %4244 = vmatprep.subr.bf16.mxu0 %v4988_v24  ;;  %v2635_v23 = vrot.slane %v2616_v17, %v2634_v18 }
 0x404   :  { %4285 = vmatprep.subr.bf16.mxu1 %v4990_v25 }
 0x406   :  { %4245 = vmatpush2.bf16.msra.mxu0 %v4987_v29 }
 0x407   :  { %4286 = vmatpush2.bf16.msra.mxu1 %v4989_v30  ;;  %4246 = vmatprep.subr.bf16.mxu0 %v4972_v31 }
 0x408   :  { %4287 = vmatprep.subr.bf16.mxu1 %v4974_v51 }
 0x40a   :  { %4247 = vmatpush2.bf16.msra.mxu0 %v4971_v33 }
 0x40b   :  { %4288 = vmatpush2.bf16.msra.mxu1 %v4973_v34  ;;  %4248 = vmatprep.subr.bf16.mxu0 %v4956_v16 }
 0x40c   :  { %4289 = vmatprep.subr.bf16.mxu1 %v4958_v35 }
 0x40e   :  { %4249 = vmatpush2.bf16.msra.mxu0 %v4955_v41  ;;  %v2642_v41 = vsub.s32 5, %v5634_v42 }
 0x40f   :  { %4290 = vmatpush2.bf16.msra.mxu1 %v4957_v43  ;;  %4250 = vmatprep.subr.bf16.mxu0 %v4940_v44  ;;  %v2650_v43 = vsub.s32 7, %v5634_v42  ;;  %v2639_v44 = vrot.slane %v2616_v17, %v2638_v38 }
 0x410   :  { %4291 = vmatprep.subr.bf16.mxu1 %v4942_v45  ;;  %v2647_v45 = vrot.slane %v2616_v17, %v2646_v39  ;;  %v2643_v46 = vrot.slane %v2616_v17, %v2642_v41 }
 0x411   :  { %v2651_v47 = vrot.slane %v2616_v17, %v2650_v43  ;;  %v2617_v17 = vld [vmem:[%s7292_s8 + $0x8] sm:$0xff] }
 0x412   :  { %4251 = vmatpush2.bf16.msra.mxu0 %v4939_v53 }
 0x413   :  { %4292 = vmatpush2.bf16.msra.mxu1 %v4941_v54  ;;  %4252 = vmatprep.subr.bf16.mxu0 %v4924_v55 }
 0x414   :  { %4293 = vmatprep.subr.bf16.mxu1 %v4926_v56 }
 0x416   :  { %4253 = vmatpush2.bf16.msra.mxu0 %v4923_v61 }
 0x417   :  { %4294 = vmatpush2.bf16.msra.mxu1 %v4925_v62  ;;  %4254 = vmatprep.subr.bf16.mxu0 %v4908_v63 }
 0x418   :  { %4295 = vmatprep.subr.bf16.mxu1 %v4910_v0 }
 0x41a   :  { %4255 = vmatpush2.bf16.msra.mxu0 %v4907_v5 }
 0x41b   :  { %4296 = vmatpush2.bf16.msra.mxu1 %v4909_v7  ;;  %4256 = vmatprep.subr.bf16.mxu0 %v4892_v8 }
 0x41c   :  { %4297 = vmatprep.subr.bf16.mxu1 %v4894_v9 }
 0x41e   :  { %4257 = vmatpush2.bf16.msra.mxu0 %v4891_v10 }
 0x41f   :  { %4298 = vmatpush2.bf16.msra.mxu1 %v4893_v14 }
 0x421   :  { %4259 = vmatmul.mubr.bf16.vlgmr.msra.gmra.mxu0 %v6672_v52  ;;  %v4014_v24 = vpop.f32.mrf.mxu0  ;;  %v4055_v25 = vpop.f32.mrf.mxu1 }
 0x422   :  { %4300 = vmatmul.mubr.bf16.vlgmr.msra.gmra.mxu1 %v6672_v52  ;;  %v4015_v11 = vadd.f32 %v4014_v24, %v2623_v20  ;;  %v4056_v26 = vadd.f32 %v4055_v25, %v2631_v21  ;;  %v2655_v20 = vrot.slane %v2617_v17, %v6329_v40  ;;  %v2663_v21 = vrot.slane %v2617_v17, %v2630_v13 }
 0x423   :  { %v4016_v27 = vpop.f32.mrf.mxu0  ;;  %v4057_v28 = vpop.f32.mrf.mxu1  ;;  %v2667_v24 = vrot.slane %v2617_v17, %v2634_v18 }
 0x424   :  { %v4017_v29 = vadd.f32 %v4016_v27, %v2627_v22  ;;  %v4058_v30 = vadd.f32 %v4057_v28, %v2635_v23  ;;  %v4308_v12 = vmax.f32 %v4015_v11, 0.0  ;;  %v4310_v15 = vmax.f32 %v4056_v26, 0.0 }
 0x425   :  { %v4018_v31 = vpop.f32.mrf.mxu0  ;;  %v4059_v51 = vpop.f32.mrf.mxu1  ;;  %v2659_v22 = vrot.slane %v2617_v17, %v6335_v6 }
 0x426   :  { %v4309_v19 = vmax.f32 %v4017_v29, 0.0  ;;  %v4311_v32 = vmax.f32 %v4058_v30, 0.0 }
 0x427   :  { %v4019_v33 = vpop.f32.mrf.mxu0  ;;  %v4060_v34 = vpop.f32.mrf.mxu1 }
 0x428   :  { %v5007_v16 = vpack.c.bf16 %v4309_v19, %v4308_v12  ;;  %v5008_v35 = vpack.c.bf16 %v4311_v32, %v4310_v15 }
 0x42a   :  { %v4366_v36 = vrot.slane %v5007_v16, %v5652_v49  ;;  %v4373_v52 = vrot.slane %v5008_v35, %v5652_v49  ;;  %v2671_v16 = vrot.slane %v2617_v17, %v2638_v38  ;;  %v2679_v35 = vrot.slane %v2617_v17, %v2646_v39 }
 0x42c   :  { %v4388_v37 = vcombine.low %v4366_v36, %v4373_v52  ;;  %v2675_v36 = vrot.slane %v2617_v17, %v2642_v41 }
 0x42e   :  { %v4396_v9 = vrot.slane %v4388_v37, %v5652_v49  ;;  %v2683_v37 = vrot.slane %v2617_v17, %v2650_v43 }
 0x461   :  { %v4096_v48 = vpop.f32.mrf.mxu0  ;;  %v4137_v50 = vpop.f32.mrf.mxu1 }
 0x462   :  { %v4097_v53 = vadd.f32 %v4096_v48, %v2639_v44  ;;  %v4138_v54 = vadd.f32 %v4137_v50, %v2647_v45 }
 0x463   :  { %v4098_v55 = vpop.f32.mrf.mxu0  ;;  %v4139_v56 = vpop.f32.mrf.mxu1 }
 0x464   :  { %v4099_v57 = vadd.f32 %v4098_v55, %v2643_v46  ;;  %v4140_v58 = vadd.f32 %v4139_v56, %v2651_v47  ;;  %v4312_v61 = vmax.f32 %v4097_v53, 0.0  ;;  %v4314_v62 = vmax.f32 %v4138_v54, 0.0 }
 0x465   :  { %v4100_v59 = vpop.f32.mrf.mxu0  ;;  %v4141_v60 = vpop.f32.mrf.mxu1 }
 0x466   :  { %v4313_v63 = vmax.f32 %v4099_v57, 0.0  ;;  %v4315_v0 = vmax.f32 %v4140_v58, 0.0 }
 0x467   :  { %v4101_v1 = vpop.f32.mrf.mxu0  ;;  %v4142_v2 = vpop.f32.mrf.mxu1 }
 0x468   :  { %v5009_v3 = vpack.c.bf16 %v4313_v63, %v4312_v61  ;;  %v5010_v4 = vpack.c.bf16 %v4315_v0, %v4314_v62 }
 0x46a   :  { %v4380_v5 = vrot.slane %v5009_v3, %v5652_v49  ;;  %v4387_v7 = vrot.slane %v5010_v4, %v5652_v49 }
 0x46c   :  { %v4389_v8 = vcombine.low %v4380_v5, %v4387_v7 }
 0x46e   :  { %v4403_v10 = vrot.slane %v4389_v8, %v5652_v49 }
 0x470   :  { %v4404_v14 = vcombine.low %v4396_v9, %v4403_v10 }
 0x472   :  { %4456 = vst [vmem:[%s7293_s9] sm:$0xff] %v4404_v14 }
 0x4a1   :  { %v4178_v23 = vpop.f32.mrf.mxu0 }
 0x4a2   :  { %v4179_v25 = vadd.f32 %v4178_v23, %v2655_v20  ;;  %v4219_v11 = vpop.f32.mrf.mxu1 }
 0x4a3   :  { %v4220_v26 = vadd.f32 %v4219_v11, %v2663_v21  ;;  %v4180_v27 = vpop.f32.mrf.mxu0 }
 0x4a4   :  { %v4181_v28 = vadd.f32 %v4180_v27, %v2659_v22  ;;  %v4221_v29 = vpop.f32.mrf.mxu1  ;;  %v4316_v51 = vmax.f32 %v4179_v25, 0.0 }
 0x4a5   :  { %v4222_v30 = vadd.f32 %v4221_v29, %v2667_v24  ;;  %v4182_v31 = vpop.f32.mrf.mxu0  ;;  %v4318_v15 = vmax.f32 %v4220_v26, 0.0 }
 0x4a6   :  { %v4317_v12 = vmax.f32 %v4181_v28, 0.0  ;;  %v4223_v40 = vpop.f32.mrf.mxu1 }
 0x4a7   :  { %v4319_v19 = vmax.f32 %v4222_v30, 0.0  ;;  %v4183_v13 = vpop.f32.mrf.mxu0 }
 0x4a8   :  { %v5011_v32 = vpack.c.bf16 %v4317_v12, %v4316_v51  ;;  %v4224_v6 = vpop.f32.mrf.mxu1 }
 0x4a9   :  { %v5012_v33 = vpack.c.bf16 %v4319_v19, %v4318_v15 }
 0x4aa   :  { %v4415_v42 = vrot.slane %v5011_v32, %v5652_v49 }
 0x4ab   :  { %v4422_v18 = vrot.slane %v5012_v33, %v5652_v49 }
 0x4ad   :  { %v4437_v34 = vcombine.low %v4415_v42, %v4422_v18 }
 0x4af   :  { %v4445_v63 = vrot.slane %v4437_v34, %v5652_v49 }
 0x4e1   :  { %v4260_v52 = vpop.f32.mrf.mxu0 }
 0x4e2   :  { %v4261_v44 = vadd.f32 %v4260_v52, %v2671_v16  ;;  %v4301_v45 = vpop.f32.mrf.mxu1 }
 0x4e3   :  { %v4302_v46 = vadd.f32 %v4301_v45, %v2679_v35  ;;  %v4262_v47 = vpop.f32.mrf.mxu0 }
 0x4e4   :  { %v4263_v48 = vadd.f32 %v4262_v47, %v2675_v36  ;;  %v4303_v50 = vpop.f32.mrf.mxu1  ;;  %v4320_v55 = vmax.f32 %v4261_v44, 0.0 }
 0x4e5   :  { %v4304_v53 = vadd.f32 %v4303_v50, %v2683_v37  ;;  %v4264_v54 = vpop.f32.mrf.mxu0  ;;  %v4322_v58 = vmax.f32 %v4302_v46, 0.0 }
 0x4e6   :  { %v4321_v56 = vmax.f32 %v4263_v48, 0.0  ;;  %v4305_v57 = vpop.f32.mrf.mxu1 }
 0x4e7   :  { %v4323_v59 = vmax.f32 %v4304_v53, 0.0  ;;  %v4265_v60 = vpop.f32.mrf.mxu0 }
 0x4e8   :  { %v5013_v61 = vpack.c.bf16 %v4321_v56, %v4320_v55  ;;  %v4306_v38 = vpop.f32.mrf.mxu1 }
 0x4e9   :  { %v5014_v39 = vpack.c.bf16 %v4323_v59, %v4322_v58 }
 0x4ea   :  { %v4429_v41 = vrot.slane %v5013_v61, %v5652_v49 }
 0x4eb   :  { %v4436_v43 = vrot.slane %v5014_v39, %v5652_v49 }
 0x4ed   :  { %v4438_v62 = vcombine.low %v4429_v41, %v4436_v43 }
 0x4ef   :  { %v4452_v0 = vrot.slane %v4438_v62, %v5652_v49 }
 0x4f1   :  { %v4453_v1 = vcombine.low %v4445_v63, %v4452_v0 }
 0x4f3   :  { %4457 = vst [vmem:[%s7293_s9 + $0x8] sm:$0xff] %v4453_v1 }

// kernel: autoencoder_forward.12
= control target key start
LH: loop header
LB: loop body
LE: loop exit
PB: predicated region body
PF: predicated region fallthrough
CT: control target
= control target key end

     0   :  { %v1579_v0 = vmov 0   ;;  %vm446_vm0 = vcmask 130048   ;;  %vm1152_vm1 = vcmask 257024   ;;  %s2176_s1 = inlined_call_operand.vmem [shape: bf16[144,32], index: 1, kind: input, shape index: {}]   ;;  %s2177_s0 = inlined_call_operand.vmem [shape: bf16[512,144], index: 0, kind: input, shape index: {}]   ;;  %s2178_s2 = inlined_call_operand.vmem [shape: f32[1,32], index: 2, kind: input, shape index: {}]   ;;  %s2179_s3 = inlined_call_operand.vmem [shape: bf16[512,32], index: 3, kind: output, shape index: {}]  }
   0x1   :  { %543 = vmatprep.subr.bf16.mxu0 %v1579_v0  ;;  %1455 = vmatprep.subr.bf16.mxu1 %v1579_v0  ;;  %v1474_v1 = vld [vmem:[%s2176_s1 + $0x38] sm:$0xff]   ;;  %v1475_v2 = vld [vmem:[%s2176_s1 + $0x30] sm:$0xff]   ;;  %v1476_v3 = vld [vmem:[%s2176_s1 + $0x28] sm:$0xff]  }
   0x2   :  { %544 = vmatpush1.bf16.msra.mxu0 %v1474_v1  ;;  %1464 = vmatpush1.bf16.msra.mxu1 %v1474_v1  ;;  %v1477_v4 = vld [vmem:[%s2176_s1 + $0x20] sm:$0xff]   ;;  %v1478_v7 = vld [vmem:[%s2176_s1 + $0x18] sm:$0xff]   ;;  %v1479_v8 = vld [vmem:[%s2176_s1 + $0x10] sm:$0xff]  }
   0x3   :  { %545 = vmatprep.subr.bf16.mxu0 %v1579_v0  ;;  %1456 = vmatprep.subr.bf16.mxu1 %v1579_v0  ;;  %v1485_v5 = vld [vmem:[%s2177_s0 + $0x4] ss:$8 sps:$4 sm:$0xff]   ;;  %v1483_v12 = vld [vmem:[%s2177_s0] ss:$8 sps:$4 sm:$0xff]   ;;  %v1489_v14 = vld [vmem:[%s2177_s0 + $0x14] ss:$8 sps:$4 sm:$0xff]  }
   0x4   :  { %v1488_v6 = vld [vmem:[%s2177_s0 + $0x104] ss:$8 sps:$4 sm:$0xff]   ;;  %1295 = vmatprep.mubr.msk.bf16.mxu0 %vm446_vm0, %v1485_v5  ;;  %v1486_v13 = vld [vmem:[%s2177_s0 + $0x100] ss:$8 sps:$4 sm:$0xff]   ;;  %v1491_v15 = vld [vmem:[%s2177_s0 + $0x114] ss:$8 sps:$4 sm:$0xff]  }
   0x5   :  { %1311 = vmatprep.mubr.msk.bf16.mxu1 %vm446_vm0, %v1488_v6  ;;  %v1480_v9 = vld [vmem:[%s2176_s1 + $0x8] sm:$0xff]   ;;  %v1481_v10 = vld [vmem:[%s2176_s1] sm:$0xff]   ;;  %v1493_v16 = vld [vmem:[%s2177_s0 + $0x10] ss:$8 sps:$4 sm:$0xff]  }
   0x6   :  { %546 = vmatpush1.bf16.msra.mxu0 %v1475_v2  ;;  %1465 = vmatpush1.bf16.msra.mxu1 %v1475_v2  ;;  %v1482_v11 = vld [vmem:[%s2176_s1 + $0x40] sm:$0xff]   ;;  %v1494_v17 = vld [vmem:[%s2177_s0 + $0x110] ss:$8 sps:$4 sm:$0xff]   ;;  %v1501_v22 = vld [vmem:[%s2177_s0 + $0x34] ss:$8 sps:$4 sm:$0xff]  }
   0x7   :  { %547 = vmatprep.subr.bf16.mxu0 %v1579_v0  ;;  %1457 = vmatprep.subr.bf16.mxu1 %v1579_v0  ;;  %v1495_v18 = vld [vmem:[%s2177_s0 + $0x24] ss:$8 sps:$4 sm:$0xff]   ;;  %v1499_v20 = vld [vmem:[%s2177_s0 + $0x20] ss:$8 sps:$4 sm:$0xff]   ;;  %v1503_v23 = vld [vmem:[%s2177_s0 + $0x134] ss:$8 sps:$4 sm:$0xff]  }
   0x8   :  { %v1497_v19 = vld [vmem:[%s2177_s0 + $0x124] ss:$8 sps:$4 sm:$0xff]   ;;  %v1500_v21 = vld [vmem:[%s2177_s0 + $0x120] ss:$8 sps:$4 sm:$0xff]   ;;  %v1505_v24 = vld [vmem:[%s2177_s0 + $0x30] ss:$8 sps:$4 sm:$0xff]  }
   0x9   :  { %v1506_v25 = vld [vmem:[%s2177_s0 + $0x130] ss:$8 sps:$4 sm:$0xff]   ;;  %v1507_v26 = vld [vmem:[%s2177_s0 + $0x44] ss:$8 sps:$4 sm:$0xff]   ;;  %v1511_v28 = vld [vmem:[%s2177_s0 + $0x40] ss:$8 sps:$4 sm:$0xff]  }
   0xa   :  { %548 = vmatpush1.bf16.msra.mxu0 %v1476_v3  ;;  %1466 = vmatpush1.bf16.msra.mxu1 %v1476_v3  ;;  %v1509_v27 = vld [vmem:[%s2177_s0 + $0x144] ss:$8 sps:$4 sm:$0xff]   ;;  %v1512_v29 = vld [vmem:[%s2177_s0 + $0x140] ss:$8 sps:$4 sm:$0xff]   ;;  %v1513_v30 = vld [vmem:[%s2177_s0 + $0x54] ss:$8 sps:$4 sm:$0xff]  }
   0xb   :  { %549 = vmatprep.subr.bf16.mxu0 %v1579_v0  ;;  %1458 = vmatprep.subr.bf16.mxu1 %v1579_v0  ;;  %v1515_v31 = vld [vmem:[%s2177_s0 + $0x154] ss:$8 sps:$4 sm:$0xff]   ;;  %v1517_v32 = vld [vmem:[%s2177_s0 + $0x50] ss:$8 sps:$4 sm:$0xff]   ;;  %v1519_v34 = vld [vmem:[%s2177_s0 + $0x64] ss:$8 sps:$4 sm:$0xff]  }
   0xc   :  { %v1518_v33 = vld [vmem:[%s2177_s0 + $0x150] ss:$8 sps:$4 sm:$0xff]   ;;  %v1521_v35 = vld [vmem:[%s2177_s0 + $0x164] ss:$8 sps:$4 sm:$0xff]   ;;  %v1523_v36 = vld [vmem:[%s2177_s0 + $0x60] ss:$8 sps:$4 sm:$0xff]  }
   0xd   :  { %v1524_v37 = vld [vmem:[%s2177_s0 + $0x160] ss:$8 sps:$4 sm:$0xff]   ;;  %v1525_v38 = vld [vmem:[%s2177_s0 + $0x74] ss:$8 sps:$4 sm:$0xff]   ;;  %v1529_v40 = vld [vmem:[%s2177_s0 + $0x70] ss:$8 sps:$4 sm:$0xff]  }
   0xe   :  { %550 = vmatpush1.bf16.msra.mxu0 %v1477_v4  ;;  %1467 = vmatpush1.bf16.msra.mxu1 %v1477_v4  ;;  %v1527_v39 = vld [vmem:[%s2177_s0 + $0x174] ss:$8 sps:$4 sm:$0xff]   ;;  %v1530_v41 = vld [vmem:[%s2177_s0 + $0x170] ss:$8 sps:$4 sm:$0xff]   ;;  %v1531_v42 = vld [vmem:[%s2177_s0 + $0x84] ss:$8 sps:$4 sm:$0xff]  }
   0xf   :  { %551 = vmatprep.subr.bf16.mxu0 %v1579_v0  ;;  %1459 = vmatprep.subr.bf16.mxu1 %v1579_v0  ;;  %v1533_v43 = vld [vmem:[%s2177_s0 + $0x184] ss:$8 sps:$4 sm:$0xff]   ;;  %v1535_v44 = vld [vmem:[%s2177_s0 + $0x80] ss:$8 sps:$4 sm:$0xff]   ;;  %v1537_v46 = vld [vmem:[%s2177_s0 + $0x94] ss:$8 sps:$4 sm:$0xff]  }
  0x10   :  { %v1536_v45 = vld [vmem:[%s2177_s0 + $0x180] ss:$8 sps:$4 sm:$0xff]   ;;  %v1539_v47 = vld [vmem:[%s2177_s0 + $0x194] ss:$8 sps:$4 sm:$0xff]   ;;  %v1541_v48 = vld [vmem:[%s2177_s0 + $0x90] ss:$8 sps:$4 sm:$0xff]  }
  0x11   :  { %v1542_v49 = vld [vmem:[%s2177_s0 + $0x190] ss:$8 sps:$4 sm:$0xff]   ;;  %v1543_v50 = vld [vmem:[%s2177_s0 + $0xa4] ss:$8 sps:$4 sm:$0xff]   ;;  %v1547_v52 = vld [vmem:[%s2177_s0 + $0xa0] ss:$8 sps:$4 sm:$0xff]  }
  0x12   :  { %552 = vmatpush1.bf16.msra.mxu0 %v1478_v7  ;;  %1468 = vmatpush1.bf16.msra.mxu1 %v1478_v7  ;;  %v1545_v51 = vld [vmem:[%s2177_s0 + $0x1a4] ss:$8 sps:$4 sm:$0xff]   ;;  %v1548_v53 = vld [vmem:[%s2177_s0 + $0x1a0] ss:$8 sps:$4 sm:$0xff]   ;;  %v1549_v54 = vld [vmem:[%s2177_s0 + $0xb4] ss:$8 sps:$4 sm:$0xff]  }
  0x13   :  { %553 = vmatprep.subr.bf16.mxu0 %v1579_v0  ;;  %1460 = vmatprep.subr.bf16.mxu1 %v1579_v0  ;;  %v1551_v55 = vld [vmem:[%s2177_s0 + $0x1b4] ss:$8 sps:$4 sm:$0xff]   ;;  %v1553_v56 = vld [vmem:[%s2177_s0 + $0xb0] ss:$8 sps:$4 sm:$0xff]   ;;  %v1555_v58 = vld [vmem:[%s2177_s0 + $0xc4] ss:$8 sps:$4 sm:$0xff]  }
  0x14   :  { %v1554_v57 = vld [vmem:[%s2177_s0 + $0x1b0] ss:$8 sps:$4 sm:$0xff]   ;;  %v1557_v59 = vld [vmem:[%s2177_s0 + $0x1c4] ss:$8 sps:$4 sm:$0xff]   ;;  %v1559_v60 = vld [vmem:[%s2177_s0 + $0xc0] ss:$8 sps:$4 sm:$0xff]  }
  0x15   :  { %v1560_v61 = vld [vmem:[%s2177_s0 + $0x1c0] ss:$8 sps:$4 sm:$0xff]   ;;  %v1561_v62 = vld [vmem:[%s2177_s0 + $0xd4] ss:$8 sps:$4 sm:$0xff]   ;;  %v1566_v1 = vld [vmem:[%s2177_s0 + $0x1d0] ss:$8 sps:$4 sm:$0xff]  }
  0x16   :  { %554 = vmatpush1.bf16.msra.mxu0 %v1479_v8  ;;  %1469 = vmatpush1.bf16.msra.mxu1 %v1479_v8  ;;  %v1563_v63 = vld [vmem:[%s2177_s0 + $0x1d4] ss:$8 sps:$4 sm:$0xff]   ;;  %v1567_v2 = vld [vmem:[%s2177_s0 + $0xe4] ss:$8 sps:$4 sm:$0xff]   ;;  %v1571_v4 = vld [vmem:[%s2177_s0 + $0xe0] ss:$8 sps:$4 sm:$0xff]  }
  0x17   :  { %555 = vmatprep.subr.bf16.mxu0 %v1579_v0  ;;  %1461 = vmatprep.subr.bf16.mxu1 %v1579_v0  ;;  %v1569_v3 = vld [vmem:[%s2177_s0 + $0x1e4] ss:$8 sps:$4 sm:$0xff]   ;;  %v1572_v5 = vld [vmem:[%s2177_s0 + $0x1e0] ss:$8 sps:$4 sm:$0xff]   ;;  %v1573_v6 = vld [vmem:[%s2177_s0 + $0xf4] ss:$8 sps:$4 sm:$0xff]  }
  0x18   :  { %v1575_v7 = vld [vmem:[%s2177_s0 + $0x1f4] ss:$8 sps:$4 sm:$0xff]   ;;  %v1577_v8 = vld [vmem:[%s2177_s0 + $0xf0] ss:$8 sps:$4 sm:$0xff]  }
  0x1a   :  { %556 = vmatpush1.bf16.msra.mxu0 %v1480_v9  ;;  %1470 = vmatpush1.bf16.msra.mxu1 %v1480_v9  ;;  %v1578_v9 = vld [vmem:[%s2177_s0 + $0x1f0] ss:$8 sps:$4 sm:$0xff]  }
  0x1b   :  { %557 = vmatprep.subr.bf16.mxu0 %v1579_v0  ;;  %1462 = vmatprep.subr.bf16.mxu1 %v1579_v0 }
  0x1e   :  { %558 = vmatpush1.bf16.msra.mxu0 %v1481_v10  ;;  %1471 = vmatpush1.bf16.msra.mxu1 %v1481_v10  ;;  %v1854_v10 = vld [vmem:[%s2178_s2] ss:$0 sm:$0xff] }
  0x1f   :  { %573 = vmatprep.subr.bf16.mxu0 %v1579_v0  ;;  %1463 = vmatprep.subr.bf16.mxu1 %v1579_v0  ;;  %v1565_v0 = vld [vmem:[%s2177_s0 + $0xd0] ss:$8 sps:$4 sm:$0xff]  }
  0x22   :  { %574 = vmatpush2.bf16.msra.mxu0 %v1482_v11  ;;  %1472 = vmatpush2.bf16.msra.mxu1 %v1482_v11 }
  0x25   :  { %576 = vmatmul.mubr.bf16.vlgmr.msra.gmra.mxu0 %v1483_v12  ;;  %704 = vmatmul.mubr.bf16.vlgmr.msra.gmra.mxu1 %v1486_v13 }
  0x26   :  { %1296 = vmatprep.mubr.msk.bf16.mxu0 %vm446_vm0, %v1489_v14  ;;  %1312 = vmatprep.mubr.msk.bf16.mxu1 %vm446_vm0, %v1491_v15 }
  0x2d   :  { %584 = vmatmul.mubr.bf16.gmra.mxu0 %v1493_v16  ;;  %712 = vmatmul.mubr.bf16.gmra.mxu1 %v1494_v17 }
  0x2e   :  { %1297 = vmatprep.mubr.msk.bf16.mxu0 %vm446_vm0, %v1495_v18  ;;  %1313 = vmatprep.mubr.msk.bf16.mxu1 %vm446_vm0, %v1497_v19 }
  0x35   :  { %592 = vmatmul.mubr.bf16.gmra.mxu0 %v1499_v20  ;;  %720 = vmatmul.mubr.bf16.gmra.mxu1 %v1500_v21 }
  0x36   :  { %1298 = vmatprep.mubr.msk.bf16.mxu0 %vm446_vm0, %v1501_v22  ;;  %1314 = vmatprep.mubr.msk.bf16.mxu1 %vm446_vm0, %v1503_v23 }
  0x3d   :  { %600 = vmatmul.mubr.bf16.gmra.mxu0 %v1505_v24  ;;  %728 = vmatmul.mubr.bf16.gmra.mxu1 %v1506_v25 }
  0x3e   :  { %1299 = vmatprep.mubr.msk.bf16.mxu0 %vm446_vm0, %v1507_v26  ;;  %1315 = vmatprep.mubr.msk.bf16.mxu1 %vm446_vm0, %v1509_v27 }
  0x45   :  { %608 = vmatmul.mubr.bf16.gmra.mxu0 %v1511_v28  ;;  %736 = vmatmul.mubr.bf16.gmra.mxu1 %v1512_v29 }
  0x46   :  { %1300 = vmatprep.mubr.msk.bf16.mxu0 %vm446_vm0, %v1513_v30  ;;  %1316 = vmatprep.mubr.msk.bf16.mxu1 %vm446_vm0, %v1515_v31 }
  0x4d   :  { %616 = vmatmul.mubr.bf16.gmra.mxu0 %v1517_v32  ;;  %744 = vmatmul.mubr.bf16.gmra.mxu1 %v1518_v33 }
  0x4e   :  { %1301 = vmatprep.mubr.msk.bf16.mxu0 %vm446_vm0, %v1519_v34  ;;  %1317 = vmatprep.mubr.msk.bf16.mxu1 %vm446_vm0, %v1521_v35 }
  0x55   :  { %624 = vmatmul.mubr.bf16.gmra.mxu0 %v1523_v36  ;;  %752 = vmatmul.mubr.bf16.gmra.mxu1 %v1524_v37 }
  0x56   :  { %1302 = vmatprep.mubr.msk.bf16.mxu0 %vm446_vm0, %v1525_v38  ;;  %1318 = vmatprep.mubr.msk.bf16.mxu1 %vm446_vm0, %v1527_v39 }
  0x5d   :  { %632 = vmatmul.mubr.bf16.gmra.mxu0 %v1529_v40  ;;  %760 = vmatmul.mubr.bf16.gmra.mxu1 %v1530_v41 }
  0x5e   :  { %1303 = vmatprep.mubr.msk.bf16.mxu0 %vm446_vm0, %v1531_v42  ;;  %1319 = vmatprep.mubr.msk.bf16.mxu1 %vm446_vm0, %v1533_v43 }
  0x65   :  { %640 = vmatmul.mubr.bf16.gmra.mxu0 %v1535_v44  ;;  %768 = vmatmul.mubr.bf16.gmra.mxu1 %v1536_v45 }
  0x66   :  { %1304 = vmatprep.mubr.msk.bf16.mxu0 %vm446_vm0, %v1537_v46  ;;  %1320 = vmatprep.mubr.msk.bf16.mxu1 %vm446_vm0, %v1539_v47 }
  0x6d   :  { %648 = vmatmul.mubr.bf16.gmra.mxu0 %v1541_v48  ;;  %776 = vmatmul.mubr.bf16.gmra.mxu1 %v1542_v49 }
  0x6e   :  { %1305 = vmatprep.mubr.msk.bf16.mxu0 %vm446_vm0, %v1543_v50  ;;  %1321 = vmatprep.mubr.msk.bf16.mxu1 %vm446_vm0, %v1545_v51 }
  0x75   :  { %656 = vmatmul.mubr.bf16.gmra.mxu0 %v1547_v52  ;;  %784 = vmatmul.mubr.bf16.gmra.mxu1 %v1548_v53 }
  0x76   :  { %1306 = vmatprep.mubr.msk.bf16.mxu0 %vm446_vm0, %v1549_v54  ;;  %1322 = vmatprep.mubr.msk.bf16.mxu1 %vm446_vm0, %v1551_v55 }
  0x7d   :  { %664 = vmatmul.mubr.bf16.gmra.mxu0 %v1553_v56  ;;  %792 = vmatmul.mubr.bf16.gmra.mxu1 %v1554_v57 }
  0x7e   :  { %1307 = vmatprep.mubr.msk.bf16.mxu0 %vm446_vm0, %v1555_v58  ;;  %1323 = vmatprep.mubr.msk.bf16.mxu1 %vm446_vm0, %v1557_v59 }
  0x85   :  { %672 = vmatmul.mubr.bf16.gmra.mxu0 %v1559_v60  ;;  %800 = vmatmul.mubr.bf16.gmra.mxu1 %v1560_v61 }
  0x86   :  { %1308 = vmatprep.mubr.msk.bf16.mxu0 %vm446_vm0, %v1561_v62  ;;  %1324 = vmatprep.mubr.msk.bf16.mxu1 %vm446_vm0, %v1563_v63 }
  0x8d   :  { %680 = vmatmul.mubr.bf16.gmra.mxu0 %v1565_v0  ;;  %808 = vmatmul.mubr.bf16.gmra.mxu1 %v1566_v1 }
  0x8e   :  { %1309 = vmatprep.mubr.msk.bf16.mxu0 %vm446_vm0, %v1567_v2  ;;  %1325 = vmatprep.mubr.msk.bf16.mxu1 %vm446_vm0, %v1569_v3 }
  0x95   :  { %688 = vmatmul.mubr.bf16.gmra.mxu0 %v1571_v4  ;;  %816 = vmatmul.mubr.bf16.gmra.mxu1 %v1572_v5 }
  0x96   :  { %1310 = vmatprep.mubr.msk.bf16.mxu0 %vm446_vm0, %v1573_v6  ;;  %1326 = vmatprep.mubr.msk.bf16.mxu1 %vm446_vm0, %v1575_v7 }
  0x9d   :  { %696 = vmatmul.mubr.bf16.gmra.mxu0 %v1577_v8  ;;  %824 = vmatmul.mubr.bf16.gmra.mxu1 %v1578_v9 }
  0xe5   :  { %v577_v11 = vpop.f32.mrf.mxu0  ;;  %v705_v12 = vpop.f32.mrf.mxu1 }
  0xe6   :  { %v578_v13 = vadd.f32 %v1854_v10, %v577_v11  ;;  %v706_v14 = vadd.f32 %v1854_v10, %v705_v12 }
  0xe7   :  { %v579_v15 = vpop.f32.mrf.mxu0  ;;  %v707_v16 = vpop.f32.mrf.mxu1 }
  0xe8   :  { %v832_v17 = vmax.f32 %v578_v13, 0.0  ;;  %v864_v18 = vmax.f32 %v706_v14, 0.0 }
  0xe9   :  { %v580_v19 = vpop.f32.mrf.mxu0  ;;  %v708_v20 = vpop.f32.mrf.mxu1 }
  0xea   :  { %v1391_v21 = vpack.c.bf16 %v832_v17, %v832_v17  ;;  %v1423_v22 = vpack.c.bf16 %v864_v18, %v864_v18  ;;  %v581_v23 = vadd.f32 %v1854_v10, %v580_v19  ;;  %v709_v24 = vadd.f32 %v1854_v10, %v708_v20 }
  0xeb   :  { %v582_v25 = vpop.f32.mrf.mxu0  ;;  %v710_v26 = vpop.f32.mrf.mxu1 }
  0xec   :  { %1153 = vst.msk [vmem:[%s2179_s3] sm:$0xf] %vm1152_vm1, %v1391_v21  ;;  %1185 = vst.msk [vmem:[%s2179_s3 + $0x80] sm:$0xf] %vm1152_vm1, %v1423_v22  ;;  %v833_v27 = vmax.f32 %v581_v23, 0.0  ;;  %v865_v28 = vmax.f32 %v709_v24, 0.0 }
  0xed   :  { %v585_v29 = vpop.f32.mrf.mxu0  ;;  %v713_v30 = vpop.f32.mrf.mxu1 }
  0xee   :  { %v1392_v31 = vpack.c.bf16 %v833_v27, %v833_v27  ;;  %v1424_v32 = vpack.c.bf16 %v865_v28, %v865_v28  ;;  %v586_v33 = vadd.f32 %v1854_v10, %v585_v29  ;;  %v714_v34 = vadd.f32 %v1854_v10, %v713_v30 }
  0xef   :  { %v587_v35 = vpop.f32.mrf.mxu0  ;;  %v715_v36 = vpop.f32.mrf.mxu1 }
  0xf0   :  { %1154 = vst.msk [vmem:[%s2179_s3 + $0x4] sm:$0xf] %vm1152_vm1, %v1392_v31  ;;  %1186 = vst.msk [vmem:[%s2179_s3 + $0x84] sm:$0xf] %vm1152_vm1, %v1424_v32  ;;  %v834_v37 = vmax.f32 %v586_v33, 0.0  ;;  %v866_v38 = vmax.f32 %v714_v34, 0.0 }
  0xf1   :  { %v588_v39 = vpop.f32.mrf.mxu0  ;;  %v716_v40 = vpop.f32.mrf.mxu1 }
  0xf2   :  { %v1393_v41 = vpack.c.bf16 %v834_v37, %v834_v37  ;;  %v1425_v42 = vpack.c.bf16 %v866_v38, %v866_v38  ;;  %v589_v43 = vadd.f32 %v1854_v10, %v588_v39  ;;  %v717_v44 = vadd.f32 %v1854_v10, %v716_v40 }
  0xf3   :  { %v590_v45 = vpop.f32.mrf.mxu0  ;;  %v718_v46 = vpop.f32.mrf.mxu1 }
  0xf4   :  { %1155 = vst.msk [vmem:[%s2179_s3 + $0x8] sm:$0xf] %vm1152_vm1, %v1393_v41  ;;  %1187 = vst.msk [vmem:[%s2179_s3 + $0x88] sm:$0xf] %vm1152_vm1, %v1425_v42  ;;  %v835_v47 = vmax.f32 %v589_v43, 0.0  ;;  %v867_v48 = vmax.f32 %v717_v44, 0.0 }
  0xf5   :  { %v593_v49 = vpop.f32.mrf.mxu0  ;;  %v721_v50 = vpop.f32.mrf.mxu1 }
  0xf6   :  { %v1394_v51 = vpack.c.bf16 %v835_v47, %v835_v47  ;;  %v1426_v52 = vpack.c.bf16 %v867_v48, %v867_v48  ;;  %v594_v53 = vadd.f32 %v1854_v10, %v593_v49  ;;  %v722_v54 = vadd.f32 %v1854_v10, %v721_v50 }
  0xf7   :  { %v595_v55 = vpop.f32.mrf.mxu0  ;;  %v723_v56 = vpop.f32.mrf.mxu1 }
  0xf8   :  { %1156 = vst.msk [vmem:[%s2179_s3 + $0xc] sm:$0xf] %vm1152_vm1, %v1394_v51  ;;  %1188 = vst.msk [vmem:[%s2179_s3 + $0x8c] sm:$0xf] %vm1152_vm1, %v1426_v52  ;;  %v836_v57 = vmax.f32 %v594_v53, 0.0  ;;  %v868_v58 = vmax.f32 %v722_v54, 0.0 }
  0xf9   :  { %v596_v59 = vpop.f32.mrf.mxu0  ;;  %v724_v60 = vpop.f32.mrf.mxu1 }
  0xfa   :  { %v1395_v61 = vpack.c.bf16 %v836_v57, %v836_v57  ;;  %v1427_v62 = vpack.c.bf16 %v868_v58, %v868_v58  ;;  %v597_v63 = vadd.f32 %v1854_v10, %v596_v59  ;;  %v725_v0 = vadd.f32 %v1854_v10, %v724_v60 }
  0xfb   :  { %v598_v1 = vpop.f32.mrf.mxu0  ;;  %v726_v2 = vpop.f32.mrf.mxu1 }
  0xfc   :  { %1157 = vst.msk [vmem:[%s2179_s3 + $0x10] sm:$0xf] %vm1152_vm1, %v1395_v61  ;;  %1189 = vst.msk [vmem:[%s2179_s3 + $0x90] sm:$0xf] %vm1152_vm1, %v1427_v62  ;;  %v837_v3 = vmax.f32 %v597_v63, 0.0  ;;  %v869_v4 = vmax.f32 %v725_v0, 0.0 }
  0xfd   :  { %v601_v5 = vpop.f32.mrf.mxu0  ;;  %v729_v6 = vpop.f32.mrf.mxu1 }
  0xfe   :  { %v1396_v7 = vpack.c.bf16 %v837_v3, %v837_v3  ;;  %v1428_v8 = vpack.c.bf16 %v869_v4, %v869_v4  ;;  %v602_v9 = vadd.f32 %v1854_v10, %v601_v5  ;;  %v730_v11 = vadd.f32 %v1854_v10, %v729_v6 }
  0xff   :  { %v603_v12 = vpop.f32.mrf.mxu0  ;;  %v731_v13 = vpop.f32.mrf.mxu1 }
 0x100   :  { %1158 = vst.msk [vmem:[%s2179_s3 + $0x14] sm:$0xf] %vm1152_vm1, %v1396_v7  ;;  %1190 = vst.msk [vmem:[%s2179_s3 + $0x94] sm:$0xf] %vm1152_vm1, %v1428_v8  ;;  %v838_v14 = vmax.f32 %v602_v9, 0.0  ;;  %v870_v15 = vmax.f32 %v730_v11, 0.0 }
 0x101   :  { %v604_v16 = vpop.f32.mrf.mxu0  ;;  %v732_v17 = vpop.f32.mrf.mxu1 }
 0x102   :  { %v1397_v18 = vpack.c.bf16 %v838_v14, %v838_v14  ;;  %v1429_v19 = vpack.c.bf16 %v870_v15, %v870_v15  ;;  %v605_v20 = vadd.f32 %v1854_v10, %v604_v16  ;;  %v733_v21 = vadd.f32 %v1854_v10, %v732_v17 }
 0x103   :  { %v606_v22 = vpop.f32.mrf.mxu0  ;;  %v734_v23 = vpop.f32.mrf.mxu1 }
 0x104   :  { %1159 = vst.msk [vmem:[%s2179_s3 + $0x18] sm:$0xf] %vm1152_vm1, %v1397_v18  ;;  %1191 = vst.msk [vmem:[%s2179_s3 + $0x98] sm:$0xf] %vm1152_vm1, %v1429_v19  ;;  %v839_v24 = vmax.f32 %v605_v20, 0.0  ;;  %v871_v25 = vmax.f32 %v733_v21, 0.0 }
 0x105   :  { %v609_v26 = vpop.f32.mrf.mxu0  ;;  %v737_v27 = vpop.f32.mrf.mxu1 }
 0x106   :  { %v1398_v28 = vpack.c.bf16 %v839_v24, %v839_v24  ;;  %v1430_v29 = vpack.c.bf16 %v871_v25, %v871_v25  ;;  %v610_v30 = vadd.f32 %v1854_v10, %v609_v26  ;;  %v738_v31 = vadd.f32 %v1854_v10, %v737_v27 }
 0x107   :  { %v611_v32 = vpop.f32.mrf.mxu0  ;;  %v739_v33 = vpop.f32.mrf.mxu1 }
 0x108   :  { %1160 = vst.msk [vmem:[%s2179_s3 + $0x1c] sm:$0xf] %vm1152_vm1, %v1398_v28  ;;  %1192 = vst.msk [vmem:[%s2179_s3 + $0x9c] sm:$0xf] %vm1152_vm1, %v1430_v29  ;;  %v840_v34 = vmax.f32 %v610_v30, 0.0  ;;  %v872_v35 = vmax.f32 %v738_v31, 0.0 }
 0x109   :  { %v612_v36 = vpop.f32.mrf.mxu0  ;;  %v740_v37 = vpop.f32.mrf.mxu1 }
 0x10a   :  { %v1399_v38 = vpack.c.bf16 %v840_v34, %v840_v34  ;;  %v1431_v39 = vpack.c.bf16 %v872_v35, %v872_v35  ;;  %v613_v40 = vadd.f32 %v1854_v10, %v612_v36  ;;  %v741_v41 = vadd.f32 %v1854_v10, %v740_v37 }
 0x10b   :  { %v614_v42 = vpop.f32.mrf.mxu0  ;;  %v742_v43 = vpop.f32.mrf.mxu1 }
 0x10c   :  { %1161 = vst.msk [vmem:[%s2179_s3 + $0x20] sm:$0xf] %vm1152_vm1, %v1399_v38  ;;  %1193 = vst.msk [vmem:[%s2179_s3 + $0xa0] sm:$0xf] %vm1152_vm1, %v1431_v39  ;;  %v841_v44 = vmax.f32 %v613_v40, 0.0  ;;  %v873_v45 = vmax.f32 %v741_v41, 0.0 }
 0x10d   :  { %v617_v46 = vpop.f32.mrf.mxu0  ;;  %v745_v47 = vpop.f32.mrf.mxu1 }
 0x10e   :  { %v1400_v48 = vpack.c.bf16 %v841_v44, %v841_v44  ;;  %v1432_v49 = vpack.c.bf16 %v873_v45, %v873_v45  ;;  %v618_v50 = vadd.f32 %v1854_v10, %v617_v46  ;;  %v746_v51 = vadd.f32 %v1854_v10, %v745_v47 }
 0x10f   :  { %v619_v52 = vpop.f32.mrf.mxu0  ;;  %v747_v53 = vpop.f32.mrf.mxu1 }
 0x110   :  { %1162 = vst.msk [vmem:[%s2179_s3 + $0x24] sm:$0xf] %vm1152_vm1, %v1400_v48  ;;  %1194 = vst.msk [vmem:[%s2179_s3 + $0xa4] sm:$0xf] %vm1152_vm1, %v1432_v49  ;;  %v842_v54 = vmax.f32 %v618_v50, 0.0  ;;  %v874_v55 = vmax.f32 %v746_v51, 0.0 }
 0x111   :  { %v620_v56 = vpop.f32.mrf.mxu0  ;;  %v748_v57 = vpop.f32.mrf.mxu1 }
 0x112   :  { %v1401_v58 = vpack.c.bf16 %v842_v54, %v842_v54  ;;  %v1433_v59 = vpack.c.bf16 %v874_v55, %v874_v55  ;;  %v621_v60 = vadd.f32 %v1854_v10, %v620_v56  ;;  %v749_v61 = vadd.f32 %v1854_v10, %v748_v57 }
 0x113   :  { %v622_v62 = vpop.f32.mrf.mxu0  ;;  %v750_v63 = vpop.f32.mrf.mxu1 }
 0x114   :  { %1163 = vst.msk [vmem:[%s2179_s3 + $0x28] sm:$0xf] %vm1152_vm1, %v1401_v58  ;;  %1195 = vst.msk [vmem:[%s2179_s3 + $0xa8] sm:$0xf] %vm1152_vm1, %v1433_v59  ;;  %v843_v0 = vmax.f32 %v621_v60, 0.0  ;;  %v875_v1 = vmax.f32 %v749_v61, 0.0 }
 0x115   :  { %v625_v2 = vpop.f32.mrf.mxu0  ;;  %v753_v3 = vpop.f32.mrf.mxu1 }
 0x116   :  { %v1402_v4 = vpack.c.bf16 %v843_v0, %v843_v0  ;;  %v1434_v5 = vpack.c.bf16 %v875_v1, %v875_v1  ;;  %v626_v6 = vadd.f32 %v1854_v10, %v625_v2  ;;  %v754_v7 = vadd.f32 %v1854_v10, %v753_v3 }
 0x117   :  { %v627_v8 = vpop.f32.mrf.mxu0  ;;  %v755_v9 = vpop.f32.mrf.mxu1 }
 0x118   :  { %1164 = vst.msk [vmem:[%s2179_s3 + $0x2c] sm:$0xf] %vm1152_vm1, %v1402_v4  ;;  %1196 = vst.msk [vmem:[%s2179_s3 + $0xac] sm:$0xf] %vm1152_vm1, %v1434_v5  ;;  %v844_v11 = vmax.f32 %v626_v6, 0.0  ;;  %v876_v12 = vmax.f32 %v754_v7, 0.0 }
 0x119   :  { %v628_v13 = vpop.f32.mrf.mxu0  ;;  %v756_v14 = vpop.f32.mrf.mxu1 }
 0x11a   :  { %v1403_v15 = vpack.c.bf16 %v844_v11, %v844_v11  ;;  %v1435_v16 = vpack.c.bf16 %v876_v12, %v876_v12  ;;  %v629_v17 = vadd.f32 %v1854_v10, %v628_v13  ;;  %v757_v18 = vadd.f32 %v1854_v10, %v756_v14 }
 0x11b   :  { %v630_v19 = vpop.f32.mrf.mxu0  ;;  %v758_v20 = vpop.f32.mrf.mxu1 }
 0x11c   :  { %1165 = vst.msk [vmem:[%s2179_s3 + $0x30] sm:$0xf] %vm1152_vm1, %v1403_v15  ;;  %1197 = vst.msk [vmem:[%s2179_s3 + $0xb0] sm:$0xf] %vm1152_vm1, %v1435_v16  ;;  %v845_v21 = vmax.f32 %v629_v17, 0.0  ;;  %v877_v22 = vmax.f32 %v757_v18, 0.0 }
 0x11d   :  { %v633_v23 = vpop.f32.mrf.mxu0  ;;  %v761_v24 = vpop.f32.mrf.mxu1 }
 0x11e   :  { %v1404_v25 = vpack.c.bf16 %v845_v21, %v845_v21  ;;  %v1436_v26 = vpack.c.bf16 %v877_v22, %v877_v22  ;;  %v634_v27 = vadd.f32 %v1854_v10, %v633_v23  ;;  %v762_v28 = vadd.f32 %v1854_v10, %v761_v24 }
 0x11f   :  { %v635_v29 = vpop.f32.mrf.mxu0  ;;  %v763_v30 = vpop.f32.mrf.mxu1 }
 0x120   :  { %1166 = vst.msk [vmem:[%s2179_s3 + $0x34] sm:$0xf] %vm1152_vm1, %v1404_v25  ;;  %1198 = vst.msk [vmem:[%s2179_s3 + $0xb4] sm:$0xf] %vm1152_vm1, %v1436_v26  ;;  %v846_v31 = vmax.f32 %v634_v27, 0.0  ;;  %v878_v32 = vmax.f32 %v762_v28, 0.0 }
 0x121   :  { %v636_v33 = vpop.f32.mrf.mxu0  ;;  %v764_v34 = vpop.f32.mrf.mxu1 }
 0x122   :  { %v1405_v35 = vpack.c.bf16 %v846_v31, %v846_v31  ;;  %v1437_v36 = vpack.c.bf16 %v878_v32, %v878_v32  ;;  %v637_v37 = vadd.f32 %v1854_v10, %v636_v33  ;;  %v765_v38 = vadd.f32 %v1854_v10, %v764_v34 }
 0x123   :  { %v638_v39 = vpop.f32.mrf.mxu0  ;;  %v766_v40 = vpop.f32.mrf.mxu1 }
 0x124   :  { %1167 = vst.msk [vmem:[%s2179_s3 + $0x38] sm:$0xf] %vm1152_vm1, %v1405_v35  ;;  %1199 = vst.msk [vmem:[%s2179_s3 + $0xb8] sm:$0xf] %vm1152_vm1, %v1437_v36  ;;  %v847_v41 = vmax.f32 %v637_v37, 0.0  ;;  %v879_v42 = vmax.f32 %v765_v38, 0.0 }
 0x125   :  { %v641_v43 = vpop.f32.mrf.mxu0  ;;  %v769_v44 = vpop.f32.mrf.mxu1 }
 0x126   :  { %v1406_v45 = vpack.c.bf16 %v847_v41, %v847_v41  ;;  %v1438_v46 = vpack.c.bf16 %v879_v42, %v879_v42  ;;  %v642_v47 = vadd.f32 %v1854_v10, %v641_v43  ;;  %v770_v48 = vadd.f32 %v1854_v10, %v769_v44 }
 0x127   :  { %v643_v49 = vpop.f32.mrf.mxu0  ;;  %v771_v50 = vpop.f32.mrf.mxu1 }
 0x128   :  { %1168 = vst.msk [vmem:[%s2179_s3 + $0x3c] sm:$0xf] %vm1152_vm1, %v1406_v45  ;;  %1200 = vst.msk [vmem:[%s2179_s3 + $0xbc] sm:$0xf] %vm1152_vm1, %v1438_v46  ;;  %v848_v51 = vmax.f32 %v642_v47, 0.0  ;;  %v880_v52 = vmax.f32 %v770_v48, 0.0 }
 0x129   :  { %v644_v53 = vpop.f32.mrf.mxu0  ;;  %v772_v54 = vpop.f32.mrf.mxu1 }
 0x12a   :  { %v1407_v55 = vpack.c.bf16 %v848_v51, %v848_v51  ;;  %v1439_v56 = vpack.c.bf16 %v880_v52, %v880_v52  ;;  %v645_v57 = vadd.f32 %v1854_v10, %v644_v53  ;;  %v773_v58 = vadd.f32 %v1854_v10, %v772_v54 }
 0x12b   :  { %v646_v59 = vpop.f32.mrf.mxu0  ;;  %v774_v60 = vpop.f32.mrf.mxu1 }
 0x12c   :  { %1169 = vst.msk [vmem:[%s2179_s3 + $0x40] sm:$0xf] %vm1152_vm1, %v1407_v55  ;;  %1201 = vst.msk [vmem:[%s2179_s3 + $0xc0] sm:$0xf] %vm1152_vm1, %v1439_v56  ;;  %v849_v61 = vmax.f32 %v645_v57, 0.0  ;;  %v881_v62 = vmax.f32 %v773_v58, 0.0 }
 0x12d   :  { %v649_v63 = vpop.f32.mrf.mxu0  ;;  %v777_v0 = vpop.f32.mrf.mxu1 }
 0x12e   :  { %v1408_v1 = vpack.c.bf16 %v849_v61, %v849_v61  ;;  %v1440_v2 = vpack.c.bf16 %v881_v62, %v881_v62  ;;  %v650_v3 = vadd.f32 %v1854_v10, %v649_v63  ;;  %v778_v4 = vadd.f32 %v1854_v10, %v777_v0 }
 0x12f   :  { %v651_v5 = vpop.f32.mrf.mxu0  ;;  %v779_v6 = vpop.f32.mrf.mxu1 }
 0x130   :  { %1170 = vst.msk [vmem:[%s2179_s3 + $0x44] sm:$0xf] %vm1152_vm1, %v1408_v1  ;;  %1202 = vst.msk [vmem:[%s2179_s3 + $0xc4] sm:$0xf] %vm1152_vm1, %v1440_v2  ;;  %v850_v7 = vmax.f32 %v650_v3, 0.0  ;;  %v882_v8 = vmax.f32 %v778_v4, 0.0 }
 0x131   :  { %v652_v9 = vpop.f32.mrf.mxu0  ;;  %v780_v11 = vpop.f32.mrf.mxu1 }
 0x132   :  { %v1409_v12 = vpack.c.bf16 %v850_v7, %v850_v7  ;;  %v1441_v13 = vpack.c.bf16 %v882_v8, %v882_v8  ;;  %v653_v14 = vadd.f32 %v1854_v10, %v652_v9  ;;  %v781_v15 = vadd.f32 %v1854_v10, %v780_v11 }
 0x133   :  { %v654_v16 = vpop.f32.mrf.mxu0  ;;  %v782_v17 = vpop.f32.mrf.mxu1 }
 0x134   :  { %1171 = vst.msk [vmem:[%s2179_s3 + $0x48] sm:$0xf] %vm1152_vm1, %v1409_v12  ;;  %1203 = vst.msk [vmem:[%s2179_s3 + $0xc8] sm:$0xf] %vm1152_vm1, %v1441_v13  ;;  %v851_v18 = vmax.f32 %v653_v14, 0.0  ;;  %v883_v19 = vmax.f32 %v781_v15, 0.0 }
 0x135   :  { %v657_v20 = vpop.f32.mrf.mxu0  ;;  %v785_v21 = vpop.f32.mrf.mxu1 }
 0x136   :  { %v1410_v22 = vpack.c.bf16 %v851_v18, %v851_v18  ;;  %v1442_v23 = vpack.c.bf16 %v883_v19, %v883_v19  ;;  %v658_v24 = vadd.f32 %v1854_v10, %v657_v20  ;;  %v786_v25 = vadd.f32 %v1854_v10, %v785_v21 }
 0x137   :  { %v659_v26 = vpop.f32.mrf.mxu0  ;;  %v787_v27 = vpop.f32.mrf.mxu1 }
 0x138   :  { %1172 = vst.msk [vmem:[%s2179_s3 + $0x4c] sm:$0xf] %vm1152_vm1, %v1410_v22  ;;  %1204 = vst.msk [vmem:[%s2179_s3 + $0xcc] sm:$0xf] %vm1152_vm1, %v1442_v23  ;;  %v852_v28 = vmax.f32 %v658_v24, 0.0  ;;  %v884_v29 = vmax.f32 %v786_v25, 0.0 }
 0x139   :  { %v660_v30 = vpop.f32.mrf.mxu0  ;;  %v788_v31 = vpop.f32.mrf.mxu1 }
 0x13a   :  { %v1411_v32 = vpack.c.bf16 %v852_v28, %v852_v28  ;;  %v1443_v33 = vpack.c.bf16 %v884_v29, %v884_v29  ;;  %v661_v34 = vadd.f32 %v1854_v10, %v660_v30  ;;  %v789_v35 = vadd.f32 %v1854_v10, %v788_v31 }
 0x13b   :  { %v662_v36 = vpop.f32.mrf.mxu0  ;;  %v790_v37 = vpop.f32.mrf.mxu1 }
 0x13c   :  { %1173 = vst.msk [vmem:[%s2179_s3 + $0x50] sm:$0xf] %vm1152_vm1, %v1411_v32  ;;  %1205 = vst.msk [vmem:[%s2179_s3 + $0xd0] sm:$0xf] %vm1152_vm1, %v1443_v33  ;;  %v853_v38 = vmax.f32 %v661_v34, 0.0  ;;  %v885_v39 = vmax.f32 %v789_v35, 0.0 }
 0x13d   :  { %v665_v40 = vpop.f32.mrf.mxu0  ;;  %v793_v41 = vpop.f32.mrf.mxu1 }
 0x13e   :  { %v1412_v42 = vpack.c.bf16 %v853_v38, %v853_v38  ;;  %v1444_v43 = vpack.c.bf16 %v885_v39, %v885_v39  ;;  %v666_v44 = vadd.f32 %v1854_v10, %v665_v40  ;;  %v794_v45 = vadd.f32 %v1854_v10, %v793_v41 }
 0x13f   :  { %v667_v46 = vpop.f32.mrf.mxu0  ;;  %v795_v47 = vpop.f32.mrf.mxu1 }
 0x140   :  { %1174 = vst.msk [vmem:[%s2179_s3 + $0x54] sm:$0xf] %vm1152_vm1, %v1412_v42  ;;  %1206 = vst.msk [vmem:[%s2179_s3 + $0xd4] sm:$0xf] %vm1152_vm1, %v1444_v43  ;;  %v854_v48 = vmax.f32 %v666_v44, 0.0  ;;  %v886_v49 = vmax.f32 %v794_v45, 0.0 }
 0x141   :  { %v668_v50 = vpop.f32.mrf.mxu0  ;;  %v796_v51 = vpop.f32.mrf.mxu1 }
 0x142   :  { %v1413_v52 = vpack.c.bf16 %v854_v48, %v854_v48  ;;  %v1445_v53 = vpack.c.bf16 %v886_v49, %v886_v49  ;;  %v669_v54 = vadd.f32 %v1854_v10, %v668_v50  ;;  %v797_v55 = vadd.f32 %v1854_v10, %v796_v51 }
 0x143   :  { %v670_v56 = vpop.f32.mrf.mxu0  ;;  %v798_v57 = vpop.f32.mrf.mxu1 }
 0x144   :  { %1175 = vst.msk [vmem:[%s2179_s3 + $0x58] sm:$0xf] %vm1152_vm1, %v1413_v52  ;;  %1207 = vst.msk [vmem:[%s2179_s3 + $0xd8] sm:$0xf] %vm1152_vm1, %v1445_v53  ;;  %v855_v58 = vmax.f32 %v669_v54, 0.0  ;;  %v887_v59 = vmax.f32 %v797_v55, 0.0 }
 0x145   :  { %v673_v60 = vpop.f32.mrf.mxu0  ;;  %v801_v61 = vpop.f32.mrf.mxu1 }
 0x146   :  { %v1414_v62 = vpack.c.bf16 %v855_v58, %v855_v58  ;;  %v1446_v63 = vpack.c.bf16 %v887_v59, %v887_v59  ;;  %v674_v0 = vadd.f32 %v1854_v10, %v673_v60  ;;  %v802_v1 = vadd.f32 %v1854_v10, %v801_v61 }
 0x147   :  { %v675_v2 = vpop.f32.mrf.mxu0  ;;  %v803_v3 = vpop.f32.mrf.mxu1 }
 0x148   :  { %1176 = vst.msk [vmem:[%s2179_s3 + $0x5c] sm:$0xf] %vm1152_vm1, %v1414_v62  ;;  %1208 = vst.msk [vmem:[%s2179_s3 + $0xdc] sm:$0xf] %vm1152_vm1, %v1446_v63  ;;  %v856_v4 = vmax.f32 %v674_v0, 0.0  ;;  %v888_v5 = vmax.f32 %v802_v1, 0.0 }
 0x149   :  { %v676_v6 = vpop.f32.mrf.mxu0  ;;  %v804_v7 = vpop.f32.mrf.mxu1 }
 0x14a   :  { %v1415_v8 = vpack.c.bf16 %v856_v4, %v856_v4  ;;  %v1447_v9 = vpack.c.bf16 %v888_v5, %v888_v5  ;;  %v677_v11 = vadd.f32 %v1854_v10, %v676_v6  ;;  %v805_v12 = vadd.f32 %v1854_v10, %v804_v7 }
 0x14b   :  { %v678_v13 = vpop.f32.mrf.mxu0  ;;  %v806_v14 = vpop.f32.mrf.mxu1 }
 0x14c   :  { %1177 = vst.msk [vmem:[%s2179_s3 + $0x60] sm:$0xf] %vm1152_vm1, %v1415_v8  ;;  %1209 = vst.msk [vmem:[%s2179_s3 + $0xe0] sm:$0xf] %vm1152_vm1, %v1447_v9  ;;  %v857_v15 = vmax.f32 %v677_v11, 0.0  ;;  %v889_v16 = vmax.f32 %v805_v12, 0.0 }
 0x14d   :  { %v681_v17 = vpop.f32.mrf.mxu0  ;;  %v809_v18 = vpop.f32.mrf.mxu1 }
 0x14e   :  { %v1416_v19 = vpack.c.bf16 %v857_v15, %v857_v15  ;;  %v1448_v20 = vpack.c.bf16 %v889_v16, %v889_v16  ;;  %v682_v21 = vadd.f32 %v1854_v10, %v681_v17  ;;  %v810_v22 = vadd.f32 %v1854_v10, %v809_v18 }
 0x14f   :  { %v683_v23 = vpop.f32.mrf.mxu0  ;;  %v811_v24 = vpop.f32.mrf.mxu1 }
 0x150   :  { %1178 = vst.msk [vmem:[%s2179_s3 + $0x64] sm:$0xf] %vm1152_vm1, %v1416_v19  ;;  %1210 = vst.msk [vmem:[%s2179_s3 + $0xe4] sm:$0xf] %vm1152_vm1, %v1448_v20  ;;  %v858_v25 = vmax.f32 %v682_v21, 0.0  ;;  %v890_v26 = vmax.f32 %v810_v22, 0.0 }
 0x151   :  { %v684_v27 = vpop.f32.mrf.mxu0  ;;  %v812_v28 = vpop.f32.mrf.mxu1 }
 0x152   :  { %v1417_v29 = vpack.c.bf16 %v858_v25, %v858_v25  ;;  %v1449_v30 = vpack.c.bf16 %v890_v26, %v890_v26  ;;  %v685_v31 = vadd.f32 %v1854_v10, %v684_v27  ;;  %v813_v32 = vadd.f32 %v1854_v10, %v812_v28 }
 0x153   :  { %v686_v33 = vpop.f32.mrf.mxu0  ;;  %v814_v34 = vpop.f32.mrf.mxu1 }
 0x154   :  { %1179 = vst.msk [vmem:[%s2179_s3 + $0x68] sm:$0xf] %vm1152_vm1, %v1417_v29  ;;  %1211 = vst.msk [vmem:[%s2179_s3 + $0xe8] sm:$0xf] %vm1152_vm1, %v1449_v30  ;;  %v859_v35 = vmax.f32 %v685_v31, 0.0  ;;  %v891_v36 = vmax.f32 %v813_v32, 0.0 }
 0x155   :  { %v689_v37 = vpop.f32.mrf.mxu0  ;;  %v817_v38 = vpop.f32.mrf.mxu1 }
 0x156   :  { %v1418_v39 = vpack.c.bf16 %v859_v35, %v859_v35  ;;  %v1450_v40 = vpack.c.bf16 %v891_v36, %v891_v36  ;;  %v690_v41 = vadd.f32 %v1854_v10, %v689_v37  ;;  %v818_v42 = vadd.f32 %v1854_v10, %v817_v38 }
 0x157   :  { %v691_v43 = vpop.f32.mrf.mxu0  ;;  %v819_v44 = vpop.f32.mrf.mxu1 }
 0x158   :  { %1180 = vst.msk [vmem:[%s2179_s3 + $0x6c] sm:$0xf] %vm1152_vm1, %v1418_v39  ;;  %1212 = vst.msk [vmem:[%s2179_s3 + $0xec] sm:$0xf] %vm1152_vm1, %v1450_v40  ;;  %v860_v45 = vmax.f32 %v690_v41, 0.0  ;;  %v892_v46 = vmax.f32 %v818_v42, 0.0 }
 0x159   :  { %v692_v47 = vpop.f32.mrf.mxu0  ;;  %v820_v48 = vpop.f32.mrf.mxu1 }
 0x15a   :  { %v1419_v49 = vpack.c.bf16 %v860_v45, %v860_v45  ;;  %v1451_v50 = vpack.c.bf16 %v892_v46, %v892_v46  ;;  %v693_v51 = vadd.f32 %v1854_v10, %v692_v47  ;;  %v821_v52 = vadd.f32 %v1854_v10, %v820_v48 }
 0x15b   :  { %v694_v53 = vpop.f32.mrf.mxu0  ;;  %v822_v54 = vpop.f32.mrf.mxu1 }
 0x15c   :  { %1181 = vst.msk [vmem:[%s2179_s3 + $0x70] sm:$0xf] %vm1152_vm1, %v1419_v49  ;;  %1213 = vst.msk [vmem:[%s2179_s3 + $0xf0] sm:$0xf] %vm1152_vm1, %v1451_v50  ;;  %v861_v55 = vmax.f32 %v693_v51, 0.0  ;;  %v893_v56 = vmax.f32 %v821_v52, 0.0 }
 0x15d   :  { %v697_v57 = vpop.f32.mrf.mxu0  ;;  %v825_v58 = vpop.f32.mrf.mxu1 }
 0x15e   :  { %v1420_v59 = vpack.c.bf16 %v861_v55, %v861_v55  ;;  %v1452_v60 = vpack.c.bf16 %v893_v56, %v893_v56  ;;  %v698_v61 = vadd.f32 %v1854_v10, %v697_v57  ;;  %v826_v62 = vadd.f32 %v1854_v10, %v825_v58 }
 0x15f   :  { %v699_v63 = vpop.f32.mrf.mxu0  ;;  %v827_v0 = vpop.f32.mrf.mxu1 }
 0x160   :  { %1182 = vst.msk [vmem:[%s2179_s3 + $0x74] sm:$0xf] %vm1152_vm1, %v1420_v59  ;;  %1214 = vst.msk [vmem:[%s2179_s3 + $0xf4] sm:$0xf] %vm1152_vm1, %v1452_v60  ;;  %v862_v1 = vmax.f32 %v698_v61, 0.0  ;;  %v894_v2 = vmax.f32 %v826_v62, 0.0 }
 0x161   :  { %v700_v3 = vpop.f32.mrf.mxu0  ;;  %v828_v4 = vpop.f32.mrf.mxu1 }
 0x162   :  { %v1421_v5 = vpack.c.bf16 %v862_v1, %v862_v1  ;;  %v1453_v6 = vpack.c.bf16 %v894_v2, %v894_v2  ;;  %v701_v7 = vadd.f32 %v1854_v10, %v700_v3  ;;  %v829_v8 = vadd.f32 %v1854_v10, %v828_v4 }
 0x163   :  { %v702_v9 = vpop.f32.mrf.mxu0  ;;  %v830_v11 = vpop.f32.mrf.mxu1 }
 0x164   :  { %1183 = vst.msk [vmem:[%s2179_s3 + $0x78] sm:$0xf] %vm1152_vm1, %v1421_v5  ;;  %1215 = vst.msk [vmem:[%s2179_s3 + $0xf8] sm:$0xf] %vm1152_vm1, %v1453_v6  ;;  %v863_v12 = vmax.f32 %v701_v7, 0.0  ;;  %v895_v13 = vmax.f32 %v829_v8, 0.0 }
 0x166   :  { %v1422_v14 = vpack.c.bf16 %v863_v12, %v863_v12  ;;  %v1454_v15 = vpack.c.bf16 %v895_v13, %v895_v13 }
 0x168   :  { %1184 = vst.msk [vmem:[%s2179_s3 + $0x7c] sm:$0xf] %vm1152_vm1, %v1422_v14  ;;  %1216 = vst.msk [vmem:[%s2179_s3 + $0xfc] sm:$0xf] %vm1152_vm1, %v1454_v15 }

// kernel: autoencoder_forward.13
= control target key start
LH: loop header
LB: loop body
LE: loop exit
PB: predicated region body
PF: predicated region fallthrough
CT: control target
= control target key end

     0   :  { %s3471_s12 = smov 0   ;;  %s4069_s0 = inlined_call_operand.vmem [shape: bf16[2048,72], index: 0, kind: input, shape index: {}]   ;;  %s4070_s1 = inlined_call_operand.vmem [shape: bf16[72,12], index: 1, kind: input, shape index: {}]   ;;  %s4071_s2 = inlined_call_operand.vmem [shape: f32[1,12], index: 2, kind: input, shape index: {}]   ;;  %s4072_s3 = inlined_call_operand.vmem [shape: f32[2048,12], index: 3, kind: output, shape index: {}]  }
   0x1 LB: > { %s2361_s13 = sadd.s32 4294967295, %s3449_s12   ;;  %p2365_p0 = scmp.ge.s32.totalorder %s3449_s12, 1  ;;  %s3449_s12 = sphi %s3471_s12, %s13_s12  }
   0x2   : > { %p138_p1 = scmp.lt.s32.totalorder %s3449_s12, 3 }
   0x4   : > { %p139_p2 = pnand %p2365_p0, %p138_p1 }
   0x5   : > { %s2366_s18 = sshll.u32 (!%p139_p2), %s2361_s13, 7 }
   0x6   : > { %142 = sbr.rel (%p139_p2) target bundleno = 499 (0x1f3), region = 32  ;;  %p163_p3 = scmp.lt.s32.totalorder (!%p139_p2), %s2366_s18, 255 }
   0xb   : > { %v2861_v0 = vld [vmem:[%s4070_s1 + $0x20] ss:$0 sps:$4 sm:$0xff]   ;;  %vm859_vm0 = vcmask 1043456   ;;  %v2862_v1 = vld [vmem:[%s4070_s1 + $0x18] sm:$0xff]   ;;  %v2863_v3 = vld [vmem:[%s4070_s1 + $0x10] sm:$0xff]   ;;  %s4074_s18 = smov (!%p163_p3, %s2366_s18), 255 }
   0xc   : > { %2851 = vmatprep.subr.msk.bf16.mxu0 %vm859_vm0, %v2861_v0  ;;  %2852 = vmatprep.subr.msk.bf16.mxu1 %vm859_vm0, %v2861_v0  ;;  %v861_v2 = vsel %vm859_vm0, %v2861_v0, 0  ;;  %v2864_v4 = vld [vmem:[%s4070_s1 + $0x8] sm:$0xff]   ;;  %s2367_s23 = sshll.u32 %s4074_s18, 2  ;;  %vm666_vm1 = vcmask 588800   ;;  %v2865_v7 = vld [vmem:[%s4070_s1] sm:$0xff]   ;;  %s2369_s4 = sshll.u32 %s4074_s18, 3 }
   0xd   : > { %2704 = vmatpush3.bf16.msra.mxu0 %v861_v2  ;;  %2846 = vmatpush3.bf16.msra.mxu1 %v861_v2  ;;  %s3497_s26 = scalar_lea.vmem %s4069_s0, %s2367_s23  ;;  %s3658_s7 = scalar_lea.vmem %s4072_s3, %s2369_s4  ;;  %vm2176_vm2 = vcmask 97280  }
   0xe   : > { %2705 = vmatprep.subr.bf16.mxu0 %v2862_v1  ;;  %2842 = vmatprep.subr.bf16.mxu1 %v2862_v1  ;;  %v2866_v5 = vld [vmem:[%s3497_s26] sm:$0xff]   ;;  %v2868_v8 = vld [vmem:[%s3497_s26 + $0x8] sm:$0xff]   ;;  %v2870_v10 = vld [vmem:[%s3497_s26 + $0x10] sm:$0xff]  }
   0xf   : > { %v2867_v6 = vld [vmem:[%s3497_s26 + $0x100] sm:$0xff]   ;;  %2713 = vmatprep.mubr.msk.bf16.mxu0 %vm666_vm1, %v2866_v5  ;;  %v2869_v9 = vld [vmem:[%s3497_s26 + $0x108] sm:$0xff]   ;;  %v2871_v11 = vld [vmem:[%s3497_s26 + $0x110] sm:$0xff]  }
  0x10   : > { %2777 = vmatprep.mubr.msk.bf16.mxu1 %vm666_vm1, %v2867_v6  ;;  %v2872_v12 = vld [vmem:[%s3497_s26 + $0x18] sm:$0xff]   ;;  %v2874_v14 = vld [vmem:[%s3497_s26 + $0x20] sm:$0xff]   ;;  %v2876_v16 = vld [vmem:[%s3497_s26 + $0x28] sm:$0xff]  }
  0x11   : > { %2706 = vmatpush3.bf16.msra.mxu0 %v2862_v1  ;;  %2847 = vmatpush3.bf16.msra.mxu1 %v2862_v1  ;;  %v2873_v13 = vld [vmem:[%s3497_s26 + $0x118] sm:$0xff]   ;;  %v2875_v15 = vld [vmem:[%s3497_s26 + $0x120] sm:$0xff]   ;;  %v2877_v17 = vld [vmem:[%s3497_s26 + $0x128] sm:$0xff]  }
  0x12   : > { %2707 = vmatprep.subr.bf16.mxu0 %v2863_v3  ;;  %2843 = vmatprep.subr.bf16.mxu1 %v2863_v3  ;;  %v2878_v18 = vld [vmem:[%s3497_s26 + $0x30] sm:$0xff]   ;;  %v2880_v20 = vld [vmem:[%s3497_s26 + $0x38] sm:$0xff]   ;;  %v2882_v22 = vld [vmem:[%s3497_s26 + $0x40] sm:$0xff]  }
  0x13   : > { %v2879_v19 = vld [vmem:[%s3497_s26 + $0x130] sm:$0xff]   ;;  %v2881_v21 = vld [vmem:[%s3497_s26 + $0x138] sm:$0xff]   ;;  %v2883_v23 = vld [vmem:[%s3497_s26 + $0x140] sm:$0xff]  }
  0x14   : > { %v2884_v24 = vld [vmem:[%s3497_s26 + $0x48] sm:$0xff]   ;;  %v2886_v26 = vld [vmem:[%s3497_s26 + $0x50] sm:$0xff]   ;;  %v2888_v28 = vld [vmem:[%s3497_s26 + $0x58] sm:$0xff]  }
  0x15   : > { %2708 = vmatpush3.bf16.msra.mxu0 %v2863_v3  ;;  %2848 = vmatpush3.bf16.msra.mxu1 %v2863_v3  ;;  %v2885_v25 = vld [vmem:[%s3497_s26 + $0x148] sm:$0xff]   ;;  %v2887_v27 = vld [vmem:[%s3497_s26 + $0x150] sm:$0xff]   ;;  %v2889_v29 = vld [vmem:[%s3497_s26 + $0x158] sm:$0xff]  }
  0x16   : > { %2709 = vmatprep.subr.bf16.mxu0 %v2864_v4  ;;  %2844 = vmatprep.subr.bf16.mxu1 %v2864_v4  ;;  %v2890_v30 = vld [vmem:[%s3497_s26 + $0x60] sm:$0xff]   ;;  %v2892_v32 = vld [vmem:[%s3497_s26 + $0x68] sm:$0xff]   ;;  %v2894_v34 = vld [vmem:[%s3497_s26 + $0x70] sm:$0xff]  }
  0x17   : > { %v2891_v31 = vld [vmem:[%s3497_s26 + $0x160] sm:$0xff]   ;;  %v2893_v33 = vld [vmem:[%s3497_s26 + $0x168] sm:$0xff]   ;;  %v2895_v35 = vld [vmem:[%s3497_s26 + $0x170] sm:$0xff]  }
  0x18   : > { %v2896_v36 = vld [vmem:[%s3497_s26 + $0x78] sm:$0xff]   ;;  %v2898_v38 = vld [vmem:[%s3497_s26 + $0x80] sm:$0xff]   ;;  %v2900_v40 = vld [vmem:[%s3497_s26 + $0x88] sm:$0xff]  }
  0x19   : > { %2710 = vmatpush3.bf16.msra.mxu0 %v2864_v4  ;;  %2849 = vmatpush3.bf16.msra.mxu1 %v2864_v4  ;;  %v2897_v37 = vld [vmem:[%s3497_s26 + $0x178] sm:$0xff]   ;;  %v2899_v39 = vld [vmem:[%s3497_s26 + $0x180] sm:$0xff]   ;;  %v2901_v41 = vld [vmem:[%s3497_s26 + $0x188] sm:$0xff]  }
  0x1a   : > { %2711 = vmatprep.subr.bf16.mxu0 %v2865_v7  ;;  %2845 = vmatprep.subr.bf16.mxu1 %v2865_v7  ;;  %v2902_v42 = vld [vmem:[%s3497_s26 + $0x90] sm:$0xff]   ;;  %v2904_v44 = vld [vmem:[%s3497_s26 + $0x98] sm:$0xff]   ;;  %v2906_v46 = vld [vmem:[%s3497_s26 + $0xa0] sm:$0xff]  }
  0x1b   : > { %v2903_v43 = vld [vmem:[%s3497_s26 + $0x190] sm:$0xff]   ;;  %v2905_v45 = vld [vmem:[%s3497_s26 + $0x198] sm:$0xff]   ;;  %v2907_v47 = vld [vmem:[%s3497_s26 + $0x1a0] sm:$0xff]  }
  0x1c   : > { %v2908_v48 = vld [vmem:[%s3497_s26 + $0xa8] sm:$0xff]   ;;  %v2910_v50 = vld [vmem:[%s3497_s26 + $0xb0] sm:$0xff]   ;;  %v2912_v52 = vld [vmem:[%s3497_s26 + $0xb8] sm:$0xff]  }
  0x1d   : > { %2712 = vmatpush3.bf16.msra.mxu0 %v2865_v7  ;;  %2850 = vmatpush3.bf16.msra.mxu1 %v2865_v7  ;;  %v2909_v49 = vld [vmem:[%s3497_s26 + $0x1a8] sm:$0xff]   ;;  %v2911_v51 = vld [vmem:[%s3497_s26 + $0x1b0] sm:$0xff]   ;;  %v2913_v53 = vld [vmem:[%s3497_s26 + $0x1b8] sm:$0xff]  }
  0x1e   : > { %v2914_v54 = vld [vmem:[%s3497_s26 + $0xc0] sm:$0xff]   ;;  %v2916_v56 = vld [vmem:[%s3497_s26 + $0xc8] sm:$0xff]   ;;  %v2918_v58 = vld [vmem:[%s3497_s26 + $0xd0] sm:$0xff]  }
  0x1f   : > { %v2915_v55 = vld [vmem:[%s3497_s26 + $0x1c0] sm:$0xff]   ;;  %v2917_v57 = vld [vmem:[%s3497_s26 + $0x1c8] sm:$0xff]   ;;  %v2919_v59 = vld [vmem:[%s3497_s26 + $0x1d0] sm:$0xff]  }
  0x20   : > { %2714 = vmatmul.mubr.msk.bf16.vlgmr.msra.gmra.mxu0 %vm666_vm1, %v2868_v8  ;;  %2778 = vmatmul.mubr.msk.bf16.vlgmr.msra.gmra.mxu1 %vm666_vm1, %v2869_v9  ;;  %v2920_v60 = vld [vmem:[%s3497_s26 + $0xd8] sm:$0xff]   ;;  %v2922_v62 = vld [vmem:[%s3497_s26 + $0xe0] sm:$0xff]   ;;  %v2924_v0 = vld [vmem:[%s3497_s26 + $0xe8] sm:$0xff]  }
  0x21   : > { %2717 = vmatprep.mubr.msk.bf16.mxu0 %vm666_vm1, %v2870_v10  ;;  %2781 = vmatprep.mubr.msk.bf16.mxu1 %vm666_vm1, %v2871_v11  ;;  %v2921_v61 = vld [vmem:[%s3497_s26 + $0x1d8] sm:$0xff]   ;;  %v2923_v63 = vld [vmem:[%s3497_s26 + $0x1e0] sm:$0xff]   ;;  %v2925_v1 = vld [vmem:[%s3497_s26 + $0x1e8] sm:$0xff]  }
  0x22   : > { %v2926_v2 = vld [vmem:[%s3497_s26 + $0xf0] sm:$0xff]   ;;  %v2928_v4 = vld [vmem:[%s3497_s26 + $0xf8] sm:$0xff]   ;;  %v3633_v6 = vld [vmem:[%s4071_s2] ss:$0 sm:$0xff] }
  0x23   : > { %v2927_v3 = vld [vmem:[%s3497_s26 + $0x1f0] sm:$0xff]   ;;  %v2929_v5 = vld [vmem:[%s3497_s26 + $0x1f8] sm:$0xff]  }
  0x28   : > { %2718 = vmatmul.mubr.msk.bf16.gmra.mxu0 %vm666_vm1, %v2872_v12  ;;  %2782 = vmatmul.mubr.msk.bf16.gmra.mxu1 %vm666_vm1, %v2873_v13 }
  0x29   : > { %2721 = vmatprep.mubr.msk.bf16.mxu0 %vm666_vm1, %v2874_v14  ;;  %2785 = vmatprep.mubr.msk.bf16.mxu1 %vm666_vm1, %v2875_v15 }
  0x30   : > { %2722 = vmatmul.mubr.msk.bf16.gmra.mxu0 %vm666_vm1, %v2876_v16  ;;  %2786 = vmatmul.mubr.msk.bf16.gmra.mxu1 %vm666_vm1, %v2877_v17 }
  0x31   : > { %2725 = vmatprep.mubr.msk.bf16.mxu0 %vm666_vm1, %v2878_v18  ;;  %2789 = vmatprep.mubr.msk.bf16.mxu1 %vm666_vm1, %v2879_v19 }
  0x38   : > { %2726 = vmatmul.mubr.msk.bf16.gmra.mxu0 %vm666_vm1, %v2880_v20  ;;  %2790 = vmatmul.mubr.msk.bf16.gmra.mxu1 %vm666_vm1, %v2881_v21 }
  0x39   : > { %2729 = vmatprep.mubr.msk.bf16.mxu0 %vm666_vm1, %v2882_v22  ;;  %2793 = vmatprep.mubr.msk.bf16.mxu1 %vm666_vm1, %v2883_v23 }
  0x40   : > { %2730 = vmatmul.mubr.msk.bf16.gmra.mxu0 %vm666_vm1, %v2884_v24  ;;  %2794 = vmatmul.mubr.msk.bf16.gmra.mxu1 %vm666_vm1, %v2885_v25 }
  0x41   : > { %2733 = vmatprep.mubr.msk.bf16.mxu0 %vm666_vm1, %v2886_v26  ;;  %2797 = vmatprep.mubr.msk.bf16.mxu1 %vm666_vm1, %v2887_v27 }
  0x48   : > { %2734 = vmatmul.mubr.msk.bf16.gmra.mxu0 %vm666_vm1, %v2888_v28  ;;  %2798 = vmatmul.mubr.msk.bf16.gmra.mxu1 %vm666_vm1, %v2889_v29 }
  0x49   : > { %2737 = vmatprep.mubr.msk.bf16.mxu0 %vm666_vm1, %v2890_v30  ;;  %2801 = vmatprep.mubr.msk.bf16.mxu1 %vm666_vm1, %v2891_v31 }
  0x50   : > { %2738 = vmatmul.mubr.msk.bf16.gmra.mxu0 %vm666_vm1, %v2892_v32  ;;  %2802 = vmatmul.mubr.msk.bf16.gmra.mxu1 %vm666_vm1, %v2893_v33 }
  0x51   : > { %2741 = vmatprep.mubr.msk.bf16.mxu0 %vm666_vm1, %v2894_v34  ;;  %2805 = vmatprep.mubr.msk.bf16.mxu1 %vm666_vm1, %v2895_v35 }
  0x58   : > { %2742 = vmatmul.mubr.msk.bf16.gmra.mxu0 %vm666_vm1, %v2896_v36  ;;  %2806 = vmatmul.mubr.msk.bf16.gmra.mxu1 %vm666_vm1, %v2897_v37 }
  0x59   : > { %2745 = vmatprep.mubr.msk.bf16.mxu0 %vm666_vm1, %v2898_v38  ;;  %2809 = vmatprep.mubr.msk.bf16.mxu1 %vm666_vm1, %v2899_v39 }
  0x60   : > { %2746 = vmatmul.mubr.msk.bf16.gmra.mxu0 %vm666_vm1, %v2900_v40  ;;  %2810 = vmatmul.mubr.msk.bf16.gmra.mxu1 %vm666_vm1, %v2901_v41 }
  0x61   : > { %2749 = vmatprep.mubr.msk.bf16.mxu0 %vm666_vm1, %v2902_v42  ;;  %2813 = vmatprep.mubr.msk.bf16.mxu1 %vm666_vm1, %v2903_v43 }
  0x68   : > { %2750 = vmatmul.mubr.msk.bf16.gmra.mxu0 %vm666_vm1, %v2904_v44  ;;  %2814 = vmatmul.mubr.msk.bf16.gmra.mxu1 %vm666_vm1, %v2905_v45 }
  0x69   : > { %2753 = vmatprep.mubr.msk.bf16.mxu0 %vm666_vm1, %v2906_v46  ;;  %2817 = vmatprep.mubr.msk.bf16.mxu1 %vm666_vm1, %v2907_v47 }
  0x70   : > { %2754 = vmatmul.mubr.msk.bf16.gmra.mxu0 %vm666_vm1, %v2908_v48  ;;  %2818 = vmatmul.mubr.msk.bf16.gmra.mxu1 %vm666_vm1, %v2909_v49 }
  0x71   : > { %2757 = vmatprep.mubr.msk.bf16.mxu0 %vm666_vm1, %v2910_v50  ;;  %2821 = vmatprep.mubr.msk.bf16.mxu1 %vm666_vm1, %v2911_v51 }
  0x78   : > { %2758 = vmatmul.mubr.msk.bf16.gmra.mxu0 %vm666_vm1, %v2912_v52  ;;  %2822 = vmatmul.mubr.msk.bf16.gmra.mxu1 %vm666_vm1, %v2913_v53 }
  0x79   : > { %2761 = vmatprep.mubr.msk.bf16.mxu0 %vm666_vm1, %v2914_v54  ;;  %2825 = vmatprep.mubr.msk.bf16.mxu1 %vm666_vm1, %v2915_v55 }
  0x80   : > { %2762 = vmatmul.mubr.msk.bf16.gmra.mxu0 %vm666_vm1, %v2916_v56  ;;  %2826 = vmatmul.mubr.msk.bf16.gmra.mxu1 %vm666_vm1, %v2917_v57 }
  0x81   : > { %2765 = vmatprep.mubr.msk.bf16.mxu0 %vm666_vm1, %v2918_v58  ;;  %2829 = vmatprep.mubr.msk.bf16.mxu1 %vm666_vm1, %v2919_v59 }
  0x88   : > { %2766 = vmatmul.mubr.msk.bf16.gmra.mxu0 %vm666_vm1, %v2920_v60  ;;  %2830 = vmatmul.mubr.msk.bf16.gmra.mxu1 %vm666_vm1, %v2921_v61 }
  0x89   : > { %2769 = vmatprep.mubr.msk.bf16.mxu0 %vm666_vm1, %v2922_v62  ;;  %2833 = vmatprep.mubr.msk.bf16.mxu1 %vm666_vm1, %v2923_v63 }
  0x90   : > { %2770 = vmatmul.mubr.msk.bf16.gmra.mxu0 %vm666_vm1, %v2924_v0  ;;  %2834 = vmatmul.mubr.msk.bf16.gmra.mxu1 %vm666_vm1, %v2925_v1 }
  0x91   : > { %2773 = vmatprep.mubr.msk.bf16.mxu0 %vm666_vm1, %v2926_v2  ;;  %2837 = vmatprep.mubr.msk.bf16.mxu1 %vm666_vm1, %v2927_v3 }
  0x98   : > { %2774 = vmatmul.mubr.msk.bf16.gmra.mxu0 %vm666_vm1, %v2928_v4  ;;  %2838 = vmatmul.mubr.msk.bf16.gmra.mxu1 %vm666_vm1, %v2929_v5 }
  0xe0   : > { %v2715_v7 = vpop.f32.mrf.mxu0  ;;  %v2779_v8 = vpop.f32.mrf.mxu1 }
  0xe1   : > { %v906_v9 = vadd.f32 %v2715_v7, %v3633_v6  ;;  %v1162_v10 = vadd.f32 %v2779_v8, %v3633_v6 }
  0xe2   : > { %v897_v11 = vpop.f32.mrf.mxu0  ;;  %v1153_v12 = vpop.f32.mrf.mxu1 }
  0xe3   : > { %v2506_v13 = vmul.f32 -1.442695, %v906_v9  ;;  %v2570_v14 = vmul.f32 -1.442695, %v1162_v10  ;;  %v898_v15 = vadd.f32 %v3633_v6, %v897_v11  ;;  %v1154_v16 = vadd.f32 %v3633_v6, %v1153_v12 }
  0xe4   : > { %v2716_v17 = vpop.f32.mrf.mxu0  ;;  %v2780_v18 = vpop.f32.mrf.mxu1 }
  0xe5   : > { %2930 = vpow2.f32 %v2506_v13  ;;  %v2504_v19 = vmul.f32 -1.442695, %v898_v15  ;;  %v2568_v20 = vmul.f32 -1.442695, %v1154_v16  ;;  %v909_v21 = vadd.f32 %v2716_v17, %v3633_v6 }
  0xe6   : > { %2932 = vpow2.f32 %v2570_v14  ;;  %v1165_v22 = vadd.f32 %v2780_v18, %v3633_v6  ;;  %v900_v23 = vpop.f32.mrf.mxu0  ;;  %v1156_v24 = vpop.f32.mrf.mxu1 }
  0xe7   : > { %2934 = vpow2.f32 %v2504_v19  ;;  %v2507_v25 = vmul.f32 -1.442695, %v909_v21  ;;  %v901_v26 = vadd.f32 %v3633_v6, %v900_v23  ;;  %v1157_v27 = vadd.f32 %v3633_v6, %v1156_v24 }
  0xe8   : > { %2936 = vpow2.f32 %v2568_v20  ;;  %v2571_v28 = vmul.f32 -1.442695, %v1165_v22  ;;  %v2719_v29 = vpop.f32.mrf.mxu0  ;;  %v2783_v30 = vpop.f32.mrf.mxu1 }
  0xe9   : > { %2938 = vpow2.f32 %v2507_v25  ;;  %v2505_v31 = vmul.f32 -1.442695, %v901_v26  ;;  %v2569_v32 = vmul.f32 -1.442695, %v1157_v27  ;;  %v922_v33 = vadd.f32 %v2719_v29, %v3633_v6 }
  0xea   : > { %2940 = vpow2.f32 %v2571_v28  ;;  %v1178_v34 = vadd.f32 %v2783_v30, %v3633_v6  ;;  %v913_v35 = vpop.f32.mrf.mxu0  ;;  %v1169_v36 = vpop.f32.mrf.mxu1 }
  0xeb   : > { %2942 = vpow2.f32 %v2505_v31  ;;  %v2510_v37 = vmul.f32 -1.442695, %v922_v33  ;;  %v914_v38 = vadd.f32 %v3633_v6, %v913_v35  ;;  %v1170_v39 = vadd.f32 %v3633_v6, %v1169_v36 }
  0xec   : > { %2944 = vpow2.f32 %v2569_v32  ;;  %v2574_v40 = vmul.f32 -1.442695, %v1178_v34  ;;  %v2720_v41 = vpop.f32.mrf.mxu0  ;;  %v2784_v42 = vpop.f32.mrf.mxu1 }
  0xed   : > { %2946 = vpow2.f32 %v2510_v37  ;;  %v2508_v43 = vmul.f32 -1.442695, %v914_v38  ;;  %v2572_v44 = vmul.f32 -1.442695, %v1170_v39  ;;  %v925_v45 = vadd.f32 %v2720_v41, %v3633_v6 }
  0xee   : > { %2948 = vpow2.f32 %v2574_v40  ;;  %v1181_v46 = vadd.f32 %v2784_v42, %v3633_v6  ;;  %v916_v47 = vpop.f32.mrf.mxu0  ;;  %v1172_v48 = vpop.f32.mrf.mxu1 }
  0xef   : > { %2950 = vpow2.f32 %v2508_v43  ;;  %v2511_v49 = vmul.f32 -1.442695, %v925_v45  ;;  %v917_v50 = vadd.f32 %v3633_v6, %v916_v47  ;;  %v1173_v51 = vadd.f32 %v3633_v6, %v1172_v48 }
  0xf0   : > { %2952 = vpow2.f32 %v2572_v44  ;;  %v2575_v52 = vmul.f32 -1.442695, %v1181_v46  ;;  %v2723_v53 = vpop.f32.mrf.mxu0  ;;  %v2787_v54 = vpop.f32.mrf.mxu1 }
  0xf1   : > { %2954 = vpow2.f32 %v2511_v49  ;;  %v2509_v55 = vmul.f32 -1.442695, %v917_v50  ;;  %v2573_v56 = vmul.f32 -1.442695, %v1173_v51  ;;  %v938_v24 = vadd.f32 %v2723_v53, %v3633_v6 }
  0xf2   : > { %v2931_v57 = vpop.eup %2930  ;;  %2956 = vpow2.f32 %v2575_v52  ;;  %v929_v58 = vpop.f32.mrf.mxu0  ;;  %v1194_v28 = vadd.f32 %v2787_v54, %v3633_v6 }
  0xf3   : > { %v1185_v59 = vpop.f32.mrf.mxu1  ;;  %v2933_v60 = vpop.eup %2932  ;;  %v1794_v61 = vadd.f32 1.0, %v2931_v57  ;;  %2958 = vpow2.f32 %v2509_v55  ;;  %v930_v31 = vadd.f32 %v3633_v6, %v929_v58  ;;  %v2514_v38 = vmul.f32 -1.442695, %v938_v24 }
  0xf4   : > { %v2935_v62 = vpop.eup %2934  ;;  %v1858_v63 = vadd.f32 1.0, %v2933_v60  ;;  %2960 = vpow2.f32 %v2573_v56  ;;  %v2724_v0 = vpop.f32.mrf.mxu0  ;;  %v1186_v34 = vadd.f32 %v3633_v6, %v1185_v59  ;;  %v2578_v43 = vmul.f32 -1.442695, %v1194_v28 }
  0xf5   : > { %v2937_v1 = vpop.eup %2936  ;;  %2962 = vrcp.f32 %v1794_v61  ;;  %v1792_v2 = vadd.f32 1.0, %v2935_v62  ;;  %v2788_v3 = vpop.f32.mrf.mxu1  ;;  %v941_v39 = vadd.f32 %v2724_v0, %v3633_v6  ;;  %v2512_v46 = vmul.f32 -1.442695, %v930_v31 }
  0xf6   : > { %v2939_v4 = vpop.eup %2938  ;;  %2964 = vrcp.f32 %v1858_v63  ;;  %v1856_v5 = vadd.f32 1.0, %v2937_v1  ;;  %v932_v11 = vpop.f32.mrf.mxu0  ;;  %v1197_v44 = vadd.f32 %v2788_v3, %v3633_v6  ;;  %v2576_v49 = vmul.f32 -1.442695, %v1186_v34 }
  0xf7   : > { %v2941_v7 = vpop.eup %2940  ;;  %2966 = vrcp.f32 %v1792_v2  ;;  %v1795_v8 = vadd.f32 1.0, %v2939_v4  ;;  %v1188_v14 = vpop.f32.mrf.mxu1  ;;  %v933_v47 = vadd.f32 %v3633_v6, %v932_v11  ;;  %v2515_v53 = vmul.f32 -1.442695, %v941_v39 }
  0xf8   : > { %v2943_v9 = vpop.eup %2942  ;;  %2968 = vrcp.f32 %v1856_v5  ;;  %v1859_v10 = vadd.f32 1.0, %v2941_v7  ;;  %v2727_v21 = vpop.f32.mrf.mxu0  ;;  %v1189_v50 = vadd.f32 %v3633_v6, %v1188_v14  ;;  %v2579_v57 = vmul.f32 -1.442695, %v1197_v44 }
  0xf9   : > { %v2945_v12 = vpop.eup %2944  ;;  %2970 = vrcp.f32 %v1795_v8  ;;  %v1793_v13 = vadd.f32 1.0, %v2943_v9  ;;  %v2791_v25 = vpop.f32.mrf.mxu1  ;;  %v954_v54 = vadd.f32 %v2727_v21, %v3633_v6  ;;  %v2513_v60 = vmul.f32 -1.442695, %v933_v47 }
  0xfa   : > { %v2947_v15 = vpop.eup %2946  ;;  %2972 = vrcp.f32 %v1859_v10  ;;  %v1857_v16 = vadd.f32 1.0, %v2945_v12  ;;  %v945_v35 = vpop.f32.mrf.mxu0  ;;  %v1210_v58 = vadd.f32 %v2791_v25, %v3633_v6  ;;  %v2577_v63 = vmul.f32 -1.442695, %v1189_v50 }
  0xfb   : > { %v2949_v17 = vpop.eup %2948  ;;  %2974 = vrcp.f32 %v1793_v13  ;;  %v1798_v18 = vadd.f32 1.0, %v2947_v15  ;;  %v1201_v40 = vpop.f32.mrf.mxu1  ;;  %v946_v61 = vadd.f32 %v3633_v6, %v945_v35  ;;  %v2518_v3 = vmul.f32 -1.442695, %v954_v54 }
  0xfc   : > { %v2951_v19 = vpop.eup %2950  ;;  %2976 = vrcp.f32 %v1857_v16  ;;  %v1862_v20 = vadd.f32 1.0, %v2949_v17  ;;  %v2728_v51 = vpop.f32.mrf.mxu0  ;;  %v1202_v0 = vadd.f32 %v3633_v6, %v1201_v40  ;;  %v2582_v8 = vmul.f32 -1.442695, %v1210_v58 }
  0xfd   : > { %v2953_v22 = vpop.eup %2952  ;;  %2978 = vrcp.f32 %v1798_v18  ;;  %v1796_v23 = vadd.f32 1.0, %v2951_v19  ;;  %v2792_v55 = vpop.f32.mrf.mxu1  ;;  %v957_v4 = vadd.f32 %v2728_v51, %v3633_v6  ;;  %v2516_v11 = vmul.f32 -1.442695, %v946_v61 }
  0xfe   : > { %v2955_v26 = vpop.eup %2954  ;;  %2980 = vrcp.f32 %v1862_v20  ;;  %v1860_v27 = vadd.f32 1.0, %v2953_v22  ;;  %v948_v1 = vpop.f32.mrf.mxu0  ;;  %v1213_v9 = vadd.f32 %v2792_v55, %v3633_v6  ;;  %v2580_v14 = vmul.f32 -1.442695, %v1202_v0 }
  0xff   : > { %v2957_v29 = vpop.eup %2956  ;;  %2982 = vrcp.f32 %v1796_v23  ;;  %v1799_v30 = vadd.f32 1.0, %v2955_v26  ;;  %v1204_v5 = vpop.f32.mrf.mxu1  ;;  %v949_v12 = vadd.f32 %v3633_v6, %v948_v1  ;;  %v2519_v18 = vmul.f32 -1.442695, %v957_v4 }
 0x100   : > { %v2959_v32 = vpop.eup %2958  ;;  %2984 = vrcp.f32 %v1860_v27  ;;  %v1863_v33 = vadd.f32 1.0, %v2957_v29  ;;  %v1205_v15 = vadd.f32 %v3633_v6, %v1204_v5  ;;  %v3693_v16 = vpop.f32.mrf.mxu0  ;;  %v2583_v21 = vmul.f32 -1.442695, %v1213_v9 }
 0x101   : > { %v2961_v36 = vpop.eup %2960  ;;  %2986 = vrcp.f32 %v1799_v30  ;;  %v1797_v37 = vadd.f32 1.0, %v2959_v32  ;;  %v3697_v19 = vpop.f32.mrf.mxu1  ;;  %v2517_v23 = vmul.f32 -1.442695, %v949_v12 }
 0x102   : > { %v2963_v41 = vpop.eup %2962  ;;  %2988 = vrcp.f32 %v1863_v33  ;;  %v1861_v42 = vadd.f32 1.0, %v2961_v36  ;;  %v2581_v25 = vmul.f32 -1.442695, %v1205_v15  ;;  %v961_v26 = vpop.f32.mrf.mxu0  ;;  %v1226_v61 = vadd.f32 %v3697_v19, %v3633_v6 }
 0x103   : > { %v2965_v45 = vpop.eup %2964  ;;  %2179 = vst.msk [vmem:[%s3658_s7 + $0x10] sm:$0xff] %vm2176_vm2, %v2963_v41  ;;  %2990 = vrcp.f32 %v1797_v37  ;;  %v1217_v28 = vpop.f32.mrf.mxu1  ;;  %v962_v0 = vadd.f32 %v3633_v6, %v961_v26 }
 0x104   : > { %v2967_v48 = vpop.eup %2966  ;;  %2243 = vst.msk [vmem:[%s3658_s7 + $0x210] sm:$0xff] %vm2176_vm2, %v2965_v45  ;;  %2992 = vrcp.f32 %v1861_v42  ;;  %v2732_v34 = vpop.f32.mrf.mxu0 }
 0x105   : > { %v2969_v52 = vpop.eup %2968  ;;  %2177 = vst.msk [vmem:[%s3658_s7] sm:$0xff] %vm2176_vm2, %v2967_v48  ;;  %2994 = vpow2.f32 %v2514_v38  ;;  %v2796_v37 = vpop.f32.mrf.mxu1  ;;  %v973_v9 = vadd.f32 %v2732_v34, %v3633_v6 }
 0x106   : > { %v2971_v56 = vpop.eup %2970  ;;  %2241 = vst.msk [vmem:[%s3658_s7 + $0x200] sm:$0xff] %vm2176_vm2, %v2969_v52  ;;  %2996 = vpow2.f32 %v2578_v43  ;;  %v964_v44 = vpop.f32.mrf.mxu0 }
 0x107   : > { %v2973_v59 = vpop.eup %2972  ;;  %2180 = vst.msk [vmem:[%s3658_s7 + $0x18] sm:$0xff] %vm2176_vm2, %v2971_v56  ;;  %2998 = vpow2.f32 %v2512_v46  ;;  %v1220_v47 = vpop.f32.mrf.mxu1 }
 0x108   : > { %v2975_v62 = vpop.eup %2974  ;;  %2244 = vst.msk [vmem:[%s3658_s7 + $0x218] sm:$0xff] %vm2176_vm2, %v2973_v59  ;;  %3000 = vpow2.f32 %v2576_v49  ;;  %v2735_v54 = vpop.f32.mrf.mxu0 }
 0x109   : > { %v2977_v2 = vpop.eup %2976  ;;  %2178 = vst.msk [vmem:[%s3658_s7 + $0x8] sm:$0xff] %vm2176_vm2, %v2975_v62  ;;  %3002 = vpow2.f32 %v2515_v53  ;;  %v2799_v58 = vpop.f32.mrf.mxu1 }
 0x10a   : > { %v2979_v7 = vpop.eup %2978  ;;  %2242 = vst.msk [vmem:[%s3658_s7 + $0x208] sm:$0xff] %vm2176_vm2, %v2977_v2  ;;  %3004 = vpow2.f32 %v2579_v57  ;;  %v970_v57 = vadd.f32 %v3693_v16, %v3633_v6  ;;  %v977_v4 = vpop.f32.mrf.mxu0  ;;  %v2520_v16 = vmul.f32 -1.442695, %v962_v0 }
 0x10b   : > { %v2981_v10 = vpop.eup %2980  ;;  %2183 = vst.msk [vmem:[%s3658_s7 + $0x30] sm:$0xff] %vm2176_vm2, %v2979_v7  ;;  %3006 = vpow2.f32 %v2513_v60 }
 0x10c   : > { %v2983_v13 = vpop.eup %2982  ;;  %2247 = vst.msk [vmem:[%s3658_s7 + $0x230] sm:$0xff] %vm2176_vm2, %v2981_v10  ;;  %3008 = vpow2.f32 %v2577_v63  ;;  %v1233_v10 = vpop.f32.mrf.mxu1 }
 0x10d   : > { %v2985_v17 = vpop.eup %2984  ;;  %2181 = vst.msk [vmem:[%s3658_s7 + $0x20] sm:$0xff] %vm2176_vm2, %v2983_v13  ;;  %3010 = vpow2.f32 %v2518_v3  ;;  %v1218_v3 = vadd.f32 %v3633_v6, %v1217_v28  ;;  %v2586_v13 = vmul.f32 -1.442695, %v1226_v61  ;;  %v1242_v28 = vadd.f32 %v2799_v58, %v3633_v6 }
 0x10e   : > { %v2987_v20 = vpop.eup %2986  ;;  %2245 = vst.msk [vmem:[%s3658_s7 + $0x220] sm:$0xff] %vm2176_vm2, %v2985_v17  ;;  %3012 = vpow2.f32 %v2582_v8  ;;  %v2522_v8 = vmul.f32 -1.442695, %v970_v57  ;;  %v965_v17 = vadd.f32 %v3633_v6, %v964_v44  ;;  %v1234_v34 = vadd.f32 %v3633_v6, %v1233_v10 }
 0x10f   : > { %v2989_v22 = vpop.eup %2988  ;;  %2184 = vst.msk [vmem:[%s3658_s7 + $0x38] sm:$0xff] %vm2176_vm2, %v2987_v20  ;;  %3014 = vpow2.f32 %v2516_v11  ;;  %v2584_v19 = vmul.f32 -1.442695, %v1218_v3  ;;  %v1221_v20 = vadd.f32 %v3633_v6, %v1220_v47 }
 0x110   : > { %v2991_v24 = vpop.eup %2990  ;;  %2248 = vst.msk [vmem:[%s3658_s7 + $0x238] sm:$0xff] %vm2176_vm2, %v2989_v22  ;;  %3016 = vpow2.f32 %v2580_v14  ;;  %v1229_v14 = vadd.f32 %v2796_v37, %v3633_v6  ;;  %v2588_v47 = vmul.f32 -1.442695, %v1234_v34 }
 0x111   : > { %v2993_v27 = vpop.eup %2992  ;;  %2182 = vst.msk [vmem:[%s3658_s7 + $0x28] sm:$0xff] %vm2176_vm2, %v2991_v24  ;;  %3018 = vpow2.f32 %v2519_v18  ;;  %v986_v24 = vadd.f32 %v2735_v54, %v3633_v6 }
 0x112   : > { %v2995_v29 = vpop.eup %2994  ;;  %2246 = vst.msk [vmem:[%s3658_s7 + $0x228] sm:$0xff] %vm2176_vm2, %v2993_v27  ;;  %3020 = vpow2.f32 %v2583_v21  ;;  %v2736_v21 = vpop.f32.mrf.mxu0  ;;  %v2587_v27 = vmul.f32 -1.442695, %v1229_v14 }
 0x113   : > { %v2997_v30 = vpop.eup %2996  ;;  %v1802_v31 = vadd.f32 1.0, %v2995_v29  ;;  %3022 = vpow2.f32 %v2517_v23  ;;  %v2523_v23 = vmul.f32 -1.442695, %v973_v9  ;;  %v2526_v37 = vmul.f32 -1.442695, %v986_v24 }
 0x114   : > { %v2999_v32 = vpop.eup %2998  ;;  %v1866_v33 = vadd.f32 1.0, %v2997_v30  ;;  %3024 = vpow2.f32 %v2581_v25  ;;  %v2800_v25 = vpop.f32.mrf.mxu1  ;;  %v2521_v30 = vmul.f32 -1.442695, %v965_v17 }
 0x115   : > { %v3001_v35 = vpop.eup %3000  ;;  %3026 = vrcp.f32 %v1802_v31  ;;  %v1800_v36 = vadd.f32 1.0, %v2999_v32  ;;  %v978_v31 = vadd.f32 %v3633_v6, %v977_v4 }
 0x116   : > { %v3003_v38 = vpop.eup %3002  ;;  %3028 = vrcp.f32 %v1866_v33  ;;  %v1864_v39 = vadd.f32 1.0, %v3001_v35  ;;  %v2585_v33 = vmul.f32 -1.442695, %v1221_v20  ;;  %v980_v35 = vpop.f32.mrf.mxu0 }
 0x117   : > { %v3005_v40 = vpop.eup %3004  ;;  %3030 = vrcp.f32 %v1800_v36  ;;  %v1803_v41 = vadd.f32 1.0, %v3003_v38  ;;  %v989_v38 = vadd.f32 %v2736_v21, %v3633_v6  ;;  %v2524_v44 = vmul.f32 -1.442695, %v978_v31 }
 0x118   : > { %v3007_v42 = vpop.eup %3006  ;;  %3032 = vrcp.f32 %v1864_v39  ;;  %v1867_v43 = vadd.f32 1.0, %v3005_v40  ;;  %v1236_v39 = vpop.f32.mrf.mxu1 }
 0x119   : > { %v3009_v45 = vpop.eup %3008  ;;  %3034 = vrcp.f32 %v1803_v41  ;;  %v1801_v46 = vadd.f32 1.0, %v3007_v42  ;;  %v2590_v41 = vmul.f32 -1.442695, %v1242_v28  ;;  %v1245_v42 = vadd.f32 %v2800_v25, %v3633_v6 }
 0x11a   : > { %v3011_v48 = vpop.eup %3010  ;;  %3036 = vrcp.f32 %v1867_v43  ;;  %v1865_v49 = vadd.f32 1.0, %v3009_v45  ;;  %v981_v45 = vadd.f32 %v3633_v6, %v980_v35 }
 0x11b   : > { %v3013_v50 = vpop.eup %3012  ;;  %3038 = vrcp.f32 %v1801_v46  ;;  %v1806_v51 = vadd.f32 1.0, %v3011_v48  ;;  %v1237_v48 = vadd.f32 %v3633_v6, %v1236_v39  ;;  %v2591_v54 = vmul.f32 -1.442695, %v1245_v42 }
 0x11c   : > { %v3015_v52 = vpop.eup %3014  ;;  %3040 = vrcp.f32 %v1865_v49  ;;  %v1870_v53 = vadd.f32 1.0, %v3013_v50  ;;  %v3747_v49 = vpop.f32.mrf.mxu0 }
 0x11d   : > { %v3017_v55 = vpop.eup %3016  ;;  %3042 = vrcp.f32 %v1806_v51  ;;  %v1804_v56 = vadd.f32 1.0, %v3015_v52  ;;  %v2527_v51 = vmul.f32 -1.442695, %v989_v38  ;;  %v3751_v52 = vpop.f32.mrf.mxu1  ;;  %v2589_v58 = vmul.f32 -1.442695, %v1237_v48 }
 0x11e   : > { %v3019_v59 = vpop.eup %3018  ;;  %3044 = vrcp.f32 %v1870_v53  ;;  %v1868_v60 = vadd.f32 1.0, %v3017_v55  ;;  %v1258_v31 = vadd.f32 %v3751_v52, %v3633_v6 }
 0x11f   : > { %v3021_v62 = vpop.eup %3020  ;;  %3046 = vrcp.f32 %v1804_v56  ;;  %v1807_v63 = vadd.f32 1.0, %v3019_v59  ;;  %v2525_v56 = vmul.f32 -1.442695, %v981_v45  ;;  %v993_v59 = vpop.f32.mrf.mxu0 }
 0x120   : > { %v3023_v1 = vpop.eup %3022  ;;  %3048 = vrcp.f32 %v1868_v60  ;;  %v1871_v2 = vadd.f32 1.0, %v3021_v62  ;;  %v1249_v61 = vpop.f32.mrf.mxu1  ;;  %v994_v34 = vadd.f32 %v3633_v6, %v993_v59 }
 0x121   : > { %v3025_v5 = vpop.eup %3024  ;;  %3050 = vrcp.f32 %v1807_v63  ;;  %v1805_v7 = vadd.f32 1.0, %v3023_v1  ;;  %v2740_v3 = vpop.f32.mrf.mxu0 }
 0x122   : > { %v3027_v11 = vpop.eup %3026  ;;  %3052 = vrcp.f32 %v1871_v2  ;;  %v1869_v12 = vadd.f32 1.0, %v3025_v5  ;;  %v1005_v42 = vadd.f32 %v2740_v3, %v3633_v6 }
 0x123   : > { %v3029_v15 = vpop.eup %3028  ;;  %2187 = vst.msk [vmem:[%s3658_s7 + $0x50] sm:$0xff] %vm2176_vm2, %v3027_v11  ;;  %3054 = vrcp.f32 %v1805_v7  ;;  %v2804_v7 = vpop.f32.mrf.mxu1 }
 0x124   : > { %v3031_v18 = vpop.eup %3030  ;;  %2251 = vst.msk [vmem:[%s3658_s7 + $0x250] sm:$0xff] %vm2176_vm2, %v3029_v15  ;;  %3056 = vrcp.f32 %v1869_v12  ;;  %v996_v14 = vpop.f32.mrf.mxu0 }
 0x125   : > { %v3033_v22 = vpop.eup %3032  ;;  %2185 = vst.msk [vmem:[%s3658_s7 + $0x40] sm:$0xff] %vm2176_vm2, %v3031_v18  ;;  %3058 = vpow2.f32 %v2522_v8  ;;  %v1252_v17 = vpop.f32.mrf.mxu1 }
 0x126   : > { %v3035_v26 = vpop.eup %3034  ;;  %2249 = vst.msk [vmem:[%s3658_s7 + $0x240] sm:$0xff] %vm2176_vm2, %v3033_v22  ;;  %3060 = vpow2.f32 %v2586_v13  ;;  %v2743_v24 = vpop.f32.mrf.mxu0 }
 0x127   : > { %v3037_v29 = vpop.eup %3036  ;;  %2188 = vst.msk [vmem:[%s3658_s7 + $0x58] sm:$0xff] %vm2176_vm2, %v3035_v26  ;;  %3062 = vpow2.f32 %v2520_v16  ;;  %v2807_v28 = vpop.f32.mrf.mxu1 }
 0x128   : > { %v3039_v32 = vpop.eup %3038  ;;  %2252 = vst.msk [vmem:[%s3658_s7 + $0x258] sm:$0xff] %vm2176_vm2, %v3037_v29  ;;  %3064 = vpow2.f32 %v2584_v19  ;;  %v1009_v38 = vpop.f32.mrf.mxu0 }
 0x129   : > { %v3041_v36 = vpop.eup %3040  ;;  %2186 = vst.msk [vmem:[%s3658_s7 + $0x48] sm:$0xff] %vm2176_vm2, %v3039_v32  ;;  %3066 = vpow2.f32 %v2523_v23 }
 0x12a   : > { %v3043_v40 = vpop.eup %3042  ;;  %2250 = vst.msk [vmem:[%s3658_s7 + $0x248] sm:$0xff] %vm2176_vm2, %v3041_v36  ;;  %3068 = vpow2.f32 %v2587_v27  ;;  %v1002_v27 = vadd.f32 %v3747_v49, %v3633_v6  ;;  %v2528_v49 = vmul.f32 -1.442695, %v994_v34 }
 0x12b   : > { %v3045_v43 = vpop.eup %3044  ;;  %2191 = vst.msk [vmem:[%s3658_s7 + $0x70] sm:$0xff] %vm2176_vm2, %v3043_v40  ;;  %3070 = vpow2.f32 %v2521_v30 }
 0x12c   : > { %v3047_v46 = vpop.eup %3046  ;;  %2255 = vst.msk [vmem:[%s3658_s7 + $0x270] sm:$0xff] %vm2176_vm2, %v3045_v43  ;;  %3072 = vpow2.f32 %v2585_v33  ;;  %v1265_v43 = vpop.f32.mrf.mxu1 }
 0x12d   : > { %v3049_v50 = vpop.eup %3048  ;;  %2189 = vst.msk [vmem:[%s3658_s7 + $0x60] sm:$0xff] %vm2176_vm2, %v3047_v46  ;;  %3074 = vpow2.f32 %v2526_v37  ;;  %v1250_v37 = vadd.f32 %v3633_v6, %v1249_v61  ;;  %v2594_v46 = vmul.f32 -1.442695, %v1258_v31  ;;  %v1274_v61 = vadd.f32 %v2807_v28, %v3633_v6 }
 0x12e   : > { %v3051_v53 = vpop.eup %3050  ;;  %2253 = vst.msk [vmem:[%s3658_s7 + $0x260] sm:$0xff] %vm2176_vm2, %v3049_v50  ;;  %3076 = vpow2.f32 %v2590_v41  ;;  %v2530_v41 = vmul.f32 -1.442695, %v1002_v27  ;;  %v997_v50 = vadd.f32 %v3633_v6, %v996_v14  ;;  %v1266_v3 = vadd.f32 %v3633_v6, %v1265_v43 }
 0x12f   : > { %v3053_v55 = vpop.eup %3052  ;;  %2192 = vst.msk [vmem:[%s3658_s7 + $0x78] sm:$0xff] %vm2176_vm2, %v3051_v53  ;;  %3078 = vpow2.f32 %v2524_v44  ;;  %v2592_v52 = vmul.f32 -1.442695, %v1250_v37  ;;  %v1253_v53 = vadd.f32 %v3633_v6, %v1252_v17 }
 0x130   : > { %v3055_v57 = vpop.eup %3054  ;;  %2256 = vst.msk [vmem:[%s3658_s7 + $0x278] sm:$0xff] %vm2176_vm2, %v3053_v55  ;;  %3080 = vpow2.f32 %v2588_v47  ;;  %v1261_v47 = vadd.f32 %v2804_v7, %v3633_v6  ;;  %v2596_v17 = vmul.f32 -1.442695, %v1266_v3 }
 0x131   : > { %v3057_v60 = vpop.eup %3056  ;;  %2190 = vst.msk [vmem:[%s3658_s7 + $0x68] sm:$0xff] %vm2176_vm2, %v3055_v57  ;;  %3082 = vpow2.f32 %v2527_v51  ;;  %v1018_v57 = vadd.f32 %v2743_v24, %v3633_v6 }
 0x132   : > { %v3059_v62 = vpop.eup %3058  ;;  %2254 = vst.msk [vmem:[%s3658_s7 + $0x268] sm:$0xff] %vm2176_vm2, %v3057_v60  ;;  %3084 = vpow2.f32 %v2591_v54  ;;  %v2744_v54 = vpop.f32.mrf.mxu0  ;;  %v2595_v60 = vmul.f32 -1.442695, %v1261_v47 }
 0x133   : > { %v3061_v63 = vpop.eup %3060  ;;  %v1810_v0 = vadd.f32 1.0, %v3059_v62  ;;  %3086 = vpow2.f32 %v2525_v56  ;;  %v2531_v56 = vmul.f32 -1.442695, %v1005_v42  ;;  %v2534_v7 = vmul.f32 -1.442695, %v1018_v57 }
 0x134   : > { %v3063_v1 = vpop.eup %3062  ;;  %v1874_v2 = vadd.f32 1.0, %v3061_v63  ;;  %3088 = vpow2.f32 %v2589_v58  ;;  %v2808_v58 = vpop.f32.mrf.mxu1  ;;  %v2529_v63 = vmul.f32 -1.442695, %v997_v50 }
 0x135   : > { %v3065_v4 = vpop.eup %3064  ;;  %3090 = vrcp.f32 %v1810_v0  ;;  %v1808_v5 = vadd.f32 1.0, %v3063_v1  ;;  %v1010_v0 = vadd.f32 %v3633_v6, %v1009_v38 }
 0x136   : > { %v3067_v8 = vpop.eup %3066  ;;  %3092 = vrcp.f32 %v1874_v2  ;;  %v1872_v9 = vadd.f32 1.0, %v3065_v4  ;;  %v2593_v2 = vmul.f32 -1.442695, %v1253_v53  ;;  %v1012_v4 = vpop.f32.mrf.mxu0 }
 0x137   : > { %v3069_v10 = vpop.eup %3068  ;;  %3094 = vrcp.f32 %v1808_v5  ;;  %v1811_v11 = vadd.f32 1.0, %v3067_v8  ;;  %v1021_v8 = vadd.f32 %v2744_v54, %v3633_v6  ;;  %v2532_v14 = vmul.f32 -1.442695, %v1010_v0 }
 0x138   : > { %v3071_v12 = vpop.eup %3070  ;;  %3096 = vrcp.f32 %v1872_v9  ;;  %v1875_v13 = vadd.f32 1.0, %v3069_v10  ;;  %v1268_v9 = vpop.f32.mrf.mxu1 }
 0x139   : > { %v3073_v15 = vpop.eup %3072  ;;  %3098 = vrcp.f32 %v1811_v11  ;;  %v1809_v16 = vadd.f32 1.0, %v3071_v12  ;;  %v2598_v11 = vmul.f32 -1.442695, %v1274_v61  ;;  %v1277_v12 = vadd.f32 %v2808_v58, %v3633_v6 }
 0x13a   : > { %v3075_v18 = vpop.eup %3074  ;;  %3100 = vrcp.f32 %v1875_v13  ;;  %v1873_v19 = vadd.f32 1.0, %v3073_v15  ;;  %v1013_v15 = vadd.f32 %v3633_v6, %v1012_v4 }
 0x13b   : > { %v3077_v20 = vpop.eup %3076  ;;  %3102 = vrcp.f32 %v1809_v16  ;;  %v1814_v21 = vadd.f32 1.0, %v3075_v18  ;;  %v1269_v18 = vadd.f32 %v3633_v6, %v1268_v9  ;;  %v2599_v24 = vmul.f32 -1.442695, %v1277_v12 }
 0x13c   : > { %v3079_v22 = vpop.eup %3078  ;;  %3104 = vrcp.f32 %v1873_v19  ;;  %v1878_v23 = vadd.f32 1.0, %v3077_v20  ;;  %v3801_v19 = vpop.f32.mrf.mxu0  ;;  %v2533_v6 = vmul.f32 -1.442695, %v1013_v15 }
 0x13d   : > { %v3081_v25 = vpop.eup %3080  ;;  %3106 = vrcp.f32 %v1814_v21  ;;  %v1812_v26 = vadd.f32 1.0, %v3079_v22  ;;  %v2535_v21 = vmul.f32 -1.442695, %v1021_v8  ;;  %v3805_v22 = vpop.f32.mrf.mxu1  ;;  %v2597_v27 = vmul.f32 -1.442695, %v1269_v18 }
 0x13e   : > { %v3083_v29 = vpop.eup %3082  ;;  %3108 = vrcp.f32 %v1878_v23  ;;  %v1876_v30 = vadd.f32 1.0, %v3081_v25  ;;  %v1025_v28 = vpop.f32.mrf.mxu0 }
 0x13f   : > { %v3085_v32 = vpop.eup %3084  ;;  %3110 = vrcp.f32 %v1812_v26  ;;  %v1815_v33 = vadd.f32 1.0, %v3083_v29 }
 0x140   : > { %v3087_v35 = vpop.eup %3086  ;;  %3112 = vrcp.f32 %v1876_v30  ;;  %v1879_v36 = vadd.f32 1.0, %v3085_v32  ;;  %v1281_v30 = vpop.f32.mrf.mxu1 }
 0x141   : > { %v3089_v39 = vpop.eup %3088  ;;  %3114 = vrcp.f32 %v1815_v33  ;;  %v1813_v40 = vadd.f32 1.0, %v3087_v35 }
 0x142   : > { %v3091_v44 = vpop.eup %3090  ;;  %3116 = vrcp.f32 %v1879_v36  ;;  %v1877_v45 = vadd.f32 1.0, %v3089_v39  ;;  %v2748_v36 = vpop.f32.mrf.mxu0 }
 0x143   : > { %v3093_v48 = vpop.eup %3092  ;;  %2195 = vst.msk [vmem:[%s3658_s7 + $0x90] sm:$0xff] %vm2176_vm2, %v3091_v44  ;;  %3118 = vrcp.f32 %v1813_v40  ;;  %v2812_v39 = vpop.f32.mrf.mxu1 }
 0x144   : > { %v3095_v51 = vpop.eup %3094  ;;  %2259 = vst.msk [vmem:[%s3658_s7 + $0x290] sm:$0xff] %vm2176_vm2, %v3093_v48  ;;  %3120 = vrcp.f32 %v1877_v45 }
 0x145   : > { %v3097_v55 = vpop.eup %3096  ;;  %2193 = vst.msk [vmem:[%s3658_s7 + $0x80] sm:$0xff] %vm2176_vm2, %v3095_v51  ;;  %3122 = vpow2.f32 %v2530_v41 }
 0x146   : > { %v3099_v59 = vpop.eup %3098  ;;  %2257 = vst.msk [vmem:[%s3658_s7 + $0x280] sm:$0xff] %vm2176_vm2, %v3097_v55  ;;  %3124 = vpow2.f32 %v2594_v46  ;;  %v1028_v46 = vpop.f32.mrf.mxu0 }
 0x147   : > { %v3101_v62 = vpop.eup %3100  ;;  %2196 = vst.msk [vmem:[%s3658_s7 + $0x98] sm:$0xff] %vm2176_vm2, %v3099_v59  ;;  %3126 = vpow2.f32 %v2528_v49  ;;  %v1284_v49 = vpop.f32.mrf.mxu1  ;;  %v3820_v59 = vld [vmem:[%s4071_s2] ss:$0 sm:$0xff] }
 0x148   : > { %v3103_v1 = vpop.eup %3102  ;;  %2260 = vst.msk [vmem:[%s3658_s7 + $0x298] sm:$0xff] %vm2176_vm2, %v3101_v62  ;;  %3128 = vpow2.f32 %v2592_v52  ;;  %v1290_v0 = vadd.f32 %v3820_v59, %v3805_v22  ;;  %v1026_v3 = vadd.f32 %v3820_v59, %v1025_v28  ;;  %v1037_v12 = vadd.f32 %v3820_v59, %v2748_v36 }
 0x149   : > { %v3105_v5 = vpop.eup %3104  ;;  %2194 = vst.msk [vmem:[%s3658_s7 + $0x88] sm:$0xff] %vm2176_vm2, %v3103_v1  ;;  %3130 = vpow2.f32 %v2531_v56  ;;  %v2751_v56 = vpop.f32.mrf.mxu0 }
 0x14a   : > { %v3107_v10 = vpop.eup %3106  ;;  %2258 = vst.msk [vmem:[%s3658_s7 + $0x288] sm:$0xff] %vm2176_vm2, %v3105_v5  ;;  %3132 = vpow2.f32 %v2595_v60  ;;  %v1034_v60 = vadd.f32 %v3820_v59, %v3801_v19  ;;  %v2815_v61 = vpop.f32.mrf.mxu1  ;;  %v2536_v19 = vmul.f32 -1.442695, %v1026_v3 }
 0x14b   : > { %v3109_v13 = vpop.eup %3108  ;;  %2199 = vst.msk [vmem:[%s3658_s7 + $0xb0] sm:$0xff] %vm2176_vm2, %v3107_v10  ;;  %3134 = vpow2.f32 %v2529_v63  ;;  %v1041_v8 = vpop.f32.mrf.mxu0 }
 0x14c   : > { %v3111_v16 = vpop.eup %3110  ;;  %2263 = vst.msk [vmem:[%s3658_s7 + $0x2b0] sm:$0xff] %vm2176_vm2, %v3109_v13  ;;  %3136 = vpow2.f32 %v2593_v2  ;;  %v1297_v13 = vpop.f32.mrf.mxu1 }
 0x14d   : > { %v3113_v20 = vpop.eup %3112  ;;  %2197 = vst.msk [vmem:[%s3658_s7 + $0xa0] sm:$0xff] %vm2176_vm2, %v3111_v16  ;;  %3138 = vpow2.f32 %v2534_v7  ;;  %v1282_v7 = vadd.f32 %v3820_v59, %v1281_v30  ;;  %v2602_v16 = vmul.f32 -1.442695, %v1290_v0  ;;  %v1306_v30 = vadd.f32 %v3820_v59, %v2815_v61 }
 0x14e   : > { %v3115_v23 = vpop.eup %3114  ;;  %2261 = vst.msk [vmem:[%s3658_s7 + $0x2a0] sm:$0xff] %vm2176_vm2, %v3113_v20  ;;  %3140 = vpow2.f32 %v2598_v11  ;;  %v2538_v11 = vmul.f32 -1.442695, %v1034_v60  ;;  %v1029_v20 = vadd.f32 %v3820_v59, %v1028_v46  ;;  %v1298_v36 = vadd.f32 %v3820_v59, %v1297_v13 }
 0x14f   : > { %v3117_v25 = vpop.eup %3116  ;;  %2200 = vst.msk [vmem:[%s3658_s7 + $0xb8] sm:$0xff] %vm2176_vm2, %v3115_v23  ;;  %3142 = vpow2.f32 %v2532_v14  ;;  %v2600_v22 = vmul.f32 -1.442695, %v1282_v7  ;;  %v1285_v23 = vadd.f32 %v3820_v59, %v1284_v49 }
 0x150   : > { %v3119_v26 = vpop.eup %3118  ;;  %2264 = vst.msk [vmem:[%s3658_s7 + $0x2b8] sm:$0xff] %vm2176_vm2, %v3117_v25  ;;  %3144 = vpow2.f32 %v2596_v17  ;;  %v1293_v17 = vadd.f32 %v3820_v59, %v2812_v39  ;;  %v2604_v49 = vmul.f32 -1.442695, %v1298_v36 }
 0x151   : > { %v3121_v29 = vpop.eup %3120  ;;  %2198 = vst.msk [vmem:[%s3658_s7 + $0xa8] sm:$0xff] %vm2176_vm2, %v3119_v26  ;;  %3146 = vpow2.f32 %v2535_v21  ;;  %v1050_v26 = vadd.f32 %v3820_v59, %v2751_v56 }
 0x152   : > { %v3123_v31 = vpop.eup %3122  ;;  %2262 = vst.msk [vmem:[%s3658_s7 + $0x2a8] sm:$0xff] %vm2176_vm2, %v3121_v29  ;;  %3148 = vpow2.f32 %v2599_v24  ;;  %v2752_v24 = vpop.f32.mrf.mxu0  ;;  %v2603_v29 = vmul.f32 -1.442695, %v1293_v17 }
 0x153   : > { %v3125_v32 = vpop.eup %3124  ;;  %v1818_v33 = vadd.f32 1.0, %v3123_v31  ;;  %3150 = vpow2.f32 %v2533_v6  ;;  %v2539_v6 = vmul.f32 -1.442695, %v1037_v12  ;;  %v2542_v39 = vmul.f32 -1.442695, %v1050_v26 }
 0x154   : > { %v3127_v34 = vpop.eup %3126  ;;  %v1882_v35 = vadd.f32 1.0, %v3125_v32  ;;  %3152 = vpow2.f32 %v2597_v27  ;;  %v2816_v27 = vpop.f32.mrf.mxu1  ;;  %v2537_v32 = vmul.f32 -1.442695, %v1029_v20 }
 0x155   : > { %v3129_v37 = vpop.eup %3128  ;;  %3154 = vrcp.f32 %v1818_v33  ;;  %v1816_v38 = vadd.f32 1.0, %v3127_v34  ;;  %v1042_v33 = vadd.f32 %v3820_v59, %v1041_v8 }
 0x156   : > { %v3131_v40 = vpop.eup %3130  ;;  %3156 = vrcp.f32 %v1882_v35  ;;  %v1880_v41 = vadd.f32 1.0, %v3129_v37  ;;  %v2601_v35 = vmul.f32 -1.442695, %v1285_v23  ;;  %v1044_v37 = vpop.f32.mrf.mxu0 }
 0x157   : > { %v3133_v42 = vpop.eup %3132  ;;  %3158 = vrcp.f32 %v1816_v38  ;;  %v1819_v43 = vadd.f32 1.0, %v3131_v40  ;;  %v1053_v40 = vadd.f32 %v3820_v59, %v2752_v24  ;;  %v2540_v46 = vmul.f32 -1.442695, %v1042_v33 }
 0x158   : > { %v3135_v44 = vpop.eup %3134  ;;  %3160 = vrcp.f32 %v1880_v41  ;;  %v1883_v45 = vadd.f32 1.0, %v3133_v42  ;;  %v1300_v41 = vpop.f32.mrf.mxu1 }
 0x159   : > { %v3137_v47 = vpop.eup %3136  ;;  %3162 = vrcp.f32 %v1819_v43  ;;  %v1817_v48 = vadd.f32 1.0, %v3135_v44  ;;  %v2606_v43 = vmul.f32 -1.442695, %v1306_v30  ;;  %v1309_v44 = vadd.f32 %v3820_v59, %v2816_v27 }
 0x15a   : > { %v3139_v50 = vpop.eup %3138  ;;  %3164 = vrcp.f32 %v1883_v45  ;;  %v1881_v51 = vadd.f32 1.0, %v3137_v47  ;;  %v1045_v47 = vadd.f32 %v3820_v59, %v1044_v37 }
 0x15b   : > { %v3141_v52 = vpop.eup %3140  ;;  %3166 = vrcp.f32 %v1817_v48  ;;  %v1822_v53 = vadd.f32 1.0, %v3139_v50  ;;  %v1301_v50 = vadd.f32 %v3820_v59, %v1300_v41  ;;  %v2607_v56 = vmul.f32 -1.442695, %v1309_v44 }
 0x15c   : > { %v3143_v54 = vpop.eup %3142  ;;  %3168 = vrcp.f32 %v1881_v51  ;;  %v1886_v55 = vadd.f32 1.0, %v3141_v52  ;;  %v3860_v51 = vpop.f32.mrf.mxu0 }
 0x15d   : > { %v3145_v57 = vpop.eup %3144  ;;  %3170 = vrcp.f32 %v1822_v53  ;;  %v1820_v58 = vadd.f32 1.0, %v3143_v54  ;;  %v2543_v53 = vmul.f32 -1.442695, %v1053_v40  ;;  %v3864_v54 = vpop.f32.mrf.mxu1  ;;  %v2605_v61 = vmul.f32 -1.442695, %v1301_v50 }
 0x15e   : > { %v3147_v62 = vpop.eup %3146  ;;  %3172 = vrcp.f32 %v1886_v55  ;;  %v1884_v63 = vadd.f32 1.0, %v3145_v57  ;;  %v1322_v33 = vadd.f32 %v3820_v59, %v3864_v54 }
 0x15f   : > { %v3149_v1 = vpop.eup %3148  ;;  %3174 = vrcp.f32 %v1820_v58  ;;  %v1823_v2 = vadd.f32 1.0, %v3147_v62  ;;  %v2541_v58 = vmul.f32 -1.442695, %v1045_v47  ;;  %v1057_v62 = vpop.f32.mrf.mxu0 }
 0x160   : > { %v3151_v4 = vpop.eup %3150  ;;  %3176 = vrcp.f32 %v1884_v63  ;;  %v1887_v5 = vadd.f32 1.0, %v3149_v1  ;;  %v1313_v0 = vpop.f32.mrf.mxu1  ;;  %v1058_v36 = vadd.f32 %v3820_v59, %v1057_v62 }
 0x161   : > { %v3153_v9 = vpop.eup %3152  ;;  %3178 = vrcp.f32 %v1823_v2  ;;  %v1821_v10 = vadd.f32 1.0, %v3151_v4  ;;  %v2756_v7 = vpop.f32.mrf.mxu0 }
 0x162   : > { %v3155_v14 = vpop.eup %3154  ;;  %3180 = vrcp.f32 %v1887_v5  ;;  %v1885_v15 = vadd.f32 1.0, %v3153_v9  ;;  %v1069_v44 = vadd.f32 %v3820_v59, %v2756_v7 }
 0x163   : > { %v3157_v18 = vpop.eup %3156  ;;  %2203 = vst.msk [vmem:[%s3658_s7 + $0xd0] sm:$0xff] %vm2176_vm2, %v3155_v14  ;;  %3182 = vrcp.f32 %v1821_v10  ;;  %v2820_v10 = vpop.f32.mrf.mxu1 }
 0x164   : > { %v3159_v21 = vpop.eup %3158  ;;  %2267 = vst.msk [vmem:[%s3658_s7 + $0x2d0] sm:$0xff] %vm2176_vm2, %v3157_v18  ;;  %3184 = vrcp.f32 %v1885_v15  ;;  %v1060_v17 = vpop.f32.mrf.mxu0 }
 0x165   : > { %v3161_v25 = vpop.eup %3160  ;;  %2201 = vst.msk [vmem:[%s3658_s7 + $0xc0] sm:$0xff] %vm2176_vm2, %v3159_v21  ;;  %3186 = vpow2.f32 %v2538_v11  ;;  %v1316_v20 = vpop.f32.mrf.mxu1 }
 0x166   : > { %v3163_v28 = vpop.eup %3162  ;;  %2265 = vst.msk [vmem:[%s3658_s7 + $0x2c0] sm:$0xff] %vm2176_vm2, %v3161_v25  ;;  %3188 = vpow2.f32 %v2602_v16  ;;  %v2759_v26 = vpop.f32.mrf.mxu0 }
 0x167   : > { %v3165_v31 = vpop.eup %3164  ;;  %2204 = vst.msk [vmem:[%s3658_s7 + $0xd8] sm:$0xff] %vm2176_vm2, %v3163_v28  ;;  %3190 = vpow2.f32 %v2536_v19  ;;  %v2823_v30 = vpop.f32.mrf.mxu1 }
 0x168   : > { %v3167_v34 = vpop.eup %3166  ;;  %2268 = vst.msk [vmem:[%s3658_s7 + $0x2d8] sm:$0xff] %vm2176_vm2, %v3165_v31  ;;  %3192 = vpow2.f32 %v2600_v22  ;;  %v1073_v40 = vpop.f32.mrf.mxu0 }
 0x169   : > { %v3169_v38 = vpop.eup %3168  ;;  %2202 = vst.msk [vmem:[%s3658_s7 + $0xc8] sm:$0xff] %vm2176_vm2, %v3167_v34  ;;  %3194 = vpow2.f32 %v2539_v6 }
 0x16a   : > { %v3171_v42 = vpop.eup %3170  ;;  %2266 = vst.msk [vmem:[%s3658_s7 + $0x2c8] sm:$0xff] %vm2176_vm2, %v3169_v38  ;;  %3196 = vpow2.f32 %v2603_v29  ;;  %v1066_v29 = vadd.f32 %v3820_v59, %v3860_v51  ;;  %v2544_v51 = vmul.f32 -1.442695, %v1058_v36 }
 0x16b   : > { %v3173_v45 = vpop.eup %3172  ;;  %2207 = vst.msk [vmem:[%s3658_s7 + $0xf0] sm:$0xff] %vm2176_vm2, %v3171_v42  ;;  %3198 = vpow2.f32 %v2537_v32 }
 0x16c   : > { %v3175_v48 = vpop.eup %3174  ;;  %2271 = vst.msk [vmem:[%s3658_s7 + $0x2f0] sm:$0xff] %vm2176_vm2, %v3173_v45  ;;  %3200 = vpow2.f32 %v2601_v35  ;;  %v1329_v45 = vpop.f32.mrf.mxu1 }
 0x16d   : > { %v3177_v52 = vpop.eup %3176  ;;  %2205 = vst.msk [vmem:[%s3658_s7 + $0xe0] sm:$0xff] %vm2176_vm2, %v3175_v48  ;;  %3202 = vpow2.f32 %v2542_v39  ;;  %v1314_v39 = vadd.f32 %v3820_v59, %v1313_v0  ;;  %v2610_v48 = vmul.f32 -1.442695, %v1322_v33  ;;  %v1338_v0 = vadd.f32 %v3820_v59, %v2823_v30 }
 0x16e   : > { %v3179_v55 = vpop.eup %3178  ;;  %2269 = vst.msk [vmem:[%s3658_s7 + $0x2e0] sm:$0xff] %vm2176_vm2, %v3177_v52  ;;  %3204 = vpow2.f32 %v2606_v43  ;;  %v2546_v43 = vmul.f32 -1.442695, %v1066_v29  ;;  %v1061_v52 = vadd.f32 %v3820_v59, %v1060_v17  ;;  %v1330_v7 = vadd.f32 %v3820_v59, %v1329_v45 }
 0x16f   : > { %v3181_v57 = vpop.eup %3180  ;;  %2208 = vst.msk [vmem:[%s3658_s7 + $0xf8] sm:$0xff] %vm2176_vm2, %v3179_v55  ;;  %3206 = vpow2.f32 %v2540_v46  ;;  %v2608_v54 = vmul.f32 -1.442695, %v1314_v39  ;;  %v1317_v55 = vadd.f32 %v3820_v59, %v1316_v20 }
 0x170   : > { %v3183_v60 = vpop.eup %3182  ;;  %2272 = vst.msk [vmem:[%s3658_s7 + $0x2f8] sm:$0xff] %vm2176_vm2, %v3181_v57  ;;  %3208 = vpow2.f32 %v2604_v49  ;;  %v1325_v49 = vadd.f32 %v3820_v59, %v2820_v10  ;;  %v2612_v20 = vmul.f32 -1.442695, %v1330_v7 }
 0x171   : > { %v3185_v63 = vpop.eup %3184  ;;  %2206 = vst.msk [vmem:[%s3658_s7 + $0xe8] sm:$0xff] %vm2176_vm2, %v3183_v60  ;;  %3210 = vpow2.f32 %v2543_v53  ;;  %v1082_v60 = vadd.f32 %v3820_v59, %v2759_v26 }
 0x172   : > { %v3187_v1 = vpop.eup %3186  ;;  %2270 = vst.msk [vmem:[%s3658_s7 + $0x2e8] sm:$0xff] %vm2176_vm2, %v3185_v63  ;;  %3212 = vpow2.f32 %v2607_v56  ;;  %v2760_v56 = vpop.f32.mrf.mxu0  ;;  %v2611_v63 = vmul.f32 -1.442695, %v1325_v49 }
 0x173   : > { %v3189_v2 = vpop.eup %3188  ;;  %v1826_v3 = vadd.f32 1.0, %v3187_v1  ;;  %3214 = vpow2.f32 %v2541_v58  ;;  %v2547_v58 = vmul.f32 -1.442695, %v1069_v44  ;;  %v2550_v10 = vmul.f32 -1.442695, %v1082_v60 }
 0x174   : > { %v3191_v4 = vpop.eup %3190  ;;  %v1890_v5 = vadd.f32 1.0, %v3189_v2  ;;  %3216 = vpow2.f32 %v2605_v61  ;;  %v2824_v61 = vpop.f32.mrf.mxu1  ;;  %v2545_v2 = vmul.f32 -1.442695, %v1061_v52 }
 0x175   : > { %v3193_v8 = vpop.eup %3192  ;;  %3218 = vrcp.f32 %v1826_v3  ;;  %v1824_v9 = vadd.f32 1.0, %v3191_v4  ;;  %v1074_v3 = vadd.f32 %v3820_v59, %v1073_v40 }
 0x176   : > { %v3195_v11 = vpop.eup %3194  ;;  %3220 = vrcp.f32 %v1890_v5  ;;  %v1888_v12 = vadd.f32 1.0, %v3193_v8  ;;  %v2609_v5 = vmul.f32 -1.442695, %v1317_v55  ;;  %v1076_v8 = vpop.f32.mrf.mxu0 }
 0x177   : > { %v3197_v13 = vpop.eup %3196  ;;  %3222 = vrcp.f32 %v1824_v9  ;;  %v1827_v14 = vadd.f32 1.0, %v3195_v11  ;;  %v1085_v11 = vadd.f32 %v3820_v59, %v2760_v56  ;;  %v2548_v17 = vmul.f32 -1.442695, %v1074_v3 }
 0x178   : > { %v3199_v15 = vpop.eup %3198  ;;  %3224 = vrcp.f32 %v1888_v12  ;;  %v1891_v16 = vadd.f32 1.0, %v3197_v13  ;;  %v1332_v12 = vpop.f32.mrf.mxu1 }
 0x179   : > { %v3201_v18 = vpop.eup %3200  ;;  %3226 = vrcp.f32 %v1827_v14  ;;  %v1825_v19 = vadd.f32 1.0, %v3199_v15  ;;  %v2614_v14 = vmul.f32 -1.442695, %v1338_v0  ;;  %v1341_v15 = vadd.f32 %v3820_v59, %v2824_v61 }
 0x17a   : > { %v3203_v21 = vpop.eup %3202  ;;  %3228 = vrcp.f32 %v1891_v16  ;;  %v1889_v22 = vadd.f32 1.0, %v3201_v18  ;;  %v1077_v18 = vadd.f32 %v3820_v59, %v1076_v8 }
 0x17b   : > { %v3205_v23 = vpop.eup %3204  ;;  %3230 = vrcp.f32 %v1825_v19  ;;  %v1830_v24 = vadd.f32 1.0, %v3203_v21  ;;  %v1333_v21 = vadd.f32 %v3820_v59, %v1332_v12  ;;  %v2615_v26 = vmul.f32 -1.442695, %v1341_v15 }
 0x17c   : > { %v3207_v25 = vpop.eup %3206  ;;  %3232 = vrcp.f32 %v1889_v22  ;;  %v1894_v6 = vadd.f32 1.0, %v3205_v23  ;;  %v3914_v22 = vpop.f32.mrf.mxu0 }
 0x17d   : > { %v3209_v27 = vpop.eup %3208  ;;  %3234 = vrcp.f32 %v1830_v24  ;;  %v1828_v28 = vadd.f32 1.0, %v3207_v25  ;;  %v2551_v24 = vmul.f32 -1.442695, %v1085_v11  ;;  %v3918_v25 = vpop.f32.mrf.mxu1  ;;  %v2613_v30 = vmul.f32 -1.442695, %v1333_v21 }
 0x17e   : > { %v3211_v31 = vpop.eup %3210  ;;  %3236 = vrcp.f32 %v1894_v6  ;;  %v1892_v32 = vadd.f32 1.0, %v3209_v27  ;;  %v1354_v3 = vadd.f32 %v3820_v59, %v3918_v25 }
 0x17f   : > { %v3213_v34 = vpop.eup %3212  ;;  %3238 = vrcp.f32 %v1828_v28  ;;  %v1831_v35 = vadd.f32 1.0, %v3211_v31  ;;  %v2549_v28 = vmul.f32 -1.442695, %v1077_v18  ;;  %v1089_v31 = vpop.f32.mrf.mxu0 }
 0x180   : > { %v3215_v37 = vpop.eup %3214  ;;  %3240 = vrcp.f32 %v1892_v32  ;;  %v1895_v38 = vadd.f32 1.0, %v3213_v34  ;;  %v1345_v33 = vpop.f32.mrf.mxu1  ;;  %v1090_v7 = vadd.f32 %v3820_v59, %v1089_v31 }
 0x181   : > { %v3217_v41 = vpop.eup %3216  ;;  %3242 = vrcp.f32 %v1831_v35  ;;  %v1829_v42 = vadd.f32 1.0, %v3215_v37  ;;  %v2764_v39 = vpop.f32.mrf.mxu0 }
 0x182   : > { %v3219_v46 = vpop.eup %3218  ;;  %3244 = vrcp.f32 %v1895_v38  ;;  %v1893_v47 = vadd.f32 1.0, %v3217_v41  ;;  %v1101_v15 = vadd.f32 %v3820_v59, %v2764_v39 }
 0x183   : > { %v3221_v50 = vpop.eup %3220  ;;  %2211 = vst.msk [vmem:[%s3658_s7 + $0x110] sm:$0xff] %vm2176_vm2, %v3219_v46  ;;  %3246 = vrcp.f32 %v1829_v42  ;;  %v2828_v42 = vpop.f32.mrf.mxu1 }
 0x184   : > { %v3223_v53 = vpop.eup %3222  ;;  %2275 = vst.msk [vmem:[%s3658_s7 + $0x310] sm:$0xff] %vm2176_vm2, %v3221_v50  ;;  %3248 = vrcp.f32 %v1893_v47  ;;  %v1092_v49 = vpop.f32.mrf.mxu0 }
 0x185   : > { %v3225_v57 = vpop.eup %3224  ;;  %2209 = vst.msk [vmem:[%s3658_s7 + $0x100] sm:$0xff] %vm2176_vm2, %v3223_v53  ;;  %3250 = vpow2.f32 %v2546_v43  ;;  %v1348_v52 = vpop.f32.mrf.mxu1 }
 0x186   : > { %v3227_v62 = vpop.eup %3226  ;;  %2273 = vst.msk [vmem:[%s3658_s7 + $0x300] sm:$0xff] %vm2176_vm2, %v3225_v57  ;;  %3252 = vpow2.f32 %v2610_v48  ;;  %v2767_v60 = vpop.f32.mrf.mxu0 }
 0x187   : > { %v3229_v1 = vpop.eup %3228  ;;  %2212 = vst.msk [vmem:[%s3658_s7 + $0x118] sm:$0xff] %vm2176_vm2, %v3227_v62  ;;  %3254 = vpow2.f32 %v2544_v51  ;;  %v2831_v0 = vpop.f32.mrf.mxu1 }
 0x188   : > { %v3231_v4 = vpop.eup %3230  ;;  %2276 = vst.msk [vmem:[%s3658_s7 + $0x318] sm:$0xff] %vm2176_vm2, %v3229_v1  ;;  %3256 = vpow2.f32 %v2608_v54  ;;  %v1105_v11 = vpop.f32.mrf.mxu0 }
 0x189   : > { %v3233_v9 = vpop.eup %3232  ;;  %2210 = vst.msk [vmem:[%s3658_s7 + $0x108] sm:$0xff] %vm2176_vm2, %v3231_v4  ;;  %3258 = vpow2.f32 %v2547_v58 }
 0x18a   : > { %v3235_v13 = vpop.eup %3234  ;;  %2274 = vst.msk [vmem:[%s3658_s7 + $0x308] sm:$0xff] %vm2176_vm2, %v3233_v9  ;;  %3260 = vpow2.f32 %v2611_v63  ;;  %v1098_v63 = vadd.f32 %v3820_v59, %v3914_v22  ;;  %v2552_v22 = vmul.f32 -1.442695, %v1090_v7 }
 0x18b   : > { %v3237_v16 = vpop.eup %3236  ;;  %2215 = vst.msk [vmem:[%s3658_s7 + $0x130] sm:$0xff] %vm2176_vm2, %v3235_v13  ;;  %3262 = vpow2.f32 %v2545_v2 }
 0x18c   : > { %v3239_v19 = vpop.eup %3238  ;;  %2279 = vst.msk [vmem:[%s3658_s7 + $0x330] sm:$0xff] %vm2176_vm2, %v3237_v16  ;;  %3264 = vpow2.f32 %v2609_v5  ;;  %v1361_v16 = vpop.f32.mrf.mxu1 }
 0x18d   : > { %v3241_v23 = vpop.eup %3240  ;;  %2213 = vst.msk [vmem:[%s3658_s7 + $0x120] sm:$0xff] %vm2176_vm2, %v3239_v19  ;;  %3266 = vpow2.f32 %v2550_v10  ;;  %v1346_v10 = vadd.f32 %v3820_v59, %v1345_v33  ;;  %v2618_v19 = vmul.f32 -1.442695, %v1354_v3  ;;  %v1370_v33 = vadd.f32 %v3820_v59, %v2831_v0 }
 0x18e   : > { %v3243_v6 = vpop.eup %3242  ;;  %2277 = vst.msk [vmem:[%s3658_s7 + $0x320] sm:$0xff] %vm2176_vm2, %v3241_v23  ;;  %3268 = vpow2.f32 %v2614_v14  ;;  %v2554_v14 = vmul.f32 -1.442695, %v1098_v63  ;;  %v1093_v23 = vadd.f32 %v3820_v59, %v1092_v49  ;;  %v1362_v39 = vadd.f32 %v3820_v59, %v1361_v16 }
 0x18f   : > { %v3245_v27 = vpop.eup %3244  ;;  %2216 = vst.msk [vmem:[%s3658_s7 + $0x138] sm:$0xff] %vm2176_vm2, %v3243_v6  ;;  %3270 = vpow2.f32 %v2548_v17  ;;  %v2616_v25 = vmul.f32 -1.442695, %v1346_v10  ;;  %v1349_v6 = vadd.f32 %v3820_v59, %v1348_v52 }
 0x190   : > { %v3247_v29 = vpop.eup %3246  ;;  %2280 = vst.msk [vmem:[%s3658_s7 + $0x338] sm:$0xff] %vm2176_vm2, %v3245_v27  ;;  %3272 = vpow2.f32 %v2612_v20  ;;  %v1357_v20 = vadd.f32 %v3820_v59, %v2828_v42  ;;  %v2620_v52 = vmul.f32 -1.442695, %v1362_v39 }
 0x191   : > { %v3249_v32 = vpop.eup %3248  ;;  %2214 = vst.msk [vmem:[%s3658_s7 + $0x128] sm:$0xff] %vm2176_vm2, %v3247_v29  ;;  %3274 = vpow2.f32 %v2551_v24  ;;  %v1114_v29 = vadd.f32 %v3820_v59, %v2767_v60 }
 0x192   : > { %v3251_v34 = vpop.eup %3250  ;;  %2278 = vst.msk [vmem:[%s3658_s7 + $0x328] sm:$0xff] %vm2176_vm2, %v3249_v32  ;;  %3276 = vpow2.f32 %v2615_v26  ;;  %v2768_v26 = vpop.f32.mrf.mxu0  ;;  %v2619_v32 = vmul.f32 -1.442695, %v1357_v20 }
 0x193   : > { %v3253_v35 = vpop.eup %3252  ;;  %v1834_v36 = vadd.f32 1.0, %v3251_v34  ;;  %3278 = vpow2.f32 %v2549_v28  ;;  %v2555_v28 = vmul.f32 -1.442695, %v1101_v15  ;;  %v2558_v42 = vmul.f32 -1.442695, %v1114_v29 }
 0x194   : > { %v3255_v37 = vpop.eup %3254  ;;  %v1898_v38 = vadd.f32 1.0, %v3253_v35  ;;  %3280 = vpow2.f32 %v2613_v30  ;;  %v2832_v30 = vpop.f32.mrf.mxu1  ;;  %v2553_v35 = vmul.f32 -1.442695, %v1093_v23 }
 0x195   : > { %v3257_v40 = vpop.eup %3256  ;;  %3282 = vrcp.f32 %v1834_v36  ;;  %v1832_v41 = vadd.f32 1.0, %v3255_v37  ;;  %v1106_v36 = vadd.f32 %v3820_v59, %v1105_v11 }
 0x196   : > { %v3259_v43 = vpop.eup %3258  ;;  %3284 = vrcp.f32 %v1898_v38  ;;  %v1896_v44 = vadd.f32 1.0, %v3257_v40  ;;  %v2617_v38 = vmul.f32 -1.442695, %v1349_v6  ;;  %v1108_v40 = vpop.f32.mrf.mxu0 }
 0x197   : > { %v3261_v45 = vpop.eup %3260  ;;  %3286 = vrcp.f32 %v1832_v41  ;;  %v1835_v46 = vadd.f32 1.0, %v3259_v43  ;;  %v1117_v43 = vadd.f32 %v3820_v59, %v2768_v26  ;;  %v2556_v49 = vmul.f32 -1.442695, %v1106_v36 }
 0x198   : > { %v3263_v47 = vpop.eup %3262  ;;  %3288 = vrcp.f32 %v1896_v44  ;;  %v1899_v48 = vadd.f32 1.0, %v3261_v45  ;;  %v1364_v44 = vpop.f32.mrf.mxu1 }
 0x199   : > { %v3265_v50 = vpop.eup %3264  ;;  %3290 = vrcp.f32 %v1835_v46  ;;  %v1833_v51 = vadd.f32 1.0, %v3263_v47  ;;  %v2622_v46 = vmul.f32 -1.442695, %v1370_v33  ;;  %v1373_v47 = vadd.f32 %v3820_v59, %v2832_v30 }
 0x19a   : > { %v3267_v53 = vpop.eup %3266  ;;  %3292 = vrcp.f32 %v1899_v48  ;;  %v1897_v54 = vadd.f32 1.0, %v3265_v50  ;;  %v1109_v50 = vadd.f32 %v3820_v59, %v1108_v40 }
 0x19b   : > { %v3269_v55 = vpop.eup %3268  ;;  %3294 = vrcp.f32 %v1833_v51  ;;  %v1838_v56 = vadd.f32 1.0, %v3267_v53  ;;  %v1365_v53 = vadd.f32 %v3820_v59, %v1364_v44  ;;  %v2623_v60 = vmul.f32 -1.442695, %v1373_v47 }
 0x19c   : > { %v3271_v57 = vpop.eup %3270  ;;  %3296 = vrcp.f32 %v1897_v54  ;;  %v1902_v58 = vadd.f32 1.0, %v3269_v55  ;;  %v3968_v54 = vpop.f32.mrf.mxu0 }
 0x19d   : > { %v3273_v61 = vpop.eup %3272  ;;  %3298 = vrcp.f32 %v1838_v56  ;;  %v1836_v62 = vadd.f32 1.0, %v3271_v57  ;;  %v2559_v56 = vmul.f32 -1.442695, %v1117_v43  ;;  %v3972_v57 = vpop.f32.mrf.mxu1  ;;  %v2621_v0 = vmul.f32 -1.442695, %v1365_v53 }
 0x19e   : > { %v3275_v1 = vpop.eup %3274  ;;  %3300 = vrcp.f32 %v1902_v58  ;;  %v1900_v2 = vadd.f32 1.0, %v3273_v61  ;;  %v1386_v36 = vadd.f32 %v3820_v59, %v3972_v57 }
 0x19f   : > { %v3277_v4 = vpop.eup %3276  ;;  %3302 = vrcp.f32 %v1836_v62  ;;  %v1839_v5 = vadd.f32 1.0, %v3275_v1  ;;  %v2557_v62 = vmul.f32 -1.442695, %v1109_v50  ;;  %v1121_v1 = vpop.f32.mrf.mxu0 }
 0x1a0   : > { %v3279_v8 = vpop.eup %3278  ;;  %3304 = vrcp.f32 %v1900_v2  ;;  %v1903_v9 = vadd.f32 1.0, %v3277_v4  ;;  %v1377_v3 = vpop.f32.mrf.mxu1  ;;  %v1122_v39 = vadd.f32 %v3820_v59, %v1121_v1 }
 0x1a1   : > { %v3281_v12 = vpop.eup %3280  ;;  %3306 = vrcp.f32 %v1839_v5  ;;  %v1837_v13 = vadd.f32 1.0, %v3279_v8  ;;  %v2772_v10 = vpop.f32.mrf.mxu0 }
 0x1a2   : > { %v3283_v17 = vpop.eup %3282  ;;  %3308 = vrcp.f32 %v1903_v9  ;;  %v1901_v18 = vadd.f32 1.0, %v3281_v12  ;;  %v1133_v47 = vadd.f32 %v3820_v59, %v2772_v10 }
 0x1a3   : > { %v3285_v21 = vpop.eup %3284  ;;  %2219 = vst.msk [vmem:[%s3658_s7 + $0x150] sm:$0xff] %vm2176_vm2, %v3283_v17  ;;  %3310 = vrcp.f32 %v1837_v13  ;;  %v2836_v13 = vpop.f32.mrf.mxu1 }
 0x1a4   : > { %v3287_v24 = vpop.eup %3286  ;;  %2283 = vst.msk [vmem:[%s3658_s7 + $0x350] sm:$0xff] %vm2176_vm2, %v3285_v21  ;;  %3312 = vrcp.f32 %v1901_v18  ;;  %v1124_v20 = vpop.f32.mrf.mxu0 }
 0x1a5   : > { %v3289_v27 = vpop.eup %3288  ;;  %2217 = vst.msk [vmem:[%s3658_s7 + $0x140] sm:$0xff] %vm2176_vm2, %v3287_v24  ;;  %3314 = vpow2.f32 %v2554_v14  ;;  %v1380_v23 = vpop.f32.mrf.mxu1 }
 0x1a6   : > { %v3291_v31 = vpop.eup %3290  ;;  %2281 = vst.msk [vmem:[%s3658_s7 + $0x340] sm:$0xff] %vm2176_vm2, %v3289_v27  ;;  %3316 = vpow2.f32 %v2618_v19  ;;  %v2775_v29 = vpop.f32.mrf.mxu0 }
 0x1a7   : > { %v3293_v34 = vpop.eup %3292  ;;  %2220 = vst.msk [vmem:[%s3658_s7 + $0x158] sm:$0xff] %vm2176_vm2, %v3291_v31  ;;  %3318 = vpow2.f32 %v2552_v22  ;;  %v2839_v33 = vpop.f32.mrf.mxu1 }
 0x1a8   : > { %v3295_v37 = vpop.eup %3294  ;;  %2284 = vst.msk [vmem:[%s3658_s7 + $0x358] sm:$0xff] %vm2176_vm2, %v3293_v34  ;;  %3320 = vpow2.f32 %v2616_v25  ;;  %v1137_v43 = vpop.f32.mrf.mxu0 }
 0x1a9   : > { %v3297_v41 = vpop.eup %3296  ;;  %2218 = vst.msk [vmem:[%s3658_s7 + $0x148] sm:$0xff] %vm2176_vm2, %v3295_v37  ;;  %3322 = vpow2.f32 %v2555_v28 }
 0x1aa   : > { %v3299_v45 = vpop.eup %3298  ;;  %2282 = vst.msk [vmem:[%s3658_s7 + $0x348] sm:$0xff] %vm2176_vm2, %v3297_v41  ;;  %3324 = vpow2.f32 %v2619_v32  ;;  %v1130_v32 = vadd.f32 %v3820_v59, %v3968_v54  ;;  %v2560_v54 = vmul.f32 -1.442695, %v1122_v39 }
 0x1ab   : > { %v3301_v48 = vpop.eup %3300  ;;  %2223 = vst.msk [vmem:[%s3658_s7 + $0x170] sm:$0xff] %vm2176_vm2, %v3299_v45  ;;  %3326 = vpow2.f32 %v2553_v35 }
 0x1ac   : > { %v3303_v51 = vpop.eup %3302  ;;  %2287 = vst.msk [vmem:[%s3658_s7 + $0x370] sm:$0xff] %vm2176_vm2, %v3301_v48  ;;  %3328 = vpow2.f32 %v2617_v38  ;;  %v1393_v48 = vpop.f32.mrf.mxu1 }
 0x1ad   : > { %v3305_v55 = vpop.eup %3304  ;;  %2221 = vst.msk [vmem:[%s3658_s7 + $0x160] sm:$0xff] %vm2176_vm2, %v3303_v51  ;;  %3330 = vpow2.f32 %v2558_v42  ;;  %v1378_v42 = vadd.f32 %v3820_v59, %v1377_v3  ;;  %v2626_v51 = vmul.f32 -1.442695, %v1386_v36  ;;  %v1402_v3 = vadd.f32 %v3820_v59, %v2839_v33 }
 0x1ae   : > { %v3307_v58 = vpop.eup %3306  ;;  %2285 = vst.msk [vmem:[%s3658_s7 + $0x360] sm:$0xff] %vm2176_vm2, %v3305_v55  ;;  %3332 = vpow2.f32 %v2622_v46  ;;  %v2562_v46 = vmul.f32 -1.442695, %v1130_v32  ;;  %v1125_v55 = vadd.f32 %v3820_v59, %v1124_v20  ;;  %v1394_v10 = vadd.f32 %v3820_v59, %v1393_v48 }
 0x1af   : > { %v3309_v61 = vpop.eup %3308  ;;  %2224 = vst.msk [vmem:[%s3658_s7 + $0x178] sm:$0xff] %vm2176_vm2, %v3307_v58  ;;  %3334 = vpow2.f32 %v2556_v49  ;;  %v2624_v57 = vmul.f32 -1.442695, %v1378_v42  ;;  %v1381_v58 = vadd.f32 %v3820_v59, %v1380_v23 }
 0x1b0   : > { %v3311_v63 = vpop.eup %3310  ;;  %2288 = vst.msk [vmem:[%s3658_s7 + $0x378] sm:$0xff] %vm2176_vm2, %v3309_v61  ;;  %3336 = vpow2.f32 %v2620_v52  ;;  %v1389_v52 = vadd.f32 %v3820_v59, %v2836_v13  ;;  %v2628_v23 = vmul.f32 -1.442695, %v1394_v10 }
 0x1b1   : > { %v3313_v2 = vpop.eup %3312  ;;  %2222 = vst.msk [vmem:[%s3658_s7 + $0x168] sm:$0xff] %vm2176_vm2, %v3311_v63  ;;  %3338 = vpow2.f32 %v2559_v56  ;;  %v1146_v63 = vadd.f32 %v3820_v59, %v2775_v29 }
 0x1b2   : > { %v3315_v4 = vpop.eup %3314  ;;  %2286 = vst.msk [vmem:[%s3658_s7 + $0x368] sm:$0xff] %vm2176_vm2, %v3313_v2  ;;  %3340 = vpow2.f32 %v2623_v60  ;;  %v2776_v60 = vpop.f32.mrf.mxu0  ;;  %v2627_v2 = vmul.f32 -1.442695, %v1389_v52 }
 0x1b3   : > { %v3317_v5 = vpop.eup %3316  ;;  %v1842_v7 = vadd.f32 1.0, %v3315_v4  ;;  %3342 = vpow2.f32 %v2557_v62  ;;  %v2563_v62 = vmul.f32 -1.442695, %v1133_v47  ;;  %v2566_v13 = vmul.f32 -1.442695, %v1146_v63 }
 0x1b4   : > { %v3319_v8 = vpop.eup %3318  ;;  %v1906_v9 = vadd.f32 1.0, %v3317_v5  ;;  %3344 = vpow2.f32 %v2621_v0  ;;  %v2840_v0 = vpop.f32.mrf.mxu1  ;;  %v2561_v5 = vmul.f32 -1.442695, %v1125_v55 }
 0x1b5   : > { %v3321_v11 = vpop.eup %3320  ;;  %3346 = vrcp.f32 %v1842_v7  ;;  %v1840_v12 = vadd.f32 1.0, %v3319_v8  ;;  %v1138_v7 = vadd.f32 %v3820_v59, %v1137_v43 }
 0x1b6   : > { %v3323_v14 = vpop.eup %3322  ;;  %3348 = vrcp.f32 %v1906_v9  ;;  %v1904_v15 = vadd.f32 1.0, %v3321_v11  ;;  %v2625_v9 = vmul.f32 -1.442695, %v1381_v58  ;;  %v1140_v11 = vpop.f32.mrf.mxu0 }
 0x1b7   : > { %v3325_v16 = vpop.eup %3324  ;;  %3350 = vrcp.f32 %v1840_v12  ;;  %v1843_v17 = vadd.f32 1.0, %v3323_v14  ;;  %v1149_v14 = vadd.f32 %v3820_v59, %v2776_v60  ;;  %v2564_v20 = vmul.f32 -1.442695, %v1138_v7 }
 0x1b8   : > { %v3327_v18 = vpop.eup %3326  ;;  %3352 = vrcp.f32 %v1904_v15  ;;  %v1907_v19 = vadd.f32 1.0, %v3325_v16  ;;  %v1396_v15 = vpop.f32.mrf.mxu1 }
 0x1b9   : > { %v3329_v21 = vpop.eup %3328  ;;  %3354 = vrcp.f32 %v1843_v17  ;;  %v1841_v22 = vadd.f32 1.0, %v3327_v18  ;;  %v2630_v17 = vmul.f32 -1.442695, %v1402_v3  ;;  %v1405_v18 = vadd.f32 %v3820_v59, %v2840_v0 }
 0x1ba   : > { %v3331_v24 = vpop.eup %3330  ;;  %3356 = vrcp.f32 %v1907_v19  ;;  %v1905_v25 = vadd.f32 1.0, %v3329_v21  ;;  %v1141_v21 = vadd.f32 %v3820_v59, %v1140_v11 }
 0x1bb   : > { %v3333_v6 = vpop.eup %3332  ;;  %3358 = vrcp.f32 %v1841_v22  ;;  %v1846_v26 = vadd.f32 1.0, %v3331_v24  ;;  %v1397_v24 = vadd.f32 %v3820_v59, %v1396_v15 }
 0x1bc   : > { %v3335_v27 = vpop.eup %3334  ;;  %3360 = vrcp.f32 %v1905_v25  ;;  %v1910_v28 = vadd.f32 1.0, %v3333_v6  ;;  %v2567_v6 = vmul.f32 -1.442695, %v1149_v14  ;;  %v2565_v29 = vmul.f32 -1.442695, %v1141_v21 }
 0x1bd   : > { %v3337_v30 = vpop.eup %3336  ;;  %3362 = vrcp.f32 %v1846_v26  ;;  %v1844_v31 = vadd.f32 1.0, %v3335_v27  ;;  %v2631_v27 = vmul.f32 -1.442695, %v1405_v18  ;;  %v2629_v59 = vmul.f32 -1.442695, %v1397_v24 }
 0x1be   : > { %v3339_v34 = vpop.eup %3338  ;;  %3364 = vrcp.f32 %v1910_v28  ;;  %v1908_v35 = vadd.f32 1.0, %v3337_v30 }
 0x1bf   : > { %v3341_v37 = vpop.eup %3340  ;;  %3366 = vrcp.f32 %v1844_v31  ;;  %v1847_v38 = vadd.f32 1.0, %v3339_v34 }
 0x1c0   : > { %v3343_v40 = vpop.eup %3342  ;;  %3368 = vrcp.f32 %v1908_v35  ;;  %v1911_v41 = vadd.f32 1.0, %v3341_v37 }
 0x1c1   : > { %v3345_v44 = vpop.eup %3344  ;;  %3370 = vrcp.f32 %v1847_v38  ;;  %v1845_v45 = vadd.f32 1.0, %v3343_v40 }
 0x1c2   : > { %v3347_v49 = vpop.eup %3346  ;;  %3372 = vrcp.f32 %v1911_v41  ;;  %v1909_v50 = vadd.f32 1.0, %v3345_v44 }
 0x1c3   : > { %v3349_v53 = vpop.eup %3348  ;;  %2227 = vst.msk [vmem:[%s3658_s7 + $0x190] sm:$0xff] %vm2176_vm2, %v3347_v49  ;;  %3374 = vrcp.f32 %v1845_v45 }
 0x1c4   : > { %v3351_v56 = vpop.eup %3350  ;;  %2291 = vst.msk [vmem:[%s3658_s7 + $0x390] sm:$0xff] %vm2176_vm2, %v3349_v53  ;;  %3376 = vrcp.f32 %v1909_v50 }
 0x1c5   : > { %v3353_v61 = vpop.eup %3352  ;;  %2225 = vst.msk [vmem:[%s3658_s7 + $0x180] sm:$0xff] %vm2176_vm2, %v3351_v56  ;;  %3378 = vpow2.f32 %v2562_v46 }
 0x1c6   : > { %v3355_v1 = vpop.eup %3354  ;;  %2289 = vst.msk [vmem:[%s3658_s7 + $0x380] sm:$0xff] %vm2176_vm2, %v3353_v61  ;;  %3380 = vpow2.f32 %v2626_v51 }
 0x1c7   : > { %v3357_v4 = vpop.eup %3356  ;;  %2228 = vst.msk [vmem:[%s3658_s7 + $0x198] sm:$0xff] %vm2176_vm2, %v3355_v1  ;;  %3382 = vpow2.f32 %v2560_v54 }
 0x1c8   : > { %v3359_v8 = vpop.eup %3358  ;;  %2292 = vst.msk [vmem:[%s3658_s7 + $0x398] sm:$0xff] %vm2176_vm2, %v3357_v4  ;;  %3384 = vpow2.f32 %v2624_v57 }
 0x1c9   : > { %v3361_v12 = vpop.eup %3360  ;;  %2226 = vst.msk [vmem:[%s3658_s7 + $0x188] sm:$0xff] %vm2176_vm2, %v3359_v8  ;;  %3386 = vpow2.f32 %v2563_v62 }
 0x1ca   : > { %v3363_v16 = vpop.eup %3362  ;;  %2290 = vst.msk [vmem:[%s3658_s7 + $0x388] sm:$0xff] %vm2176_vm2, %v3361_v12  ;;  %3388 = vpow2.f32 %v2627_v2 }
 0x1cb   : > { %v3365_v19 = vpop.eup %3364  ;;  %2231 = vst.msk [vmem:[%s3658_s7 + $0x1b0] sm:$0xff] %vm2176_vm2, %v3363_v16  ;;  %3390 = vpow2.f32 %v2561_v5 }
 0x1cc   : > { %v3367_v22 = vpop.eup %3366  ;;  %2295 = vst.msk [vmem:[%s3658_s7 + $0x3b0] sm:$0xff] %vm2176_vm2, %v3365_v19  ;;  %3392 = vpow2.f32 %v2625_v9 }
 0x1cd   : > { %v3369_v25 = vpop.eup %3368  ;;  %2229 = vst.msk [vmem:[%s3658_s7 + $0x1a0] sm:$0xff] %vm2176_vm2, %v3367_v22  ;;  %3394 = vpow2.f32 %v2566_v13 }
 0x1ce   : > { %v3371_v26 = vpop.eup %3370  ;;  %2293 = vst.msk [vmem:[%s3658_s7 + $0x3a0] sm:$0xff] %vm2176_vm2, %v3369_v25  ;;  %3396 = vpow2.f32 %v2630_v17 }
 0x1cf   : > { %v3373_v28 = vpop.eup %3372  ;;  %2232 = vst.msk [vmem:[%s3658_s7 + $0x1b8] sm:$0xff] %vm2176_vm2, %v3371_v26  ;;  %3398 = vpow2.f32 %v2564_v20 }
 0x1d0   : > { %v3375_v30 = vpop.eup %3374  ;;  %2296 = vst.msk [vmem:[%s3658_s7 + $0x3b8] sm:$0xff] %vm2176_vm2, %v3373_v28  ;;  %3400 = vpow2.f32 %v2628_v23 }
 0x1d1   : > { %v3377_v31 = vpop.eup %3376  ;;  %2230 = vst.msk [vmem:[%s3658_s7 + $0x1a8] sm:$0xff] %vm2176_vm2, %v3375_v30  ;;  %3402 = vpow2.f32 %v2567_v6 }
 0x1d2   : > { %v3379_v32 = vpop.eup %3378  ;;  %2294 = vst.msk [vmem:[%s3658_s7 + $0x3a8] sm:$0xff] %vm2176_vm2, %v3377_v31  ;;  %3404 = vpow2.f32 %v2631_v27 }
 0x1d3   : > { %v3381_v33 = vpop.eup %3380  ;;  %v1850_v34 = vadd.f32 1.0, %v3379_v32  ;;  %3406 = vpow2.f32 %v2565_v29 }
 0x1d4   : > { %v3383_v35 = vpop.eup %3382  ;;  %v1914_v36 = vadd.f32 1.0, %v3381_v33  ;;  %3408 = vpow2.f32 %v2629_v59 }
 0x1d5   : > { %v3385_v37 = vpop.eup %3384  ;;  %3410 = vrcp.f32 %v1850_v34  ;;  %v1848_v38 = vadd.f32 1.0, %v3383_v35 }
 0x1d6   : > { %v3387_v39 = vpop.eup %3386  ;;  %3412 = vrcp.f32 %v1914_v36  ;;  %v1912_v40 = vadd.f32 1.0, %v3385_v37 }
 0x1d7   : > { %v3389_v41 = vpop.eup %3388  ;;  %3414 = vrcp.f32 %v1848_v38  ;;  %v1851_v42 = vadd.f32 1.0, %v3387_v39 }
 0x1d8   : > { %v3391_v43 = vpop.eup %3390  ;;  %3416 = vrcp.f32 %v1912_v40  ;;  %v1915_v44 = vadd.f32 1.0, %v3389_v41 }
 0x1d9   : > { %v3393_v45 = vpop.eup %3392  ;;  %3418 = vrcp.f32 %v1851_v42  ;;  %v1849_v46 = vadd.f32 1.0, %v3391_v43 }
 0x1da   : > { %v3395_v47 = vpop.eup %3394  ;;  %3420 = vrcp.f32 %v1915_v44  ;;  %v1913_v48 = vadd.f32 1.0, %v3393_v45 }
 0x1db   : > { %v3397_v49 = vpop.eup %3396  ;;  %3422 = vrcp.f32 %v1849_v46  ;;  %v1854_v50 = vadd.f32 1.0, %v3395_v47 }
 0x1dc   : > { %v3399_v51 = vpop.eup %3398  ;;  %3424 = vrcp.f32 %v1913_v48  ;;  %v1918_v52 = vadd.f32 1.0, %v3397_v49 }
 0x1dd   : > { %v3401_v53 = vpop.eup %3400  ;;  %3426 = vrcp.f32 %v1854_v50  ;;  %v1852_v54 = vadd.f32 1.0, %v3399_v51 }
 0x1de   : > { %v3403_v55 = vpop.eup %3402  ;;  %3428 = vrcp.f32 %v1918_v52  ;;  %v1916_v56 = vadd.f32 1.0, %v3401_v53 }
 0x1df   : > { %v3405_v57 = vpop.eup %3404  ;;  %3430 = vrcp.f32 %v1852_v54  ;;  %v1855_v58 = vadd.f32 1.0, %v3403_v55 }
 0x1e0   : > { %v3407_v60 = vpop.eup %3406  ;;  %3432 = vrcp.f32 %v1916_v56  ;;  %v1919_v61 = vadd.f32 1.0, %v3405_v57 }
 0x1e1   : > { %v3409_v62 = vpop.eup %3408  ;;  %3434 = vrcp.f32 %v1855_v58  ;;  %v1853_v63 = vadd.f32 1.0, %v3407_v60 }
 0x1e2   : > { %v3411_v0 = vpop.eup %3410  ;;  %3436 = vrcp.f32 %v1919_v61  ;;  %v1917_v1 = vadd.f32 1.0, %v3409_v62 }
 0x1e3   : > { %v3413_v2 = vpop.eup %3412  ;;  %2235 = vst.msk [vmem:[%s3658_s7 + $0x1d0] sm:$0xff] %vm2176_vm2, %v3411_v0  ;;  %3438 = vrcp.f32 %v1853_v63 }
 0x1e4   : > { %v3415_v3 = vpop.eup %3414  ;;  %2299 = vst.msk [vmem:[%s3658_s7 + $0x3d0] sm:$0xff] %vm2176_vm2, %v3413_v2  ;;  %3440 = vrcp.f32 %v1917_v1 }
 0x1e5   : > { %v3417_v4 = vpop.eup %3416  ;;  %2233 = vst.msk [vmem:[%s3658_s7 + $0x1c0] sm:$0xff] %vm2176_vm2, %v3415_v3 }
 0x1e6   : > { %v3419_v5 = vpop.eup %3418  ;;  %2297 = vst.msk [vmem:[%s3658_s7 + $0x3c0] sm:$0xff] %vm2176_vm2, %v3417_v4 }
 0x1e7   : > { %v3421_v7 = vpop.eup %3420  ;;  %2236 = vst.msk [vmem:[%s3658_s7 + $0x1d8] sm:$0xff] %vm2176_vm2, %v3419_v5 }
 0x1e8   : > { %v3423_v8 = vpop.eup %3422  ;;  %2300 = vst.msk [vmem:[%s3658_s7 + $0x3d8] sm:$0xff] %vm2176_vm2, %v3421_v7 }
 0x1e9   : > { %v3425_v9 = vpop.eup %3424  ;;  %2234 = vst.msk [vmem:[%s3658_s7 + $0x1c8] sm:$0xff] %vm2176_vm2, %v3423_v8 }
 0x1ea   : > { %v3427_v10 = vpop.eup %3426  ;;  %2298 = vst.msk [vmem:[%s3658_s7 + $0x3c8] sm:$0xff] %vm2176_vm2, %v3425_v9 }
 0x1eb   : > { %v3429_v11 = vpop.eup %3428  ;;  %2239 = vst.msk [vmem:[%s3658_s7 + $0x1f0] sm:$0xff] %vm2176_vm2, %v3427_v10 }
 0x1ec   : > { %v3431_v12 = vpop.eup %3430  ;;  %2303 = vst.msk [vmem:[%s3658_s7 + $0x3f0] sm:$0xff] %vm2176_vm2, %v3429_v11 }
 0x1ed   : > { %v3433_v13 = vpop.eup %3432  ;;  %2237 = vst.msk [vmem:[%s3658_s7 + $0x1e0] sm:$0xff] %vm2176_vm2, %v3431_v12 }
 0x1ee   : > { %v3435_v14 = vpop.eup %3434  ;;  %2301 = vst.msk [vmem:[%s3658_s7 + $0x3e0] sm:$0xff] %vm2176_vm2, %v3433_v13 }
 0x1ef   : > { %v3437_v15 = vpop.eup %3436  ;;  %2240 = vst.msk [vmem:[%s3658_s7 + $0x1f8] sm:$0xff] %vm2176_vm2, %v3435_v14 }
 0x1f0   : > { %v3439_v16 = vpop.eup %3438  ;;  %2304 = vst.msk [vmem:[%s3658_s7 + $0x3f8] sm:$0xff] %vm2176_vm2, %v3437_v15 }
 0x1f1   : > { %v3441_v17 = vpop.eup %3440  ;;  %2238 = vst.msk [vmem:[%s3658_s7 + $0x1e8] sm:$0xff] %vm2176_vm2, %v3439_v16 }
 0x1f2   : > { %2302 = vst.msk [vmem:[%s3658_s7 + $0x3e8] sm:$0xff] %vm2176_vm2, %v3441_v17 }
 0x1f3 PF: > { %s13_s12 = sadd.s32 1, %s3449_s12  }
 0x1f4   : > { %p10_p4 = scmp.ge.s32.totalorder %s13_s12, 4  }
 0x1f6   :  { %12 = sbr.rel (!%p10_p4) target bundleno = 1 (0x1), region = 62 }

</bundles_post_ra>
